<compile_context>
chip_gen: v6e
topology: v6e:2x2x1
jax: 0.10.0
libtpu: 0.0.40
codegen_flags: <defaults>
</compile_context>

<pallas_src>
import functools
import math

import jax
import jax.numpy as jnp
from jax.experimental import pallas as pl
from jax.experimental.pallas import tpu as pltpu


LANE = 128  # TPU lane width; channel dims are padded to a multiple of this.


def _round_up(x, m):
    return (x + m - 1) // m * m


# ----------------------------------------------------------------------------
# Spectral normalization (PyTorch nn.utils.spectral_norm, 1 power iteration)
# ----------------------------------------------------------------------------
def _l2normalize(v, eps=1e-12):
    return v / jnp.maximum(jnp.linalg.norm(v), eps)


def spectral_normalize(w, u, n_power_iterations=1, eps=1e-12):
    # NOTE: single-forward semantics; PyTorch also updates the `u` buffer in
    # training mode (not needed for a one-shot forward check).
    w_mat = w.reshape(w.shape[0], -1)
    v = None
    for _ in range(n_power_iterations):
        v = _l2normalize(w_mat.T @ u, eps)
        u = _l2normalize(w_mat @ v, eps)
    sigma = jnp.dot(u, w_mat @ v)
    return w / sigma


# ----------------------------------------------------------------------------
# Fused AdainResBlk kernel (one batch element per grid step)
# ----------------------------------------------------------------------------
def _adain_resblk_kernel(x_ref, g1_ref, b1_ref, g2_ref, b2_ref,
                         w1_ref, c1b_ref, w2_ref, c2b_ref, wsc_ref,
                         o_ref, pad_ref, *,
                         H, W, cin_p, cout_p, pad_base, eps, neg_slope,
                         learned_sc, w_hpf):
    # x_ref   : (H*W, cin_p)          f32   activations, lane-dense
    # g1/b1   : (1, 1, cin_p)         f32   AdaIN-1 gamma/beta (this batch elt)
    # g2/b2   : (1, 1, cout_p)        f32   AdaIN-2 gamma/beta
    # w1      : (9, cin_p, cout_p)    bf16  conv1 weight, tap-major (kh*3+kw)
    # w2      : (9, cout_p, cout_p)   bf16  conv2 weight
    # c1b/c2b : (1, cout_p)           f32   conv biases
    # wsc     : (cin_p, cout_p)       bf16  1x1 shortcut weight (if learned_sc)
    # o_ref   : (H*W, cout_p)         f32   output block
    # pad_ref : (pad_rows, cmax)      bf16  zero-row-padded staging scratch
    HW = H * W
    f32 = jnp.float32
    inv_sqrt2 = 1.0 / math.sqrt(2.0)
    pad_rows = pad_ref.shape[0]
    cmax = pad_ref.shape[1]

    # Zero ONLY the halo row strips (tiny vs. the HW interior, which is always
    # fully overwritten by each conv's staging store).
    tail = pad_rows - pad_base - HW
    pad_ref[pl.ds(0, pad_base), :] = jnp.zeros((pad_base, cmax), pad_ref.dtype)
    pad_ref[pl.ds(pad_base + HW, tail), :] = jnp.zeros((tail, cmax),
                                                       pad_ref.dtype)

    # Lane-invariant (HW, 1) boundary masks for the dw = +-1 taps.
    col = jax.lax.broadcasted_iota(jnp.int32, (HW, 1), 0) % W
    mask_l = (col >= 1).astype(f32)        # tap reads (w-1): invalid at w == 0
    mask_r = (col <= W - 2).astype(f32)    # tap reads (w+1): invalid at w==W-1

    def adain_act(v, g_ref, b_ref):
        # InstanceNorm2d(affine=False) fused into per-channel scale/shift.
        mean = jnp.mean(v, axis=0, keepdims=True)               # (1, C)
        meansq = jnp.mean(v * v, axis=0, keepdims=True)
        var = meansq - mean * mean
        scale = (1.0 + g_ref[0]) * jax.lax.rsqrt(var + eps)     # (1, C)
        shift = b_ref[0] - mean * scale                         # (1, C)
        h = v * scale + shift
        return jnp.where(h >= 0, h, neg_slope * h)              # LeakyReLU

    def conv3x3(v, cw, w_ref, bias_ref):
        # Stage the interior rows once (bf16); halo rows are already zero.
        pad_ref[pl.ds(pad_base, HW), :cw] = v.astype(pad_ref.dtype)
        acc = None
        for dw, mask in ((-1, mask_l), (0, None), (1, mask_r)):
            part = None
            for dh in (-1, 0, 1):
                tap = (dh + 1) * 3 + (dw + 1)          # (kh, kw) flattened
                off = pad_base + dh * W + dw           # static row offset
                patch = pad_ref[pl.ds(off, HW), :cw]   # bf16 (HW, cw)
                d = jnp.dot(patch, w_ref[tap], preferred_element_type=f32)
                part = d if part is None else part + d
            if mask is not None:
                part = part * mask                     # (HW,1) broadcast
            acc = part if acc is None else acc + part
        return acc + bias_ref[...]                     # (1, cout_p) broadcast

    x = x_ref[...].astype(f32)                         # (HW, cin_p)

    # Shortcut first: write sc/sqrt(2) into o_ref so x dies early.
    if w_hpf == 0:
        if learned_sc:
            sc = jnp.dot(x.astype(wsc_ref.dtype), wsc_ref[...],
                         preferred_element_type=f32)
        else:
            sc = x
        o_ref[...] = (sc * inv_sqrt2).astype(o_ref.dtype)

    # Residual branch.
    t = adain_act(x, g1_ref, b1_ref)
    t = conv3x3(t, cin_p, w1_ref, c1b_ref)
    t = adain_act(t, g2_ref, b2_ref)
    t = conv3x3(t, cout_p, w2_ref, c2b_ref)

    if w_hpf == 0:
        o_ref[...] = o_ref[...] + (t * inv_sqrt2).astype(o_ref.dtype)
    else:
        o_ref[...] = t.astype(o_ref.dtype)


# ----------------------------------------------------------------------------
# Wrapper: NCHW in / NCHW out (matches the PyTorch module)
# ----------------------------------------------------------------------------
def adain_resblk_forward(x_nchw, s, params, *, dim_in, dim_out,
                         w_hpf=0, upsample=False, neg_slope=0.2, eps=1e-5):
    if upsample:
        # TODO(synk): UpsamplingBilinear2d(scale_factor=2) path not implemented.
        raise NotImplementedError("upsample=True path is not implemented")

    learned_sc = dim_in != dim_out
    N, _, H, W = x_nchw.shape
    HW = H * W
    assert HW % 8 == 0, "H*W must be a multiple of 8 for the (8,128) tiling"
    cin_p = _round_up(dim_in, LANE)
    cout_p = _round_up(dim_out, LANE)
    cmax = max(cin_p, cout_p)

    # ---- tiny parameter / style setup in plain JAX glue ----
    w1 = spectral_normalize(params["conv1_w"], params["conv1_u"])
    w2 = spectral_normalize(params["conv2_w"], params["conv2_u"])
    fc1_w = spectral_normalize(params["fc1_w"], params["fc1_u"])
    fc2_w = spectral_normalize(params["fc2_w"], params["fc2_u"])
    h1 = s @ fc1_w.T + params["fc1_b"]                    # (N, 2*dim_in)
    h2 = s @ fc2_w.T + params["fc2_b"]                    # (N, 2*dim_out)
    gamma1, beta1 = h1[:, :dim_in], h1[:, dim_in:]
    gamma2, beta2 = h2[:, :dim_out], h2[:, dim_out:]

    def pad_c(a, cp):  # zero-pad the channel (last) dim up to cp
        return jnp.pad(a, [(0, 0)] * (a.ndim - 1) + [(0, cp - a.shape[-1])])

    # Activations: NCHW -> lane-dense (N*H*W, cin_p).
    x2d = pad_c(x_nchw.transpose(0, 2, 3, 1).reshape(N, HW, dim_in), cin_p)
    x2d = x2d.reshape(N * HW, cin_p).astype(jnp.float32)

    g1 = pad_c(gamma1, cin_p).reshape(N, 1, cin_p).astype(jnp.float32)
    b1 = pad_c(beta1, cin_p).reshape(N, 1, cin_p).astype(jnp.float32)
    g2 = pad_c(gamma2, cout_p).reshape(N, 1, cout_p).astype(jnp.float32)
    b2 = pad_c(beta2, cout_p).reshape(N, 1, cout_p).astype(jnp.float32)

    def conv_w_to_kernel(w_oihw, ci, co):
        # OIHW -> tap-major (KH*KW, ci, co), bf16 MXU operands.
        o, i, kh, kw = w_oihw.shape
        w = w_oihw.transpose(2, 3, 1, 0).reshape(kh * kw, i, o)
        w = jnp.pad(w, [(0, 0), (0, ci - i), (0, co - o)])
        return w.astype(jnp.bfloat16)

    w1_k = conv_w_to_kernel(w1, cin_p, cout_p)
    w2_k = conv_w_to_kernel(w2, cout_p, cout_p)
    c1b = pad_c(params["conv1_b"][None, :], cout_p).astype(jnp.float32)
    c2b = pad_c(params["conv2_b"][None, :], cout_p).astype(jnp.float32)

    if learned_sc:
        wsc = spectral_normalize(params["conv1x1_w"], params["conv1x1_u"])
        wsc_k = jnp.pad(wsc.reshape(dim_out, dim_in).T,
                        [(0, cin_p - dim_in), (0, cout_p - dim_out)]
                        ).astype(jnp.bfloat16)
    else:
        wsc_k = jnp.zeros((cin_p, cout_p), jnp.bfloat16)   # unused (static flag)

    # Zero-row-padded staging buffer: interior written at a sublane-aligned
    # base row, taps slice rows [base + dh*W + dw, ... + HW).
    pad_base = _round_up(W + 1, 8)
    pad_rows = _round_up(pad_base + HW + W + 1, 8)
    assert pad_base >= W + 1, "top halo too small for dh=-1,dw=-1 tap"
    assert pad_rows - (pad_base + HW) >= W + 1, "bottom halo too small"

    # VMEM budget: double-buffered activation blocks + double-buffered weight
    # slabs + staging scratch + a bound on live f32 temporaries, with headroom.
    weight_bytes = 2 * (9 * cin_p * cout_p + 9 * cout_p * cout_p
                        + cin_p * cout_p)                       # bf16
    est = (2 * HW * cin_p * 4 + 2 * HW * cout_p * 4             # act in/out x2
           + 2 * weight_bytes                                   # weights x2
           + pad_rows * cmax * 2                                # staging scratch
           + 4 * HW * cmax * 4                                  # f32 temporaries
           + (2 << 20))                                         # headroom
    vmem_limit = int(min(max(est, 32 << 20), 96 << 20))

    kernel = functools.partial(
        _adain_resblk_kernel, H=H, W=W, cin_p=cin_p, cout_p=cout_p,
        pad_base=pad_base, eps=eps, neg_slope=neg_slope,
        learned_sc=learned_sc, w_hpf=w_hpf)

    out2d = pl.pallas_call(
        kernel,
        out_shape=jax.ShapeDtypeStruct((N * HW, cout_p), jnp.float32),
        grid=(N,),
        in_specs=[
            pl.BlockSpec((HW, cin_p), lambda n: (n, 0)),             # x
            pl.BlockSpec((1, 1, cin_p), lambda n: (n, 0, 0)),        # gamma1
            pl.BlockSpec((1, 1, cin_p), lambda n: (n, 0, 0)),        # beta1
            pl.BlockSpec((1, 1, cout_p), lambda n: (n, 0, 0)),       # gamma2
            pl.BlockSpec((1, 1, cout_p), lambda n: (n, 0, 0)),       # beta2
            pl.BlockSpec((9, cin_p, cout_p), lambda n: (0, 0, 0)),   # conv1 w
            pl.BlockSpec((1, cout_p), lambda n: (0, 0)),             # conv1 b
            pl.BlockSpec((9, cout_p, cout_p), lambda n: (0, 0, 0)),  # conv2 w
            pl.BlockSpec((1, cout_p), lambda n: (0, 0)),             # conv2 b
            pl.BlockSpec((cin_p, cout_p), lambda n: (0, 0)),         # 1x1 sc w
        ],
        out_specs=pl.BlockSpec((HW, cout_p), lambda n: (n, 0)),
        scratch_shapes=[pltpu.VMEM((pad_rows, cmax), jnp.bfloat16)],
        compiler_params=pltpu.CompilerParams(
            dimension_semantics=("parallel",),
            vmem_limit_bytes=vmem_limit),
    )(x2d, g1, b1, g2, b2, w1_k, c1b, w2_k, c2b, wsc_k)

    # Lane-dense kernel output -> NCHW, drop channel padding.
    out = out2d.reshape(N, H, W, cout_p)[..., :dim_out].transpose(0, 3, 1, 2)
    return out


# ----------------------------------------------------------------------------
# Pure-JAX reference (PyTorch semantics; bf16 rounding only at MXU operands,
# matching the kernel's compute dtype choices).
# ----------------------------------------------------------------------------
def _reference_forward(x, s, params, dim_in, dim_out, w_hpf=0, eps=1e-5):
    learned_sc = dim_in != dim_out
    f32 = jnp.float32

    def bf16r(a):
        return a.astype(jnp.bfloat16).astype(f32)

    def inorm(v):
        mean = v.mean(axis=(2, 3), keepdims=True)
        var = jnp.var(v, axis=(2, 3), keepdims=True)
        return (v - mean) * jax.lax.rsqrt(var + eps)

    def lrelu(v):
        return jnp.where(v >= 0, v, 0.2 * v)

    def conv(v, w, b, pad):
        out = jax.lax.conv_general_dilated(
            bf16r(v), bf16r(w), (1, 1), [(pad, pad), (pad, pad)],
            dimension_numbers=("NCHW", "OIHW", "NCHW"),
            preferred_element_type=f32)
        if b is not None:
            out = out + b[None, :, None, None]
        return out

    w1 = spectral_normalize(params["conv1_w"], params["conv1_u"])
    w2 = spectral_normalize(params["conv2_w"], params["conv2_u"])
    fc1_w = spectral_normalize(params["fc1_w"], params["fc1_u"])
    fc2_w = spectral_normalize(params["fc2_w"], params["fc2_u"])
    h1 = s @ fc1_w.T + params["fc1_b"]
    h2 = s @ fc2_w.T + params["fc2_b"]
    g1, bt1 = h1[:, :dim_in], h1[:, dim_in:]
    g2, bt2 = h2[:, :dim_out], h2[:, dim_out:]

    t = lrelu((1 + g1[:, :, None, None]) * inorm(x) + bt1[:, :, None, None])
    t = conv(t, w1, params["conv1_b"], 1)
    t = lrelu((1 + g2[:, :, None, None]) * inorm(t) + bt2[:, :, None, None])
    t = conv(t, w2, params["conv2_b"], 1)
    if learned_sc:
        wsc = spectral_normalize(params["conv1x1_w"], params["conv1x1_u"])
        sc = conv(x, wsc, None, 0)
    else:
        sc = x
    if w_hpf == 0:
        return (t + sc) / math.sqrt(2.0)
    return t


# ----------------------------------------------------------------------------
# Demo / self-check
# ----------------------------------------------------------------------------
if __name__ == "__main__":
    key = jax.random.PRNGKey(0)
    keys = jax.random.split(key, 16)

    # AdainResBlk(dim_in=4, dim_out=8, style_dim=64, w_hpf=0, upsample=False)
    N, dim_in, dim_out, style_dim, H, W = 2, 4, 8, 64, 16, 16

    x = jax.random.normal(keys[0], (N, dim_in, H, W), jnp.float32)
    s = jax.random.normal(keys[1], (N, style_dim), jnp.float32)

    def uinit(k, shape, fan_in):
        b = 1.0 / math.sqrt(fan_in)
        return jax.random.uniform(k, shape, jnp.float32, minval=-b, maxval=b)

    def uvec(k, n):
        u = jax.random.normal(k, (n,), jnp.float32)
        return u / jnp.maximum(jnp.linalg.norm(u), 1e-12)

    params = {
        "conv1_w": uinit(keys[2], (dim_out, dim_in, 3, 3), dim_in * 9),
        "conv1_b": uinit(keys[3], (dim_out,), dim_in * 9),
        "conv1_u": uvec(keys[4], dim_out),
        "conv2_w": uinit(keys[5], (dim_out, dim_out, 3, 3), dim_out * 9),
        "conv2_b": uinit(keys[6], (dim_out,), dim_out * 9),
        "conv2_u": uvec(keys[7], dim_out),
        "conv1x1_w": uinit(keys[8], (dim_out, dim_in, 1, 1), dim_in),
        "conv1x1_u": uvec(keys[9], dim_out),
        "fc1_w": uinit(keys[10], (2 * dim_in, style_dim), style_dim),
        "fc1_b": uinit(keys[11], (2 * dim_in,), style_dim),
        "fc1_u": uvec(keys[12], 2 * dim_in),
        "fc2_w": uinit(keys[13], (2 * dim_out, style_dim), style_dim),
        "fc2_b": uinit(keys[14], (2 * dim_out,), style_dim),
        "fc2_u": uvec(keys[15], 2 * dim_out),
    }

    forward = jax.jit(functools.partial(
        adain_resblk_forward, dim_in=dim_in, dim_out=dim_out))
    out = forward(x, s, params)
    out = jax.block_until_ready(out)

    ref = _reference_forward(x, s, params, dim_in, dim_out)
    assert out.shape == (N, dim_out, H, W), out.shape
    err = float(jnp.max(jnp.abs(out - ref)))
    assert err < 5e-3, f"max abs err {err}"

    print("KERNEL_OK")
</pallas_src>

<mosaic_0001>
module attributes {stable_mosaic.version = 11 : i64} {
  func.func @_adain_resblk_kernel(%arg0: i32, %arg1: memref<256x128xf32, #tpu.memory_space<vmem>>, %arg2: memref<1x1x128xf32, #tpu.memory_space<vmem>>, %arg3: memref<1x1x128xf32, #tpu.memory_space<vmem>>, %arg4: memref<1x1x128xf32, #tpu.memory_space<vmem>>, %arg5: memref<1x1x128xf32, #tpu.memory_space<vmem>>, %arg6: memref<9x128x128xbf16, #tpu.memory_space<vmem>>, %arg7: memref<1x128xf32, #tpu.memory_space<vmem>>, %arg8: memref<9x128x128xbf16, #tpu.memory_space<vmem>>, %arg9: memref<1x128xf32, #tpu.memory_space<vmem>>, %arg10: memref<128x128xbf16, #tpu.memory_space<vmem>>, %arg11: memref<256x128xf32, #tpu.memory_space<vmem>>, %arg12: memref<304x128xbf16, #tpu.memory_space<vmem>>) attributes {dimension_semantics = [#tpu.dimension_semantics<parallel>], iteration_bounds = array<i64: 2>, scalar_prefetch = 0 : i64, scratch_operands = 1 : i64, tpu.core_type = #tpu.core_type<tc>, window_params = [{transform_indices = @transform_0, window_bounds = array<i64: 256, 128>}, {transform_indices = @transform_1, window_bounds = array<i64: 1, 1, 128>}, {transform_indices = @transform_2, window_bounds = array<i64: 1, 1, 128>}, {transform_indices = @transform_3, window_bounds = array<i64: 1, 1, 128>}, {transform_indices = @transform_4, window_bounds = array<i64: 1, 1, 128>}, {pipeline_mode = #tpu.pipeline_mode<synchronous>, transform_indices = @transform_5, window_bounds = array<i64: 9, 128, 128>}, {pipeline_mode = #tpu.pipeline_mode<synchronous>, transform_indices = @transform_6, window_bounds = array<i64: 1, 128>}, {pipeline_mode = #tpu.pipeline_mode<synchronous>, transform_indices = @transform_7, window_bounds = array<i64: 9, 128, 128>}, {pipeline_mode = #tpu.pipeline_mode<synchronous>, transform_indices = @transform_8, window_bounds = array<i64: 1, 128>}, {pipeline_mode = #tpu.pipeline_mode<synchronous>, transform_indices = @transform_9, window_bounds = array<i64: 128, 128>}, {transform_indices = @transform_10, window_bounds = array<i64: 256, 128>}]} {
    %cst = arith.constant 0.000000e+00 : bf16
    %0 = vector.broadcast %cst : bf16 to vector<24x128xbf16>
    %c0 = arith.constant 0 : index
    %c0_0 = arith.constant 0 : index
    %1 = vector.load %arg12[%c0, %c0_0] : memref<304x128xbf16, #tpu.memory_space<vmem>>, vector<24x128xbf16>
    tpu.vector_store %arg12[%c0, %c0_0], %0 {strides = array<i32>} : memref<304x128xbf16, #tpu.memory_space<vmem>>, vector<24x128xbf16>,
    %cst_1 = arith.constant 0.000000e+00 : bf16
    %2 = vector.broadcast %cst_1 : bf16 to vector<24x128xbf16>
    %c280 = arith.constant 280 : index
    %c0_2 = arith.constant 0 : index
    %3 = vector.load %arg12[%c280, %c0_2] : memref<304x128xbf16, #tpu.memory_space<vmem>>, vector<24x128xbf16>
    tpu.vector_store %arg12[%c280, %c0_2], %2 {strides = array<i32>} : memref<304x128xbf16, #tpu.memory_space<vmem>>, vector<24x128xbf16>,
    %4 = tpu.iota {dimensions = array<i32: 0>} : vector<256x1xi32>
    %c16_i32 = arith.constant 16 : i32
    %c0_i32 = arith.constant 0 : i32
    %5 = arith.cmpi eq, %c16_i32, %c0_i32 : i32
    %c1_i32 = arith.constant 1 : i32
    %6 = arith.select %5, %c1_i32, %c16_i32 : i32
    %7 = vector.broadcast %6 : i32 to vector<256x1xi32>
    %8 = arith.remsi %4, %7 : vector<256x1xi32>
    %c0_i32_3 = arith.constant 0 : i32
    %9 = vector.broadcast %c0_i32_3 : i32 to vector<256x1xi32>
    %10 = arith.cmpi ne, %8, %9 : vector<256x1xi32>
    %c0_i32_4 = arith.constant 0 : i32
    %11 = vector.broadcast %c0_i32_4 : i32 to vector<256x1xi32>
    %12 = arith.cmpi slt, %8, %11 : vector<256x1xi32>
    %c0_i32_5 = arith.constant 0 : i32
    %13 = arith.cmpi slt, %6, %c0_i32_5 : i32
    %14 = vector.broadcast %13 : i1 to vector<256x1xi1>
    %15 = vector.broadcast %14 : vector<256x1xi1> to vector<256x1xi1>
    %16 = arith.xori %12, %15 : vector<256x1xi1>
    %17 = arith.andi %16, %10 : vector<256x1xi1>
    %18 = vector.broadcast %6 : i32 to vector<256x1xi32>
    %19 = arith.addi %8, %18 : vector<256x1xi32>
    %20 = arith.select %17, %19, %8 : vector<256x1xi1>, vector<256x1xi32>
    %c1_i32_6 = arith.constant 1 : i32
    %21 = vector.broadcast %c1_i32_6 : i32 to vector<256x1xi32>
    %22 = arith.cmpi sge, %20, %21 : vector<256x1xi32>
    %23 = arith.extui %22 : vector<256x1xi1> to vector<256x1xi32>
    %24 = arith.sitofp %23 : vector<256x1xi32> to vector<256x1xf32>
    %c14_i32 = arith.constant 14 : i32
    %25 = vector.broadcast %c14_i32 : i32 to vector<256x1xi32>
    %26 = arith.cmpi sle, %20, %25 : vector<256x1xi32>
    %27 = arith.extui %26 : vector<256x1xi1> to vector<256x1xi32>
    %28 = arith.sitofp %27 : vector<256x1xi32> to vector<256x1xf32>
    %c0_7 = arith.constant 0 : index
    %c0_8 = arith.constant 0 : index
    %29 = vector.load %arg1[%c0_7, %c0_8] : memref<256x128xf32, #tpu.memory_space<vmem>>, vector<256x128xf32>
    %30 = arith.truncf %29 : vector<256x128xf32> to vector<256x128xbf16>
    %c0_9 = arith.constant 0 : index
    %c0_10 = arith.constant 0 : index
    %31 = vector.load %arg10[%c0_9, %c0_10] : memref<128x128xbf16, #tpu.memory_space<vmem>>, vector<128x128xbf16>
    %cst_11 = arith.constant dense<0.000000e+00> : vector<256x128xf32>
    %32 = tpu.matmul %30, %31, %cst_11 {dimension_numbers = #tpu.dot_dimension_numbers<[1], [0], [0], [1], [0, 0, 1, 1], [], []>} : vector<256x128xbf16>, vector<128x128xbf16>, vector<256x128xf32> -> vector<256x128xf32>
    %cst_12 = arith.constant 0.707106769 : f32
    %33 = vector.broadcast %cst_12 : f32 to vector<256x128xf32>
    %34 = arith.mulf %32, %33 : vector<256x128xf32>
    %c0_13 = arith.constant 0 : index
    %c0_14 = arith.constant 0 : index
    %35 = vector.load %arg11[%c0_13, %c0_14] : memref<256x128xf32, #tpu.memory_space<vmem>>, vector<256x128xf32>
    tpu.vector_store %arg11[%c0_13, %c0_14], %34 {strides = array<i32>} : memref<256x128xf32, #tpu.memory_space<vmem>>, vector<256x128xf32>,
    %cst_15 = arith.constant dense<0.000000e+00> : vector<128xf32>
    %36 = vector.multi_reduction <add>, %29, %cst_15 [0] : vector<256x128xf32> to vector<128xf32>
    %37 = vector.shape_cast %36 : vector<128xf32> to vector<1x128xf32>
    %cst_16 = arith.constant 2.560000e+02 : f32
    %38 = vector.broadcast %cst_16 : f32 to vector<1x128xf32>
    %39 = arith.divf %37, %38 : vector<1x128xf32>
    %40 = arith.mulf %29, %29 : vector<256x128xf32>
    %cst_17 = arith.constant dense<0.000000e+00> : vector<128xf32>
    %41 = vector.multi_reduction <add>, %40, %cst_17 [0] : vector<256x128xf32> to vector<128xf32>
    %42 = vector.shape_cast %41 : vector<128xf32> to vector<1x128xf32>
    %cst_18 = arith.constant 2.560000e+02 : f32
    %43 = vector.broadcast %cst_18 : f32 to vector<1x128xf32>
    %44 = arith.divf %42, %43 : vector<1x128xf32>
    %45 = arith.mulf %39, %39 : vector<1x128xf32>
    %46 = arith.subf %44, %45 : vector<1x128xf32>
    %c0_19 = arith.constant 0 : index
    %c0_20 = arith.constant 0 : index
    %c0_21 = arith.constant 0 : index
    %47 = vector.load %arg2[%c0_19, %c0_20, %c0_21] : memref<1x1x128xf32, #tpu.memory_space<vmem>>, vector<1x1x128xf32>
    %48 = vector.shape_cast %47 : vector<1x1x128xf32> to vector<1x128xf32>
    %cst_22 = arith.constant 1.000000e+00 : f32
    %49 = vector.broadcast %cst_22 : f32 to vector<1x128xf32>
    %50 = arith.addf %49, %48 : vector<1x128xf32>
    %cst_23 = arith.constant 9.99999974E-6 : f32
    %51 = vector.broadcast %cst_23 : f32 to vector<1x128xf32>
    %52 = arith.addf %46, %51 : vector<1x128xf32>
    %53 = math.rsqrt %52 : vector<1x128xf32>
    %54 = arith.mulf %50, %53 : vector<1x128xf32>
    %c0_24 = arith.constant 0 : index
    %c0_25 = arith.constant 0 : index
    %c0_26 = arith.constant 0 : index
    %55 = vector.load %arg3[%c0_24, %c0_25, %c0_26] : memref<1x1x128xf32, #tpu.memory_space<vmem>>, vector<1x1x128xf32>
    %56 = vector.shape_cast %55 : vector<1x1x128xf32> to vector<1x128xf32>
    %57 = arith.mulf %39, %54 : vector<1x128xf32>
    %58 = arith.subf %56, %57 : vector<1x128xf32>
    %59 = vector.broadcast %54 : vector<1x128xf32> to vector<256x128xf32>
    %60 = arith.mulf %29, %59 : vector<256x128xf32>
    %61 = vector.broadcast %58 : vector<1x128xf32> to vector<256x128xf32>
    %62 = arith.addf %60, %61 : vector<256x128xf32>
    %cst_27 = arith.constant 0.000000e+00 : f32
    %63 = vector.broadcast %cst_27 : f32 to vector<256x128xf32>
    %64 = arith.cmpf oge, %62, %63 : vector<256x128xf32>
    %cst_28 = arith.constant 2.000000e-01 : f32
    %65 = vector.broadcast %cst_28 : f32 to vector<256x128xf32>
    %66 = arith.mulf %65, %62 : vector<256x128xf32>
    %67 = arith.select %64, %62, %66 : vector<256x128xi1>, vector<256x128xf32>
    %68 = arith.truncf %67 : vector<256x128xf32> to vector<256x128xbf16>
    %c24 = arith.constant 24 : index
    %c0_29 = arith.constant 0 : index
    %69 = vector.load %arg12[%c24, %c0_29] : memref<304x128xbf16, #tpu.memory_space<vmem>>, vector<256x128xbf16>
    tpu.vector_store %arg12[%c24, %c0_29], %68 {strides = array<i32>} : memref<304x128xbf16, #tpu.memory_space<vmem>>, vector<256x128xbf16>,
    %c7 = arith.constant 7 : index
    %c0_30 = arith.constant 0 : index
    %70 = vector.load %arg12[%c7, %c0_30] : memref<304x128xbf16, #tpu.memory_space<vmem>>, vector<256x128xbf16>
    %c0_31 = arith.constant 0 : index
    %c0_32 = arith.constant 0 : index
    %c0_33 = arith.constant 0 : index
    %71 = vector.load %arg6[%c0_31, %c0_32, %c0_33] : memref<9x128x128xbf16, #tpu.memory_space<vmem>>, vector<1x128x128xbf16>
    %72 = vector.shape_cast %71 : vector<1x128x128xbf16> to vector<128x128xbf16>
    %cst_34 = arith.constant dense<0.000000e+00> : vector<256x128xf32>
    %73 = tpu.matmul %70, %72, %cst_34 {dimension_numbers = #tpu.dot_dimension_numbers<[1], [0], [0], [1], [0, 0, 1, 1], [], []>} : vector<256x128xbf16>, vector<128x128xbf16>, vector<256x128xf32> -> vector<256x128xf32>
    %c23 = arith.constant 23 : index
    %c0_35 = arith.constant 0 : index
    %74 = vector.load %arg12[%c23, %c0_35] : memref<304x128xbf16, #tpu.memory_space<vmem>>, vector<256x128xbf16>
    %c3 = arith.constant 3 : index
    %c0_36 = arith.constant 0 : index
    %c0_37 = arith.constant 0 : index
    %75 = vector.load %arg6[%c3, %c0_36, %c0_37] : memref<9x128x128xbf16, #tpu.memory_space<vmem>>, vector<1x128x128xbf16>
    %76 = vector.shape_cast %75 : vector<1x128x128xbf16> to vector<128x128xbf16>
    %cst_38 = arith.constant dense<0.000000e+00> : vector<256x128xf32>
    %77 = tpu.matmul %74, %76, %cst_38 {dimension_numbers = #tpu.dot_dimension_numbers<[1], [0], [0], [1], [0, 0, 1, 1], [], []>} : vector<256x128xbf16>, vector<128x128xbf16>, vector<256x128xf32> -> vector<256x128xf32>
    %78 = arith.addf %73, %77 : vector<256x128xf32>
    %c39 = arith.constant 39 : index
    %c0_39 = arith.constant 0 : index
    %79 = vector.load %arg12[%c39, %c0_39] : memref<304x128xbf16, #tpu.memory_space<vmem>>, vector<256x128xbf16>
    %c6 = arith.constant 6 : index
    %c0_40 = arith.constant 0 : index
    %c0_41 = arith.constant 0 : index
    %80 = vector.load %arg6[%c6, %c0_40, %c0_41] : memref<9x128x128xbf16, #tpu.memory_space<vmem>>, vector<1x128x128xbf16>
    %81 = vector.shape_cast %80 : vector<1x128x128xbf16> to vector<128x128xbf16>
    %cst_42 = arith.constant dense<0.000000e+00> : vector<256x128xf32>
    %82 = tpu.matmul %79, %81, %cst_42 {dimension_numbers = #tpu.dot_dimension_numbers<[1], [0], [0], [1], [0, 0, 1, 1], [], []>} : vector<256x128xbf16>, vector<128x128xbf16>, vector<256x128xf32> -> vector<256x128xf32>
    %83 = arith.addf %78, %82 : vector<256x128xf32>
    %84 = vector.broadcast %24 : vector<256x1xf32> to vector<256x128xf32>
    %85 = arith.mulf %83, %84 : vector<256x128xf32>
    %c8 = arith.constant 8 : index
    %c0_43 = arith.constant 0 : index
    %86 = vector.load %arg12[%c8, %c0_43] : memref<304x128xbf16, #tpu.memory_space<vmem>>, vector<256x128xbf16>
    %c1 = arith.constant 1 : index
    %c0_44 = arith.constant 0 : index
    %c0_45 = arith.constant 0 : index
    %87 = vector.load %arg6[%c1, %c0_44, %c0_45] : memref<9x128x128xbf16, #tpu.memory_space<vmem>>, vector<1x128x128xbf16>
    %88 = vector.shape_cast %87 : vector<1x128x128xbf16> to vector<128x128xbf16>
    %cst_46 = arith.constant dense<0.000000e+00> : vector<256x128xf32>
    %89 = tpu.matmul %86, %88, %cst_46 {dimension_numbers = #tpu.dot_dimension_numbers<[1], [0], [0], [1], [0, 0, 1, 1], [], []>} : vector<256x128xbf16>, vector<128x128xbf16>, vector<256x128xf32> -> vector<256x128xf32>
    %c24_47 = arith.constant 24 : index
    %c0_48 = arith.constant 0 : index
    %90 = vector.load %arg12[%c24_47, %c0_48] : memref<304x128xbf16, #tpu.memory_space<vmem>>, vector<256x128xbf16>
    %c4 = arith.constant 4 : index
    %c0_49 = arith.constant 0 : index
    %c0_50 = arith.constant 0 : index
    %91 = vector.load %arg6[%c4, %c0_49, %c0_50] : memref<9x128x128xbf16, #tpu.memory_space<vmem>>, vector<1x128x128xbf16>
    %92 = vector.shape_cast %91 : vector<1x128x128xbf16> to vector<128x128xbf16>
    %cst_51 = arith.constant dense<0.000000e+00> : vector<256x128xf32>
    %93 = tpu.matmul %90, %92, %cst_51 {dimension_numbers = #tpu.dot_dimension_numbers<[1], [0], [0], [1], [0, 0, 1, 1], [], []>} : vector<256x128xbf16>, vector<128x128xbf16>, vector<256x128xf32> -> vector<256x128xf32>
    %94 = arith.addf %89, %93 : vector<256x128xf32>
    %c40 = arith.constant 40 : index
    %c0_52 = arith.constant 0 : index
    %95 = vector.load %arg12[%c40, %c0_52] : memref<304x128xbf16, #tpu.memory_space<vmem>>, vector<256x128xbf16>
    %c7_53 = arith.constant 7 : index
    %c0_54 = arith.constant 0 : index
    %c0_55 = arith.constant 0 : index
    %96 = vector.load %arg6[%c7_53, %c0_54, %c0_55] : memref<9x128x128xbf16, #tpu.memory_space<vmem>>, vector<1x128x128xbf16>
    %97 = vector.shape_cast %96 : vector<1x128x128xbf16> to vector<128x128xbf16>
    %cst_56 = arith.constant dense<0.000000e+00> : vector<256x128xf32>
    %98 = tpu.matmul %95, %97, %cst_56 {dimension_numbers = #tpu.dot_dimension_numbers<[1], [0], [0], [1], [0, 0, 1, 1], [], []>} : vector<256x128xbf16>, vector<128x128xbf16>, vector<256x128xf32> -> vector<256x128xf32>
    %99 = arith.addf %94, %98 : vector<256x128xf32>
    %100 = arith.addf %85, %99 : vector<256x128xf32>
    %c9 = arith.constant 9 : index
    %c0_57 = arith.constant 0 : index
    %101 = vector.load %arg12[%c9, %c0_57] : memref<304x128xbf16, #tpu.memory_space<vmem>>, vector<256x128xbf16>
    %c2 = arith.constant 2 : index
    %c0_58 = arith.constant 0 : index
    %c0_59 = arith.constant 0 : index
    %102 = vector.load %arg6[%c2, %c0_58, %c0_59] : memref<9x128x128xbf16, #tpu.memory_space<vmem>>, vector<1x128x128xbf16>
    %103 = vector.shape_cast %102 : vector<1x128x128xbf16> to vector<128x128xbf16>
    %cst_60 = arith.constant dense<0.000000e+00> : vector<256x128xf32>
    %104 = tpu.matmul %101, %103, %cst_60 {dimension_numbers = #tpu.dot_dimension_numbers<[1], [0], [0], [1], [0, 0, 1, 1], [], []>} : vector<256x128xbf16>, vector<128x128xbf16>, vector<256x128xf32> -> vector<256x128xf32>
    %c25 = arith.constant 25 : index
    %c0_61 = arith.constant 0 : index
    %105 = vector.load %arg12[%c25, %c0_61] : memref<304x128xbf16, #tpu.memory_space<vmem>>, vector<256x128xbf16>
    %c5 = arith.constant 5 : index
    %c0_62 = arith.constant 0 : index
    %c0_63 = arith.constant 0 : index
    %106 = vector.load %arg6[%c5, %c0_62, %c0_63] : memref<9x128x128xbf16, #tpu.memory_space<vmem>>, vector<1x128x128xbf16>
    %107 = vector.shape_cast %106 : vector<1x128x128xbf16> to vector<128x128xbf16>
    %cst_64 = arith.constant dense<0.000000e+00> : vector<256x128xf32>
    %108 = tpu.matmul %105, %107, %cst_64 {dimension_numbers = #tpu.dot_dimension_numbers<[1], [0], [0], [1], [0, 0, 1, 1], [], []>} : vector<256x128xbf16>, vector<128x128xbf16>, vector<256x128xf32> -> vector<256x128xf32>
    %109 = arith.addf %104, %108 : vector<256x128xf32>
    %c41 = arith.constant 41 : index
    %c0_65 = arith.constant 0 : index
    %110 = vector.load %arg12[%c41, %c0_65] : memref<304x128xbf16, #tpu.memory_space<vmem>>, vector<256x128xbf16>
    %c8_66 = arith.constant 8 : index
    %c0_67 = arith.constant 0 : index
    %c0_68 = arith.constant 0 : index
    %111 = vector.load %arg6[%c8_66, %c0_67, %c0_68] : memref<9x128x128xbf16, #tpu.memory_space<vmem>>, vector<1x128x128xbf16>
    %112 = vector.shape_cast %111 : vector<1x128x128xbf16> to vector<128x128xbf16>
    %cst_69 = arith.constant dense<0.000000e+00> : vector<256x128xf32>
    %113 = tpu.matmul %110, %112, %cst_69 {dimension_numbers = #tpu.dot_dimension_numbers<[1], [0], [0], [1], [0, 0, 1, 1], [], []>} : vector<256x128xbf16>, vector<128x128xbf16>, vector<256x128xf32> -> vector<256x128xf32>
    %114 = arith.addf %109, %113 : vector<256x128xf32>
    %115 = vector.broadcast %28 : vector<256x1xf32> to vector<256x128xf32>
    %116 = arith.mulf %114, %115 : vector<256x128xf32>
    %117 = arith.addf %100, %116 : vector<256x128xf32>
    %c0_70 = arith.constant 0 : index
    %c0_71 = arith.constant 0 : index
    %118 = vector.load %arg7[%c0_70, %c0_71] : memref<1x128xf32, #tpu.memory_space<vmem>>, vector<1x128xf32>
    %119 = vector.broadcast %118 : vector<1x128xf32> to vector<256x128xf32>
    %120 = arith.addf %117, %119 : vector<256x128xf32>
    %cst_72 = arith.constant dense<0.000000e+00> : vector<128xf32>
    %121 = vector.multi_reduction <add>, %120, %cst_72 [0] : vector<256x128xf32> to vector<128xf32>
    %122 = vector.shape_cast %121 : vector<128xf32> to vector<1x128xf32>
    %cst_73 = arith.constant 2.560000e+02 : f32
    %123 = vector.broadcast %cst_73 : f32 to vector<1x128xf32>
    %124 = arith.divf %122, %123 : vector<1x128xf32>
    %125 = arith.mulf %120, %120 : vector<256x128xf32>
    %cst_74 = arith.constant dense<0.000000e+00> : vector<128xf32>
    %126 = vector.multi_reduction <add>, %125, %cst_74 [0] : vector<256x128xf32> to vector<128xf32>
    %127 = vector.shape_cast %126 : vector<128xf32> to vector<1x128xf32>
    %cst_75 = arith.constant 2.560000e+02 : f32
    %128 = vector.broadcast %cst_75 : f32 to vector<1x128xf32>
    %129 = arith.divf %127, %128 : vector<1x128xf32>
    %130 = arith.mulf %124, %124 : vector<1x128xf32>
    %131 = arith.subf %129, %130 : vector<1x128xf32>
    %c0_76 = arith.constant 0 : index
    %c0_77 = arith.constant 0 : index
    %c0_78 = arith.constant 0 : index
    %132 = vector.load %arg4[%c0_76, %c0_77, %c0_78] : memref<1x1x128xf32, #tpu.memory_space<vmem>>, vector<1x1x128xf32>
    %133 = vector.shape_cast %132 : vector<1x1x128xf32> to vector<1x128xf32>
    %cst_79 = arith.constant 1.000000e+00 : f32
    %134 = vector.broadcast %cst_79 : f32 to vector<1x128xf32>
    %135 = arith.addf %134, %133 : vector<1x128xf32>
    %cst_80 = arith.constant 9.99999974E-6 : f32
    %136 = vector.broadcast %cst_80 : f32 to vector<1x128xf32>
    %137 = arith.addf %131, %136 : vector<1x128xf32>
    %138 = math.rsqrt %137 : vector<1x128xf32>
    %139 = arith.mulf %135, %138 : vector<1x128xf32>
    %c0_81 = arith.constant 0 : index
    %c0_82 = arith.constant 0 : index
    %c0_83 = arith.constant 0 : index
    %140 = vector.load %arg5[%c0_81, %c0_82, %c0_83] : memref<1x1x128xf32, #tpu.memory_space<vmem>>, vector<1x1x128xf32>
    %141 = vector.shape_cast %140 : vector<1x1x128xf32> to vector<1x128xf32>
    %142 = arith.mulf %124, %139 : vector<1x128xf32>
    %143 = arith.subf %141, %142 : vector<1x128xf32>
    %144 = vector.broadcast %139 : vector<1x128xf32> to vector<256x128xf32>
    %145 = arith.mulf %120, %144 : vector<256x128xf32>
    %146 = vector.broadcast %143 : vector<1x128xf32> to vector<256x128xf32>
    %147 = arith.addf %145, %146 : vector<256x128xf32>
    %cst_84 = arith.constant 0.000000e+00 : f32
    %148 = vector.broadcast %cst_84 : f32 to vector<256x128xf32>
    %149 = arith.cmpf oge, %147, %148 : vector<256x128xf32>
    %cst_85 = arith.constant 2.000000e-01 : f32
    %150 = vector.broadcast %cst_85 : f32 to vector<256x128xf32>
    %151 = arith.mulf %150, %147 : vector<256x128xf32>
    %152 = arith.select %149, %147, %151 : vector<256x128xi1>, vector<256x128xf32>
    %153 = arith.truncf %152 : vector<256x128xf32> to vector<256x128xbf16>
    %c24_86 = arith.constant 24 : index
    %c0_87 = arith.constant 0 : index
    %154 = vector.load %arg12[%c24_86, %c0_87] : memref<304x128xbf16, #tpu.memory_space<vmem>>, vector<256x128xbf16>
    tpu.vector_store %arg12[%c24_86, %c0_87], %153 {strides = array<i32>} : memref<304x128xbf16, #tpu.memory_space<vmem>>, vector<256x128xbf16>,
    %c7_88 = arith.constant 7 : index
    %c0_89 = arith.constant 0 : index
    %155 = vector.load %arg12[%c7_88, %c0_89] : memref<304x128xbf16, #tpu.memory_space<vmem>>, vector<256x128xbf16>
    %c0_90 = arith.constant 0 : index
    %c0_91 = arith.constant 0 : index
    %c0_92 = arith.constant 0 : index
    %156 = vector.load %arg8[%c0_90, %c0_91, %c0_92] : memref<9x128x128xbf16, #tpu.memory_space<vmem>>, vector<1x128x128xbf16>
    %157 = vector.shape_cast %156 : vector<1x128x128xbf16> to vector<128x128xbf16>
    %cst_93 = arith.constant dense<0.000000e+00> : vector<256x128xf32>
    %158 = tpu.matmul %155, %157, %cst_93 {dimension_numbers = #tpu.dot_dimension_numbers<[1], [0], [0], [1], [0, 0, 1, 1], [], []>} : vector<256x128xbf16>, vector<128x128xbf16>, vector<256x128xf32> -> vector<256x128xf32>
    %c23_94 = arith.constant 23 : index
    %c0_95 = arith.constant 0 : index
    %159 = vector.load %arg12[%c23_94, %c0_95] : memref<304x128xbf16, #tpu.memory_space<vmem>>, vector<256x128xbf16>
    %c3_96 = arith.constant 3 : index
    %c0_97 = arith.constant 0 : index
    %c0_98 = arith.constant 0 : index
    %160 = vector.load %arg8[%c3_96, %c0_97, %c0_98] : memref<9x128x128xbf16, #tpu.memory_space<vmem>>, vector<1x128x128xbf16>
    %161 = vector.shape_cast %160 : vector<1x128x128xbf16> to vector<128x128xbf16>
    %cst_99 = arith.constant dense<0.000000e+00> : vector<256x128xf32>
    %162 = tpu.matmul %159, %161, %cst_99 {dimension_numbers = #tpu.dot_dimension_numbers<[1], [0], [0], [1], [0, 0, 1, 1], [], []>} : vector<256x128xbf16>, vector<128x128xbf16>, vector<256x128xf32> -> vector<256x128xf32>
    %163 = arith.addf %158, %162 : vector<256x128xf32>
    %c39_100 = arith.constant 39 : index
    %c0_101 = arith.constant 0 : index
    %164 = vector.load %arg12[%c39_100, %c0_101] : memref<304x128xbf16, #tpu.memory_space<vmem>>, vector<256x128xbf16>
    %c6_102 = arith.constant 6 : index
    %c0_103 = arith.constant 0 : index
    %c0_104 = arith.constant 0 : index
    %165 = vector.load %arg8[%c6_102, %c0_103, %c0_104] : memref<9x128x128xbf16, #tpu.memory_space<vmem>>, vector<1x128x128xbf16>
    %166 = vector.shape_cast %165 : vector<1x128x128xbf16> to vector<128x128xbf16>
    %cst_105 = arith.constant dense<0.000000e+00> : vector<256x128xf32>
    %167 = tpu.matmul %164, %166, %cst_105 {dimension_numbers = #tpu.dot_dimension_numbers<[1], [0], [0], [1], [0, 0, 1, 1], [], []>} : vector<256x128xbf16>, vector<128x128xbf16>, vector<256x128xf32> -> vector<256x128xf32>
    %168 = arith.addf %163, %167 : vector<256x128xf32>
    %169 = vector.broadcast %24 : vector<256x1xf32> to vector<256x128xf32>
    %170 = arith.mulf %168, %169 : vector<256x128xf32>
    %c8_106 = arith.constant 8 : index
    %c0_107 = arith.constant 0 : index
    %171 = vector.load %arg12[%c8_106, %c0_107] : memref<304x128xbf16, #tpu.memory_space<vmem>>, vector<256x128xbf16>
    %c1_108 = arith.constant 1 : index
    %c0_109 = arith.constant 0 : index
    %c0_110 = arith.constant 0 : index
    %172 = vector.load %arg8[%c1_108, %c0_109, %c0_110] : memref<9x128x128xbf16, #tpu.memory_space<vmem>>, vector<1x128x128xbf16>
    %173 = vector.shape_cast %172 : vector<1x128x128xbf16> to vector<128x128xbf16>
    %cst_111 = arith.constant dense<0.000000e+00> : vector<256x128xf32>
    %174 = tpu.matmul %171, %173, %cst_111 {dimension_numbers = #tpu.dot_dimension_numbers<[1], [0], [0], [1], [0, 0, 1, 1], [], []>} : vector<256x128xbf16>, vector<128x128xbf16>, vector<256x128xf32> -> vector<256x128xf32>
    %c24_112 = arith.constant 24 : index
    %c0_113 = arith.constant 0 : index
    %175 = vector.load %arg12[%c24_112, %c0_113] : memref<304x128xbf16, #tpu.memory_space<vmem>>, vector<256x128xbf16>
    %c4_114 = arith.constant 4 : index
    %c0_115 = arith.constant 0 : index
    %c0_116 = arith.constant 0 : index
    %176 = vector.load %arg8[%c4_114, %c0_115, %c0_116] : memref<9x128x128xbf16, #tpu.memory_space<vmem>>, vector<1x128x128xbf16>
    %177 = vector.shape_cast %176 : vector<1x128x128xbf16> to vector<128x128xbf16>
    %cst_117 = arith.constant dense<0.000000e+00> : vector<256x128xf32>
    %178 = tpu.matmul %175, %177, %cst_117 {dimension_numbers = #tpu.dot_dimension_numbers<[1], [0], [0], [1], [0, 0, 1, 1], [], []>} : vector<256x128xbf16>, vector<128x128xbf16>, vector<256x128xf32> -> vector<256x128xf32>
    %179 = arith.addf %174, %178 : vector<256x128xf32>
    %c40_118 = arith.constant 40 : index
    %c0_119 = arith.constant 0 : index
    %180 = vector.load %arg12[%c40_118, %c0_119] : memref<304x128xbf16, #tpu.memory_space<vmem>>, vector<256x128xbf16>
    %c7_120 = arith.constant 7 : index
    %c0_121 = arith.constant 0 : index
    %c0_122 = arith.constant 0 : index
    %181 = vector.load %arg8[%c7_120, %c0_121, %c0_122] : memref<9x128x128xbf16, #tpu.memory_space<vmem>>, vector<1x128x128xbf16>
    %182 = vector.shape_cast %181 : vector<1x128x128xbf16> to vector<128x128xbf16>
    %cst_123 = arith.constant dense<0.000000e+00> : vector<256x128xf32>
    %183 = tpu.matmul %180, %182, %cst_123 {dimension_numbers = #tpu.dot_dimension_numbers<[1], [0], [0], [1], [0, 0, 1, 1], [], []>} : vector<256x128xbf16>, vector<128x128xbf16>, vector<256x128xf32> -> vector<256x128xf32>
    %184 = arith.addf %179, %183 : vector<256x128xf32>
    %185 = arith.addf %170, %184 : vector<256x128xf32>
    %c9_124 = arith.constant 9 : index
    %c0_125 = arith.constant 0 : index
    %186 = vector.load %arg12[%c9_124, %c0_125] : memref<304x128xbf16, #tpu.memory_space<vmem>>, vector<256x128xbf16>
    %c2_126 = arith.constant 2 : index
    %c0_127 = arith.constant 0 : index
    %c0_128 = arith.constant 0 : index
    %187 = vector.load %arg8[%c2_126, %c0_127, %c0_128] : memref<9x128x128xbf16, #tpu.memory_space<vmem>>, vector<1x128x128xbf16>
    %188 = vector.shape_cast %187 : vector<1x128x128xbf16> to vector<128x128xbf16>
    %cst_129 = arith.constant dense<0.000000e+00> : vector<256x128xf32>
    %189 = tpu.matmul %186, %188, %cst_129 {dimension_numbers = #tpu.dot_dimension_numbers<[1], [0], [0], [1], [0, 0, 1, 1], [], []>} : vector<256x128xbf16>, vector<128x128xbf16>, vector<256x128xf32> -> vector<256x128xf32>
    %c25_130 = arith.constant 25 : index
    %c0_131 = arith.constant 0 : index
    %190 = vector.load %arg12[%c25_130, %c0_131] : memref<304x128xbf16, #tpu.memory_space<vmem>>, vector<256x128xbf16>
    %c5_132 = arith.constant 5 : index
    %c0_133 = arith.constant 0 : index
    %c0_134 = arith.constant 0 : index
    %191 = vector.load %arg8[%c5_132, %c0_133, %c0_134] : memref<9x128x128xbf16, #tpu.memory_space<vmem>>, vector<1x128x128xbf16>
    %192 = vector.shape_cast %191 : vector<1x128x128xbf16> to vector<128x128xbf16>
    %cst_135 = arith.constant dense<0.000000e+00> : vector<256x128xf32>
    %193 = tpu.matmul %190, %192, %cst_135 {dimension_numbers = #tpu.dot_dimension_numbers<[1], [0], [0], [1], [0, 0, 1, 1], [], []>} : vector<256x128xbf16>, vector<128x128xbf16>, vector<256x128xf32> -> vector<256x128xf32>
    %194 = arith.addf %189, %193 : vector<256x128xf32>
    %c41_136 = arith.constant 41 : index
    %c0_137 = arith.constant 0 : index
    %195 = vector.load %arg12[%c41_136, %c0_137] : memref<304x128xbf16, #tpu.memory_space<vmem>>, vector<256x128xbf16>
    %c8_138 = arith.constant 8 : index
    %c0_139 = arith.constant 0 : index
    %c0_140 = arith.constant 0 : index
    %196 = vector.load %arg8[%c8_138, %c0_139, %c0_140] : memref<9x128x128xbf16, #tpu.memory_space<vmem>>, vector<1x128x128xbf16>
    %197 = vector.shape_cast %196 : vector<1x128x128xbf16> to vector<128x128xbf16>
    %cst_141 = arith.constant dense<0.000000e+00> : vector<256x128xf32>
    %198 = tpu.matmul %195, %197, %cst_141 {dimension_numbers = #tpu.dot_dimension_numbers<[1], [0], [0], [1], [0, 0, 1, 1], [], []>} : vector<256x128xbf16>, vector<128x128xbf16>, vector<256x128xf32> -> vector<256x128xf32>
    %199 = arith.addf %194, %198 : vector<256x128xf32>
    %200 = vector.broadcast %28 : vector<256x1xf32> to vector<256x128xf32>
    %201 = arith.mulf %199, %200 : vector<256x128xf32>
    %202 = arith.addf %185, %201 : vector<256x128xf32>
    %c0_142 = arith.constant 0 : index
    %c0_143 = arith.constant 0 : index
    %203 = vector.load %arg9[%c0_142, %c0_143] : memref<1x128xf32, #tpu.memory_space<vmem>>, vector<1x128xf32>
    %204 = vector.broadcast %203 : vector<1x128xf32> to vector<256x128xf32>
    %205 = arith.addf %202, %204 : vector<256x128xf32>
    %c0_144 = arith.constant 0 : index
    %c0_145 = arith.constant 0 : index
    %206 = vector.load %arg11[%c0_144, %c0_145] : memref<256x128xf32, #tpu.memory_space<vmem>>, vector<256x128xf32>
    %cst_146 = arith.constant 0.707106769 : f32
    %207 = vector.broadcast %cst_146 : f32 to vector<256x128xf32>
    %208 = arith.mulf %205, %207 : vector<256x128xf32>
    %209 = arith.addf %206, %208 : vector<256x128xf32>
    %c0_147 = arith.constant 0 : index
    %c0_148 = arith.constant 0 : index
    %210 = vector.load %arg11[%c0_147, %c0_148] : memref<256x128xf32, #tpu.memory_space<vmem>>, vector<256x128xf32>
    tpu.vector_store %arg11[%c0_147, %c0_148], %209 {strides = array<i32>} : memref<256x128xf32, #tpu.memory_space<vmem>>, vector<256x128xf32>,
    return
  }
  func.func @transform_0(%arg0: i32) -> (i32, i32) {
    %c0_i32 = arith.constant 0 : i32
    %c0_i32_0 = arith.constant 0 : i32
    return %arg0, %c0_i32 : i32, i32
  }
  func.func @transform_1(%arg0: i32) -> (i32, i32, i32) {
    %c0_i32 = arith.constant 0 : i32
    %c0_i32_0 = arith.constant 0 : i32
    %c0_i32_1 = arith.constant 0 : i32
    return %arg0, %c0_i32, %c0_i32_0 : i32, i32, i32
  }
  func.func @transform_2(%arg0: i32) -> (i32, i32, i32) {
    %c0_i32 = arith.constant 0 : i32
    %c0_i32_0 = arith.constant 0 : i32
    %c0_i32_1 = arith.constant 0 : i32
    return %arg0, %c0_i32, %c0_i32_0 : i32, i32, i32
  }
  func.func @transform_3(%arg0: i32) -> (i32, i32, i32) {
    %c0_i32 = arith.constant 0 : i32
    %c0_i32_0 = arith.constant 0 : i32
    %c0_i32_1 = arith.constant 0 : i32
    return %arg0, %c0_i32, %c0_i32_0 : i32, i32, i32
  }
  func.func @transform_4(%arg0: i32) -> (i32, i32, i32) {
    %c0_i32 = arith.constant 0 : i32
    %c0_i32_0 = arith.constant 0 : i32
    %c0_i32_1 = arith.constant 0 : i32
    return %arg0, %c0_i32, %c0_i32_0 : i32, i32, i32
  }
  func.func @transform_5(%arg0: i32) -> (i32, i32, i32) {
    %c0_i32 = arith.constant 0 : i32
    %c0_i32_0 = arith.constant 0 : i32
    %c0_i32_1 = arith.constant 0 : i32
    %c0_i32_2 = arith.constant 0 : i32
    return %c0_i32, %c0_i32_0, %c0_i32_1 : i32, i32, i32
  }
  func.func @transform_6(%arg0: i32) -> (i32, i32) {
    %c0_i32 = arith.constant 0 : i32
    %c0_i32_0 = arith.constant 0 : i32
    %c0_i32_1 = arith.constant 0 : i32
    return %c0_i32, %c0_i32_0 : i32, i32
  }
  func.func @transform_7(%arg0: i32) -> (i32, i32, i32) {
    %c0_i32 = arith.constant 0 : i32
    %c0_i32_0 = arith.constant 0 : i32
    %c0_i32_1 = arith.constant 0 : i32
    %c0_i32_2 = arith.constant 0 : i32
    return %c0_i32, %c0_i32_0, %c0_i32_1 : i32, i32, i32
  }
  func.func @transform_8(%arg0: i32) -> (i32, i32) {
    %c0_i32 = arith.constant 0 : i32
    %c0_i32_0 = arith.constant 0 : i32
    %c0_i32_1 = arith.constant 0 : i32
    return %c0_i32, %c0_i32_0 : i32, i32
  }
  func.func @transform_9(%arg0: i32) -> (i32, i32) {
    %c0_i32 = arith.constant 0 : i32
    %c0_i32_0 = arith.constant 0 : i32
    %c0_i32_1 = arith.constant 0 : i32
    return %c0_i32, %c0_i32_0 : i32, i32
  }
  func.func @transform_10(%arg0: i32) -> (i32, i32) {
    %c0_i32 = arith.constant 0 : i32
    %c0_i32_0 = arith.constant 0 : i32
    return %arg0, %c0_i32 : i32, i32
  }
}

</mosaic_0001>

<bundles_post_ra>
// kernel: adain_resblk_forward.1
= control target key start
LH: loop header
LB: loop body
LE: loop exit
PB: predicated region body
PF: predicated region fallthrough
CT: control target
= control target key end

     0   :  { %s12360_s13 = smov 0   ;;  %s16154_s0 = inlined_call_operand.vmem [shape: f32[512,128], index: 0, kind: input, shape index: {}]   ;;  %s16155_s1 = inlined_call_operand.vmem [shape: f32[2,1,128], index: 1, kind: input, shape index: {}]   ;;  %s16156_s2 = inlined_call_operand.vmem [shape: f32[2,1,128], index: 2, kind: input, shape index: {}]   ;;  %s16157_s3 = inlined_call_operand.vmem [shape: f32[2,1,128], index: 3, kind: input, shape index: {}]   ;;  %s16158_s4 = inlined_call_operand.vmem [shape: f32[2,1,128], index: 4, kind: input, shape index: {}]   ;;  %s16159_s5 = inlined_call_operand.vmem [shape: bf16[9,128,128], index: 5, kind: input, shape index: {}]   ;;  %s16160_s6 = inlined_call_operand.vmem [shape: f32[1,128], index: 6, kind: input, shape index: {}]   ;;  %s16161_s7 = inlined_call_operand.vmem [shape: bf16[9,128,128], index: 7, kind: input, shape index: {}]   ;;  %s16162_s8 = inlined_call_operand.vmem [shape: f32[1,128], index: 8, kind: input, shape index: {}]   ;;  %s16163_s9 = inlined_call_operand.vmem [shape: bf16[128,128], index: 9, kind: input, shape index: {}]   ;;  %s16164_s10 = inlined_call_operand.vmem [shape: f32[512,128], index: 10, kind: output, shape index: {}]  }
   0x1 LB: > { %s12366_s14 = sadd.s32 4294967295, %s12301_s13   ;;  %p9551_p0 = scmp.ge.s32.totalorder %s12301_s13, 1  ;;  %s12301_s13 = sphi %s12360_s13, %s20_s13  }
   0x2   : > { %p345_p1 = scmp.lt.s32.totalorder %s12301_s13, 3 }
   0x4   : > { %p346_p2 = pnand %p9551_p0, %p345_p1 }
   0x6   : > { %349 = sbr.rel (%p346_p2) target bundleno = 1331 (0x533), region = 60 }
   0xb   : > { %v11914_v0 = vld [vmem:[%s16163_s9 + $0x38] sm:$0xff]   ;;  %s9552_s17 = sshll.u32 %s12366_s14, 5  ;;  %v11915_v1 = vld [vmem:[%s16163_s9 + $0x30] sm:$0xff]   ;;  %v11916_v2 = vld [vmem:[%s16163_s9 + $0x28] sm:$0xff]   ;;  %v12303_v7 = vmov 0   ;;  %p401_p4 = scmp.lt.s32.totalorder %s12366_s14, 1 }
   0xc   : > { %p396_p3 = scmp.lt.s32.totalorder %s9552_s17, 63  ;;  %11888 = vmatprep.subr.bf16.mxu1 %v11914_v0  ;;  %10976 = vmatprep.subr.bf16.mxu0 %v11914_v0  ;;  %v11917_v3 = vld [vmem:[%s16163_s9 + $0x20] sm:$0xff]   ;;  %422 = vst [vmem:[#allocation2 + $0x8] sm:$0xf] %v12303_v7  ;;  %420 = vst [vmem:[#allocation2] sm:$0xf] %v12303_v7 }
   0xd   : > { %11896 = vmatpush3.bf16.msra.mxu1 %v11914_v0  ;;  %10977 = vmatpush3.bf16.msra.mxu0 %v11914_v0  ;;  %421 = vst [vmem:[#allocation2 + $0x4] sm:$0xf] %v12303_v7  ;;  %423 = vst [vmem:[#allocation2 + $0x8c] sm:$0xf] %v12303_v7  ;;  %v11918_v12 = vld [vmem:[%s16163_s9 + $0x18] sm:$0xff]   ;;  %v11919_v20 = vld [vmem:[%s16163_s9 + $0x10] sm:$0xff]  }
   0xe   : > { %s16709_s17 = smov (!%p396_p3, %s9552_s17), 63  ;;  %11889 = vmatprep.subr.bf16.mxu1 %v11915_v1  ;;  %10978 = vmatprep.subr.bf16.mxu0 %v11915_v1  ;;  %424 = vst [vmem:[#allocation2 + $0x90] sm:$0xf] %v12303_v7  ;;  %425 = vst [vmem:[#allocation2 + $0x94] sm:$0xf] %v12303_v7  ;;  %v11920_v27 = vld [vmem:[%s16163_s9 + $0x8] sm:$0xff]  }
   0xf   : > { %s9553_s22 = sshll.u32 %s16709_s17, 3  ;;  %v11921_v36 = vld [vmem:[%s16163_s9] sm:$0xff]   ;;  %v11922_v49 = vld [vmem:[%s16159_s5 + $0xf8] sm:$0xff]   ;;  %s16711_s14 = smov (!%p401_p4, %s12366_s14), 1 }
  0x10   : > { %s12388_s25 = scalar_lea.vmem %s16154_s0, %s9553_s22  ;;  %v11923_v53 = vld [vmem:[%s16159_s5 + $0x38] sm:$0xff]   ;;  %s403_s29 = scalar_lea.vmem %s16155_s1, %s16711_s14 }
  0x11   : > { %11897 = vmatpush3.bf16.msra.mxu1 %v11915_v1  ;;  %10979 = vmatpush3.bf16.msra.mxu0 %v11915_v1  ;;  %v1035_v4 = vld [vmem:[%s12388_s25] sm:$0xff]  ;;  %v1036_v5 = vld [vmem:[%s12388_s25 + $0x8] sm:$0xff]  ;;  %v12396_v6 = vld [vmem:[%s12388_s25 + $0x10] sm:$0xff]  ;;  %s406_s12 = scalar_lea.vmem %s16156_s2, %s16711_s14  ;;  %s13057_s20 = scalar_lea.vmem %s16164_s10, %s9553_s22 }
  0x12   : > { %11890 = vmatprep.subr.bf16.mxu1 %v11916_v2  ;;  %10980 = vmatprep.subr.bf16.mxu0 %v11916_v2  ;;  %v1372_v8 = vadd.f32 %v1036_v5, %v1035_v4  ;;  %v12399_v9 = vld [vmem:[%s12388_s25 + $0x18] sm:$0xff]  ;;  %v1067_v10 = vpack.c.bf16 %v1036_v5, %v1035_v4  ;;  %v12406_v13 = vld [vmem:[%s12388_s25 + $0x20] sm:$0xff]  ;;  %v12412_v15 = vld [vmem:[%s12388_s25 + $0x88] sm:$0xff]  ;;  %v1411_v22 = vmul.f32 %v1035_v4, %v1035_v4  ;;  %s409_s16 = scalar_lea.vmem %s16157_s3, %s16711_s14  ;;  %s412_s21 = scalar_lea.vmem %s16158_s4, %s16711_s14 }
  0x13   : > { %v12409_v14 = vld [vmem:[%s12388_s25 + $0x80] sm:$0xff]  ;;  %v12416_v17 = vld [vmem:[%s12388_s25 + $0x28] sm:$0xff]  ;;  %v12425_v21 = vld [vmem:[%s12388_s25 + $0x30] sm:$0xff]  ;;  %v1412_v23 = vmul.f32 %v1036_v5, %v1036_v5  ;;  %v1413_v26 = vmul.f32 %v12396_v6, %v12396_v6  ;;  %v1414_v30 = vmul.f32 %v12399_v9, %v12399_v9  ;;  %v1415_v34 = vmul.f32 %v12406_v13, %v12406_v13 }
  0x14   : > { %v1373_v11 = vadd.f32 %v1372_v8, %v12396_v6  ;;  %10992 = vmatprep.mubr.bf16.mxu0 %v1067_v10  ;;  %v1075_v18 = vpack.c.bf16 %v12412_v15, %v12409_v14  ;;  %v12429_v25 = vld [vmem:[%s12388_s25 + $0x38] sm:$0xff]  ;;  %v12437_v28 = vld [vmem:[%s12388_s25 + $0x40] sm:$0xff]  ;;  %v12444_v33 = vld [vmem:[%s12388_s25 + $0x48] sm:$0xff]  ;;  %v1416_v39 = vmul.f32 %v12416_v17, %v12416_v17  ;;  %v1417_v44 = vmul.f32 %v12425_v21, %v12425_v21 }
  0x15   : > { %11898 = vmatpush3.bf16.msra.mxu1 %v11916_v2  ;;  %10981 = vmatpush3.bf16.msra.mxu0 %v11916_v2  ;;  %v1443_v31 = vadd.f32 %v1412_v23, %v1411_v22  ;;  %v12453_v38 = vld [vmem:[%s12388_s25 + $0x50] sm:$0xff]  ;;  %v12458_v41 = vld [vmem:[%s12388_s25 + $0x58] sm:$0xff]  ;;  %v12462_v43 = vld [vmem:[%s12388_s25 + $0x60] sm:$0xff]  ;;  %v1418_v51 = vmul.f32 %v12429_v25, %v12429_v25  ;;  %v1419_v57 = vmul.f32 %v12437_v28, %v12437_v28 }
  0x16   : > { %11891 = vmatprep.subr.bf16.mxu1 %v11917_v3  ;;  %10982 = vmatprep.subr.bf16.mxu0 %v11917_v3  ;;  %v1374_v16 = vadd.f32 %v1373_v11, %v12399_v9  ;;  %v12467_v46 = vld [vmem:[%s12388_s25 + $0x90] sm:$0xff]  ;;  %v12470_v47 = vld [vmem:[%s12388_s25 + $0x98] sm:$0xff]  ;;  %v12477_v50 = vld [vmem:[%s12388_s25 + $0x68] sm:$0xff]  ;;  %v1068_v60 = vpack.c.bf16 %v12399_v9, %v12396_v6  ;;  %v1420_v0 = vmul.f32 %v12444_v33, %v12444_v33 }
  0x17   : > { %11008 = vmatprep.mubr.bf16.mxu1 %v1075_v18  ;;  %v1444_v35 = vadd.f32 %v1443_v31, %v1413_v26  ;;  %v12485_v54 = vld [vmem:[%s12388_s25 + $0xa0] sm:$0xff]  ;;  %v12489_v56 = vld [vmem:[%s12388_s25 + $0xa8] sm:$0xff]  ;;  %v1076_v59 = vpack.c.bf16 %v12470_v47, %v12467_v46  ;;  %v12498_v61 = vld [vmem:[%s12388_s25 + $0x70] sm:$0xff]  ;;  %v1069_v5 = vpack.c.bf16 %v12416_v17, %v12406_v13  ;;  %v1421_v7 = vmul.f32 %v12453_v38, %v12453_v38 }
  0x18   : > { %v1375_v19 = vadd.f32 %v1374_v16, %v12406_v13  ;;  %v1077_v63 = vpack.c.bf16 %v12489_v56, %v12485_v54  ;;  %v11924_v2 = vld [vmem:[%s16159_s5 + $0xf0] sm:$0xff]   ;;  %v12515_v6 = vld [vmem:[%s12388_s25 + $0x78] sm:$0xff]  ;;  %v12530_v16 = vld [vmem:[%s12388_s25 + $0xc8] sm:$0xff]  ;;  %v1422_v13 = vmul.f32 %v12458_v41, %v12458_v41  ;;  %v1423_v22 = vmul.f32 %v12462_v43, %v12462_v43 }
  0x19   : > { %11899 = vmatpush3.bf16.msra.mxu1 %v11917_v3  ;;  %10983 = vmatpush3.bf16.msra.mxu0 %v11917_v3  ;;  %v1445_v40 = vadd.f32 %v1444_v35, %v1414_v30  ;;  %v11925_v4 = vld [vmem:[%s16159_s5 + $0x30] sm:$0xff]   ;;  %v12523_v10 = vld [vmem:[%s12388_s25 + $0xb8] sm:$0xff]  ;;  %v11926_v18 = vld [vmem:[%s16159_s5 + $0xe8] sm:$0xff]   ;;  %v1070_v26 = vpack.c.bf16 %v12429_v25, %v12425_v21  ;;  %v1424_v31 = vmul.f32 %v12477_v50, %v12477_v50 }
  0x1a   : > { %11892 = vmatprep.subr.bf16.mxu1 %v11918_v12  ;;  %10984 = vmatprep.subr.bf16.mxu0 %v11918_v12  ;;  %v1376_v24 = vadd.f32 %v1375_v19, %v12416_v17  ;;  %v12520_v9 = vld [vmem:[%s12388_s25 + $0xb0] sm:$0xff]  ;;  %v11927_v19 = vld [vmem:[%s16159_s5 + $0x28] sm:$0xff]   ;;  %v11928_v30 = vld [vmem:[%s16159_s5 + $0xe0] sm:$0xff]   ;;  %v1425_v35 = vmul.f32 %v12498_v61, %v12498_v61 }
  0x1b   : > { %v1446_v45 = vadd.f32 %v1445_v40, %v1415_v34  ;;  %v1071_v34 = vpack.c.bf16 %v12444_v33, %v12437_v28  ;;  %v12570_v40 = vld [vmem:[%s12388_s25 + $0xd8] sm:$0xff] }
  0x1c   : > { %v1377_v29 = vadd.f32 %v1376_v24, %v12425_v21  ;;  %v1078_v24 = vpack.c.bf16 %v12523_v10, %v12520_v9 }
  0x1d   : > { %11900 = vmatpush3.bf16.msra.mxu1 %v11918_v12  ;;  %10985 = vmatpush3.bf16.msra.mxu0 %v11918_v12  ;;  %v1447_v52 = vadd.f32 %v1446_v45, %v1416_v39  ;;  %v12527_v12 = vld [vmem:[%s12388_s25 + $0xc0] sm:$0xff]  ;;  %v12567_v39 = vld [vmem:[%s12388_s25 + $0xd0] sm:$0xff]  ;;  %v1426_v45 = vmul.f32 %v12515_v6, %v12515_v6 }
  0x1e   : > { %11893 = vmatprep.subr.bf16.mxu1 %v11919_v20  ;;  %10986 = vmatprep.subr.bf16.mxu0 %v11919_v20  ;;  %v1378_v32 = vadd.f32 %v1377_v29, %v12429_v25  ;;  %v1079_v29 = vpack.c.bf16 %v12530_v16, %v12527_v12  ;;  %v11929_v25 = vld [vmem:[%s16159_s5 + $0x20] sm:$0xff]  }
  0x1f   : > { %v1448_v58 = vadd.f32 %v1447_v52, %v1417_v44  ;;  %v12580_v44 = vld [vmem:[%s12388_s25 + $0xe8] sm:$0xff] }
  0x20   : > { %v1379_v37 = vadd.f32 %v1378_v32, %v12437_v28  ;;  %v11931_v28 = vld [vmem:[%s16159_s5 + $0x18] sm:$0xff]  }
  0x21   : > { %11901 = vmatpush3.bf16.msra.mxu1 %v11919_v20  ;;  %10987 = vmatpush3.bf16.msra.mxu0 %v11919_v20  ;;  %v1449_v1 = vadd.f32 %v1448_v58, %v1418_v51  ;;  %v1427_v51 = vmul.f32 %v12409_v14, %v12409_v14 }
  0x22   : > { %11894 = vmatprep.subr.bf16.mxu1 %v11920_v27  ;;  %10988 = vmatprep.subr.bf16.mxu0 %v11920_v27  ;;  %v1380_v42 = vadd.f32 %v1379_v37, %v12444_v33  ;;  %v11930_v37 = vld [vmem:[%s16159_s5 + $0xd8] sm:$0xff]   ;;  %v12577_v33 = vld [vmem:[%s12388_s25 + $0xe0] sm:$0xff] }
  0x23   : > { %v1450_v8 = vadd.f32 %v1449_v1, %v1419_v57  ;;  %v11932_v57 = vld [vmem:[%s16159_s5 + $0xd0] sm:$0xff]  }
  0x24   : > { %v1381_v48 = vadd.f32 %v1380_v42, %v12453_v38  ;;  %v12611_v1 = vld [vmem:[%s12388_s25 + $0xf0] sm:$0xff] }
  0x25   : > { %11902 = vmatpush3.bf16.msra.mxu1 %v11920_v27  ;;  %10989 = vmatpush3.bf16.msra.mxu0 %v11920_v27  ;;  %v1451_v17 = vadd.f32 %v1450_v8, %v1420_v0  ;;  %v1431_v8 = vmul.f32 %v12485_v54, %v12485_v54 }
  0x26   : > { %11895 = vmatprep.subr.bf16.mxu1 %v11921_v36  ;;  %10990 = vmatprep.subr.bf16.mxu0 %v11921_v36  ;;  %v1382_v55 = vadd.f32 %v1381_v48, %v12458_v41 }
  0x27   : > { %v1452_v23 = vadd.f32 %v1451_v17, %v1421_v7  ;;  %v1074_v17 = vpack.c.bf16 %v12515_v6, %v12498_v61 }
  0x28   : > { %v1383_v62 = vadd.f32 %v1382_v55, %v12462_v43  ;;  %v1072_v55 = vpack.c.bf16 %v12458_v41, %v12453_v38  ;;  %v11933_v41 = vld [vmem:[%s16159_s5 + $0x10] sm:$0xff]  }
  0x29   : > { %11903 = vmatpush3.bf16.msra.mxu1 %v11921_v36  ;;  %10991 = vmatpush3.bf16.msra.mxu0 %v11921_v36  ;;  %v1453_v32 = vadd.f32 %v1452_v23, %v1422_v13 }
  0x2a   : > { %11024 = vmatprep.subr.bf16.mxu1 %v11922_v49  ;;  %11072 = vmatprep.subr.bf16.mxu0 %v11923_v53  ;;  %v1384_v3 = vadd.f32 %v1383_v62, %v12477_v50  ;;  %v1073_v62 = vpack.c.bf16 %v12477_v50, %v12462_v43  ;;  %v11935_v43 = vld [vmem:[%s16159_s5 + $0x8] sm:$0xff]  }
  0x2b   : > { %v1454_v36 = vadd.f32 %v1453_v32, %v1423_v22 }
  0x2c   : > { %11009 = vmatmul.mubr.bf16.vlgmr.msra.gmra.mxu1 %v1076_v59  ;;  %10993 = vmatmul.mubr.bf16.vlgmr.msra.gmra.mxu0 %v1068_v60  ;;  %v1385_v11 = vadd.f32 %v1384_v3, %v12498_v61  ;;  %v1081_v59 = vpack.c.bf16 %v12580_v44, %v12577_v33 }
  0x2d   : > { %11025 = vmatpush3.bf16.msra.mxu1 %v11922_v49  ;;  %11012 = vmatprep.mubr.bf16.mxu1 %v1077_v63  ;;  %v1455_v48 = vadd.f32 %v1454_v36, %v1424_v31  ;;  %v1429_v63 = vmul.f32 %v12467_v46, %v12467_v46  ;;  %v1434_v31 = vmul.f32 %v12523_v10, %v12523_v10 }
  0x2e   : > { %11073 = vmatpush3.bf16.msra.mxu0 %v11923_v53  ;;  %11026 = vmatprep.subr.bf16.mxu1 %v11924_v2  ;;  %v1386_v20 = vadd.f32 %v1385_v11, %v12515_v6  ;;  %v1080_v53 = vpack.c.bf16 %v12570_v40, %v12567_v39  ;;  %v1436_v36 = vmul.f32 %v12530_v16, %v12530_v16 }
  0x2f   : > { %11074 = vmatprep.subr.bf16.mxu0 %v11925_v4  ;;  %10996 = vmatprep.mubr.bf16.mxu0 %v1069_v5  ;;  %v1456_v52 = vadd.f32 %v1455_v48, %v1425_v35 }
  0x30   : > { %v1387_v27 = vadd.f32 %v1386_v20, %v12409_v14  ;;  %v1428_v14 = vmul.f32 %v12412_v15, %v12412_v15  ;;  %v1432_v20 = vmul.f32 %v12489_v56, %v12489_v56 }
  0x31   : > { %11027 = vmatpush3.bf16.msra.mxu1 %v11924_v2  ;;  %v1457_v60 = vadd.f32 %v1456_v52, %v1426_v45  ;;  %v12614_v2 = vld [vmem:[%s12388_s25 + $0xf8] sm:$0xff] }
  0x32   : > { %11075 = vmatpush3.bf16.msra.mxu0 %v11925_v4  ;;  %11028 = vmatprep.subr.bf16.mxu1 %v11926_v18  ;;  %v1388_v21 = vadd.f32 %v1387_v27, %v12412_v15  ;;  %v11934_v15 = vld [vmem:[%s16159_s5 + $0xc8] sm:$0xff]   ;;  %v1430_v4 = vmul.f32 %v12470_v47, %v12470_v47  ;;  %v1082_v13 = vpack.c.bf16 %v12614_v2, %v12611_v1 }
  0x33   : > { %11076 = vmatprep.subr.bf16.mxu0 %v11927_v19  ;;  %v1458_v0 = vadd.f32 %v1457_v60, %v1427_v51  ;;  %v1441_v60 = vmul.f32 %v12611_v1, %v12611_v1 }
  0x34   : > { %11013 = vmatmul.mubr.bf16.gmra.mxu1 %v1078_v24  ;;  %10997 = vmatmul.mubr.bf16.gmra.mxu0 %v1070_v26  ;;  %v1389_v42 = vadd.f32 %v1388_v21, %v12467_v46  ;;  %v11937_v24 = vld [vmem:[%s16159_s5] sm:$0xff]   ;;  %v1433_v26 = vmul.f32 %v12520_v9, %v12520_v9 }
  0x35   : > { %11029 = vmatpush3.bf16.msra.mxu1 %v11926_v18  ;;  %11016 = vmatprep.mubr.bf16.mxu1 %v1079_v29  ;;  %v1459_v5 = vadd.f32 %v1458_v0, %v1428_v14  ;;  %v11936_v18 = vld [vmem:[%s16159_s5 + $0xc0] sm:$0xff]   ;;  %v11942_v29 = vld [vmem:[%s16159_s5 + $0x1b8] sm:$0xff]  }
  0x36   : > { %11077 = vmatpush3.bf16.msra.mxu0 %v11927_v19  ;;  %11030 = vmatprep.subr.bf16.mxu1 %v11928_v30  ;;  %v1390_v49 = vadd.f32 %v1389_v42, %v12470_v47 }
  0x37   : > { %11078 = vmatprep.subr.bf16.mxu0 %v11929_v25  ;;  %11000 = vmatprep.mubr.bf16.mxu0 %v1071_v34  ;;  %v1460_v11 = vadd.f32 %v1459_v5, %v1429_v63 }
  0x38   : > { %v1391_v58 = vadd.f32 %v1390_v49, %v12485_v54  ;;  %v1438_v49 = vmul.f32 %v12570_v40, %v12570_v40 }
  0x39   : > { %11031 = vmatpush3.bf16.msra.mxu1 %v11928_v30  ;;  %v1461_v22 = vadd.f32 %v1460_v11, %v1430_v4 }
  0x3a   : > { %11079 = vmatpush3.bf16.msra.mxu0 %v11929_v25  ;;  %11032 = vmatprep.subr.bf16.mxu1 %v11930_v37  ;;  %v1392_v38 = vadd.f32 %v1391_v58, %v12489_v56  ;;  %v1435_v25 = vmul.f32 %v12527_v12, %v12527_v12  ;;  %v1440_v58 = vmul.f32 %v12580_v44, %v12580_v44 }
  0x3b   : > { %11080 = vmatprep.subr.bf16.mxu0 %v11931_v28  ;;  %v1462_v27 = vadd.f32 %v1461_v22, %v1431_v8 }
  0x3c   : > { %11017 = vmatmul.mubr.bf16.gmra.mxu1 %v1080_v53  ;;  %11001 = vmatmul.mubr.bf16.gmra.mxu0 %v1072_v55  ;;  %v1393_v3 = vadd.f32 %v1392_v38, %v12520_v9  ;;  %v1439_v53 = vmul.f32 %v12577_v33, %v12577_v33 }
  0x3d   : > { %11033 = vmatpush3.bf16.msra.mxu1 %v11930_v37  ;;  %11020 = vmatprep.mubr.bf16.mxu1 %v1081_v59  ;;  %v1463_v32 = vadd.f32 %v1462_v27, %v1432_v20  ;;  %v1823_v27 = vld [vmem:[#allocation2] sm:$0x8] }
  0x3e   : > { %11081 = vmatpush3.bf16.msra.mxu0 %v11931_v28  ;;  %11034 = vmatprep.subr.bf16.mxu1 %v11932_v57  ;;  %v1394_v7 = vadd.f32 %v1393_v3, %v12523_v10  ;;  %v1437_v28 = vmul.f32 %v12567_v39, %v12567_v39  ;;  %v12671_v3 = vld [vmem:[%s16159_s5 + $0x138] sm:$0xff]  }
  0x3f   : > { %11082 = vmatprep.subr.bf16.mxu0 %v11933_v41  ;;  %11004 = vmatprep.mubr.bf16.mxu0 %v1073_v62  ;;  %v1464_v34 = vadd.f32 %v1463_v32, %v1433_v26  ;;  %v1442_v62 = vmul.f32 %v12614_v2, %v12614_v2 }
  0x40   : > { %v1395_v19 = vadd.f32 %v1394_v7, %v12527_v12 }
  0x41   : > { %11035 = vmatpush3.bf16.msra.mxu1 %v11932_v57  ;;  %v1465_v37 = vadd.f32 %v1464_v34, %v1434_v31  ;;  %v1483_v31 = vld [vmem:[%s403_s29] sm:$0x1] }
  0x42   : > { %11083 = vmatpush3.bf16.msra.mxu0 %v11933_v41  ;;  %11036 = vmatprep.subr.bf16.mxu1 %v11934_v15  ;;  %v1396_v23 = vadd.f32 %v1395_v19, %v12530_v16 }
  0x43   : > { %11084 = vmatprep.subr.bf16.mxu0 %v11935_v43  ;;  %v1466_v45 = vadd.f32 %v1465_v37, %v1435_v25  ;;  %v1488_v37 = vld [vmem:[%s406_s12] sm:$0x1] }
  0x44   : > { %11021 = vmatmul.mubr.bf16.gmra.mxu1 %v1082_v13  ;;  %11005 = vmatmul.mubr.bf16.gmra.mxu0 %v1074_v17  ;;  %v1397_v30 = vadd.f32 %v1396_v23, %v12567_v39 }
  0x45   : > { %11037 = vmatpush3.bf16.msra.mxu1 %v11934_v15  ;;  %v1467_v51 = vadd.f32 %v1466_v45, %v1436_v36 }
  0x46   : > { %11085 = vmatpush3.bf16.msra.mxu0 %v11935_v43  ;;  %11038 = vmatprep.subr.bf16.mxu1 %v11936_v18  ;;  %v1398_v21 = vadd.f32 %v1397_v30, %v12570_v40 }
  0x47   : > { %11086 = vmatprep.subr.bf16.mxu0 %v11937_v24  ;;  %v1468_v55 = vadd.f32 %v1467_v51, %v1437_v28 }
  0x48   : > { %v1399_v35 = vadd.f32 %v1398_v21, %v12577_v33  ;;  %v1484_v21 = vadd.f32 1.0, %v1483_v31 }
  0x49   : > { %11039 = vmatpush3.bf16.msra.mxu1 %v11936_v18  ;;  %v1469_v59 = vadd.f32 %v1468_v55, %v1438_v49  ;;  %v426_v18 = vlaneseq  ;;  %v12276_v55 = vld [vmem:[%s12388_s25 + $0x88] sm:$0xff] }
  0x4a   : > { %11087 = vmatpush3.bf16.msra.mxu0 %v11937_v24  ;;  %11120 = vmatprep.subr.bf16.mxu1 %v11942_v29  ;;  %v1400_v42 = vadd.f32 %v1399_v35, %v12580_v44  ;;  %v1824_v29 = vld [vmem:[#allocation2 + $0x4] sm:$0xf] }
  0x4b   : > { %v1470_v38 = vadd.f32 %v1469_v59, %v1439_v53  ;;  %11168 = vmatprep.subr.bf16.mxu0 %v12671_v3  ;;  %v12678_v23 = vshrl.u32 %v426_v18, 7  ;;  %v9669_v32 = vcombine.low %v1823_v27, %v1824_v29 }
  0x4c   : > { %v1401_v48 = vadd.f32 %v1400_v42, %v12611_v1 }
  0x4d   : > { %v1471_v63 = vadd.f32 %v1470_v38, %v1440_v58  ;;  %16223 = vst [vmem:[#allocation3_spill] sm:$0xff] %v12678_v23  ;;  %v12685_v25 = vsub.s32 0, %v12678_v23  ;;  %v2363_v34 = vshrl.u32 %v9669_v32, 16  ;;  %v2366_v35 = vshll.u32 %v9669_v32, 16  ;;  %v12278_v38 = vld [vmem:[%s12388_s25 + $0x8] sm:$0xff] }
  0x4e   : > { %v1402_v52 = vadd.f32 %v1401_v48, %v12614_v2 }
  0x4f   : > { %v1472_v15 = vadd.f32 %v1471_v63, %v1441_v60  ;;  %16224 = vst [vmem:[#allocation4_spill] sm:$0xff] %v12685_v25  ;;  %v12691_v42 = vrot.slane %v2363_v34, 3  ;;  %v12693_v28 = vrot.slane %v2366_v35, 4 }
  0x50   : > { %v1403_v57 = vrot.slane %v1402_v52, 4 }
  0x51   : > { %v1473_v4 = vadd.f32 %v1472_v15, %v1442_v62  ;;  %v12279_v62 = vld [vmem:[%s12388_s25 + $0x10] sm:$0xff] }
  0x52   : > { %v1404_v14 = vadd.f32 %v1403_v57, %v1402_v52  ;;  %v12275_v52 = vld [vmem:[%s12388_s25 + $0x80] sm:$0xff] }
  0x53   : > { %v1474_v5 = vrot.slane %v1473_v4, 4 }
  0x54   : > { %v1405_v41 = vrot.slane %v1404_v14, 2 }
  0x55   : > { %v1475_v8 = vadd.f32 %v1474_v5, %v1473_v4 }
  0x56   : > { %v1406_v0 = vadd.f32 %v1405_v41, %v1404_v14  ;;  %v12277_v14 = vld [vmem:[%s12388_s25] sm:$0xff] }
  0x57   : > { %v1476_v11 = vrot.slane %v1475_v8, 2 }
  0x58   : > { %v1407_v43 = vrot.slane %v1406_v0, 1 }
  0x59   : > { %v1477_v17 = vadd.f32 %v1476_v11, %v1475_v8 }
  0x5a   : > { %v1408_v7 = vadd.f32 %v1407_v43, %v1406_v0 }
  0x5b   : > { %v1478_v19 = vrot.slane %v1477_v17, 1 }
  0x5c   : > { %v1410_v13 = vmul.f32 0.00390625, %v1408_v7 }
  0x5d   : > { %v1479_v20 = vadd.f32 %v1478_v19, %v1477_v17 }
  0x5e   : > { %v1481_v22 = vmul.f32 %v1410_v13, %v1410_v13 }
  0x5f   : > { %v1480_v24 = vmul.f32 0.00390625, %v1479_v20 }
  0x61   : > { %v1482_v26 = vsub.f32 %v1480_v24, %v1481_v22 }
  0x63   : > { %v1485_v30 = vadd.f32 1e-05, %v1482_v26 }
  0x65   : > { %12271 = vrsqrt.f32 %v1485_v30 }
  0x72   : > { %v12272_v36 = vpop.eup %12271 }
  0x73   : > { %v1487_v45 = vmul.f32 %v12272_v36, %v1484_v21 }
  0x75   : > { %v1489_v48 = vmul.f32 %v1487_v45, %v1410_v13  ;;  %v12696_v49 = vrot.slane %v1487_v45, %v12685_v25 }
  0x77   : > { %v1490_v51 = vsub.f32 %v1488_v37, %v1489_v48  ;;  %v1513_v53 = vmul.f32 %v12275_v52, %v12696_v49  ;;  %v1514_v57 = vmul.f32 %v12276_v55, %v12696_v49  ;;  %v1515_v58 = vmul.f32 %v12696_v49, %v12467_v46 }
  0x78   : > { %v1516_v59 = vmul.f32 %v12696_v49, %v12470_v47  ;;  %v1497_v60 = vmul.f32 %v12277_v14, %v12696_v49  ;;  %v1498_v41 = vmul.f32 %v12278_v38, %v12696_v49  ;;  %v1499_v63 = vmul.f32 %v12279_v62, %v12696_v49 }
  0x79   : > { %v12713_v0 = vrot.slane %v1490_v51, %v12685_v25  ;;  %v12717_v15 = vmul.f32 %v12696_v49, %v12477_v50  ;;  %v2369_v46 = vor.u32 %v12693_v28, %v12691_v42  ;;  %v12723_v47 = vmul.f32 %v12696_v49, %v12498_v61 }
  0x7a   : > { %v1512_v43 = vmul.f32 %v12696_v49, %v12515_v6  ;;  %v1517_v4 = vmul.f32 %v12696_v49, %v12485_v54  ;;  %v1518_v5 = vmul.f32 %v12696_v49, %v12489_v56  ;;  %v1519_v54 = vmul.f32 %v12696_v49, %v12520_v9 }
  0x7b   : > { %v12732_v7 = vadd.f32 %v12713_v0, %v1513_v53  ;;  %v1552_v50 = vadd.f32 %v12713_v0, %v1514_v57  ;;  %v1553_v8 = vadd.f32 %v12713_v0, %v1515_v58  ;;  %v1554_v11 = vadd.f32 %v12713_v0, %v1516_v59 }
  0x7c   : > { %v1535_v61 = vadd.f32 %v12713_v0, %v1497_v60  ;;  %v1536_v13 = vadd.f32 %v12713_v0, %v1498_v41  ;;  %v1537_v6 = vadd.f32 %v12713_v0, %v1499_v63  ;;  %v1520_v18 = vmul.f32 %v12696_v49, %v12523_v10 }
  0x7d   : > { %vm1584_vm0 = vcmp.ge.f32.partialorder %v1552_v50, 0.0  ;;  %v12743_v56 = vmul.f32 0.2, %v12732_v7  ;;  %v1616_v17 = vmul.f32 0.2, %v1552_v50  ;;  %vm1585_vm1 = vcmp.ge.f32.partialorder %v1553_v8, 0.0 }
  0x7e   : > { %vm1586_vm2 = vcmp.ge.f32.partialorder %v1554_v11, 0.0  ;;  %v1617_v19 = vmul.f32 0.2, %v1553_v8  ;;  %v1618_v20 = vmul.f32 0.2, %v1554_v11  ;;  %v12748_v24 = vadd.f32 %v12713_v0, %v1512_v43 }
  0x7f   : > { %v1648_v22 = vsel %vm1584_vm0, %v1552_v50, %v1616_v17  ;;  %vm1567_vm3 = vcmp.ge.f32.partialorder %v1535_v61, 0.0  ;;  %vm1568_vm4 = vcmp.ge.f32.partialorder %v1536_v13, 0.0  ;;  %vm1569_vm5 = vcmp.ge.f32.partialorder %v1537_v6, 0.0 }
  0x80   : > { %v1649_v26 = vsel %vm1585_vm1, %v1553_v8, %v1617_v19  ;;  %v1650_v9 = vsel %vm1586_vm2, %v1554_v11, %v1618_v20  ;;  %v1599_v27 = vmul.f32 0.2, %v1535_v61  ;;  %v1600_v30 = vmul.f32 0.2, %v1536_v13 }
  0x81   : > { %v10383_v29 = vpack.c.bf16 %v1649_v26, %v1648_v22  ;;  %v1601_v31 = vmul.f32 0.2, %v1537_v6  ;;  %v1555_v32 = vadd.f32 %v12713_v0, %v1517_v4  ;;  %v1556_v21 = vadd.f32 %v12713_v0, %v1518_v5 }
  0x82   : > { %v1631_v10 = vsel %vm1567_vm3, %v1535_v61, %v1599_v27  ;;  %v1557_v34 = vadd.f32 %v12713_v0, %v1519_v54  ;;  %v1558_v35 = vadd.f32 %v12713_v0, %v1520_v18  ;;  %v1632_v36 = vsel %vm1568_vm4, %v1536_v13, %v1600_v30  ;;  %v1825_v18 = vld [vmem:[#allocation2 + $0x8] sm:$0xf] }
  0x83   : > { %10498 = vst [vmem:[#allocation2 + $0x50] sm:$0xff] %v10383_v29   ;;  %v1633_v37 = vsel %vm1569_vm5, %v1537_v6, %v1601_v31  ;;  %v10276_v45 = vpack.c.bf16 %v1631_v10, %v1631_v10  ;;  %vm1587_vm6 = vcmp.ge.f32.partialorder %v1555_v32, 0.0  ;;  %vm1588_vm7 = vcmp.ge.f32.partialorder %v1556_v21, 0.0 }
  0x84   : > { %v10343_v48 = vpack.c.bf16 %v1633_v37, %v1632_v36  ;;  %v1619_v51 = vmul.f32 0.2, %v1555_v32  ;;  %v1620_v52 = vmul.f32 0.2, %v1556_v21  ;;  %vm1589_vm8 = vcmp.ge.f32.partialorder %v1557_v34, 0.0 }
  0x85   : > { %1791 = vst [vmem:[#allocation2 + $0xc] sm:$0xf] %v10276_v45  ;;  %vm1590_vm9 = vcmp.ge.f32.partialorder %v1558_v35, 0.0  ;;  %v1621_v53 = vmul.f32 0.2, %v1557_v34  ;;  %v1521_v59 = vmul.f32 %v12696_v49, %v12527_v12  ;;  %v1522_v14 = vmul.f32 %v12696_v49, %v12530_v16 }
  0x86   : > { %v1622_v55 = vmul.f32 0.2, %v1558_v35  ;;  %10490 = vst [vmem:[#allocation2 + $0x10] sm:$0xff] %v10343_v48   ;;  %v1651_v57 = vsel %vm1587_vm6, %v1555_v32, %v1619_v51  ;;  %v1652_v58 = vsel %vm1588_vm7, %v1556_v21, %v1620_v52  ;;  %v1523_v62 = vmul.f32 %v12696_v49, %v12567_v39 }
  0x87   : > { %v10388_v60 = vpack.c.bf16 %v1651_v57, %v1650_v9  ;;  %v1653_v38 = vsel %vm1589_vm8, %v1557_v34, %v1621_v53  ;;  %v1559_v43 = vadd.f32 %v12713_v0, %v1521_v59  ;;  %v1560_v4 = vadd.f32 %v12713_v0, %v1522_v14 }
  0x88   : > { %v1654_v41 = vsel %vm1590_vm9, %v1558_v35, %v1622_v55  ;;  %v10393_v63 = vpack.c.bf16 %v1653_v38, %v1652_v58  ;;  %v1524_v5 = vmul.f32 %v12696_v49, %v12570_v40  ;;  %v1561_v12 = vadd.f32 %v12713_v0, %v1523_v62 }
  0x89   : > { %10499 = vst [vmem:[#allocation2 + $0x58] sm:$0xff] %v10388_v60   ;;  %v1525_v16 = vmul.f32 %v12696_v49, %v12577_v33  ;;  %v1526_v50 = vmul.f32 %v12696_v49, %v12580_v44  ;;  %v1527_v39 = vmul.f32 %v12696_v49, %v12611_v1  ;;  %vm1591_vm10 = vcmp.ge.f32.partialorder %v1559_v43, 0.0  ;;  %v1872_v1 = vld [vmem:[#allocation2 + $0x8] sm:$0x8] }
  0x8a   : > { %10500 = vst [vmem:[#allocation2 + $0x60] sm:$0xff] %v10393_v63   ;;  %vm1592_vm11 = vcmp.ge.f32.partialorder %v1560_v4, 0.0  ;;  %v1623_v8 = vmul.f32 0.2, %v1559_v43  ;;  %v1624_v11 = vmul.f32 0.2, %v1560_v4  ;;  %v1562_v61 = vadd.f32 %v12713_v0, %v1524_v5 }
  0x8b   : > { %vm1593_vm12 = vcmp.ge.f32.partialorder %v1561_v12, 0.0  ;;  %v1625_v40 = vmul.f32 0.2, %v1561_v12  ;;  %v1563_v13 = vadd.f32 %v12713_v0, %v1525_v16  ;;  %v1564_v33 = vadd.f32 %v12713_v0, %v1526_v50  ;;  %v12280_v16 = vld [vmem:[%s12388_s25 + $0x18] sm:$0xff] }
  0x8c   : > { %v1655_v6 = vsel %vm1591_vm10, %v1559_v43, %v1623_v8  ;;  %v1656_v54 = vsel %vm1592_vm11, %v1560_v4, %v1624_v11  ;;  %v1528_v44 = vmul.f32 %v12696_v49, %v12614_v2  ;;  %v12776_v17 = vld [vmem:[#allocation2 + $0xc] sm:$0xf]  ;;  %vm1594_vm13 = vcmp.ge.f32.partialorder %v1562_v61, 0.0  ;;  %v12281_v8 = vld [vmem:[%s12388_s25 + $0x20] sm:$0xff] }
  0x8d   : > { %v10398_v19 = vpack.c.bf16 %v1655_v6, %v1654_v41  ;;  %v1626_v20 = vmul.f32 0.2, %v1562_v61  ;;  %v1657_v22 = vsel %vm1593_vm12, %v1561_v12, %v1625_v40  ;;  %v12778_v26 = vld [vmem:[#allocation2 + $0x10] sm:$0xf]  ;;  %vm1595_vm14 = vcmp.ge.f32.partialorder %v1563_v13, 0.0 }
  0x8e   : > { %v10403_v9 = vpack.c.bf16 %v1657_v22, %v1656_v54  ;;  %vm1596_vm15 = vcmp.ge.f32.partialorder %v1564_v33, 0.0  ;;  %v1627_v27 = vmul.f32 0.2, %v1563_v13  ;;  %v12780_v29 = vld [vmem:[#allocation2 + $0x14] sm:$0xf]  ;;  %v1565_v31 = vadd.f32 %v12713_v0, %v1527_v39 }
  0x8f   : > { %vm16205_vm0 = vsmask.f32 4352  ;;  %10501 = vst [vmem:[#allocation2 + $0x68] sm:$0xff] %v10398_v19   ;;  %v1658_v30 = vsel %vm1594_vm13, %v1562_v61, %v1626_v20  ;;  %v1628_v2 = vmul.f32 0.2, %v1564_v33  ;;  %v1566_v32 = vadd.f32 %v12713_v0, %v1528_v44  ;;  %v12282_v61 = vld [vmem:[%s12388_s25 + $0x28] sm:$0xff] }
  0x90   : > { %10502 = vst [vmem:[#allocation2 + $0x70] sm:$0xff] %v10403_v9   ;;  %v1659_v10 = vsel %vm1595_vm14, %v1563_v13, %v1627_v27  ;;  %v9644_v21 = vcombine.low %v1872_v1, %v12776_v17  ;;  %v9645_v34 = vcombine.low %v12778_v26, %v12780_v29  ;;  %v9670_v35 = vcombine.low %v1825_v18, %v12776_v17  ;;  %v12283_v13 = vld [vmem:[%s12388_s25 + $0x30] sm:$0xff]  ;;  %v12284_v44 = vld [vmem:[%s12388_s25 + $0x38] sm:$0xff]  ;;  %v12285_v18 = vld [vmem:[%s12388_s25 + $0x40] sm:$0xff] }
  0x91   : > { %v1660_v36 = vsel %vm1596_vm15, %v1564_v33, %v1628_v2  ;;  %v10408_v37 = vpack.c.bf16 %v1659_v10, %v1658_v30  ;;  %vm1597_vm1 = vcmp.ge.f32.partialorder %v1565_v31, 0.0  ;;  %vm1598_vm2 = vcmp.ge.f32.partialorder %v1566_v32, 0.0 }
  0x92   : > { %v1629_v45 = vmul.f32 0.2, %v1565_v31  ;;  %v1630_v48 = vmul.f32 0.2, %v1566_v32  ;;  %v1977_v51 = vshrl.u32 %v9644_v21, 16  ;;  %v1980_v52 = vshll.u32 %v9644_v21, 16 }
  0x93   : > { %10503 = vst [vmem:[#allocation2 + $0x78] sm:$0xff] %v10408_v37   ;;  %v1985_v53 = vshrl.u32 %v9645_v34, 16  ;;  %v1988_v55 = vshll.u32 %v9645_v34, 16  ;;  %v2371_v57 = vshrl.u32 %v9670_v35, 16  ;;  %v2374_v58 = vshll.u32 %v9670_v35, 16 }
  0x94   : > { %v1661_v59 = vsel %vm1597_vm1, %v1565_v31, %v1629_v45  ;;  %v1662_v14 = vsel %vm1598_vm2, %v1566_v32, %v1630_v48  ;;  %v1979_v60 = vrot.slane %v1977_v51, 3  ;;  %v1982_v38 = vrot.slane %v1980_v52, 4  ;;  %v11957_v32 = vld [vmem:[%s16159_s5 + $0x130] sm:$0xff]  }
  0x95   : > { %v10307_v41 = vpack.c.bf16 %v1662_v14, %v1662_v14  ;;  %v10413_v62 = vpack.c.bf16 %v1661_v59, %v1660_v36  ;;  %v1987_v63 = vrot.slane %v1985_v53, 3  ;;  %v1990_v43 = vrot.slane %v1988_v55, 4  ;;  %v12286_v36 = vld [vmem:[%s12388_s25 + $0x48] sm:$0xff]  ;;  %v12287_v45 = vld [vmem:[%s12388_s25 + $0x50] sm:$0xff] }
  0x96   : > { %v1983_v4 = vor.u32 %v1982_v38, %v1979_v60  ;;  %v2373_v5 = vrot.slane %v2371_v57, 3  ;;  %v2376_v12 = vrot.slane %v2374_v58, 4  ;;  %v1500_v50 = vmul.f32 %v12280_v16, %v12696_v49  ;;  %v11961_v55 = vld [vmem:[%s16159_s5 + $0x128] sm:$0xff]   ;;  %v12288_v60 = vld [vmem:[%s12388_s25 + $0x58] sm:$0xff] }
  0x97   : > { %10504 = vst [vmem:[#allocation2 + $0x80] sm:$0xff] %v10413_v62   ;;  %1822 = vst [vmem:[#allocation2 + $0x88] sm:$0xf] %v10307_v41  ;;  %v12790_v39 = vor.u32 %v1990_v43, %v1987_v63  ;;  %v1501_v11 = vmul.f32 %v12281_v8, %v12696_v49  ;;  %v1502_v40 = vmul.f32 %v12282_v61, %v12696_v49  ;;  %vm1583_vm7 = vcmp.ge.f32.partialorder %v12732_v7, 0.0  ;;  %v12289_v41 = vld [vmem:[%s12388_s25 + $0x60] sm:$0xff] }
  0x98   : > { %v1503_v6 = vmul.f32 %v12283_v13, %v12696_v49  ;;  %v2377_v54 = vor.u32 %v2376_v12, %v2373_v5  ;;  %v1538_v33 = vadd.f32 %v12713_v0, %v1500_v50  ;;  %v1504_v1 = vmul.f32 %v12284_v44, %v12696_v49  ;;  %v11962_v50 = vld [vmem:[%s16159_s5 + $0x120] sm:$0xff]  }
  0x99   : > { %v1505_v19 = vmul.f32 %v12285_v18, %v12696_v49  ;;  %v1992_v20 = vsel %vm16205_vm0, %v1983_v4, %v12790_v39  ;;  %v1539_v22 = vadd.f32 %v12713_v0, %v1501_v11  ;;  %v1540_v9 = vadd.f32 %v12713_v0, %v1502_v40  ;;  %v11966_v40 = vld [vmem:[%s16159_s5 + $0x118] sm:$0xff]  }
  0x9a   : > { %v1541_v27 = vadd.f32 %v12713_v0, %v1503_v6  ;;  %11040 = vmatprep.mubr.bf16.mxu1 %v1992_v20  ;;  %v2378_v30 = vsel %vm16205_vm0, %v2369_v46, %v2377_v54  ;;  %vm1570_vm3 = vcmp.ge.f32.partialorder %v1538_v33, 0.0  ;;  %v1602_v2 = vmul.f32 0.2, %v1538_v33 }
  0x9b   : > { %v2379_v31 = vsel %vm16205_vm0, %v2377_v54, %v12790_v39  ;;  %11088 = vmatprep.mubr.bf16.mxu0 %v2378_v30  ;;  %vm1571_vm4 = vcmp.ge.f32.partialorder %v1539_v22, 0.0  ;;  %v1603_v10 = vmul.f32 0.2, %v1539_v22  ;;  %vm1572_vm5 = vcmp.ge.f32.partialorder %v1540_v9, 0.0 }
  0x9c   : > { %vm1573_vm6 = vcmp.ge.f32.partialorder %v1541_v27, 0.0  ;;  %v1634_v21 = vsel %vm1570_vm3, %v1538_v33, %v1602_v2  ;;  %11089 = vmatmul.mubr.bf16.vlgmr.msra.gmra.mxu0 %v2379_v31  ;;  %v1604_v42 = vmul.f32 0.2, %v1540_v9  ;;  %v1605_v28 = vmul.f32 0.2, %v1541_v27 }
  0x9d   : > { %v1542_v46 = vadd.f32 %v12713_v0, %v1504_v1  ;;  %v1635_v34 = vsel %vm1571_vm4, %v1539_v22, %v1603_v10  ;;  %v1543_v35 = vadd.f32 %v12713_v0, %v1505_v19  ;;  %v1506_v37 = vmul.f32 %v12286_v36, %v12696_v49  ;;  %11169 = vmatpush3.bf16.msra.mxu0 %v12671_v3 }
  0x9e   : > { %v1507_v48 = vmul.f32 %v12287_v45, %v12696_v49  ;;  %v10348_v51 = vpack.c.bf16 %v1635_v34, %v1634_v21  ;;  %v1636_v52 = vsel %vm1572_vm5, %v1540_v9, %v1604_v42  ;;  %v1637_v53 = vsel %vm1573_vm6, %v1541_v27, %v1605_v28  ;;  %11170 = vmatprep.subr.bf16.mxu0 %v11957_v32  ;;  %v11967_v42 = vld [vmem:[%s16159_s5 + $0x110] sm:$0xff]  }
  0x9f   : > { %vm1574_vm8 = vcmp.ge.f32.partialorder %v1542_v46, 0.0  ;;  %v10353_v57 = vpack.c.bf16 %v1637_v53, %v1636_v52  ;;  %vm1575_vm9 = vcmp.ge.f32.partialorder %v1543_v35, 0.0  ;;  %v1606_v58 = vmul.f32 0.2, %v1542_v46 }
  0xa0   : > { %v1607_v59 = vmul.f32 0.2, %v1543_v35  ;;  %10491 = vst [vmem:[#allocation2 + $0x18] sm:$0xff] %v10348_v51   ;;  %v1544_v14 = vadd.f32 %v12713_v0, %v1506_v37  ;;  %v1545_v3 = vadd.f32 %v12713_v0, %v1507_v48  ;;  %v1508_v38 = vmul.f32 %v12288_v60, %v12696_v49 }
  0xa1   : > { %v1509_v62 = vmul.f32 %v12289_v41, %v12696_v49  ;;  %10492 = vst [vmem:[#allocation2 + $0x20] sm:$0xff] %v10353_v57   ;;  %v1638_v63 = vsel %vm1574_vm8, %v1542_v46, %v1606_v58  ;;  %v1548_v4 = vadd.f32 %v12713_v0, %v12717_v15  ;;  %v1549_v5 = vadd.f32 %v12713_v0, %v12723_v47  ;;  %v11945_v58 = vld [vmem:[%s16159_s5 + $0x1b0] sm:$0xff]  }
  0xa2   : > { %v1639_v43 = vsel %vm1575_vm9, %v1543_v35, %v1607_v59  ;;  %11171 = vmatpush3.bf16.msra.mxu0 %v11957_v32  ;;  %vm1576_vm10 = vcmp.ge.f32.partialorder %v1544_v14, 0.0  ;;  %vm1577_vm11 = vcmp.ge.f32.partialorder %v1545_v3, 0.0  ;;  %v1608_v16 = vmul.f32 0.2, %v1544_v14 }
  0xa3   : > { %v10358_v12 = vpack.c.bf16 %v1639_v43, %v1638_v63  ;;  %11172 = vmatprep.subr.bf16.mxu0 %v11961_v55  ;;  %v1609_v49 = vmul.f32 0.2, %v1545_v3  ;;  %v1546_v8 = vadd.f32 %v12713_v0, %v1508_v38  ;;  %v1547_v11 = vadd.f32 %v12713_v0, %v1509_v62 }
  0xa4   : > { %vm1580_vm12 = vcmp.ge.f32.partialorder %v1548_v4, 0.0  ;;  %v1640_v15 = vsel %vm1576_vm10, %v1544_v14, %v1608_v16  ;;  %vm1581_vm13 = vcmp.ge.f32.partialorder %v1549_v5, 0.0  ;;  %v1612_v47 = vmul.f32 0.2, %v1548_v4 }
  0xa5   : > { %10493 = vst [vmem:[#allocation2 + $0x28] sm:$0xff] %v10358_v12   ;;  %v1613_v61 = vmul.f32 0.2, %v1549_v5  ;;  %v1641_v13 = vsel %vm1577_vm11, %v1545_v3, %v1609_v49  ;;  %vm1578_vm14 = vcmp.ge.f32.partialorder %v1546_v8, 0.0  ;;  %vm1579_vm15 = vcmp.ge.f32.partialorder %v1547_v11, 0.0  ;;  %v12290_v12 = vld [vmem:[%s16159_s5 + $0x1b8] sm:$0xff]  }
  0xa6   : > { %v1610_v6 = vmul.f32 0.2, %v1546_v8  ;;  %11173 = vmatpush3.bf16.msra.mxu0 %v11961_v55  ;;  %v10363_v54 = vpack.c.bf16 %v1641_v13, %v1640_v15  ;;  %v1611_v33 = vmul.f32 0.2, %v1547_v11  ;;  %v1644_v44 = vsel %vm1580_vm12, %v1548_v4, %v1612_v47  ;;  %v11948_v4 = vld [vmem:[%s16159_s5 + $0x1a8] sm:$0xff]  }
  0xa7   : > { %v1645_v1 = vsel %vm1581_vm13, %v1549_v5, %v1613_v61  ;;  %11174 = vmatprep.subr.bf16.mxu0 %v11962_v50  ;;  %v12848_v0 = vld [vmem:[#allocation2 + $0x18] sm:$0xf]  ;;  %v12850_v18 = vld [vmem:[#allocation2 + $0x1c] sm:$0xf]  ;;  %vm1582_vm1 = vcmp.ge.f32.partialorder %v12748_v24, 0.0  ;;  %v1647_v22 = vsel %vm1583_vm7, %v12732_v7, %v12743_v56  ;;  %v11972_v5 = vld [vmem:[%s16159_s5 + $0x108] sm:$0xff]  }
  0xa8   : > { %v1642_v19 = vsel %vm1578_vm14, %v1546_v8, %v1610_v6  ;;  %v10373_v20 = vpack.c.bf16 %v1645_v1, %v1644_v44  ;;  %v9646_v9 = vcombine.low %v12848_v0, %v12850_v18  ;;  %v12859_v27 = vld [vmem:[#allocation2 + $0x20] sm:$0xf]  ;;  %v12861_v30 = vld [vmem:[#allocation2 + $0x24] sm:$0xf]  ;;  %10494 = vst [vmem:[#allocation2 + $0x30] sm:$0xff] %v10363_v54   ;;  %v1643_v2 = vsel %vm1579_vm15, %v1547_v11, %v1611_v33 }
  0xa9   : > { %v1614_v31 = vmul.f32 0.2, %v12748_v24  ;;  %v9647_v32 = vcombine.low %v12859_v27, %v12861_v30  ;;  %v10368_v10 = vpack.c.bf16 %v1643_v2, %v1642_v19  ;;  %v12912_v13 = vld [vmem:[#allocation2 + $0x54] sm:$0xf]  ;;  %v11951_v2 = vld [vmem:[%s16159_s5 + $0x1a0] sm:$0xff]  }
  0xaa   : > { %10496 = vst [vmem:[#allocation2 + $0x40] sm:$0xff] %v10373_v20   ;;  %11175 = vmatpush3.bf16.msra.mxu0 %v11962_v50  ;;  %v1994_v21 = vshrl.u32 %v9646_v9, 16  ;;  %v1997_v7 = vshll.u32 %v9646_v9, 16  ;;  %vm16204_vm2 = vsmask.f32 7424 }
  0xab   : > { %v1646_v56 = vsel %vm1582_vm1, %v12748_v24, %v1614_v31  ;;  %11176 = vmatprep.subr.bf16.mxu0 %v11966_v40  ;;  %v2003_v28 = vshrl.u32 %v9647_v32, 16  ;;  %v2006_v46 = vshll.u32 %v9647_v32, 16  ;;  %10495 = vst [vmem:[#allocation2 + $0x38] sm:$0xff] %v10368_v10   ;;  %v12929_v10 = vld [vmem:[#allocation2 + $0x58] sm:$0xf] }
  0xac   : > { %v12871_v34 = vld [vmem:[#allocation2 + $0x28] sm:$0xf]  ;;  %v12873_v35 = vld [vmem:[#allocation2 + $0x2c] sm:$0xf]  ;;  %v10378_v36 = vpack.c.bf16 %v1647_v22, %v1646_v56  ;;  %v1996_v37 = vrot.slane %v1994_v21, 3  ;;  %v1999_v45 = vrot.slane %v1997_v7, 4 }
  0xad   : > { %v9648_v48 = vcombine.low %v12871_v34, %v12873_v35  ;;  %v2005_v51 = vrot.slane %v2003_v28, 3  ;;  %v2008_v24 = vrot.slane %v2006_v46, 4  ;;  %v11973_v22 = vld [vmem:[%s16159_s5 + $0x100] sm:$0xff]   ;;  %v12931_v28 = vld [vmem:[#allocation2 + $0x5c] sm:$0xf] }
  0xae   : > { %10497 = vst [vmem:[#allocation2 + $0x48] sm:$0xff] %v10378_v36   ;;  %11177 = vmatpush3.bf16.msra.mxu0 %v11966_v40  ;;  %v2000_v52 = vor.u32 %v1999_v45, %v1996_v37  ;;  %v12910_v40 = vld [vmem:[#allocation2 + $0x50] sm:$0xf] }
  0xaf   : > { %v2012_v53 = vshrl.u32 %v9648_v48, 16  ;;  %v2015_v55 = vshll.u32 %v9648_v48, 16  ;;  %11178 = vmatprep.subr.bf16.mxu0 %v11967_v42  ;;  %v2009_v57 = vor.u32 %v2008_v24, %v2005_v51  ;;  %v12880_v59 = vld [vmem:[#allocation2 + $0x30] sm:$0xf]  ;;  %v12882_v14 = vld [vmem:[#allocation2 + $0x34] sm:$0xf]  ;;  %v9653_v32 = vcombine.low %v12910_v40, %v12912_v13 }
  0xb0   : > { %v2001_v3 = vsel %vm16205_vm0, %v12790_v39, %v2000_v52  ;;  %v9649_v41 = vcombine.low %v12880_v59, %v12882_v14  ;;  %v11954_v48 = vld [vmem:[%s16159_s5 + $0x198] sm:$0xff]   ;;  %v12937_v51 = vld [vmem:[#allocation2 + $0x60] sm:$0xf] }
  0xb1   : > { %v2014_v60 = vrot.slane %v2012_v53, 3  ;;  %v2017_v38 = vrot.slane %v2015_v55, 4  ;;  %v12888_v62 = vld [vmem:[#allocation2 + $0x40] sm:$0xf]  ;;  %v12890_v63 = vld [vmem:[#allocation2 + $0x44] sm:$0xf]  ;;  %11041 = vmatmul.mubr.bf16.vlgmr.msra.gmra.mxu1 %v2001_v3  ;;  %v2010_v43 = vsel %vm16205_vm0, %v2000_v52, %v2009_v57  ;;  %11092 = vmatprep.mubr.bf16.mxu0 %v2001_v3  ;;  %v9654_v55 = vcombine.low %v12929_v10, %v12931_v28 }
  0xb2   : > { %v9651_v39 = vcombine.low %v12888_v62, %v12890_v63  ;;  %11121 = vmatpush3.bf16.msra.mxu1 %v12290_v12  ;;  %11044 = vmatprep.mubr.bf16.mxu1 %v2010_v43  ;;  %v2021_v50 = vshrl.u32 %v9649_v41, 16  ;;  %v2024_v49 = vshll.u32 %v9649_v41, 16  ;;  %v12904_v8 = vld [vmem:[#allocation2 + $0x38] sm:$0xf]  ;;  %v12906_v11 = vld [vmem:[#allocation2 + $0x3c] sm:$0xf] }
  0xb3   : > { %v2018_v16 = vor.u32 %v2017_v38, %v2014_v60  ;;  %11122 = vmatprep.subr.bf16.mxu1 %v11945_v58  ;;  %11093 = vmatmul.mubr.bf16.gmra.mxu0 %v2010_v43  ;;  %v9650_v15 = vcombine.low %v12904_v8, %v12906_v11  ;;  %v12942_v24 = vld [vmem:[%s16159_s5 + $0x1f8] sm:$0xff]   ;;  %v2057_v52 = vshrl.u32 %v9653_v32, 16  ;;  %v2060_v53 = vshll.u32 %v9653_v32, 16 }
  0xb4   : > { %v2039_v47 = vshrl.u32 %v9651_v39, 16  ;;  %v2042_v61 = vshll.u32 %v9651_v39, 16  ;;  %v2023_v54 = vrot.slane %v2021_v50, 3  ;;  %v2026_v33 = vrot.slane %v2024_v49, 4  ;;  %11179 = vmatpush3.bf16.msra.mxu0 %v11967_v42  ;;  %v11959_v50 = vld [vmem:[%s16159_s5 + $0x190] sm:$0xff]  }
  0xb5   : > { %v2019_v6 = vsel %vm16205_vm0, %v2009_v57, %v2018_v16  ;;  %v12915_v44 = vld [vmem:[#allocation2 + $0x48] sm:$0xf]  ;;  %v12917_v1 = vld [vmem:[#allocation2 + $0x4c] sm:$0xf]  ;;  %v2030_v19 = vshrl.u32 %v9650_v15, 16  ;;  %v2033_v20 = vshll.u32 %v9650_v15, 16  ;;  %11180 = vmatprep.subr.bf16.mxu0 %v11972_v5 }
  0xb6   : > { %11096 = vmatprep.mubr.bf16.mxu0 %v2019_v6  ;;  %11123 = vmatpush3.bf16.msra.mxu1 %v11945_v58  ;;  %v2027_v9 = vor.u32 %v2026_v33, %v2023_v54  ;;  %v9652_v31 = vcombine.low %v12915_v44, %v12917_v1  ;;  %v2041_v56 = vrot.slane %v2039_v47, 3  ;;  %v2044_v42 = vrot.slane %v2042_v61, 4  ;;  %v12946_v57 = vld [vmem:[#allocation2 + $0x64] sm:$0xf]  ;;  %v12956_v49 = vld [vmem:[#allocation2 + $0x68] sm:$0xf] }
  0xb7   : > { %11124 = vmatprep.subr.bf16.mxu1 %v11948_v4  ;;  %v2032_v21 = vrot.slane %v2030_v19, 3  ;;  %v2035_v7 = vrot.slane %v2033_v20, 4  ;;  %v2066_v41 = vshrl.u32 %v9654_v55, 16  ;;  %v2069_v43 = vshll.u32 %v9654_v55, 16  ;;  %v12958_v15 = vld [vmem:[#allocation2 + $0x6c] sm:$0xf] }
  0xb8   : > { %v2028_v46 = vsel %vm16205_vm0, %v2018_v16, %v2027_v9  ;;  %v2048_v36 = vshrl.u32 %v9652_v31, 16  ;;  %v2051_v37 = vshll.u32 %v9652_v31, 16  ;;  %11181 = vmatpush3.bf16.msra.mxu0 %v11972_v5  ;;  %v2045_v3 = vor.u32 %v2044_v42, %v2041_v56  ;;  %v12960_v47 = vld [vmem:[#allocation2 + $0x70] sm:$0xf]  ;;  %v11964_v61 = vld [vmem:[%s16159_s5 + $0x188] sm:$0xff]   ;;  %v11969_v31 = vld [vmem:[%s16159_s5 + $0x180] sm:$0xff]  }
  0xb9   : > { %11045 = vmatmul.mubr.bf16.gmra.mxu1 %v2019_v6  ;;  %v2036_v45 = vor.u32 %v2035_v7, %v2032_v21  ;;  %11182 = vmatprep.subr.bf16.mxu0 %v11973_v22  ;;  %v2059_v12 = vrot.slane %v2057_v52, 3  ;;  %v2062_v16 = vrot.slane %v2060_v53, 4  ;;  %v2068_v6 = vrot.slane %v2066_v41, 3  ;;  %v12975_v42 = vld [vmem:[#allocation2 + $0x78] sm:$0xf] }
  0xba   : > { %11048 = vmatprep.mubr.bf16.mxu1 %v2028_v46  ;;  %11125 = vmatpush3.bf16.msra.mxu1 %v11948_v4  ;;  %v2050_v60 = vrot.slane %v2048_v36, 3  ;;  %v2053_v38 = vrot.slane %v2051_v37, 4  ;;  %v9655_v4 = vcombine.low %v12937_v51, %v12946_v57  ;;  %v2071_v54 = vrot.slane %v2069_v43, 4  ;;  %v12990_v43 = vld [vmem:[#allocation2 + $0x84] sm:$0xf] }
  0xbb   : > { %v2037_v58 = vsel %vm16205_vm0, %v2027_v9, %v2036_v45  ;;  %11097 = vmatmul.mubr.bf16.gmra.mxu0 %v2028_v46  ;;  %11126 = vmatprep.subr.bf16.mxu1 %v11951_v2  ;;  %v2046_v39 = vsel %vm16205_vm0, %v2036_v45, %v2045_v3  ;;  %v9656_v9 = vcombine.low %v12956_v49, %v12958_v15  ;;  %v12977_v46 = vld [vmem:[#allocation2 + $0x7c] sm:$0xf] }
  0xbc   : > { %11100 = vmatprep.mubr.bf16.mxu0 %v2037_v58  ;;  %11183 = vmatpush3.bf16.msra.mxu0 %v11973_v22  ;;  %v2054_v5 = vor.u32 %v2053_v38, %v2050_v60  ;;  %v2075_v33 = vshrl.u32 %v9655_v4, 16  ;;  %v2078_v19 = vshll.u32 %v9655_v4, 16  ;;  %v2063_v22 = vor.u32 %v2062_v16, %v2059_v12 }
  0xbd   : > { %11264 = vmatprep.subr.bf16.mxu0 %v12942_v24  ;;  %v2072_v32 = vor.u32 %v2071_v54, %v2068_v6  ;;  %v2084_v37 = vshrl.u32 %v9656_v9, 16  ;;  %v2087_v45 = vshll.u32 %v9656_v9, 16  ;;  %v9658_v41 = vcombine.low %v12975_v42, %v12977_v46  ;;  %v12998_v54 = vld [vmem:[#allocation2 + $0x88] sm:$0xf] }
  0xbe   : > { %11127 = vmatpush3.bf16.msra.mxu1 %v11951_v2  ;;  %v2055_v20 = vsel %vm16205_vm0, %v2045_v3, %v2054_v5  ;;  %v12968_v2 = vld [vmem:[#allocation2 + $0x74] sm:$0xf]  ;;  %v2077_v21 = vrot.slane %v2075_v33, 3  ;;  %v2080_v7 = vrot.slane %v2078_v19, 4  ;;  %v2064_v36 = vsel %vm16205_vm0, %v2054_v5, %v2063_v22  ;;  %v2601_v33 = vld [vmem:[#allocation2 + $0x10] sm:$0x8] }
  0xbf   : > { %11128 = vmatprep.subr.bf16.mxu1 %v11954_v48  ;;  %v9657_v56 = vcombine.low %v12960_v47, %v12968_v2  ;;  %v2073_v52 = vsel %vm16205_vm0, %v2063_v22, %v2072_v32  ;;  %v2086_v60 = vrot.slane %v2084_v37, 3  ;;  %v2089_v38 = vrot.slane %v2087_v45, 4  ;;  %v13000_v19 = vld [vmem:[#allocation2 + $0x14] sm:$0xf] }
  0xc0   : > { %v2081_v3 = vor.u32 %v2080_v7, %v2077_v21  ;;  %16225 = vst [vmem:[#allocation5_spill] sm:$0xff] %v13000_v19  ;;  %v9660_v45 = vcombine.low %v12998_v54, %v12998_v54 }
  0xc1   : > { %11049 = vmatmul.mubr.bf16.gmra.mxu1 %v2037_v58  ;;  %v2093_v53 = vshrl.u32 %v9657_v56, 16  ;;  %v2096_v55 = vshll.u32 %v9657_v56, 16  ;;  %v12986_v58 = vld [vmem:[#allocation2 + $0x80] sm:$0xf]  ;;  %v2090_v16 = vor.u32 %v2089_v38, %v2086_v60 }
  0xc2   : > { %11052 = vmatprep.mubr.bf16.mxu1 %v2046_v39  ;;  %11129 = vmatpush3.bf16.msra.mxu1 %v11954_v48  ;;  %v12983_v48 = vld [vmem:[%s16159_s5 + $0x78] sm:$0xff]   ;;  %v9659_v5 = vcombine.low %v12986_v58, %v12990_v43  ;;  %v2082_v12 = vsel %vm16205_vm0, %v2072_v32, %v2081_v3  ;;  %v9671_v6 = vcombine.low %v12986_v58, %v12986_v58 }
  0xc3   : > { %11101 = vmatmul.mubr.bf16.gmra.mxu0 %v2046_v39  ;;  %11130 = vmatprep.subr.bf16.mxu1 %v11959_v50  ;;  %v2095_v4 = vrot.slane %v2093_v53, 3  ;;  %v2098_v39 = vrot.slane %v2096_v55, 4  ;;  %v13004_v32 = vld [vmem:[#allocation2 + $0x1c] sm:$0xf]  ;;  %v2091_v21 = vsel %vm16205_vm0, %v2081_v3, %v2090_v16  ;;  %v9696_v53 = vcombine.low %v2601_v33, %v13000_v19 }
  0xc4   : > { %11104 = vmatprep.mubr.bf16.mxu0 %v2055_v20  ;;  %v2111_v22 = vshrl.u32 %v9659_v5, 16  ;;  %v2114_v9 = vshll.u32 %v9659_v5, 16  ;;  %16226 = vst [vmem:[#allocation6_spill] sm:$0xff] %v13004_v32  ;;  %v2384_v37 = vshll.u32 %v9671_v6, 16  ;;  %v2123_v5 = vshll.u32 %v9660_v45, 16 }
  0xc6   : > { %11131 = vmatpush3.bf16.msra.mxu1 %v11959_v50  ;;  %v2102_v50 = vshrl.u32 %v9658_v41, 16  ;;  %v2113_v60 = vrot.slane %v2111_v22, 3  ;;  %v2116_v38 = vrot.slane %v2114_v9, 4 }
  0xc7   : > { %11132 = vmatprep.subr.bf16.mxu1 %v11964_v61 }
  0xc8   : > { %v2104_v7 = vrot.slane %v2102_v50, 3  ;;  %v13015_v50 = vld [vmem:[#allocation2 + $0x24] sm:$0xf]  ;;  %v2117_v22 = vor.u32 %v2116_v38, %v2113_v60  ;;  %v13030_v60 = vcombine.low %v12776_v17, %v12778_v26  ;;  %v13032_v38 = vld [vmem:[#allocation2 + $0x30] sm:$0xf] }
  0xc9   : > { %11053 = vmatmul.mubr.bf16.gmra.mxu1 %v2055_v20  ;;  %v2099_v20 = vor.u32 %v2098_v39, %v2095_v4  ;;  %v2386_v4 = vrot.slane %v2384_v37, 4  ;;  %v2120_v39 = vshrl.u32 %v9660_v45, 16  ;;  %v2125_v37 = vrot.slane %v2123_v5, 4  ;;  %v13039_v17 = vld [vmem:[#allocation2 + $0x38] sm:$0xf] }
  0xca   : > { %11056 = vmatprep.mubr.bf16.mxu1 %v2064_v36  ;;  %11133 = vmatpush3.bf16.msra.mxu1 %v11964_v61  ;;  %v2105_v61 = vshll.u32 %v9658_v41, 16  ;;  %16228 = vst [vmem:[#allocation8_spill] sm:$0xff] %v13030_v60  ;;  %16230 = vst [vmem:[#allocation10_spill] sm:$0xff] %v13039_v17  ;;  %v13041_v26 = vld [vmem:[#allocation2 + $0x3c] sm:$0xf] }
  0xcb   : > { %11105 = vmatmul.mubr.bf16.gmra.mxu0 %v2064_v36  ;;  %11134 = vmatprep.subr.bf16.mxu1 %v11969_v31  ;;  %v2381_v36 = vshrl.u32 %v9671_v6, 16  ;;  %v13017_v6 = vld [vmem:[#allocation2 + $0x28] sm:$0xf]  ;;  %16231 = vst [vmem:[#allocation11_spill] sm:$0xff] %v13041_v26 }
  0xcc   : > { %11108 = vmatprep.mubr.bf16.mxu0 %v2073_v52  ;;  %v2107_v56 = vrot.slane %v2105_v61, 4  ;;  %v2735_v61 = vshrl.u32 %v9696_v53, 16 }
  0xcd   : > { %v2383_v3 = vrot.slane %v2381_v36, 3  ;;  %v2122_v36 = vrot.slane %v2120_v39, 3 }
  0xce   : > { %11135 = vmatpush3.bf16.msra.mxu1 %v11969_v31  ;;  %v13002_v31 = vld [vmem:[#allocation2 + $0x18] sm:$0xf]  ;;  %v2108_v55 = vor.u32 %v2107_v56, %v2104_v7  ;;  %v2737_v45 = vrot.slane %v2735_v61, 3 }
  0xcf   : > { %11216 = vmatprep.subr.bf16.mxu1 %v12983_v48  ;;  %v9697_v41 = vcombine.low %v13002_v31, %v13004_v32  ;;  %v2387_v56 = vor.u32 %v2386_v4, %v2383_v3  ;;  %v2126_v3 = vor.u32 %v2125_v37, %v2122_v36  ;;  %v13050_v36 = vcombine.low %v12780_v29, %v12848_v0 }
  0xd0   : > { %v2109_v33 = vsel %vm16205_vm0, %v2099_v20, %v2108_v55 }
  0xd1   : > { %11057 = vmatmul.mubr.bf16.gmra.mxu1 %v2073_v52  ;;  %v2100_v52 = vsel %vm16205_vm0, %v2090_v16, %v2099_v20  ;;  %v2738_v16 = vshll.u32 %v9696_v53, 16  ;;  %v2743_v9 = vshrl.u32 %v9697_v41, 16  ;;  %v2746_v7 = vshll.u32 %v9697_v41, 16  ;;  %v13034_v41 = vld [vmem:[#allocation2 + $0x34] sm:$0xf] }
  0xd2   : > { %11060 = vmatprep.mubr.bf16.mxu1 %v2082_v12  ;;  %v2118_v53 = vsel %vm16205_vm0, %v2108_v55, %v2117_v22  ;;  %16229 = vst [vmem:[#allocation9_spill] sm:$0xff] %v13034_v41 }
  0xd3   : > { %11109 = vmatmul.mubr.bf16.gmra.mxu0 %v2082_v12  ;;  %v13013_v12 = vld [vmem:[#allocation2 + $0x20] sm:$0xf]  ;;  %v2740_v25 = vrot.slane %v2738_v16, 4  ;;  %v2745_v32 = vrot.slane %v2743_v9, 3  ;;  %v2748_v19 = vrot.slane %v2746_v7, 4 }
  0xd4   : > { %11112 = vmatprep.mubr.bf16.mxu0 %v2091_v21  ;;  %v9698_v23 = vcombine.low %v13013_v12, %v13015_v50 }
  0xd5   : > { %v2741_v5 = vor.u32 %v2740_v25, %v2737_v45  ;;  %v13036_v61 = vor.u32 %v2748_v19, %v2745_v32  ;;  %v2127_v25 = vsel %vm16205_vm0, %v2117_v22, %v2126_v3  ;;  %v9701_v22 = vcombine.low %v13039_v17, %v13041_v26  ;;  %v13072_v3 = vld [vmem:[#allocation2 + $0x40] sm:$0xf] }
  0xd6   : > { %v2752_v4 = vshrl.u32 %v9698_v23, 16  ;;  %v2755_v39 = vshll.u32 %v9698_v23, 16 }
  0xd7   : > { %v2750_v37 = vsel %vm16205_vm0, %v2741_v5, %v13036_v61 }
  0xd8   : > { %v2754_v19 = vrot.slane %v2752_v4, 3  ;;  %v2757_v32 = vrot.slane %v2755_v39, 4  ;;  %v13074_v4 = vld [vmem:[#allocation2 + $0x44] sm:$0xf] }
  0xd9   : > { %11061 = vmatmul.mubr.bf16.gmra.mxu1 %v2091_v21  ;;  %v13020_v21 = vld [vmem:[#allocation2 + $0x2c] sm:$0xf] }
  0xda   : > { %11064 = vmatprep.mubr.bf16.mxu1 %v2100_v52  ;;  %16227 = vst [vmem:[#allocation7_spill] sm:$0xff] %v13020_v21  ;;  %v9699_v20 = vcombine.low %v13017_v6, %v13020_v21  ;;  %v13080_v21 = vld [vmem:[#allocation2 + $0x90] sm:$0xf] }
  0xdb   : > { %11113 = vmatmul.mubr.bf16.gmra.mxu0 %v2100_v52  ;;  %v2388_v52 = vsel %vm16205_vm0, %v2108_v55, %v2387_v56 }
  0xdc   : > { %11116 = vmatprep.mubr.bf16.mxu0 %v2109_v33  ;;  %v2761_v16 = vshrl.u32 %v9699_v20, 16  ;;  %v2764_v55 = vshll.u32 %v9699_v20, 16  ;;  %v13066_v20 = vld [vmem:[%s16159_s5 + $0x1f0] sm:$0xff]  }
  0xde   : > { %v2763_v45 = vrot.slane %v2761_v16, 3 }
  0xe1   : > { %11065 = vmatmul.mubr.bf16.gmra.mxu1 %v2109_v33  ;;  %v13045_v33 = vcombine.low %v13032_v38, %v13034_v41 }
  0xe2   : > { %11068 = vmatprep.mubr.bf16.mxu1 %v2118_v53  ;;  %v2766_v53 = vrot.slane %v2764_v55, 4 }
  0xe3   : > { %11117 = vmatmul.mubr.bf16.gmra.mxu0 %v2388_v52  ;;  %v13070_v52 = vcombine.low %v12850_v18, %v12859_v27  ;;  %v2770_v16 = vshrl.u32 %v13045_v33, 16  ;;  %v2773_v55 = vshll.u32 %v13045_v33, 16  ;;  %v2758_v18 = vor.u32 %v2757_v32, %v2754_v19  ;;  %v13078_v27 = vld [vmem:[#allocation2 + $0x8c] sm:$0xf] }
  0xe4   : > { %11184 = vmatprep.mubr.bf16.mxu0 %v13030_v60  ;;  %v2779_v33 = vshrl.u32 %v9701_v22, 16 }
  0xe9   : > { %11069 = vmatmul.mubr.bf16.gmra.mxu1 %v2127_v25 }
  0xea   : > { %11136 = vmatprep.mubr.bf16.mxu1 %v2750_v37  ;;  %v13087_v37 = vld [vmem:[#allocation2 + $0x48] sm:$0xf] }
  0xeb   : > { %11185 = vmatmul.mubr.bf16.vlgmr.msra.gmra.mxu0 %v13050_v36 }
  0xec   : > { %v11010_v9 = vpop.f32.mrf.mxu1  ;;  %v10994_v7 = vpop.f32.mrf.mxu0  ;;  %11188 = vmatprep.mubr.bf16.mxu0 %v13070_v52  ;;  %11265 = vmatpush3.bf16.msra.mxu0 %v12942_v24  ;;  %v12000_v24 = vld [vmem:[%s16159_s5 + $0x1e8] sm:$0xff]  }
  0xed   : > { %v1326_v39 = vmul.f32 0.70710677, %v11010_v9  ;;  %v1310_v60 = vmul.f32 0.70710677, %v10994_v7  ;;  %v13085_v7 = vor.u32 %v2766_v53, %v2763_v45  ;;  %v2772_v53 = vrot.slane %v2770_v16, 3  ;;  %11266 = vmatprep.subr.bf16.mxu0 %v13066_v20 }
  0xee   : > { %v1245_v23 = vpop.f32.mrf.mxu1  ;;  %v1181_v56 = vpop.f32.mrf.mxu0 }
  0xef   : > { %v1324_v5 = vmul.f32 0.70710677, %v1245_v23  ;;  %1358 = vst [vmem:[%s13057_s20 + $0x90] sm:$0xff] %v1326_v39  ;;  %v1308_v23 = vmul.f32 0.70710677, %v1181_v56  ;;  %1342 = vst [vmem:[%s13057_s20 + $0x10] sm:$0xff] %v1310_v60  ;;  %v13100_v60 = vcombine.low %v12861_v30, %v12871_v34  ;;  %v2759_v30 = vsel %vm16205_vm0, %v13036_v61, %v2758_v18 }
  0xf0   : > { %v11011_v29 = vpop.f32.mrf.mxu1  ;;  %v10995_v0 = vpop.f32.mrf.mxu0  ;;  %v2775_v34 = vrot.slane %v2773_v55, 4  ;;  %v13124_v55 = vcombine.low %v12873_v35, %v12880_v59  ;;  %11267 = vmatpush3.bf16.msra.mxu0 %v13066_v20  ;;  %v12001_v35 = vld [vmem:[%s16159_s5 + $0x1e0] sm:$0xff]  }
  0xf1   : > { %v1327_v26 = vmul.f32 0.70710677, %v11011_v29  ;;  %1356 = vst [vmem:[%s13057_s20 + $0x80] sm:$0xff] %v1324_v5  ;;  %v1311_v25 = vmul.f32 0.70710677, %v10995_v0  ;;  %v2782_v29 = vshll.u32 %v9701_v22, 16  ;;  %1340 = vst [vmem:[%s13057_s20] sm:$0xff] %v1308_v23  ;;  %11137 = vmatmul.mubr.bf16.vlgmr.msra.gmra.mxu1 %v2759_v30  ;;  %11268 = vmatprep.subr.bf16.mxu0 %v12000_v24 }
  0xf2   : > { %v1248_v41 = vpop.f32.mrf.mxu1  ;;  %v1184_v17 = vpop.f32.mrf.mxu0  ;;  %v11980_v23 = vld [vmem:[%s16159_s5 + $0x70] sm:$0xff]   ;;  %11217 = vmatpush3.bf16.msra.mxu1 %v12983_v48  ;;  %v13147_v48 = vld [vmem:[#allocation2 + $0x58] sm:$0xf] }
  0xf3   : > { %v1325_v9 = vmul.f32 0.70710677, %v1248_v41  ;;  %1359 = vst [vmem:[%s13057_s20 + $0x98] sm:$0xff] %v1327_v26  ;;  %v1309_v32 = vmul.f32 0.70710677, %v1184_v17  ;;  %1343 = vst [vmem:[%s13057_s20 + $0x18] sm:$0xff] %v1311_v25  ;;  %v9702_v17 = vcombine.low %v13072_v3, %v13074_v4  ;;  %11218 = vmatprep.subr.bf16.mxu1 %v11980_v23  ;;  %11189 = vmatmul.mubr.bf16.gmra.mxu0 %v13100_v60 }
  0xf4   : > { %v11014_v19 = vpop.f32.mrf.mxu1  ;;  %v10998_v39 = vpop.f32.mrf.mxu0  ;;  %v13092_v41 = vld [vmem:[#allocation2 + $0x4c] sm:$0xf]  ;;  %v2781_v25 = vrot.slane %v2779_v33, 3  ;;  %11192 = vmatprep.mubr.bf16.mxu0 %v13124_v55  ;;  %11269 = vmatpush3.bf16.msra.mxu0 %v12000_v24 }
  0xf5   : > { %1357 = vst [vmem:[%s13057_s20 + $0x88] sm:$0xff] %v1325_v9  ;;  %v1330_v56 = vmul.f32 0.70710677, %v11014_v19  ;;  %v1314_v45 = vmul.f32 0.70710677, %v10998_v39  ;;  %1341 = vst [vmem:[%s13057_s20 + $0x8] sm:$0xff] %v1309_v32  ;;  %v2768_v9 = vsel %vm16205_vm0, %v2758_v18, %v13085_v7  ;;  %v9703_v32 = vcombine.low %v13087_v37, %v13092_v41  ;;  %11270 = vmatprep.subr.bf16.mxu0 %v12001_v35 }
  0xf6   : > { %v1261_v26 = vpop.f32.mrf.mxu1  ;;  %v1197_v22 = vpop.f32.mrf.mxu0  ;;  %v2784_v19 = vrot.slane %v2782_v29, 4  ;;  %v13132_v33 = vld [vmem:[%s16159_s5 + $0x68] sm:$0xff]   ;;  %v2788_v29 = vshrl.u32 %v9702_v17, 16  ;;  %11140 = vmatprep.mubr.bf16.mxu1 %v2768_v9  ;;  %v13150_v9 = vld [vmem:[#allocation2 + $0x5c] sm:$0xf]  ;;  %11219 = vmatpush3.bf16.msra.mxu1 %v11980_v23 }
  0xf7   : > { %1362 = vst [vmem:[%s13057_s20 + $0xb0] sm:$0xff] %v1330_v56  ;;  %v1328_v5 = vmul.f32 0.70710677, %v1261_v26  ;;  %1346 = vst [vmem:[%s13057_s20 + $0x30] sm:$0xff] %v1314_v45  ;;  %v1312_v16 = vmul.f32 0.70710677, %v1197_v22  ;;  %v2776_v26 = vor.u32 %v2775_v34, %v2772_v53  ;;  %11220 = vmatprep.subr.bf16.mxu1 %v13132_v33  ;;  %v9705_v23 = vcombine.low %v13147_v48, %v13150_v9 }
  0xf8   : > { %v11015_v39 = vpop.f32.mrf.mxu1  ;;  %v10999_v61 = vpop.f32.mrf.mxu0  ;;  %v2791_v45 = vshll.u32 %v9702_v17, 16  ;;  %v13138_v22 = vld [vmem:[#allocation2 + $0x50] sm:$0xf]  ;;  %v13143_v17 = vor.u32 %v2784_v19, %v2781_v25  ;;  %v2790_v19 = vrot.slane %v2788_v29, 3  ;;  %11271 = vmatpush3.bf16.msra.mxu0 %v12001_v35 }
  0xf9   : > { %1360 = vst [vmem:[%s13057_s20 + $0xa0] sm:$0xff] %v1328_v5  ;;  %v1331_v18 = vmul.f32 0.70710677, %v11015_v39  ;;  %1344 = vst [vmem:[%s13057_s20 + $0x20] sm:$0xff] %v1312_v16  ;;  %v1315_v56 = vmul.f32 0.70710677, %v10999_v61  ;;  %v2777_v24 = vsel %vm16205_vm0, %v13085_v7, %v2776_v26 }
  0xfa   : > { %v1264_v59 = vpop.f32.mrf.mxu1  ;;  %v1200_v20 = vpop.f32.mrf.mxu0  ;;  %v2797_v16 = vshrl.u32 %v9703_v32, 16  ;;  %v2800_v39 = vshll.u32 %v9703_v32, 16  ;;  %v13145_v61 = vld [vmem:[#allocation2 + $0x54] sm:$0xf]  ;;  %v13156_v32 = vcombine.low %v12882_v14, %v12904_v8  ;;  %v2786_v8 = vsel %vm16205_vm0, %v2776_v26, %v13143_v17  ;;  %v11986_v7 = vld [vmem:[%s16159_s5 + $0x60] sm:$0xff]   ;;  %11141 = vmatmul.mubr.bf16.gmra.mxu1 %v2777_v24 }
  0xfb   : > { %1363 = vst [vmem:[%s13057_s20 + $0xb8] sm:$0xff] %v1331_v18  ;;  %v1329_v30 = vmul.f32 0.70710677, %v1264_v59  ;;  %1347 = vst [vmem:[%s13057_s20 + $0x38] sm:$0xff] %v1315_v56  ;;  %v1313_v5 = vmul.f32 0.70710677, %v1200_v20  ;;  %v9704_v29 = vcombine.low %v13138_v22, %v13145_v61  ;;  %11144 = vmatprep.mubr.bf16.mxu1 %v2786_v8  ;;  %11221 = vmatpush3.bf16.msra.mxu1 %v13132_v33 }
  0xfc   : > { %v11018_v53 = vpop.f32.mrf.mxu1  ;;  %v11002_v34 = vpop.f32.mrf.mxu0  ;;  %v2793_v56 = vrot.slane %v2791_v45, 4  ;;  %v12007_v59 = vld [vmem:[%s16159_s5 + $0x1d8] sm:$0xff]   ;;  %11193 = vmatmul.mubr.bf16.gmra.mxu0 %v13156_v32  ;;  %11222 = vmatprep.subr.bf16.mxu1 %v11986_v7  ;;  %v13197_v33 = vld [vmem:[#allocation2 + $0x68] sm:$0xf] }
  0xfd   : > { %1361 = vst [vmem:[%s13057_s20 + $0xa8] sm:$0xff] %v1329_v30  ;;  %v1334_v18 = vmul.f32 0.70710677, %v11018_v53  ;;  %1345 = vst [vmem:[%s13057_s20 + $0x28] sm:$0xff] %v1313_v5  ;;  %v1318_v25 = vmul.f32 0.70710677, %v11002_v34  ;;  %11272 = vmatprep.subr.bf16.mxu0 %v12007_v59 }
  0xfe   : > { %v1277_v20 = vpop.f32.mrf.mxu1  ;;  %v1213_v0 = vpop.f32.mrf.mxu0  ;;  %v2799_v30 = vrot.slane %v2797_v16, 3  ;;  %v2802_v5 = vrot.slane %v2800_v39, 4  ;;  %v2794_v16 = vor.u32 %v2793_v56, %v2790_v19  ;;  %v13181_v39 = vld [vmem:[#allocation2 + $0x60] sm:$0xf]  ;;  %v2806_v35 = vshrl.u32 %v9704_v29, 16  ;;  %v11990_v8 = vld [vmem:[%s16159_s5 + $0x58] sm:$0xff]   ;;  %11273 = vmatpush3.bf16.msra.mxu0 %v12007_v59 }
  0xff   : > { %1366 = vst [vmem:[%s13057_s20 + $0xd0] sm:$0xff] %v1334_v18  ;;  %v1332_v45 = vmul.f32 0.70710677, %v1277_v20  ;;  %1350 = vst [vmem:[%s13057_s20 + $0x50] sm:$0xff] %v1318_v25  ;;  %v1316_v14 = vmul.f32 0.70710677, %v1213_v0  ;;  %v13177_v18 = vcombine.low %v12906_v11, %v12888_v62  ;;  %11223 = vmatpush3.bf16.msra.mxu1 %v11986_v7 }
 0x100   : > { %v11019_v53 = vpop.f32.mrf.mxu1  ;;  %v11003_v34 = vpop.f32.mrf.mxu0  ;;  %v13183_v25 = vld [vmem:[#allocation2 + $0x64] sm:$0xf]  ;;  %v12008_v20 = vld [vmem:[%s16159_s5 + $0x1d0] sm:$0xff]   ;;  %v13192_v56 = vor.u32 %v2802_v5, %v2799_v30  ;;  %v12014_v59 = vld [vmem:[%s16159_s5 + $0x1c8] sm:$0xff]   ;;  %11224 = vmatprep.subr.bf16.mxu1 %v11990_v8 }
 0x101   : > { %16232 = vst [vmem:[#allocation12_spill] sm:$0xff] %v13177_v18  ;;  %1364 = vst [vmem:[%s13057_s20 + $0xc0] sm:$0xff] %v1332_v45  ;;  %v1335_v0 = vmul.f32 0.70710677, %v11019_v53  ;;  %v1319_v26 = vmul.f32 0.70710677, %v11003_v34  ;;  %11196 = vmatprep.mubr.bf16.mxu0 %v13177_v18  ;;  %11274 = vmatprep.subr.bf16.mxu0 %v12008_v20 }
 0x102   : > { %1348 = vst [vmem:[%s13057_s20 + $0x40] sm:$0xff] %v1316_v14  ;;  %16233 = vst [vmem:[#allocation13_spill] sm:$0xff] %v13183_v25  ;;  %v1280_v62 = vpop.f32.mrf.mxu1  ;;  %v1216_v11 = vpop.f32.mrf.mxu0  ;;  %v2809_v45 = vshll.u32 %v9704_v29, 16  ;;  %v2815_v14 = vshrl.u32 %v9705_v23, 16  ;;  %v2818_v53 = vshll.u32 %v9705_v23, 16  ;;  %v2795_v23 = vsel %vm16205_vm0, %v13143_v17, %v2794_v16  ;;  %11275 = vmatpush3.bf16.msra.mxu0 %v12008_v20 }
 0x103   : > { %1367 = vst [vmem:[%s13057_s20 + $0xd8] sm:$0xff] %v1335_v0  ;;  %v1333_v24 = vmul.f32 0.70710677, %v1280_v62  ;;  %1351 = vst [vmem:[%s13057_s20 + $0x58] sm:$0xff] %v1319_v26  ;;  %v1317_v19 = vmul.f32 0.70710677, %v1216_v11  ;;  %v13208_v26 = vcombine.low %v12890_v63, %v12915_v44  ;;  %v9706_v62 = vcombine.low %v13181_v39, %v13183_v25  ;;  %11145 = vmatmul.mubr.bf16.gmra.mxu1 %v2795_v23 }
 0x104   : > { %v11022_v29 = vpop.f32.mrf.mxu1  ;;  %v11006_v34 = vpop.f32.mrf.mxu0  ;;  %v13200_v0 = vld [vmem:[#allocation2 + $0x6c] sm:$0xf]  ;;  %v2804_v44 = vsel %vm16205_vm0, %v2794_v16, %v13192_v56  ;;  %v2820_v18 = vrot.slane %v2818_v53, 4  ;;  %11276 = vmatprep.subr.bf16.mxu0 %v12014_v59  ;;  %11225 = vmatpush3.bf16.msra.mxu1 %v11990_v8  ;;  %v13244_v8 = vld [vmem:[#allocation2 + $0x78] sm:$0xf] }
 0x105   : > { %16234 = vst [vmem:[#allocation14_spill] sm:$0xff] %v13200_v0  ;;  %1365 = vst [vmem:[%s13057_s20 + $0xc8] sm:$0xff] %v1333_v24  ;;  %v1338_v30 = vmul.f32 0.70710677, %v11022_v29  ;;  %v1322_v5 = vmul.f32 0.70710677, %v11006_v34  ;;  %v9707_v25 = vcombine.low %v13197_v33, %v13200_v0  ;;  %11148 = vmatprep.mubr.bf16.mxu1 %v2804_v44  ;;  %11197 = vmatmul.mubr.bf16.gmra.mxu0 %v13208_v26 }
 0x106   : > { %1349 = vst [vmem:[%s13057_s20 + $0x48] sm:$0xff] %v1317_v19  ;;  %v1293_v11 = vpop.f32.mrf.mxu1  ;;  %v1229_v24 = vpop.f32.mrf.mxu0  ;;  %v2808_v29 = vrot.slane %v2806_v35, 3  ;;  %v2811_v19 = vrot.slane %v2809_v45, 4  ;;  %v2817_v34 = vrot.slane %v2815_v14, 3  ;;  %v11997_v35 = vld [vmem:[%s16159_s5 + $0x50] sm:$0xff]   ;;  %v2824_v53 = vshrl.u32 %v9706_v62, 16  ;;  %11277 = vmatpush3.bf16.msra.mxu0 %v12014_v59 }
 0x107   : > { %1370 = vst [vmem:[%s13057_s20 + $0xf0] sm:$0xff] %v1338_v30  ;;  %v1336_v17 = vmul.f32 0.70710677, %v1293_v11  ;;  %1354 = vst [vmem:[%s13057_s20 + $0x70] sm:$0xff] %v1322_v5  ;;  %v1320_v63 = vmul.f32 0.70710677, %v1229_v24  ;;  %v13226_v30 = vcombine.low %v12917_v1, %v12910_v40  ;;  %11226 = vmatprep.subr.bf16.mxu1 %v11997_v35 }
 0x108   : > { %v11023_v45 = vpop.f32.mrf.mxu1  ;;  %v11007_v7 = vpop.f32.mrf.mxu0  ;;  %v13230_v5 = vld [vmem:[#allocation2 + $0x70] sm:$0xf]  ;;  %v12015_v11 = vld [vmem:[%s16159_s5 + $0x1c0] sm:$0xff]   ;;  %v2812_v40 = vor.u32 %v2811_v19, %v2808_v29  ;;  %v2827_v1 = vshll.u32 %v9706_v62, 16  ;;  %v12004_v29 = vld [vmem:[%s16159_s5 + $0x48] sm:$0xff]   ;;  %v2826_v19 = vrot.slane %v2824_v53, 3  ;;  %11227 = vmatpush3.bf16.msra.mxu1 %v11997_v35 }
 0x109   : > { %1368 = vst [vmem:[%s13057_s20 + $0xe0] sm:$0xff] %v1336_v17  ;;  %v1339_v16 = vmul.f32 0.70710677, %v11023_v45  ;;  %1352 = vst [vmem:[%s13057_s20 + $0x60] sm:$0xff] %v1320_v63  ;;  %v1323_v14 = vmul.f32 0.70710677, %v11007_v7  ;;  %v2821_v17 = vor.u32 %v2820_v18, %v2817_v34  ;;  %11200 = vmatprep.mubr.bf16.mxu0 %v13226_v30  ;;  %v13252_v18 = vcombine.low %v12912_v13, %v12929_v10 }
 0x10a   : > { %v1296_v24 = vpop.f32.mrf.mxu1  ;;  %v1232_v0 = vpop.f32.mrf.mxu0  ;;  %v2833_v63 = vshrl.u32 %v9707_v25, 16  ;;  %v2836_v45 = vshll.u32 %v9707_v25, 16  ;;  %v13238_v7 = vld [vmem:[#allocation2 + $0x74] sm:$0xf]  ;;  %v13246_v62 = vld [vmem:[#allocation2 + $0x7c] sm:$0xf]  ;;  %11278 = vmatprep.subr.bf16.mxu0 %v12015_v11  ;;  %11228 = vmatprep.subr.bf16.mxu1 %v12004_v29 }
 0x10b   : > { %1371 = vst [vmem:[%s13057_s20 + $0xf8] sm:$0xff] %v1339_v16  ;;  %v1337_v20 = vmul.f32 0.70710677, %v1296_v24  ;;  %1355 = vst [vmem:[%s13057_s20 + $0x78] sm:$0xff] %v1323_v14  ;;  %v1321_v23 = vmul.f32 0.70710677, %v1232_v0  ;;  %v2813_v0 = vsel %vm16205_vm0, %v13192_v56, %v2812_v40  ;;  %v9708_v59 = vcombine.low %v13230_v5, %v13238_v7  ;;  %11279 = vmatpush3.bf16.msra.mxu0 %v12015_v11 }
 0x10c   : > { %v13257_v25 = vld [vmem:[%s16159_s5 + $0xb8] sm:$0xff]   ;;  %v2829_v44 = vrot.slane %v2827_v1, 4  ;;  %v2822_v34 = vsel %vm16205_vm0, %v2812_v40, %v2821_v17  ;;  %v2835_v16 = vrot.slane %v2833_v63, 3  ;;  %v2838_v13 = vrot.slane %v2836_v45, 4  ;;  %v12011_v14 = vld [vmem:[%s16159_s5 + $0x40] sm:$0xff]   ;;  %11149 = vmatmul.mubr.bf16.gmra.mxu1 %v2813_v0 }
 0x10d   : > { %1369 = vst [vmem:[%s13057_s20 + $0xe8] sm:$0xff] %v1337_v20  ;;  %1353 = vst [vmem:[%s13057_s20 + $0x68] sm:$0xff] %v1321_v23  ;;  %v9709_v10 = vcombine.low %v13244_v8, %v13246_v62  ;;  %v13271_v56 = vcombine.low %v12931_v28, %v12937_v51  ;;  %11360 = vmatprep.subr.bf16.mxu0 %v13257_v25  ;;  %11152 = vmatprep.mubr.bf16.mxu1 %v2822_v34  ;;  %v2842_v53 = vshrl.u32 %v9708_v59, 16  ;;  %v13274_v40 = vld [vmem:[#allocation2 + $0x80] sm:$0xf]  ;;  %v13282_v28 = vld [vmem:[%s16159_s5 + $0x178] sm:$0xff]  }
 0x10e   : > { %v2830_v35 = vor.u32 %v2829_v44, %v2826_v19  ;;  %v2845_v24 = vshll.u32 %v9708_v59, 16  ;;  %11229 = vmatpush3.bf16.msra.mxu1 %v12004_v29  ;;  %11201 = vmatmul.mubr.bf16.gmra.mxu0 %v13252_v18  ;;  %v2839_v1 = vor.u32 %v2838_v13, %v2835_v16  ;;  %v13277_v63 = vld [vmem:[#allocation2 + $0x84] sm:$0xf]  ;;  %v13285_v51 = vld [vmem:[#allocation2 + $0x88] sm:$0xf]  ;;  %v13289_v11 = vcombine.low %v12946_v57, %v12956_v49 }
 0x10f   : > { %v2851_v20 = vshrl.u32 %v9709_v10, 16  ;;  %v2854_v23 = vshll.u32 %v9709_v10, 16  ;;  %11230 = vmatprep.subr.bf16.mxu1 %v12011_v14  ;;  %11204 = vmatprep.mubr.bf16.mxu0 %v13271_v56  ;;  %v2844_v29 = vrot.slane %v2842_v53, 3  ;;  %v9710_v19 = vcombine.low %v13274_v40, %v13277_v63 }
 0x110   : > { %v2831_v45 = vsel %vm16205_vm0, %v2821_v17, %v2830_v35  ;;  %v2847_v0 = vrot.slane %v2845_v24, 4  ;;  %v2840_v44 = vsel %vm16205_vm0, %v2830_v35, %v2839_v1  ;;  %v9711_v16 = vcombine.low %v13285_v51, %v13078_v27 }
 0x111   : > { %v2853_v59 = vrot.slane %v2851_v20, 3  ;;  %v2856_v34 = vrot.slane %v2854_v23, 4  ;;  %v13300_v57 = vcombine.low %v12958_v15, %v12960_v47  ;;  %v2860_v17 = vshrl.u32 %v9710_v19, 16 }
 0x112   : > { %11231 = vmatpush3.bf16.msra.mxu1 %v12011_v14  ;;  %v2848_v49 = vor.u32 %v2847_v0, %v2844_v29  ;;  %v2863_v13 = vshll.u32 %v9710_v19, 16  ;;  %v2869_v14 = vshrl.u32 %v9711_v16, 16  ;;  %v2872_v35 = vshll.u32 %v9711_v16, 16 }
 0x113   : > { %11312 = vmatprep.subr.bf16.mxu1 %v13282_v28  ;;  %v2857_v10 = vor.u32 %v2856_v34, %v2853_v59  ;;  %v2862_v24 = vrot.slane %v2860_v17, 3  ;;  %v9712_v15 = vcombine.low %v13080_v21, %v13080_v21  ;;  %v13310_v23 = vcombine.low %v12968_v2, %v12975_v42 }
 0x114   : > { %11153 = vmatmul.mubr.bf16.gmra.mxu1 %v2831_v45  ;;  %v2849_v53 = vsel %vm16205_vm0, %v2839_v1, %v2848_v49  ;;  %v2865_v20 = vrot.slane %v2863_v13, 4  ;;  %v2871_v45 = vrot.slane %v2869_v14, 3  ;;  %v2874_v29 = vrot.slane %v2872_v35, 4  ;;  %v12291_v14 = vld [vmem:[#allocation2 + $0x4] sm:$0xf] }
 0x115   : > { %11156 = vmatprep.mubr.bf16.mxu1 %v2840_v44  ;;  %v2858_v47 = vsel %vm16205_vm0, %v2848_v49, %v2857_v10  ;;  %v13314_v0 = vcombine.low %v12977_v46, %v12986_v58  ;;  %v2878_v19 = vshrl.u32 %v9712_v15, 16  ;;  %v2881_v44 = vshll.u32 %v9712_v15, 16  ;;  %v16235_v58 = vld [vmem:[#allocation5_spill] sm:$0xff] }
 0x116   : > { %11205 = vmatmul.mubr.bf16.gmra.mxu0 %v13289_v11  ;;  %v2866_v1 = vor.u32 %v2865_v20, %v2862_v24  ;;  %v2875_v59 = vor.u32 %v2874_v29, %v2871_v45  ;;  %v9768_v46 = vcombine.low %v12990_v43, %v12998_v54  ;;  %v9802_v49 = vcombine.low %v16235_v58, %v13002_v31  ;;  %v12292_v35 = vld [vmem:[#allocation2 + $0x8] sm:$0xf]  ;;  %v12033_v43 = vld [vmem:[%s16159_s5 + $0xb0] sm:$0xff]   ;;  %v16240_v45 = vld [vmem:[#allocation8_spill] sm:$0xff] }
 0x117   : > { %11208 = vmatprep.mubr.bf16.mxu0 %v13300_v57  ;;  %v2880_v2 = vrot.slane %v2878_v19, 3  ;;  %v2883_v42 = vrot.slane %v2881_v44, 4  ;;  %v9804_v20 = vcombine.low %v13015_v50, %v13017_v6  ;;  %v12037_v54 = vld [vmem:[%s16159_s5 + $0xa8] sm:$0xff]   ;;  %v12021_v31 = vld [vmem:[%s16159_s5 + $0x170] sm:$0xff]   ;;  %v12042_v29 = vld [vmem:[%s16159_s5 + $0x98] sm:$0xff]   ;;  %v9808_v19 = vcombine.low %v13074_v4, %v13087_v37 }
 0x118   : > { %v2867_v34 = vsel %vm16205_vm0, %v2857_v10, %v2866_v1  ;;  %v2876_v16 = vsel %vm16205_vm0, %v2866_v1, %v2875_v59  ;;  %v9777_v10 = vcombine.low %v12291_v14, %v12292_v35  ;;  %v16238_v6 = vld [vmem:[#allocation10_spill] sm:$0xff]  ;;  %v16239_v15 = vld [vmem:[#allocation9_spill] sm:$0xff]  ;;  %v16241_v1 = vld [vmem:[#allocation11_spill] sm:$0xff]  ;;  %v9809_v4 = vcombine.low %v13092_v41, %v13138_v22 }
 0x119   : > { %v2884_v17 = vor.u32 %v2883_v42, %v2880_v2  ;;  %v12043_v44 = vld [vmem:[%s16159_s5 + $0x90] sm:$0xff]   ;;  %v12040_v41 = vld [vmem:[%s16159_s5 + $0x148] sm:$0xff]   ;;  %v12045_v22 = vld [vmem:[%s16159_s5 + $0x140] sm:$0xff]   ;;  %v9815_v42 = vcombine.low %v13246_v62, %v13274_v40 }
 0x11a   : > { %v12035_v37 = vld [vmem:[%s16159_s5 + $0x150] sm:$0xff]   ;;  %v12054_v35 = vld [vmem:[#allocation2 + $0x24] sm:$0xff]  }
 0x11b   : > { %v2885_v13 = vsel %vm16205_vm0, %v2875_v59, %v2884_v17  ;;  %v12048_v59 = vld [vmem:[%s16159_s5 + $0x80] sm:$0xff]  }
 0x11c   : > { %11157 = vmatmul.mubr.bf16.gmra.mxu1 %v2849_v53  ;;  %v16236_v53 = vld [vmem:[#allocation6_spill] sm:$0xff] }
 0x11d   : > { %11160 = vmatprep.mubr.bf16.mxu1 %v2858_v47  ;;  %v9803_v24 = vcombine.low %v16236_v53, %v13013_v12  ;;  %v16237_v12 = vld [vmem:[#allocation7_spill] sm:$0xff]  ;;  %v9806_v47 = vcombine.low %v16239_v15, %v16238_v6 }
 0x11e   : > { %11209 = vmatmul.mubr.bf16.gmra.mxu0 %v13310_v23  ;;  %v9805_v50 = vcombine.low %v16237_v12, %v13032_v38  ;;  %v12024_v38 = vld [vmem:[%s16159_s5 + $0x168] sm:$0xff]  }
 0x11f   : > { %11212 = vmatprep.mubr.bf16.mxu0 %v13314_v0 }
 0x124   : > { %11161 = vmatmul.mubr.bf16.gmra.mxu1 %v2867_v34 }
 0x125   : > { %11164 = vmatprep.mubr.bf16.mxu1 %v2876_v16  ;;  %v12049_v16 = vld [vmem:[#allocation2 + $0xc] sm:$0xff]  }
 0x126   : > { %11213 = vmatmul.mubr.bf16.gmra.mxu0 %v9768_v46  ;;  %v4138_v17 = vshrl.u32 %v12049_v16, 16 }
 0x127   : > { %11280 = vmatprep.mubr.bf16.mxu0 %v9802_v49  ;;  %v12053_v49 = vld [vmem:[#allocation2 + $0x1c] sm:$0xff]  }
 0x12c   : > { %11165 = vmatmul.mubr.bf16.gmra.mxu1 %v2885_v13 }
 0x12d   : > { %11232 = vmatprep.mubr.bf16.mxu1 %v9777_v10 }
 0x12e   : > { %11281 = vmatmul.mubr.bf16.vlgmr.msra.gmra.mxu0 %v9803_v24 }
 0x12f   : > { %11284 = vmatprep.mubr.bf16.mxu0 %v9804_v20  ;;  %11361 = vmatpush3.bf16.msra.mxu0 %v13257_v25  ;;  %v12038_v25 = vld [vmem:[%s16159_s5 + $0xa0] sm:$0xff]   ;;  %v4157_v20 = vshrl.u32 %v12053_v49, 16 }
 0x130   : > { %11362 = vmatprep.subr.bf16.mxu0 %v12033_v43 }
 0x133   : > { %11363 = vmatpush3.bf16.msra.mxu0 %v12033_v43  ;;  %v4161_v43 = vshll.u32 %v12054_v35, 16 }
 0x134   : > { %11233 = vmatmul.mubr.bf16.vlgmr.msra.gmra.mxu1 %v16240_v45  ;;  %11364 = vmatprep.subr.bf16.mxu0 %v12037_v54 }
 0x135   : > { %11313 = vmatpush3.bf16.msra.mxu1 %v13282_v28  ;;  %11236 = vmatprep.mubr.bf16.mxu1 %v13050_v36  ;;  %v9807_v28 = vcombine.low %v16241_v1, %v13072_v3  ;;  %v12027_v36 = vld [vmem:[%s16159_s5 + $0x160] sm:$0xff]   ;;  %v12030_v3 = vld [vmem:[%s16159_s5 + $0x158] sm:$0xff]   ;;  %v4163_v12 = vrot.slane %v4161_v43, 1 }
 0x136   : > { %11314 = vmatprep.subr.bf16.mxu1 %v12021_v31  ;;  %11285 = vmatmul.mubr.bf16.gmra.mxu0 %v9805_v50  ;;  %v4165_v50 = vshrl.u32 %v12054_v35, 16 }
 0x137   : > { %11288 = vmatprep.mubr.bf16.mxu0 %v9806_v47  ;;  %11365 = vmatpush3.bf16.msra.mxu0 %v12037_v54  ;;  %v12056_v54 = vld [vmem:[#allocation2 + $0x2c] sm:$0xff]   ;;  %v12059_v47 = vld [vmem:[#allocation2 + $0x3c] sm:$0xff]  }
 0x138   : > { %11366 = vmatprep.subr.bf16.mxu0 %v12038_v25  ;;  %v4169_v6 = vshll.u32 %v12056_v54, 16  ;;  %v4173_v1 = vshrl.u32 %v12056_v54, 16 }
 0x139   : > { %11315 = vmatpush3.bf16.msra.mxu1 %v12021_v31  ;;  %v12057_v31 = vld [vmem:[#allocation2 + $0x34] sm:$0xff]  }
 0x13a   : > { %11316 = vmatprep.subr.bf16.mxu1 %v12024_v38  ;;  %v4177_v15 = vshll.u32 %v12057_v31, 16 }
 0x13b   : > { %11367 = vmatpush3.bf16.msra.mxu0 %v12038_v25 }
 0x13c   : > { %11237 = vmatmul.mubr.bf16.gmra.mxu1 %v13070_v52  ;;  %11368 = vmatprep.subr.bf16.mxu0 %v12042_v29  ;;  %v12047_v52 = vld [vmem:[%s16159_s5 + $0x88] sm:$0xff]  }
 0x13d   : > { %11240 = vmatprep.mubr.bf16.mxu1 %v13100_v60  ;;  %11317 = vmatpush3.bf16.msra.mxu1 %v12024_v38  ;;  %v9810_v60 = vcombine.low %v13145_v61, %v13147_v48  ;;  %v16242_v61 = vld [vmem:[#allocation13_spill] sm:$0xff]  ;;  %v4167_v38 = vor.u32 %v4165_v50, %v4163_v12 }
 0x13e   : > { %11289 = vmatmul.mubr.bf16.gmra.mxu0 %v9807_v28  ;;  %11318 = vmatprep.subr.bf16.mxu1 %v12027_v36  ;;  %v9812_v48 = vcombine.low %v16242_v61, %v13197_v33  ;;  %v9814_v33 = vcombine.low %v13238_v7, %v13244_v8  ;;  %v4140_v7 = vshll.u32 %v12049_v16, 16  ;;  %v12062_v16 = vld [vmem:[#allocation2 + $0x4c] sm:$0xff]  }
 0x13f   : > { %11292 = vmatprep.mubr.bf16.mxu0 %v9808_v19  ;;  %11369 = vmatpush3.bf16.msra.mxu0 %v12042_v29  ;;  %v4171_v29 = vrot.slane %v4169_v6, 1  ;;  %v4179_v19 = vrot.slane %v4177_v15, 1  ;;  %v4205_v54 = vshrl.u32 %v12062_v16, 16 }
 0x140   : > { %11370 = vmatprep.subr.bf16.mxu0 %v12043_v44  ;;  %v4142_v62 = vrot.slane %v4140_v7, 1 }
 0x141   : > { %11319 = vmatpush3.bf16.msra.mxu1 %v12027_v36 }
 0x142   : > { %11320 = vmatprep.subr.bf16.mxu1 %v12030_v3  ;;  %v4143_v13 = vor.u32 %v4142_v62, %v4138_v17 }
 0x143   : > { %11371 = vmatpush3.bf16.msra.mxu0 %v12043_v44  ;;  %v4181_v44 = vshrl.u32 %v12057_v31, 16 }
 0x144   : > { %11241 = vmatmul.mubr.bf16.gmra.mxu1 %v13124_v55  ;;  %11372 = vmatprep.subr.bf16.mxu0 %v12047_v52  ;;  %v9811_v55 = vcombine.low %v13150_v9, %v13181_v39  ;;  %v13400_v9 = vld [vmem:[%s16159_s5 + $0x238] sm:$0xff]   ;;  %v16244_v39 = vld [vmem:[#allocation14_spill] sm:$0xff] }
 0x145   : > { %11244 = vmatprep.mubr.bf16.mxu1 %v13156_v32  ;;  %11321 = vmatpush3.bf16.msra.mxu1 %v12030_v3  ;;  %v16243_v32 = vld [vmem:[#allocation12_spill] sm:$0xff]  ;;  %v9813_v34 = vcombine.low %v16244_v39, %v13230_v5  ;;  %v9816_v5 = vcombine.low %v13277_v63, %v13285_v51  ;;  %v4153_v51 = vshll.u32 %v12053_v49, 16  ;;  %v4185_v3 = vshll.u32 %v12059_v47, 16 }
 0x146   : > { %11293 = vmatmul.mubr.bf16.gmra.mxu0 %v9809_v4  ;;  %11322 = vmatprep.subr.bf16.mxu1 %v12035_v37 }
 0x147   : > { %11296 = vmatprep.mubr.bf16.mxu0 %v9810_v60  ;;  %11373 = vmatpush3.bf16.msra.mxu0 %v12047_v52  ;;  %v4155_v53 = vrot.slane %v4153_v51, 1  ;;  %v4175_v60 = vor.u32 %v4173_v1, %v4171_v29 }
 0x148   : > { %11374 = vmatprep.subr.bf16.mxu0 %v12048_v59 }
 0x149   : > { %11323 = vmatpush3.bf16.msra.mxu1 %v12035_v37  ;;  %v4172_v37 = vsel %vm16204_vm2, %v4167_v38, %v4171_v29  ;;  %v12066_v38 = vld [vmem:[#allocation2 + $0x64] sm:$0xff]  }
 0x14a   : > { %11324 = vmatprep.subr.bf16.mxu1 %v12040_v41  ;;  %v12070_v29 = vld [vmem:[%s16159_s5 + $0x208] sm:$0xff]  }
 0x14b   : > { %11375 = vmatpush3.bf16.msra.mxu0 %v12048_v59  ;;  %v12058_v59 = vld [vmem:[%s16159_s5 + $0x228] sm:$0xff]  }
 0x14c   : > { %11245 = vmatmul.mubr.bf16.gmra.mxu1 %v16243_v32  ;;  %v4183_v32 = vor.u32 %v4181_v44, %v4179_v19 }
 0x14d   : > { %11248 = vmatprep.mubr.bf16.mxu1 %v13208_v26  ;;  %11325 = vmatpush3.bf16.msra.mxu1 %v12040_v41  ;;  %v12051_v26 = vld [vmem:[#allocation2 + $0x4] sm:$0xff]  }
 0x14e   : > { %11297 = vmatmul.mubr.bf16.gmra.mxu0 %v9811_v55  ;;  %11326 = vmatprep.subr.bf16.mxu1 %v12045_v22  ;;  %v4505_v2 = vshll.u32 %v12051_v26, 16  ;;  %v4503_v46 = vshrl.u32 %v12051_v26, 16  ;;  %v12060_v41 = vld [vmem:[#allocation2 + $0x44] sm:$0xff]   ;;  %v4189_v26 = vshrl.u32 %v12059_v47, 16 }
 0x14f   : > { %11300 = vmatprep.mubr.bf16.mxu0 %v9812_v48 }
 0x150   : > { %v4507_v58 = vrot.slane %v4505_v2, 1  ;;  %v4193_v2 = vshll.u32 %v12060_v41, 16 }
 0x151   : > { %11327 = vmatpush3.bf16.msra.mxu1 %v12045_v22 }
 0x152   : > { %11408 = vmatprep.subr.bf16.mxu1 %v13400_v9  ;;  %v4508_v8 = vor.u32 %v4507_v58, %v4503_v46 }
 0x154   : > { %11249 = vmatmul.mubr.bf16.gmra.mxu1 %v13226_v30  ;;  %v12050_v30 = vld [vmem:[#allocation2 + $0x14] sm:$0xff]   ;;  %v4509_v40 = vsel %vm16204_vm2, %v4508_v8, %v4142_v62  ;;  %v4195_v62 = vrot.slane %v4193_v2, 1 }
 0x155   : > { %11252 = vmatprep.mubr.bf16.mxu1 %v13252_v18  ;;  %v4145_v18 = vshll.u32 %v12050_v30, 16  ;;  %v4149_v63 = vshrl.u32 %v12050_v30, 16  ;;  %v12063_v8 = vld [vmem:[#allocation2 + $0x54] sm:$0xff]  }
 0x156   : > { %11301 = vmatmul.mubr.bf16.gmra.mxu0 %v9813_v34  ;;  %v4209_v35 = vshll.u32 %v12063_v8, 16  ;;  %v4213_v6 = vshrl.u32 %v12063_v8, 16 }
 0x157   : > { %11304 = vmatprep.mubr.bf16.mxu0 %v9814_v33  ;;  %v4180_v33 = vsel %vm16204_vm2, %v4175_v60, %v4179_v19 }
 0x158   : > { %v4211_v50 = vrot.slane %v4209_v35, 1 }
 0x15c   : > { %11253 = vmatmul.mubr.bf16.gmra.mxu1 %v13271_v56  ;;  %v4147_v56 = vrot.slane %v4145_v18, 1  ;;  %v11090_v14 = vpop.f32.mrf.mxu0 }
 0x15d   : > { %11256 = vmatprep.mubr.bf16.mxu1 %v13289_v11  ;;  %v16245_v11 = vcombine.low %v13078_v27, %v13080_v21  ;;  %v4159_v27 = vor.u32 %v4157_v20, %v4155_v53 }
 0x15e   : > { %11305 = vmatmul.mubr.bf16.gmra.mxu0 %v9815_v42  ;;  %v4151_v10 = vor.u32 %v4149_v63, %v4147_v56  ;;  %v4148_v24 = vsel %vm16204_vm2, %v4143_v13, %v4147_v56  ;;  %v12061_v42 = vld [vmem:[%s16159_s5 + $0x220] sm:$0xff]   ;;  %v4201_v56 = vshll.u32 %v12062_v16, 16  ;;  %v12064_v63 = vld [vmem:[%s16159_s5 + $0x218] sm:$0xff]  }
 0x15f   : > { %11308 = vmatprep.mubr.bf16.mxu0 %v9816_v5  ;;  %v4164_v25 = vsel %vm16204_vm2, %v4159_v27, %v4163_v12 }
 0x160   : > { %v4203_v43 = vrot.slane %v4201_v56, 1 }
 0x164   : > { %11257 = vmatmul.mubr.bf16.gmra.mxu1 %v13300_v57  ;;  %v2474_v57 = vpop.f32.mrf.mxu0 }
 0x165   : > { %11260 = vmatprep.mubr.bf16.mxu1 %v13310_v23  ;;  %v4156_v23 = vsel %vm16204_vm2, %v4151_v10, %v4155_v53  ;;  %v12065_v10 = vld [vmem:[#allocation2 + $0x5c] sm:$0xff]  }
 0x166   : > { %11309 = vmatmul.mubr.bf16.gmra.mxu0 %v16245_v11  ;;  %v11091_v21 = vpop.f32.mrf.mxu0  ;;  %v4217_v15 = vshll.u32 %v12065_v10, 16 }
 0x167   : > { %11376 = vmatprep.mubr.bf16.mxu0 %v4509_v40  ;;  %v4197_v40 = vshrl.u32 %v12060_v41, 16  ;;  %v4225_v41 = vshll.u32 %v12066_v38, 16 }
 0x168   : > { %v2477_v45 = vpop.f32.mrf.mxu0 }
 0x169   : > { %v4199_v20 = vor.u32 %v4197_v40, %v4195_v62 }
 0x16c   : > { %11261 = vmatmul.mubr.bf16.gmra.mxu1 %v13314_v0  ;;  %v12055_v0 = vld [vmem:[%s16159_s5 + $0x230] sm:$0xff]  }
 0x16d   : > { %11328 = vmatprep.mubr.bf16.mxu1 %v4148_v24 }
 0x16e   : > { %11377 = vmatmul.mubr.bf16.vlgmr.msra.gmra.mxu0 %v4148_v24 }
 0x16f   : > { %11380 = vmatprep.mubr.bf16.mxu0 %v4156_v23 }
 0x171   : > { %v11042_v28 = vpop.f32.mrf.mxu1 }
 0x172   : > { %v13428_v36 = vadd.f32 %v11090_v14, %v11042_v28 }
 0x173   : > { %v2226_v52 = vpop.f32.mrf.mxu1  ;;  %v11094_v4 = vpop.f32.mrf.mxu0 }
 0x174   : > { %11329 = vmatmul.mubr.bf16.vlgmr.msra.gmra.mxu1 %v4156_v23  ;;  %v13435_v55 = vadd.f32 %v2474_v57, %v2226_v52  ;;  %v12067_v23 = vld [vmem:[%s16159_s5 + $0x210] sm:$0xff]   ;;  %v4219_v52 = vrot.slane %v4217_v15, 1  ;;  %v12072_v15 = vld [vmem:[#allocation2 + $0x84] sm:$0xff]  }
 0x175   : > { %11409 = vmatpush3.bf16.msra.mxu1 %v13400_v9  ;;  %11332 = vmatprep.mubr.bf16.mxu1 %v4164_v25  ;;  %v11043_v22 = vpop.f32.mrf.mxu1  ;;  %v2490_v61 = vpop.f32.mrf.mxu0  ;;  %v4187_v9 = vrot.slane %v4185_v3, 1  ;;  %v4215_v3 = vor.u32 %v4213_v6, %v4211_v50 }
 0x176   : > { %11410 = vmatprep.subr.bf16.mxu1 %v12055_v0  ;;  %11381 = vmatmul.mubr.bf16.gmra.mxu0 %v4164_v25  ;;  %v13437_v48 = vadd.f32 %v11091_v21, %v11043_v22  ;;  %v4204_v25 = vsel %vm16204_vm2, %v4199_v20, %v4203_v43  ;;  %v12068_v22 = vld [vmem:[#allocation2 + $0x6c] sm:$0xff]  }
 0x177   : > { %11384 = vmatprep.mubr.bf16.mxu0 %v4172_v37  ;;  %v2229_v39 = vpop.f32.mrf.mxu1  ;;  %v11095_v34 = vpop.f32.mrf.mxu0  ;;  %v4188_v7 = vsel %vm16204_vm2, %v4183_v32, %v4187_v9  ;;  %v4191_v17 = vor.u32 %v4189_v26, %v4187_v9  ;;  %v12069_v26 = vld [vmem:[#allocation2 + $0x74] sm:$0xff]   ;;  %v4237_v35 = vshrl.u32 %v12068_v22, 16 }
 0x178   : > { %v13443_v5 = vadd.f32 %v2477_v45, %v2229_v39 }
 0x179   : > { %11411 = vmatpush3.bf16.msra.mxu1 %v12055_v0  ;;  %v11046_v46 = vpop.f32.mrf.mxu1  ;;  %v2493_v58 = vpop.f32.mrf.mxu0  ;;  %v4196_v57 = vsel %vm16204_vm2, %v4191_v17, %v4195_v62  ;;  %v4207_v0 = vor.u32 %v4205_v54, %v4203_v43  ;;  %v4241_v62 = vshll.u32 %v12069_v26, 16  ;;  %v4245_v54 = vshrl.u32 %v12069_v26, 16 }
 0x17a   : > { %11412 = vmatprep.subr.bf16.mxu1 %v12058_v59  ;;  %v13445_v30 = vadd.f32 %v11094_v4, %v11046_v46  ;;  %v4227_v46 = vrot.slane %v4225_v41, 1 }
 0x17b   : > { %v2242_v18 = vpop.f32.mrf.mxu1  ;;  %v11098_v49 = vpop.f32.mrf.mxu0  ;;  %v4212_v60 = vsel %vm16204_vm2, %v4207_v0, %v4211_v50  ;;  %v4243_v43 = vrot.slane %v4241_v62, 1 }
 0x17c   : > { %11333 = vmatmul.mubr.bf16.gmra.mxu1 %v4172_v37  ;;  %v13451_v51 = vadd.f32 %v2490_v61, %v2242_v18  ;;  %v12073_v61 = vld [vmem:[%s16159_s5 + $0x200] sm:$0xff]  }
 0x17d   : > { %11336 = vmatprep.mubr.bf16.mxu1 %v4180_v33  ;;  %11413 = vmatpush3.bf16.msra.mxu1 %v12058_v59  ;;  %v11047_v11 = vpop.f32.mrf.mxu1  ;;  %v2506_v13 = vpop.f32.mrf.mxu0  ;;  %v4221_v59 = vshrl.u32 %v12065_v10, 16  ;;  %v12071_v10 = vld [vmem:[#allocation2 + $0x7c] sm:$0xff]  }
 0x17e   : > { %11385 = vmatmul.mubr.bf16.gmra.mxu0 %v4180_v33  ;;  %11414 = vmatprep.subr.bf16.mxu1 %v12061_v42  ;;  %v13453_v14 = vadd.f32 %v11095_v34, %v11047_v11  ;;  %v4220_v33 = vsel %vm16204_vm2, %v4215_v3, %v4219_v52  ;;  %v4249_v6 = vshll.u32 %v12071_v10, 16 }
 0x17f   : > { %11388 = vmatprep.mubr.bf16.mxu0 %v4188_v7  ;;  %v2245_v53 = vpop.f32.mrf.mxu1  ;;  %v11099_v24 = vpop.f32.mrf.mxu0  ;;  %v4223_v16 = vor.u32 %v4221_v59, %v4219_v52 }
 0x180   : > { %v13459_v31 = vadd.f32 %v2493_v58, %v2245_v53  ;;  %v4229_v58 = vshrl.u32 %v12066_v38, 16  ;;  %v4251_v52 = vrot.slane %v4249_v6, 1 }
 0x181   : > { %11415 = vmatpush3.bf16.msra.mxu1 %v12061_v42  ;;  %v11050_v21 = vpop.f32.mrf.mxu1  ;;  %v2509_v27 = vpop.f32.mrf.mxu0 }
 0x182   : > { %11416 = vmatprep.subr.bf16.mxu1 %v12064_v63  ;;  %v13461_v12 = vadd.f32 %v11098_v49, %v11050_v21  ;;  %v4231_v11 = vor.u32 %v4229_v58, %v4227_v46 }
 0x183   : > { %v2258_v47 = vpop.f32.mrf.mxu1  ;;  %v11102_v45 = vpop.f32.mrf.mxu0 }
 0x184   : > { %11337 = vmatmul.mubr.bf16.gmra.mxu1 %v4188_v7  ;;  %v13467_v1 = vadd.f32 %v2506_v13, %v2258_v47  ;;  %v4233_v7 = vshll.u32 %v12068_v22, 16 }
 0x185   : > { %11340 = vmatprep.mubr.bf16.mxu1 %v4196_v57  ;;  %11417 = vmatpush3.bf16.msra.mxu1 %v12064_v63  ;;  %v11051_v28 = vpop.f32.mrf.mxu1  ;;  %v2522_v19 = vpop.f32.mrf.mxu0  ;;  %v4228_v63 = vsel %vm16204_vm2, %v4223_v16, %v4227_v46  ;;  %v12077_v16 = vld [vmem:[#allocation2 + $0x1c] sm:$0xff]  }
 0x186   : > { %11389 = vmatmul.mubr.bf16.gmra.mxu0 %v4196_v57  ;;  %11418 = vmatprep.subr.bf16.mxu1 %v12067_v23  ;;  %v13469_v44 = vadd.f32 %v11099_v24, %v11051_v28  ;;  %v4235_v13 = vrot.slane %v4233_v7, 1 }
 0x187   : > { %11392 = vmatprep.mubr.bf16.mxu0 %v4204_v25  ;;  %v2261_v4 = vpop.f32.mrf.mxu1  ;;  %v11103_v37 = vpop.f32.mrf.mxu0 }
 0x188   : > { %v13475_v32 = vadd.f32 %v2509_v27, %v2261_v4  ;;  %v4236_v27 = vsel %vm16204_vm2, %v4231_v11, %v4235_v13  ;;  %v4239_v50 = vor.u32 %v4237_v35, %v4235_v13  ;;  %v4253_v4 = vshrl.u32 %v12071_v10, 16 }
 0x189   : > { %11419 = vmatpush3.bf16.msra.mxu1 %v12067_v23  ;;  %v11054_v9 = vpop.f32.mrf.mxu1  ;;  %v2525_v39 = vpop.f32.mrf.mxu0 }
 0x18a   : > { %11420 = vmatprep.subr.bf16.mxu1 %v12070_v29  ;;  %v13477_v34 = vadd.f32 %v11102_v45, %v11054_v9  ;;  %v12075_v45 = vld [vmem:[#allocation2 + $0x84] ss:$0 sps:$4 sm:$0x11]   ;;  %v4244_v3 = vsel %vm16204_vm2, %v4239_v50, %v4243_v43  ;;  %v12074_v9 = vld [vmem:[#allocation2 + $0x8c] ss:$0 sps:$4 sm:$0x11]  }
 0x18b   : > { %v2274_v2 = vpop.f32.mrf.mxu1  ;;  %v11106_v42 = vpop.f32.mrf.mxu0  ;;  %v4511_v59 = vshll.u32 %v12075_v45, 16 }
 0x18c   : > { %11341 = vmatmul.mubr.bf16.gmra.mxu1 %v4204_v25  ;;  %v13480_v8 = vadd.f32 %v2522_v19, %v2274_v2  ;;  %v4255_v2 = vor.u32 %v4253_v4, %v4251_v52 }
 0x18d   : > { %11344 = vmatprep.mubr.bf16.mxu1 %v4212_v60  ;;  %11421 = vmatpush3.bf16.msra.mxu1 %v12070_v29  ;;  %v11055_v18 = vpop.f32.mrf.mxu1  ;;  %v2538_v49 = vpop.f32.mrf.mxu0  ;;  %v4247_v29 = vor.u32 %v4245_v54, %v4243_v43  ;;  %v4513_v7 = vrot.slane %v4511_v59, 1  ;;  %v4871_v59 = vshrl.u32 %v12077_v16, 16 }
 0x18e   : > { %11393 = vmatmul.mubr.bf16.gmra.mxu0 %v4212_v60  ;;  %11422 = vmatprep.subr.bf16.mxu1 %v12073_v61  ;;  %v13482_v17 = vadd.f32 %v11103_v37, %v11055_v18  ;;  %v4257_v37 = vshll.u32 %v12072_v15, 16  ;;  %v12076_v60 = vld [vmem:[#allocation2 + $0x14] sm:$0xff]  }
 0x18f   : > { %11396 = vmatprep.mubr.bf16.mxu0 %v4220_v33  ;;  %v2277_v40 = vpop.f32.mrf.mxu1  ;;  %v11107_v56 = vpop.f32.mrf.mxu0  ;;  %v4252_v26 = vsel %vm16204_vm2, %v4247_v29, %v4251_v52  ;;  %v4862_v46 = vshll.u32 %v12076_v60, 16  ;;  %v4860_v35 = vshrl.u32 %v12076_v60, 16  ;;  %v4514_v43 = vsel %vm16204_vm2, %v4255_v2, %v4513_v7  ;;  %v12079_v29 = vld [vmem:[#allocation2 + $0x2c] sm:$0xff]   ;;  %v12080_v7 = vld [vmem:[#allocation2 + $0x34] sm:$0xff]  }
 0x190   : > { %v13485_v53 = vadd.f32 %v2525_v39, %v2277_v40  ;;  %v4261_v40 = vshrl.u32 %v12072_v15, 16 }
 0x191   : > { %11423 = vmatpush3.bf16.msra.mxu1 %v12073_v61  ;;  %v11058_v24 = vpop.f32.mrf.mxu1  ;;  %v13487_v57 = vpop.f32.mrf.mxu0  ;;  %v4864_v10 = vrot.slane %v4862_v46, 1 }
 0x192   : > { %16246 = vst [vmem:[#allocation5_spill] sm:$0xff] %v13487_v57  ;;  %v13489_v20 = vadd.f32 %v11106_v42, %v11058_v24  ;;  %v4259_v42 = vrot.slane %v4257_v37, 1  ;;  %v4867_v24 = vshll.u32 %v12077_v16, 16 }
 0x193   : > { %v2290_v23 = vpop.f32.mrf.mxu1  ;;  %v11110_v21 = vpop.f32.mrf.mxu0 }
 0x194   : > { %11345 = vmatmul.mubr.bf16.gmra.mxu1 %v4220_v33  ;;  %v13492_v47 = vadd.f32 %v2538_v49, %v2290_v23  ;;  %v4260_v13 = vsel %vm16204_vm2, %v4255_v2, %v4259_v42  ;;  %v4263_v50 = vor.u32 %v4261_v40, %v4259_v42 }
 0x195   : > { %11348 = vmatprep.mubr.bf16.mxu1 %v4228_v63  ;;  %v11059_v25 = vpop.f32.mrf.mxu1  ;;  %v2554_v0 = vpop.f32.mrf.mxu0 }
 0x196   : > { %11397 = vmatmul.mubr.bf16.gmra.mxu0 %v4228_v63  ;;  %v13494_v38 = vadd.f32 %v11107_v56, %v11059_v25  ;;  %v4265_v56 = vshll.u32 %v12074_v9, 16  ;;  %v4865_v25 = vor.u32 %v4864_v10, %v4860_v35 }
 0x197   : > { %11400 = vmatprep.mubr.bf16.mxu0 %v4236_v27  ;;  %v13496_v28 = vpop.f32.mrf.mxu1  ;;  %v11111_v19 = vpop.f32.mrf.mxu0 }
 0x198   : > { %16247 = vst [vmem:[#allocation6_spill] sm:$0xff] %v13496_v28  ;;  %v4267_v6 = vrot.slane %v4265_v56, 1 }
 0x199   : > { %v11062_v41 = vpop.f32.mrf.mxu1  ;;  %v13499_v22 = vpop.f32.mrf.mxu0 }
 0x19a   : > { %16248 = vst [vmem:[#allocation7_spill] sm:$0xff] %v13499_v22  ;;  %v13501_v61 = vadd.f32 %v11110_v21, %v11062_v41  ;;  %v12078_v21 = vld [vmem:[#allocation2 + $0x24] sm:$0xff]   ;;  %v4268_v60 = vsel %vm16204_vm2, %v4263_v50, %v4267_v6  ;;  %v4887_v50 = vshrl.u32 %v12079_v29, 16 }
 0x19b   : > { %v2306_v39 = vpop.f32.mrf.mxu1  ;;  %v11114_v33 = vpop.f32.mrf.mxu0  ;;  %v4875_v4 = vshll.u32 %v12078_v21, 16 }
 0x19c   : > { %11349 = vmatmul.mubr.bf16.gmra.mxu1 %v4236_v27  ;;  %v13504_v58 = vadd.f32 %v2554_v0, %v2306_v39  ;;  %v4869_v0 = vrot.slane %v4867_v24, 1 }
 0x19d   : > { %11352 = vmatprep.mubr.bf16.mxu1 %v4244_v3  ;;  %v11063_v18 = vpop.f32.mrf.mxu1  ;;  %v2570_v49 = vpop.f32.mrf.mxu0  ;;  %v4877_v46 = vrot.slane %v4875_v4, 1 }
 0x19e   : > { %11401 = vmatmul.mubr.bf16.gmra.mxu0 %v4244_v3  ;;  %v13506_v62 = vadd.f32 %v11111_v19, %v11063_v18  ;;  %v4870_v39 = vsel %vm16204_vm2, %v4865_v25, %v4869_v0  ;;  %v4895_v25 = vshrl.u32 %v12080_v7, 16 }
 0x19f   : > { %11404 = vmatprep.mubr.bf16.mxu0 %v4252_v26  ;;  %v13508_v63 = vpop.f32.mrf.mxu1  ;;  %v11115_v11 = vpop.f32.mrf.mxu0 }
 0x1a0   : > { %16249 = vst [vmem:[#allocation10_spill] sm:$0xff] %v13508_v63  ;;  %v12091_v63 = vld [vmem:[#allocation2 + $0x8c] sm:$0xff]  }
 0x1a1   : > { %v11066_v54 = vpop.f32.mrf.mxu1  ;;  %v13512_v23 = vpop.f32.mrf.mxu0 }
 0x1a2   : > { %16250 = vst [vmem:[#allocation9_spill] sm:$0xff] %v13512_v23  ;;  %v13514_v27 = vadd.f32 %v11114_v33, %v11066_v54  ;;  %v4879_v33 = vshrl.u32 %v12078_v21, 16 }
 0x1a3   : > { %v2322_v15 = vpop.f32.mrf.mxu1  ;;  %v11118_v45 = vpop.f32.mrf.mxu0 }
 0x1a4   : > { %11353 = vmatmul.mubr.bf16.gmra.mxu1 %v4252_v26  ;;  %v13516_v19 = vadd.f32 %v2570_v49, %v2322_v15  ;;  %v4883_v26 = vshll.u32 %v12079_v29, 16  ;;  %v4873_v49 = vor.u32 %v4871_v59, %v4869_v0  ;;  %v4881_v16 = vor.u32 %v4879_v33, %v4877_v46 }
 0x1a5   : > { %11356 = vmatprep.mubr.bf16.mxu1 %v4260_v13  ;;  %v11067_v3 = vpop.f32.mrf.mxu1  ;;  %v2586_v52 = vpop.f32.mrf.mxu0  ;;  %v12081_v13 = vld [vmem:[#allocation2 + $0x3c] sm:$0xff]  }
 0x1a6   : > { %11405 = vmatmul.mubr.bf16.gmra.mxu0 %v4514_v43  ;;  %v13518_v37 = vadd.f32 %v11115_v11, %v11067_v3  ;;  %v4885_v11 = vrot.slane %v4883_v26, 1  ;;  %v4891_v43 = vshll.u32 %v12080_v7, 16  ;;  %v4878_v21 = vsel %vm16204_vm2, %v4873_v49, %v4877_v46 }
 0x1a7   : > { %v13521_v41 = vpop.f32.mrf.mxu1  ;;  %v11119_v9 = vpop.f32.mrf.mxu0  ;;  %v4899_v0 = vshll.u32 %v12081_v13, 16 }
 0x1a8   : > { %16251 = vst [vmem:[#allocation8_spill] sm:$0xff] %v13521_v41  ;;  %v4893_v4 = vrot.slane %v4891_v43, 1  ;;  %v12089_v41 = vld [vmem:[#allocation2 + $0x7c] sm:$0xff]  }
 0x1a9   : > { %v11070_v2 = vpop.f32.mrf.mxu1  ;;  %v13524_v42 = vpop.f32.mrf.mxu0  ;;  %v4901_v26 = vrot.slane %v4899_v0, 1 }
 0x1aa   : > { %16252 = vst [vmem:[#allocation11_spill] sm:$0xff] %v13524_v42  ;;  %v13526_v18 = vadd.f32 %v11118_v45, %v11070_v2  ;;  %v4886_v45 = vsel %vm16204_vm2, %v4881_v16, %v4885_v11  ;;  %v4897_v33 = vor.u32 %v4895_v25, %v4893_v4  ;;  %v12083_v2 = vld [vmem:[#allocation2 + $0x4c] sm:$0xff]  }
 0x1ab   : > { %v2338_v40 = vpop.f32.mrf.mxu1  ;;  %v13528_v56 = vpop.f32.mrf.mxu0 }
 0x1ac   : > { %11357 = vmatmul.mubr.bf16.gmra.mxu1 %v4268_v60  ;;  %v13530_v35 = vadd.f32 %v2586_v52, %v2338_v40  ;;  %v12082_v60 = vld [vmem:[#allocation2 + $0x44] sm:$0xff]  }
 0x1ad   : > { %11424 = vmatprep.mubr.bf16.mxu1 %v4870_v39  ;;  %v11071_v10 = vpop.f32.mrf.mxu1  ;;  %v13532_v24 = vpop.f32.mrf.mxu0  ;;  %v4907_v40 = vshll.u32 %v12082_v60, 16 }
 0x1ae   : > { %v13534_v54 = vadd.f32 %v11119_v9, %v11071_v10  ;;  %v4889_v9 = vor.u32 %v4887_v50, %v4885_v11  ;;  %v4903_v10 = vshrl.u32 %v12081_v13, 16  ;;  %v4911_v50 = vshrl.u32 %v12082_v60, 16 }
 0x1af   : > { %v13537_v6 = vpop.f32.mrf.mxu1  ;;  %v13539_v15 = vpop.f32.mrf.mxu0 }
 0x1b0   : > { %16253 = vst [vmem:[#allocation13_spill] sm:$0xff] %v13537_v6  ;;  %v4905_v13 = vor.u32 %v4903_v10, %v4901_v26 }
 0x1b1   : > { %v11138_v3 = vpop.f32.mrf.mxu1  ;;  %v13542_v52 = vpop.f32.mrf.mxu0 }
 0x1b2   : > { %16254 = vst [vmem:[#allocation12_spill] sm:$0xff] %v13542_v52  ;;  %v13545_v59 = vadd.f32 %v11138_v3, %v13428_v36  ;;  %v4894_v36 = vsel %vm16204_vm2, %v4889_v9, %v4893_v4  ;;  %v4909_v3 = vrot.slane %v4907_v40, 1 }
 0x1b3   : > { %v2984_v29 = vpop.f32.mrf.mxu1  ;;  %v13547_v39 = vpop.f32.mrf.mxu0 }
 0x1b4   : > { %11425 = vmatmul.mubr.bf16.vlgmr.msra.gmra.mxu1 %v4878_v21  ;;  %v13550_v46 = vadd.f32 %v2984_v29, %v13435_v55  ;;  %v4902_v21 = vsel %vm16204_vm2, %v4897_v33, %v4901_v26  ;;  %v4913_v33 = vor.u32 %v4911_v50, %v4909_v3 }
 0x1b5   : > { %11428 = vmatprep.mubr.bf16.mxu1 %v4886_v45  ;;  %v11139_v7 = vpop.f32.mrf.mxu1  ;;  %v13552_v49 = vpop.f32.mrf.mxu0  ;;  %v4915_v45 = vshll.u32 %v12083_v2, 16 }
 0x1b6   : > { %v13555_v16 = vadd.f32 %v11139_v7, %v13437_v48  ;;  %v12084_v48 = vld [vmem:[#allocation2 + $0x54] sm:$0xff]   ;;  %v12085_v7 = vld [vmem:[#allocation2 + $0x5c] sm:$0xff]  }
 0x1b7   : > { %v2987_v11 = vpop.f32.mrf.mxu1  ;;  %v13558_v43 = vpop.f32.mrf.mxu0  ;;  %v4917_v60 = vrot.slane %v4915_v45, 1  ;;  %v4927_v45 = vshrl.u32 %v12084_v48, 16 }
 0x1b8   : > { %v13562_v55 = vadd.f32 %v2987_v11, %v13443_v5 }
 0x1b9   : > { %v13564_v0 = vpop.f32.mrf.mxu0  ;;  %v4918_v50 = vsel %vm16204_vm2, %v4913_v33, %v4917_v60 }
 0x1ba   : > { %16255 = vst [vmem:[#allocation14_spill] sm:$0xff] %v13562_v55  ;;  %v11142_v25 = vpop.f32.mrf.mxu1  ;;  %16256 = vst [vmem:[#allocation15_spill] sm:$0xff] %v13564_v0  ;;  %v4923_v55 = vshll.u32 %v12084_v48, 16  ;;  %v12087_v0 = vld [vmem:[#allocation2 + $0x6c] sm:$0xff]  }
 0x1bb   : > { %v13567_v29 = vadd.f32 %v11142_v25, %v13445_v30  ;;  %v4910_v30 = vsel %vm16204_vm2, %v4905_v13, %v4909_v3  ;;  %v4931_v25 = vshll.u32 %v12085_v7, 16 }
 0x1bc   : > { %11429 = vmatmul.mubr.bf16.gmra.mxu1 %v4894_v36  ;;  %v3000_v4 = vpop.f32.mrf.mxu1  ;;  %v13569_v9 = vpop.f32.mrf.mxu0  ;;  %v4925_v6 = vrot.slane %v4923_v55, 1 }
 0x1bd   : > { %11432 = vmatprep.mubr.bf16.mxu1 %v4902_v21  ;;  %v13572_v5 = vadd.f32 %v3000_v4, %v13451_v51  ;;  %v4919_v21 = vshrl.u32 %v12083_v2, 16  ;;  %v4933_v48 = vrot.slane %v4931_v25, 1 }
 0x1be   : > { %v11143_v11 = vpop.f32.mrf.mxu1  ;;  %v13574_v36 = vpop.f32.mrf.mxu0  ;;  %v4929_v33 = vor.u32 %v4927_v45, %v4925_v6 }
 0x1bf   : > { %v13577_v40 = vadd.f32 %v11143_v11, %v13453_v14  ;;  %v12086_v14 = vld [vmem:[#allocation2 + $0x64] sm:$0xff]   ;;  %v4921_v2 = vor.u32 %v4919_v21, %v4917_v60 }
 0x1c0   : > { %v3003_v26 = vpop.f32.mrf.mxu1  ;;  %v13580_v10 = vpop.f32.mrf.mxu0  ;;  %v4934_v45 = vsel %vm16204_vm2, %v4929_v33, %v4933_v48  ;;  %v4943_v25 = vshrl.u32 %v12086_v14, 16 }
 0x1c1   : > { %v13584_v51 = vadd.f32 %v3003_v26, %v13459_v31 }
 0x1c2   : > { %v13586_v42 = vpop.f32.mrf.mxu0 }
 0x1c3   : > { %16257 = vst [vmem:[#allocation16_spill] sm:$0xff] %v13584_v51  ;;  %v11146_v4 = vpop.f32.mrf.mxu1  ;;  %16258 = vst [vmem:[#allocation17_spill] sm:$0xff] %v13586_v42  ;;  %v4939_v51 = vshll.u32 %v12086_v14, 16 }
 0x1c4   : > { %11433 = vmatmul.mubr.bf16.gmra.mxu1 %v4910_v30  ;;  %v13589_v11 = vadd.f32 %v11146_v4, %v13461_v12  ;;  %v4926_v12 = vsel %vm16204_vm2, %v4921_v2, %v4925_v6  ;;  %v4947_v4 = vshll.u32 %v12087_v0, 16 }
 0x1c5   : > { %11436 = vmatprep.mubr.bf16.mxu1 %v4918_v50  ;;  %v3016_v3 = vpop.f32.mrf.mxu1  ;;  %v13591_v13 = vpop.f32.mrf.mxu0  ;;  %v4935_v50 = vshrl.u32 %v12085_v7, 16  ;;  %v4941_v23 = vrot.slane %v4939_v51, 1 }
 0x1c6   : > { %v13594_v31 = vadd.f32 %v3016_v3, %v13467_v1  ;;  %v4949_v14 = vrot.slane %v4947_v4, 1 }
 0x1c7   : > { %v11147_v26 = vpop.f32.mrf.mxu1  ;;  %v13596_v30 = vpop.f32.mrf.mxu0  ;;  %v4937_v6 = vor.u32 %v4935_v50, %v4933_v48  ;;  %v4945_v33 = vor.u32 %v4943_v25, %v4941_v23 }
 0x1c8   : > { %v13599_v55 = vadd.f32 %v11147_v26, %v13469_v44  ;;  %v12088_v44 = vld [vmem:[#allocation2 + $0x74] sm:$0xff]  }
 0x1c9   : > { %v3019_v60 = vpop.f32.mrf.mxu1  ;;  %v13602_v21 = vpop.f32.mrf.mxu0  ;;  %v4950_v25 = vsel %vm16204_vm2, %v4945_v33, %v4949_v14  ;;  %v4959_v4 = vshrl.u32 %v12088_v44, 16 }
 0x1ca   : > { %v13606_v1 = vadd.f32 %v3019_v60, %v13475_v32 }
 0x1cb   : > { %v13608_v42 = vpop.f32.mrf.mxu0 }
 0x1cc   : > { %16259 = vst [vmem:[#allocation18_spill] sm:$0xff] %v13606_v1  ;;  %v11150_v3 = vpop.f32.mrf.mxu1  ;;  %11437 = vmatmul.mubr.bf16.gmra.mxu1 %v4926_v12  ;;  %16260 = vst [vmem:[#allocation19_spill] sm:$0xff] %v13608_v42  ;;  %v4955_v1 = vshll.u32 %v12088_v44, 16 }
 0x1cd   : > { %v13611_v26 = vadd.f32 %v11150_v3, %v13477_v34  ;;  %11440 = vmatprep.mubr.bf16.mxu1 %v4934_v45  ;;  %v4942_v34 = vsel %vm16204_vm2, %v4937_v6, %v4941_v23  ;;  %v4951_v45 = vshrl.u32 %v12087_v0, 16  ;;  %v4963_v3 = vshll.u32 %v12089_v41, 16 }
 0x1ce   : > { %v3032_v7 = vpop.f32.mrf.mxu1  ;;  %v13613_v2 = vpop.f32.mrf.mxu0  ;;  %v4957_v22 = vrot.slane %v4955_v1, 1 }
 0x1cf   : > { %v13616_v32 = vadd.f32 %v3032_v7, %v13480_v8  ;;  %v4953_v23 = vor.u32 %v4951_v45, %v4949_v14  ;;  %v4965_v44 = vrot.slane %v4963_v3, 1 }
 0x1d0   : > { %v11151_v60 = vpop.f32.mrf.mxu1  ;;  %v13618_v12 = vpop.f32.mrf.mxu0  ;;  %v4961_v33 = vor.u32 %v4959_v4, %v4957_v22 }
 0x1d1   : > { %v13621_v51 = vadd.f32 %v11151_v60, %v13482_v17  ;;  %v12090_v17 = vld [vmem:[#allocation2 + $0x84] sm:$0xff]  }
 0x1d2   : > { %v3035_v48 = vpop.f32.mrf.mxu1  ;;  %v13624_v50 = vpop.f32.mrf.mxu0  ;;  %v4966_v4 = vsel %vm16204_vm2, %v4961_v33, %v4965_v44  ;;  %v4975_v3 = vshrl.u32 %v12090_v17, 16 }
 0x1d3   : > { %v13628_v8 = vadd.f32 %v3035_v48, %v13485_v53 }
 0x1d4   : > { %v11154_v7 = vpop.f32.mrf.mxu1  ;;  %11441 = vmatmul.mubr.bf16.gmra.mxu1 %v4942_v34  ;;  %v13630_v42 = vpop.f32.mrf.mxu0 }
 0x1d5   : > { %16261 = vst [vmem:[#allocation20_spill] sm:$0xff] %v13628_v8  ;;  %16262 = vst [vmem:[#allocation21_spill] sm:$0xff] %v13630_v42  ;;  %v13633_v60 = vadd.f32 %v11154_v7, %v13489_v20  ;;  %11444 = vmatprep.mubr.bf16.mxu1 %v4950_v25  ;;  %v4971_v8 = vshll.u32 %v12090_v17, 16  ;;  %v4958_v20 = vsel %vm16204_vm2, %v4953_v23, %v4957_v22  ;;  %v4967_v25 = vshrl.u32 %v12089_v41, 16 }
 0x1d6   : > { %v3048_v0 = vpop.f32.mrf.mxu1  ;;  %v13635_v6 = vpop.f32.mrf.mxu0  ;;  %v4979_v7 = vshll.u32 %v12091_v63, 16  ;;  %v12092_v22 = vld [vmem:[#allocation2 + $0x94] ss:$0 sps:$4 sm:$0x11]  }
 0x1d7   : > { %v13638_v53 = vadd.f32 %v3048_v0, %v13492_v47  ;;  %v4973_v42 = vrot.slane %v4971_v8, 1  ;;  %v4983_v8 = vshrl.u32 %v12091_v63, 16 }
 0x1d8   : > { %v11155_v48 = vpop.f32.mrf.mxu1  ;;  %v13640_v34 = vpop.f32.mrf.mxu0 }
 0x1d9   : > { %v13643_v1 = vadd.f32 %v11155_v48, %v13494_v38  ;;  %v4969_v38 = vor.u32 %v4967_v25, %v4965_v44  ;;  %v4977_v48 = vor.u32 %v4975_v3, %v4973_v42 }
 0x1da   : > { %v13646_v14 = vpop.f32.mrf.mxu1  ;;  %v13648_v45 = vpop.f32.mrf.mxu0 }
 0x1db   : > { %16263 = vst [vmem:[#allocation22_spill] sm:$0xff] %v13646_v14  ;;  %v4981_v14 = vrot.slane %v4979_v7, 1 }
 0x1dc   : > { %v11158_v47 = vpop.f32.mrf.mxu1  ;;  %11445 = vmatmul.mubr.bf16.gmra.mxu1 %v4958_v20  ;;  %v13651_v0 = vpop.f32.mrf.mxu0 }
 0x1dd   : > { %16264 = vst [vmem:[#allocation23_spill] sm:$0xff] %v13651_v0  ;;  %v13654_v57 = vadd.f32 %v11158_v47, %v13501_v61  ;;  %11448 = vmatprep.mubr.bf16.mxu1 %v4966_v4  ;;  %v4974_v61 = vsel %vm16204_vm2, %v4969_v38, %v4973_v42  ;;  %v4987_v4 = vshll.u32 %v12092_v22, 16  ;;  %v4982_v3 = vsel %vm16204_vm2, %v4977_v48, %v4981_v14  ;;  %v16269_v48 = vld [vmem:[#allocation3_spill] sm:$0xff] }
 0x1de   : > { %v3064_v41 = vpop.f32.mrf.mxu1  ;;  %v13656_v23 = vpop.f32.mrf.mxu0  ;;  %v429_v0 = vadd.s32 16, %v16269_v48 }
 0x1df   : > { %v13659_v33 = vadd.f32 %v3064_v41, %v13504_v58  ;;  %v4989_v41 = vrot.slane %v4987_v4, 1 }
 0x1e0   : > { %v11159_v17 = vpop.f32.mrf.mxu1  ;;  %v13661_v28 = vpop.f32.mrf.mxu0 }
 0x1e1   : > { %v13664_v20 = vadd.f32 %v11159_v17, %v13506_v62  ;;  %v4985_v62 = vor.u32 %v4983_v8, %v4981_v14 }
 0x1e2   : > { %v13667_v44 = vpop.f32.mrf.mxu1  ;;  %v13669_v25 = vpop.f32.mrf.mxu0 }
 0x1e3   : > { %16265 = vst [vmem:[#allocation24_spill] sm:$0xff] %v13667_v44  ;;  %v463_v44 = vand.u32 15, %v16269_v48 }
 0x1e4   : > { %v11162_v7 = vpop.f32.mrf.mxu1  ;;  %11449 = vmatmul.mubr.bf16.gmra.mxu1 %v4974_v61  ;;  %v13672_v58 = vpop.f32.mrf.mxu0 }
 0x1e5   : > { %16266 = vst [vmem:[#allocation25_spill] sm:$0xff] %v13672_v58  ;;  %v13675_v47 = vadd.f32 %v11162_v7, %v13514_v27  ;;  %11452 = vmatprep.mubr.bf16.mxu1 %v4982_v3  ;;  %v4990_v27 = vsel %vm16204_vm2, %v4985_v62, %v4989_v41  ;;  %v433_v62 = vadd.s32 48, %v16269_v48  ;;  %vm843_vm4 = vcmp.ge.s32.totalorder %v463_v44, 1 }
 0x1e6   : > { %v3080_v17 = vpop.f32.mrf.mxu1  ;;  %v13677_v42 = vpop.f32.mrf.mxu0 }
 0x1e7   : > { %16267 = vst [vmem:[#allocation26_spill] sm:$0xff] %v13677_v42  ;;  %v13680_v63 = vadd.f32 %v3080_v17, %v13516_v19  ;;  %v477_v19 = vand.u32 15, %v429_v0 }
 0x1e8   : > { %v11163_v38 = vpop.f32.mrf.mxu1  ;;  %v13682_v22 = vpop.f32.mrf.mxu0 }
 0x1e9   : > { %16268 = vst [vmem:[#allocation27_spill] sm:$0xff] %v13682_v22  ;;  %v13686_v61 = vadd.f32 %v11163_v38, %v13518_v37  ;;  %vm845_vm3 = vcmp.ge.s32.totalorder %v477_v19, 1 }
 0x1ea   : > { %v13689_v7 = vpop.f32.mrf.mxu1  ;;  %v13691_v14 = vpop.f32.mrf.mxu0 }
 0x1eb   : > { %16270 = vst [vmem:[#allocation3_spill] sm:$0xff] %v13689_v7  ;;  %16271 = vst [vmem:[#allocation28_spill] sm:$0xff] %v13691_v14 }
 0x1ec   : > { %v11166_v8 = vpop.f32.mrf.mxu1  ;;  %11453 = vmatmul.mubr.bf16.gmra.mxu1 %v4990_v27  ;;  %v13693_v4 = vpop.f32.mrf.mxu0 }
 0x1ed   : > { %16272 = vst [vmem:[#allocation29_spill] sm:$0xff] %v13693_v4  ;;  %v13696_v3 = vadd.f32 %v11166_v8, %v13526_v18  ;;  %v431_v18 = vadd.s32 32, %v16269_v48  ;;  %v16179_v8 = vmov 0.0  }
 0x1ee   : > { %v3096_v17 = vpop.f32.mrf.mxu1  ;;  %v11282_v58 = vpop.f32.mrf.mxu0  ;;  %v13710_v7 = vsel %vm845_vm3, 1.0, %v16179_v8  ;;  %v13716_v19 = vsel %vm843_vm4, 1.0, %v16179_v8 }
 0x1ef   : > { %16273 = vst [vmem:[#allocation30_spill] sm:$0xff] %v13696_v3  ;;  %v13700_v37 = vadd.f32 %v3096_v17, %v13530_v35  ;;  %16277 = vst [vmem:[#allocation34_spill] sm:$0xff] %v13710_v7  ;;  %v505_v35 = vand.u32 15, %v433_v62  ;;  %v3145_v44 = vmul.f32 %v13710_v7, %v13545_v59  ;;  %v437_v62 = vadd.s32 80, %v16269_v48 }
 0x1f0   : > { %v11167_v41 = vpop.f32.mrf.mxu1  ;;  %v3792_v38 = vpop.f32.mrf.mxu0  ;;  %16279 = vst [vmem:[#allocation36_spill] sm:$0xff] %v13716_v19 }
 0x1f1   : > { %16274 = vst [vmem:[#allocation31_spill] sm:$0xff] %v13700_v37  ;;  %v13704_v27 = vadd.f32 %v11167_v41, %v13534_v54  ;;  %vm849_vm5 = vcmp.ge.s32.totalorder %v505_v35, 1 }
 0x1f2   : > { %v13706_v4 = vpop.f32.mrf.mxu1  ;;  %v11283_v0 = vpop.f32.mrf.mxu0 }
 0x1f3   : > { %16275 = vst [vmem:[#allocation32_spill] sm:$0xff] %v13704_v27  ;;  %16276 = vst [vmem:[#allocation33_spill] sm:$0xff] %v13706_v4  ;;  %v491_v4 = vand.u32 15, %v431_v18  ;;  %v16280_v18 = vmov 0.0  }
 0x1f4   : > { %v11234_v17 = vpop.f32.mrf.mxu1  ;;  %v13712_v52 = vpop.f32.mrf.mxu0  ;;  %v13733_v35 = vsel %vm849_vm5, 1.0, %v16280_v18 }
 0x1f5   : > { %16278 = vst [vmem:[#allocation35_spill] sm:$0xff] %v13712_v52  ;;  %v3543_v14 = vadd.f32 %v11234_v17, %v13528_v56  ;;  %v3143_v56 = vmul.f32 %v13716_v19, %v13550_v46  ;;  %vm847_vm6 = vcmp.ge.s32.totalorder %v491_v4, 1  ;;  %16281 = vst [vmem:[#allocation37_spill] sm:$0xff] %v13733_v35 }
 0x1f6   : > { %v3534_v54 = vpop.f32.mrf.mxu1  ;;  %v11286_v41 = vpop.f32.mrf.mxu0 }
 0x1f7   : > { %v3921_v27 = vadd.f32 %v11282_v58, %v3543_v14  ;;  %v3535_v37 = vadd.f32 %v3534_v54, %v13532_v24  ;;  %v435_v58 = vadd.s32 64, %v16269_v48  ;;  %v533_v54 = vand.u32 15, %v437_v62 }
 0x1f8   : > { %v11235_v22 = vpop.f32.mrf.mxu1  ;;  %v3808_v3 = vpop.f32.mrf.mxu0 }
 0x1f9   : > { %v13724_v17 = vadd.f32 %v3921_v27, %v3145_v44  ;;  %v3919_v8 = vadd.f32 %v3792_v38, %v3535_v37  ;;  %v3546_v52 = vadd.f32 %v11235_v22, %v13539_v15  ;;  %v13742_v22 = vsel %vm847_vm6, 1.0, %v16280_v18 }
 0x1fa   : > { %v13727_v42 = vpop.f32.mrf.mxu1  ;;  %v11287_v59 = vpop.f32.mrf.mxu0  ;;  %16282 = vst [vmem:[#allocation38_spill] sm:$0xff] %v13742_v22  ;;  %v519_v27 = vand.u32 15, %v435_v58  ;;  %vm853_vm7 = vcmp.ge.s32.totalorder %v533_v54, 1  ;;  %v441_v44 = vadd.s32 112, %v16269_v48 }
 0x1fb   : > { %v13730_v24 = vadd.f32 %v3919_v8, %v3143_v56  ;;  %v3922_v14 = vadd.f32 %v11283_v0, %v3546_v52  ;;  %v3149_v52 = vmul.f32 %v13733_v35, %v13567_v29  ;;  %v13759_v54 = vsel %vm853_vm7, 1.0, %v16280_v18 }
 0x1fc   : > { %v11238_v7 = vpop.f32.mrf.mxu1  ;;  %v13735_v46 = vpop.f32.mrf.mxu0  ;;  %vm851_vm8 = vcmp.ge.s32.totalorder %v519_v27, 1  ;;  %16283 = vst [vmem:[#allocation39_spill] sm:$0xff] %v13759_v54 }
 0x1fd   : > { %v13738_v37 = vadd.f32 %v3922_v14, %v13555_v16  ;;  %v3559_v15 = vadd.f32 %v11238_v7, %v13547_v39  ;;  %v3147_v39 = vmul.f32 %v13742_v22, %v13572_v5 }
 0x1fe   : > { %v3550_v4 = vpop.f32.mrf.mxu1  ;;  %v11290_v38 = vpop.f32.mrf.mxu0 }
 0x1ff   : > { %v3925_v0 = vadd.f32 %v11286_v41, %v3559_v15  ;;  %v3551_v8 = vadd.f32 %v3550_v4, %v13552_v49  ;;  %v439_v41 = vadd.s32 96, %v16269_v48  ;;  %v561_v15 = vand.u32 15, %v441_v44 }
 0x200   : > { %v11239_v62 = vpop.f32.mrf.mxu1  ;;  %v3824_v16 = vpop.f32.mrf.mxu0 }
 0x201   : > { %v13750_v7 = vadd.f32 %v3925_v0, %v3149_v52  ;;  %v3923_v56 = vadd.f32 %v3808_v3, %v3551_v8  ;;  %v3562_v14 = vadd.f32 %v11239_v62, %v13558_v43  ;;  %v13768_v52 = vsel %vm851_vm8, 1.0, %v16280_v18 }
 0x202   : > { %v13753_v19 = vpop.f32.mrf.mxu1  ;;  %v11291_v29 = vpop.f32.mrf.mxu0  ;;  %16285 = vst [vmem:[#allocation41_spill] sm:$0xff] %v13768_v52  ;;  %v547_v8 = vand.u32 15, %v439_v41  ;;  %vm857_vm9 = vcmp.ge.s32.totalorder %v561_v15, 1 }
 0x203   : > { %v13756_v49 = vadd.f32 %v3923_v56, %v3147_v39  ;;  %v3926_v58 = vadd.f32 %v11287_v59, %v3562_v14  ;;  %v3153_v59 = vmul.f32 %v13759_v54, %v13589_v11  ;;  %v445_v39 = vadd.s32 144, %v16269_v48 }
 0x204   : > { %v11242_v4 = vpop.f32.mrf.mxu1  ;;  %v13761_v5 = vpop.f32.mrf.mxu0  ;;  %vm855_vm10 = vcmp.ge.s32.totalorder %v547_v8, 1  ;;  %v13785_v15 = vsel %vm857_vm9, 1.0, %v16280_v18 }
 0x205   : > { %v13764_v3 = vadd.f32 %v3926_v58, %v13577_v40  ;;  %v3575_v43 = vadd.f32 %v11242_v4, %v13569_v9  ;;  %v3151_v9 = vmul.f32 %v13768_v52, %v13594_v31  ;;  %16288 = vst [vmem:[#allocation44_spill] sm:$0xff] %v13785_v15 }
 0x206   : > { %v3566_v27 = vpop.f32.mrf.mxu1  ;;  %v11294_v0 = vpop.f32.mrf.mxu0 }
 0x207   : > { %16284 = vst [vmem:[#allocation40_spill] sm:$0xff] %v13764_v3  ;;  %v3929_v62 = vadd.f32 %v11290_v38, %v3575_v43  ;;  %v3567_v44 = vadd.f32 %v3566_v27, %v13574_v36  ;;  %v443_v38 = vadd.s32 128, %v16269_v48  ;;  %v589_v43 = vand.u32 15, %v445_v39 }
 0x208   : > { %v11243_v56 = vpop.f32.mrf.mxu1  ;;  %v3840_v40 = vpop.f32.mrf.mxu0 }
 0x209   : > { %v13776_v14 = vadd.f32 %v3929_v62, %v3153_v59  ;;  %v3927_v58 = vadd.f32 %v3824_v16, %v3567_v44  ;;  %v3578_v4 = vadd.f32 %v11243_v56, %v13580_v10  ;;  %v13794_v59 = vsel %vm855_vm10, 1.0, %v16280_v18 }
 0x20a   : > { %v13779_v22 = vpop.f32.mrf.mxu1  ;;  %v11295_v11 = vpop.f32.mrf.mxu0  ;;  %16290 = vst [vmem:[#allocation46_spill] sm:$0xff] %v13794_v59  ;;  %v575_v44 = vand.u32 15, %v443_v38  ;;  %vm861_vm11 = vcmp.ge.s32.totalorder %v589_v43, 1 }
 0x20b   : > { %16286 = vst [vmem:[#allocation42_spill] sm:$0xff] %v13776_v14  ;;  %v13782_v36 = vadd.f32 %v3927_v58, %v3151_v9  ;;  %v3930_v41 = vadd.f32 %v11291_v29, %v3578_v4  ;;  %v3157_v29 = vmul.f32 %v13785_v15, %v13611_v26  ;;  %v449_v9 = vadd.s32 176, %v16269_v48  ;;  %v16352_v14 = vld [vmem:[#allocation35_spill] sm:$0xff] }
 0x20c   : > { %v11246_v27 = vpop.f32.mrf.mxu1  ;;  %v13787_v31 = vpop.f32.mrf.mxu0  ;;  %vm859_vm12 = vcmp.ge.s32.totalorder %v575_v44, 1  ;;  %v13811_v43 = vsel %vm861_vm11, 1.0, %v16280_v18 }
 0x20d   : > { %16287 = vst [vmem:[#allocation43_spill] sm:$0xff] %v13782_v36  ;;  %v13790_v16 = vadd.f32 %v3930_v41, %v13599_v55  ;;  %v3591_v10 = vadd.f32 %v11246_v27, %v13591_v13  ;;  %v3155_v13 = vmul.f32 %v13794_v59, %v13616_v32  ;;  %16293 = vst [vmem:[#allocation49_spill] sm:$0xff] %v13811_v43  ;;  %v16348_v36 = vld [vmem:[#allocation7_spill] sm:$0xff] }
 0x20e   : > { %v3582_v8 = vpop.f32.mrf.mxu1  ;;  %v11298_v62 = vpop.f32.mrf.mxu0 }
 0x20f   : > { %16289 = vst [vmem:[#allocation45_spill] sm:$0xff] %v13790_v16  ;;  %v3933_v56 = vadd.f32 %v11294_v0, %v3591_v10  ;;  %v3583_v39 = vadd.f32 %v3582_v8, %v13596_v30  ;;  %v447_v0 = vadd.s32 160, %v16269_v48  ;;  %v617_v10 = vand.u32 15, %v449_v9  ;;  %v16344_v16 = vld [vmem:[#allocation6_spill] sm:$0xff] }
 0x210   : > { %v11247_v58 = vpop.f32.mrf.mxu1  ;;  %v3856_v55 = vpop.f32.mrf.mxu0 }
 0x211   : > { %v13802_v4 = vadd.f32 %v3933_v56, %v3157_v29  ;;  %v3931_v41 = vadd.f32 %v3840_v40, %v3583_v39  ;;  %v3594_v27 = vadd.f32 %v11247_v58, %v13602_v21  ;;  %v13820_v29 = vsel %vm859_vm12, 1.0, %v16280_v18 }
 0x212   : > { %v13805_v52 = vpop.f32.mrf.mxu1  ;;  %v11299_v26 = vpop.f32.mrf.mxu0  ;;  %16295 = vst [vmem:[#allocation51_spill] sm:$0xff] %v13820_v29  ;;  %v603_v39 = vand.u32 15, %v447_v0  ;;  %vm865_vm13 = vcmp.ge.s32.totalorder %v617_v10, 1 }
 0x213   : > { %16291 = vst [vmem:[#allocation47_spill] sm:$0xff] %v13802_v4  ;;  %v13808_v30 = vadd.f32 %v3931_v41, %v3155_v13  ;;  %v3934_v38 = vadd.f32 %v11295_v11, %v3594_v27  ;;  %v3161_v11 = vmul.f32 %v13811_v43, %v13633_v60  ;;  %v453_v13 = vadd.s32 208, %v16269_v48 }
 0x214   : > { %v11250_v8 = vpop.f32.mrf.mxu1  ;;  %v13813_v32 = vpop.f32.mrf.mxu0  ;;  %vm863_vm14 = vcmp.ge.s32.totalorder %v603_v39, 1  ;;  %v13837_v10 = vsel %vm865_vm13, 1.0, %v16280_v18 }
 0x215   : > { %16292 = vst [vmem:[#allocation48_spill] sm:$0xff] %v13808_v30  ;;  %v13816_v40 = vadd.f32 %v3934_v38, %v13621_v51  ;;  %v3607_v21 = vadd.f32 %v11250_v8, %v13613_v2  ;;  %v3159_v2 = vmul.f32 %v13820_v29, %v13638_v53  ;;  %16298 = vst [vmem:[#allocation54_spill] sm:$0xff] %v13837_v10  ;;  %v16342_v30 = vld [vmem:[#allocation12_spill] sm:$0xff] }
 0x216   : > { %v3598_v44 = vpop.f32.mrf.mxu1  ;;  %v11302_v56 = vpop.f32.mrf.mxu0 }
 0x217   : > { %16294 = vst [vmem:[#allocation50_spill] sm:$0xff] %v13816_v40  ;;  %v3937_v58 = vadd.f32 %v11298_v62, %v3607_v21  ;;  %v3599_v9 = vadd.f32 %v3598_v44, %v13618_v12  ;;  %v451_v62 = vadd.s32 192, %v16269_v48  ;;  %v645_v21 = vand.u32 15, %v453_v13 }
 0x218   : > { %v11251_v41 = vpop.f32.mrf.mxu1  ;;  %v3872_v51 = vpop.f32.mrf.mxu0 }
 0x219   : > { %v13828_v27 = vadd.f32 %v3937_v58, %v3161_v11  ;;  %v3935_v38 = vadd.f32 %v3856_v55, %v3599_v9  ;;  %v3610_v8 = vadd.f32 %v11251_v41, %v13624_v50  ;;  %v13846_v11 = vsel %vm863_vm14, 1.0, %v16280_v18 }
 0x21a   : > { %v13831_v59 = vpop.f32.mrf.mxu1  ;;  %v11303_v60 = vpop.f32.mrf.mxu0  ;;  %16300 = vst [vmem:[#allocation56_spill] sm:$0xff] %v13846_v11  ;;  %v631_v9 = vand.u32 15, %v451_v62  ;;  %vm869_vm15 = vcmp.ge.s32.totalorder %v645_v21, 1 }
 0x21b   : > { %16296 = vst [vmem:[#allocation52_spill] sm:$0xff] %v13828_v27  ;;  %v13834_v12 = vadd.f32 %v3935_v38, %v3159_v2  ;;  %v3938_v0 = vadd.f32 %v11299_v26, %v3610_v8  ;;  %v3165_v26 = vmul.f32 %v13837_v10, %v13654_v57  ;;  %v457_v2 = vadd.s32 240, %v16269_v48 }
 0x21c   : > { %v11254_v44 = vpop.f32.mrf.mxu1  ;;  %v13839_v53 = vpop.f32.mrf.mxu0  ;;  %vm867_vm1 = vcmp.ge.s32.totalorder %v631_v9, 1  ;;  %v13863_v21 = vsel %vm869_vm15, 1.0, %v16280_v18 }
 0x21d   : > { %16297 = vst [vmem:[#allocation53_spill] sm:$0xff] %v13834_v12  ;;  %v13842_v55 = vadd.f32 %v3938_v0, %v13643_v1  ;;  %v3623_v50 = vadd.f32 %v11254_v44, %v13635_v6  ;;  %v3163_v6 = vmul.f32 %v13846_v11, %v13659_v33  ;;  %16303 = vst [vmem:[#allocation59_spill] sm:$0xff] %v13863_v21 }
 0x21e   : > { %v3614_v39 = vpop.f32.mrf.mxu1  ;;  %v11306_v58 = vpop.f32.mrf.mxu0 }
 0x21f   : > { %16299 = vst [vmem:[#allocation55_spill] sm:$0xff] %v13842_v55  ;;  %v3941_v41 = vadd.f32 %v11302_v56, %v3623_v50  ;;  %v3615_v13 = vadd.f32 %v3614_v39, %v13640_v34  ;;  %v455_v56 = vadd.s32 224, %v16269_v48  ;;  %v673_v50 = vand.u32 15, %v457_v2 }
 0x220   : > { %v11255_v38 = vpop.f32.mrf.mxu1  ;;  %v3888_v1 = vpop.f32.mrf.mxu0 }
 0x221   : > { %v13854_v8 = vadd.f32 %v3941_v41, %v3165_v26  ;;  %v3939_v0 = vadd.f32 %v3872_v51, %v3615_v13  ;;  %v3626_v44 = vadd.f32 %v11255_v38, %v13648_v45  ;;  %v13872_v26 = vsel %vm867_vm1, 1.0, %v16280_v18 }
 0x222   : > { %v13857_v29 = vpop.f32.mrf.mxu1  ;;  %v11307_v57 = vpop.f32.mrf.mxu0  ;;  %16305 = vst [vmem:[#allocation61_spill] sm:$0xff] %v13872_v26  ;;  %v659_v13 = vand.u32 15, %v455_v56  ;;  %vm873_vm3 = vcmp.ge.s32.totalorder %v673_v50, 1 }
 0x223   : > { %16301 = vst [vmem:[#allocation57_spill] sm:$0xff] %v13854_v8  ;;  %v13860_v34 = vadd.f32 %v3939_v0, %v3163_v6  ;;  %v3942_v62 = vadd.f32 %v11303_v60, %v3626_v44  ;;  %v3169_v60 = vmul.f32 %v13863_v21, %v13675_v47 }
 0x224   : > { %v11258_v39 = vpop.f32.mrf.mxu1  ;;  %v13865_v33 = vpop.f32.mrf.mxu0  ;;  %vm871_vm4 = vcmp.ge.s32.totalorder %v659_v13, 1 }
 0x225   : > { %16302 = vst [vmem:[#allocation58_spill] sm:$0xff] %v13860_v34  ;;  %v13868_v51 = vadd.f32 %v3942_v62, %v13664_v20  ;;  %v3639_v45 = vadd.f32 %v11258_v39, %v13656_v23  ;;  %v3167_v20 = vmul.f32 %v13872_v26, %v13680_v63  ;;  %v16310_v63 = vld [vmem:[#allocation26_spill] sm:$0xff] }
 0x226   : > { %v3630_v9 = vpop.f32.mrf.mxu1  ;;  %v11310_v41 = vpop.f32.mrf.mxu0 }
 0x227   : > { %16304 = vst [vmem:[#allocation60_spill] sm:$0xff] %v13868_v51  ;;  %v3945_v38 = vadd.f32 %v11306_v58, %v3639_v45  ;;  %v3631_v2 = vadd.f32 %v3630_v9, %v13661_v28  ;;  %v13887_v28 = vsel %vm873_vm3, 1.0, %v16280_v18 }
 0x228   : > { %v11259_v6 = vpop.f32.mrf.mxu1  ;;  %v3904_v0 = vpop.f32.mrf.mxu0  ;;  %16308 = vst [vmem:[#allocation64_spill] sm:$0xff] %v13887_v28 }
 0x229   : > { %v13879_v44 = vadd.f32 %v3945_v38, %v3169_v60  ;;  %v3943_v23 = vadd.f32 %v3888_v1, %v3631_v2  ;;  %v3642_v62 = vadd.f32 %v11259_v6, %v13669_v25  ;;  %v13894_v1 = vsel %vm871_vm4, 1.0, %v16280_v18  ;;  %v16313_v60 = vld [vmem:[#allocation30_spill] sm:$0xff] }
 0x22a   : > { %v13882_v39 = vpop.f32.mrf.mxu1  ;;  %v11311_v11 = vpop.f32.mrf.mxu0  ;;  %16311 = vst [vmem:[#allocation26_spill] sm:$0xff] %v13894_v1  ;;  %v3173_v13 = vmul.f32 %v13887_v28, %v16313_v60 }
 0x22b   : > { %16306 = vst [vmem:[#allocation62_spill] sm:$0xff] %v13879_v44  ;;  %v13884_v47 = vadd.f32 %v3943_v23, %v3167_v20  ;;  %v3946_v58 = vadd.f32 %v11307_v57, %v3642_v62  ;;  %v16314_v57 = vld [vmem:[#allocation27_spill] sm:$0xff] }
 0x22c   : > { %v11262_v56 = vpop.f32.mrf.mxu1  ;;  %v13896_v9 = vpop.f32.mrf.mxu0  ;;  %v16315_v20 = vld [vmem:[#allocation31_spill] sm:$0xff] }
 0x22d   : > { %16307 = vst [vmem:[#allocation63_spill] sm:$0xff] %v13884_v47  ;;  %v13890_v50 = vadd.f32 %v3946_v58, %v13686_v61  ;;  %v3655_v45 = vadd.f32 %v11262_v56, %v16310_v63  ;;  %16312 = vst [vmem:[#allocation66_spill] sm:$0xff] %v13896_v9  ;;  %v3171_v23 = vmul.f32 %v13894_v1, %v16315_v20  ;;  %v16317_v58 = vld [vmem:[#allocation28_spill] sm:$0xff] }
 0x22e   : > { %v3646_v25 = vpop.f32.mrf.mxu1  ;;  %v13908_v26 = vpop.f32.mrf.mxu0 }
 0x22f   : > { %16309 = vst [vmem:[#allocation65_spill] sm:$0xff] %v13890_v50  ;;  %v3949_v38 = vadd.f32 %v11310_v41, %v3655_v45  ;;  %v3647_v2 = vadd.f32 %v3646_v25, %v16314_v57  ;;  %v16320_v41 = vld [vmem:[#allocation32_spill] sm:$0xff] }
 0x230   : > { %v11263_v6 = vpop.f32.mrf.mxu1  ;;  %v13919_v57 = vpop.f32.mrf.mxu0 }
 0x231   : > { %v13903_v61 = vadd.f32 %v3949_v38, %v3173_v13  ;;  %v3947_v62 = vadd.f32 %v3904_v0, %v3647_v2  ;;  %v3658_v56 = vadd.f32 %v11263_v6, %v16317_v58 }
 0x232   : > { %v13906_v63 = vpop.f32.mrf.mxu1  ;;  %v13923_v0 = vpop.f32.mrf.mxu0 }
 0x233   : > { %16316 = vst [vmem:[#allocation30_spill] sm:$0xff] %v13903_v61  ;;  %16318 = vst [vmem:[#allocation27_spill] sm:$0xff] %v13906_v63  ;;  %v13910_v21 = vadd.f32 %v3947_v62, %v3171_v23  ;;  %v3950_v10 = vadd.f32 %v11311_v11, %v3658_v56 }
 0x234   : > { %v13912_v60 = vpop.f32.mrf.mxu1  ;;  %v13929_v6 = vpop.f32.mrf.mxu0 }
 0x235   : > { %16319 = vst [vmem:[#allocation31_spill] sm:$0xff] %v13910_v21  ;;  %v13915_v45 = vadd.f32 %v3950_v10, %v16320_v41 }
 0x236   : > { %v13917_v25 = vpop.f32.mrf.mxu1  ;;  %v13935_v10 = vpop.f32.mrf.mxu0 }
 0x237   : > { %16321 = vst [vmem:[#allocation28_spill] sm:$0xff] %v13915_v45 }
 0x238   : > { %v13921_v13 = vpop.f32.mrf.mxu1  ;;  %v13941_v58 = vpop.f32.mrf.mxu0 }
 0x23a   : > { %v13925_v38 = vpop.f32.mrf.mxu1  ;;  %v13947_v1 = vpop.f32.mrf.mxu0 }
 0x23c   : > { %v13927_v2 = vpop.f32.mrf.mxu1  ;;  %v13953_v15 = vpop.f32.mrf.mxu0 }
 0x23e   : > { %v13931_v11 = vpop.f32.mrf.mxu1  ;;  %v13959_v45 = vpop.f32.mrf.mxu0 }
 0x240   : > { %v13933_v20 = vpop.f32.mrf.mxu1  ;;  %v13965_v50 = vpop.f32.mrf.mxu0 }
 0x242   : > { %v13937_v23 = vpop.f32.mrf.mxu1  ;;  %v13971_v44 = vpop.f32.mrf.mxu0 }
 0x243   : > { %16331 = vst [vmem:[#allocation75_spill] sm:$0xff] %v13971_v44  ;;  %v16353_v44 = vld [vmem:[#allocation17_spill] sm:$0xff] }
 0x244   : > { %v13939_v62 = vpop.f32.mrf.mxu1  ;;  %v13977_v8 = vpop.f32.mrf.mxu0 }
 0x245   : > { %16334 = vst [vmem:[#allocation78_spill] sm:$0xff] %v13977_v8  ;;  %v16351_v8 = vld [vmem:[#allocation15_spill] sm:$0xff] }
 0x246   : > { %v13943_v56 = vpop.f32.mrf.mxu1  ;;  %v13983_v12 = vpop.f32.mrf.mxu0 }
 0x247   : > { %16337 = vst [vmem:[#allocation81_spill] sm:$0xff] %v13983_v12 }
 0x248   : > { %v13945_v41 = vpop.f32.mrf.mxu1 }
 0x249   : > { %16322 = vst [vmem:[#allocation32_spill] sm:$0xff] %v13945_v41  ;;  %v3570_v41 = vadd.f32 %v13779_v22, %v16353_v44  ;;  %v16361_v22 = vld [vmem:[#allocation24_spill] sm:$0xff] }
 0x24a   : > { %v13949_v28 = vpop.f32.mrf.mxu1 }
 0x24b   : > { %16323 = vst [vmem:[#allocation67_spill] sm:$0xff] %v13949_v28 }
 0x24c   : > { %v13951_v43 = vpop.f32.mrf.mxu1 }
 0x24d   : > { %16324 = vst [vmem:[#allocation68_spill] sm:$0xff] %v13951_v43  ;;  %v16347_v43 = vld [vmem:[#allocation10_spill] sm:$0xff] }
 0x24e   : > { %v13955_v54 = vpop.f32.mrf.mxu1 }
 0x24f   : > { %16325 = vst [vmem:[#allocation69_spill] sm:$0xff] %v13955_v54  ;;  %v16345_v54 = vld [vmem:[#allocation5_spill] sm:$0xff] }
 0x250   : > { %v13957_v35 = vpop.f32.mrf.mxu1 }
 0x251   : > { %16326 = vst [vmem:[#allocation70_spill] sm:$0xff] %v13957_v35  ;;  %v436_v35 = vadd.s32 72, %v16269_v48 }
 0x252   : > { %v13961_v21 = vpop.f32.mrf.mxu1 }
 0x253   : > { %16327 = vst [vmem:[#allocation71_spill] sm:$0xff] %v13961_v21 }
 0x254   : > { %v13963_v61 = vpop.f32.mrf.mxu1 }
 0x255   : > { %16328 = vst [vmem:[#allocation72_spill] sm:$0xff] %v13963_v61  ;;  %v13991_v61 = vpop.f32.mrf.mxu0 }
 0x256   : > { %v13967_v9 = vpop.f32.mrf.mxu1  ;;  %16340 = vst [vmem:[#allocation84_spill] sm:$0xff] %v13991_v61  ;;  %v2542_v61 = vadd.f32 %v16345_v54, %v16344_v16 }
 0x257   : > { %16329 = vst [vmem:[#allocation73_spill] sm:$0xff] %v13967_v9  ;;  %v428_v9 = vadd.s32 8, %v16269_v48  ;;  %v14005_v12 = vpop.f32.mrf.mxu0 }
 0x258   : > { %v13969_v47 = vpop.f32.mrf.mxu1 }
 0x259   : > { %16330 = vst [vmem:[#allocation74_spill] sm:$0xff] %v13969_v47  ;;  %v430_v47 = vadd.s32 24, %v16269_v48  ;;  %v470_v4 = vand.u32 15, %v428_v9  ;;  %v3554_v9 = vadd.f32 %v13753_v19, %v16351_v8  ;;  %v16358_v19 = vld [vmem:[#allocation11_spill] sm:$0xff] }
 0x25a   : > { %v13973_v51 = vpop.f32.mrf.mxu1 }
 0x25b   : > { %16332 = vst [vmem:[#allocation76_spill] sm:$0xff] %v13973_v51  ;;  %v484_v21 = vand.u32 15, %v430_v47  ;;  %vm14020_vm6 = vcmp.le.s32.totalorder %v470_v4, 14 }
 0x25c   : > { %v13975_v34 = vpop.f32.mrf.mxu1 }
 0x25d   : > { %16333 = vst [vmem:[#allocation77_spill] sm:$0xff] %v13975_v34  ;;  %v434_v34 = vadd.s32 56, %v16269_v48  ;;  %vm942_vm5 = vcmp.le.s32.totalorder %v484_v21, 14  ;;  %v14035_v21 = vpop.f32.mrf.mxu0 }
 0x25e   : > { %v13979_v63 = vpop.f32.mrf.mxu1  ;;  %16362 = vst [vmem:[#allocation7_spill] sm:$0xff] %v14035_v21 }
 0x25f   : > { %16335 = vst [vmem:[#allocation79_spill] sm:$0xff] %v13979_v63  ;;  %v3538_v63 = vadd.f32 %v13727_v42, %v16342_v30  ;;  %v2558_v42 = vadd.f32 %v16348_v36, %v16347_v43  ;;  %v16349_v30 = vld [vmem:[#allocation8_spill] sm:$0xff]  ;;  %v512_v28 = vand.u32 15, %v434_v34  ;;  %v526_v43 = vand.u32 15, %v436_v35 }
 0x260   : > { %v13981_v55 = vpop.f32.mrf.mxu1 }
 0x261   : > { %16336 = vst [vmem:[#allocation80_spill] sm:$0xff] %v13981_v55  ;;  %v3920_v3 = vadd.f32 %v16352_v14, %v3538_v63  ;;  %v16360_v14 = vld [vmem:[#allocation22_spill] sm:$0xff]  ;;  %v14033_v44 = vadd.f32 %v16361_v22, %v2558_v42  ;;  %v3924_v63 = vadd.f32 %v13735_v46, %v3554_v9  ;;  %vm946_vm7 = vcmp.le.s32.totalorder %v512_v28, 14  ;;  %v14069_v9 = vpop.f32.mrf.mxu0 }
 0x262   : > { %v13985_v27 = vpop.f32.mrf.mxu1  ;;  %v14030_v34 = vadd.f32 %v16360_v14, %v2542_v61  ;;  %v16366_v61 = vld [vmem:[#allocation14_spill] sm:$0xff]  ;;  %v3928_v42 = vadd.f32 %v13761_v5, %v3570_v41  ;;  %v14056_v22 = vsel %vm14020_vm6, 1.0, %v16280_v18  ;;  %vm14062_vm10 = vcmp.le.s32.totalorder %v526_v43, 14  ;;  %v16373_v5 = vld [vmem:[#allocation19_spill] sm:$0xff]  ;;  %16374 = vst [vmem:[#allocation17_spill] sm:$0xff] %v14069_v9  ;;  %v16377_v43 = vld [vmem:[#allocation16_spill] sm:$0xff] }
 0x263   : > { %16338 = vst [vmem:[#allocation82_spill] sm:$0xff] %v13985_v27  ;;  %v432_v27 = vadd.s32 40, %v16269_v48  ;;  %16368 = vst [vmem:[#allocation35_spill] sm:$0xff] %v14056_v22  ;;  %v446_v28 = vadd.s32 152, %v16269_v48  ;;  %v3586_v41 = vadd.f32 %v13805_v52, %v16373_v5  ;;  %v450_v52 = vadd.s32 184, %v16269_v48  ;;  %v16379_v5 = vld [vmem:[#allocation18_spill] sm:$0xff] }
 0x264   : > { %v13987_v40 = vpop.f32.mrf.mxu1 }
 0x265   : > { %16339 = vst [vmem:[#allocation83_spill] sm:$0xff] %v13987_v40  ;;  %v438_v40 = vadd.s32 88, %v16269_v48  ;;  %v498_v16 = vand.u32 15, %v432_v27  ;;  %v440_v27 = vadd.s32 104, %v16269_v48 }
 0x266   : > { %v13993_v51 = vpop.f32.mrf.mxu1 }
 0x267   : > { %16341 = vst [vmem:[#allocation85_spill] sm:$0xff] %v13993_v51  ;;  %v540_v36 = vand.u32 15, %v438_v40  ;;  %v16364_v40 = vld [vmem:[#allocation3_spill] sm:$0xff]  ;;  %vm944_vm8 = vcmp.le.s32.totalorder %v498_v16, 14  ;;  %v14074_v16 = vsel %vm946_vm7, 1.0, %v16280_v18 }
 0x268   : > { %v13998_v55 = vpop.f32.mrf.mxu1  ;;  %16376 = vst [vmem:[#allocation11_spill] sm:$0xff] %v14074_v16 }
 0x269   : > { %16343 = vst [vmem:[#allocation12_spill] sm:$0xff] %v13998_v55  ;;  %v16350_v55 = vld [vmem:[#allocation9_spill] sm:$0xff]  ;;  %vm14058_vm9 = vcmp.le.s32.totalorder %v540_v36, 14  ;;  %v554_v36 = vand.u32 15, %v440_v27 }
 0x26a   : > { %v14007_v51 = vpop.f32.mrf.mxu1  ;;  %v2574_v47 = vadd.f32 %v16350_v55, %v16349_v30  ;;  %v442_v55 = vadd.s32 120, %v16269_v48  ;;  %v16357_v30 = vld [vmem:[#allocation13_spill] sm:$0xff]  ;;  %v14092_v27 = vsel %vm14058_vm9, 1.0, %v16280_v18 }
 0x26b   : > { %16346 = vst [vmem:[#allocation6_spill] sm:$0xff] %v14007_v51  ;;  %v14027_v8 = vadd.f32 %v16358_v19, %v16357_v30  ;;  %v14045_v30 = vsel %vm942_vm5, 1.0, %v16280_v18  ;;  %v14048_v19 = vadd.f32 %v3920_v3, %v16366_v61  ;;  %v14078_v61 = vadd.f32 %v3924_v63, %v16377_v43  ;;  %16381 = vst [vmem:[#allocation3_spill] sm:$0xff] %v14092_v27 }
 0x26c   : > { %v14018_v54 = vpop.f32.mrf.mxu1  ;;  %v14041_v35 = vadd.f32 %v16364_v40, %v2574_v47  ;;  %16365 = vst [vmem:[#allocation9_spill] sm:$0xff] %v14045_v30  ;;  %v568_v3 = vand.u32 15, %v442_v55  ;;  %v444_v40 = vadd.s32 136, %v16269_v48  ;;  %v4608_v55 = vadd.f32 %v13908_v26, %v13912_v60 }
 0x26d   : > { %16354 = vst [vmem:[#allocation5_spill] sm:$0xff] %v14018_v54  ;;  %16359 = vst [vmem:[#allocation10_spill] sm:$0xff] %v14027_v8  ;;  %v14083_v8 = vsel %vm944_vm8, 1.0, %v16280_v18  ;;  %v14097_v63 = vsel %vm14062_vm10, 1.0, %v16280_v18  ;;  %v448_v26 = vadd.s32 168, %v16269_v48  ;;  %v4600_v60 = vadd.f32 %v13919_v57, %v13917_v25  ;;  %v14105_v54 = vpop.f32.mrf.mxu0 }
 0x26e   : > { %v14037_v4 = vpop.f32.mrf.mxu1  ;;  %16378 = vst [vmem:[#allocation22_spill] sm:$0xff] %v14083_v8  ;;  %16382 = vst [vmem:[#allocation14_spill] sm:$0xff] %v14097_v63  ;;  %vm954_vm11 = vcmp.le.s32.totalorder %v568_v3, 14  ;;  %vm14107_vm12 = vcmp.le.s32.totalorder %v554_v36, 14  ;;  %v582_v21 = vand.u32 15, %v444_v40  ;;  %v624_v3 = vand.u32 15, %v450_v52 }
 0x26f   : > { %16363 = vst [vmem:[#allocation8_spill] sm:$0xff] %v14037_v4  ;;  %v16383_v4 = vld [vmem:[#allocation21_spill] sm:$0xff]  ;;  %v4603_v36 = vadd.f32 %v13929_v6, %v13925_v38  ;;  %v14132_v52 = vsel %vm14107_vm12, 1.0, %v16280_v18 }
 0x270   : > { %v14051_v14 = vpop.f32.mrf.mxu1  ;;  %v3602_v47 = vadd.f32 %v13831_v59, %v16383_v4  ;;  %v14117_v59 = vsel %vm954_vm11, 1.0, %v16280_v18  ;;  %v610_v4 = vand.u32 15, %v448_v26  ;;  %16389 = vst [vmem:[#allocation16_spill] sm:$0xff] %v14132_v52  ;;  %vm14134_vm14 = vcmp.le.s32.totalorder %v582_v21, 14 }
 0x271   : > { %16367 = vst [vmem:[#allocation15_spill] sm:$0xff] %v14051_v14  ;;  %v14087_v14 = vadd.f32 %v3928_v42, %v16379_v5  ;;  %v596_v42 = vand.u32 15, %v446_v28  ;;  %v3932_v5 = vadd.f32 %v13787_v31, %v3586_v41  ;;  %v16386_v28 = vld [vmem:[#allocation23_spill] sm:$0xff]  ;;  %16387 = vst [vmem:[#allocation19_spill] sm:$0xff] %v14117_v59  ;;  %vm14141_vm15 = vcmp.le.s32.totalorder %v624_v3, 14 }
 0x272   : > { %v14071_v51 = vpop.f32.mrf.mxu1  ;;  %v3618_v31 = vadd.f32 %v13857_v29, %v16386_v28  ;;  %v14127_v29 = vpop.f32.mrf.mxu0  ;;  %vm14149_vm1 = vcmp.le.s32.totalorder %v610_v4, 14 }
 0x273   : > { %16375 = vst [vmem:[#allocation13_spill] sm:$0xff] %v14071_v51  ;;  %16380 = vst [vmem:[#allocation24_spill] sm:$0xff] %v14087_v14  ;;  %v4611_v14 = vadd.f32 %v13923_v0, %v13921_v13  ;;  %vm958_vm13 = vcmp.le.s32.totalorder %v596_v42, 14 }
 0x274   : > { %v11426_v51 = vpop.f32.mrf.mxu1  ;;  %v14167_v28 = vpop.f32.mrf.mxu0 }
 0x275   : > { %v5218_v43 = vadd.f32 %v11426_v51, %v4608_v55  ;;  %v454_v51 = vadd.s32 216, %v16269_v48 }
 0x276   : > { %v5089_v9 = vpop.f32.mrf.mxu1 }
 0x277   : > { %v5282_v25 = vadd.f32 %v5218_v43, %v13724_v17  ;;  %v5216_v57 = vadd.f32 %v5089_v9, %v4600_v60  ;;  %v16388_v17 = vld [vmem:[#allocation20_spill] sm:$0xff]  ;;  %v3936_v9 = vadd.f32 %v13813_v32, %v3602_v47  ;;  %v14147_v43 = vsel %vm958_vm13, 1.0, %v16280_v18 }
 0x278   : > { %v11427_v41 = vpop.f32.mrf.mxu1  ;;  %v14124_v0 = vadd.f32 %v3932_v5, %v16388_v17  ;;  %16394 = vst [vmem:[#allocation18_spill] sm:$0xff] %v14147_v43  ;;  %v652_v42 = vand.u32 15, %v454_v51  ;;  %v4627_v51 = vadd.f32 %v13947_v1, %v13933_v20  ;;  %v14206_v1 = vadd.s32 200, %v16269_v48  ;;  %v14211_v17 = vpop.f32.mrf.mxu0 }
 0x279   : > { %v5280_v40 = vadd.f32 %v5216_v57, %v13730_v24  ;;  %v5219_v13 = vadd.f32 %v11427_v41, %v4611_v14  ;;  %v4624_v24 = vadd.f32 %v13935_v10, %v13927_v2  ;;  %v3940_v14 = vadd.f32 %v13839_v53, %v3618_v31  ;;  %v14158_v10 = vld [vmem:[%s16160_s6] ss:$0 sm:$0xff]  ;;  %v16397_v57 = vld [vmem:[#allocation25_spill] sm:$0xff] }
 0x27a   : > { %v5092_v55 = vpop.f32.mrf.mxu1  ;;  %v4616_v2 = vadd.f32 %v13941_v58, %v13931_v11  ;;  %v14163_v46 = vadd.f32 %v3936_v9, %v14030_v34  ;;  %v3634_v3 = vadd.f32 %v13882_v39, %v16397_v57  ;;  %v14172_v11 = vsel %vm14134_vm14, 1.0, %v16280_v18 }
 0x27b   : > { %v5251_v38 = vmul.f32 %v14045_v30, %v5219_v13  ;;  %v5217_v6 = vadd.f32 %v5092_v55, %v4603_v36  ;;  %16398 = vst [vmem:[#allocation21_spill] sm:$0xff] %v14172_v11  ;;  %v14180_v58 = vadd.f32 %v14158_v10, %v5280_v40  ;;  %v14185_v4 = vadd.f32 %v3940_v14, %v14033_v44 }
 0x27c   : > { %v11430_v60 = vpop.f32.mrf.mxu1  ;;  %v14190_v36 = vadd.f32 %v14158_v10, %v5282_v25  ;;  %v14195_v40 = vsel %vm14149_vm1, 1.0, %v16280_v18  ;;  %vm14201_vm3 = vcmp.le.s32.totalorder %v652_v42, 14  ;;  %v3944_v20 = vadd.f32 %v13865_v33, %v3634_v3  ;;  %v16403_v42 = vld [vmem:[#allocation32_spill] sm:$0xff] }
 0x27d   : > { %v5283_v5 = vadd.f32 %v5251_v38, %v13738_v37  ;;  %v5249_v53 = vmul.f32 %v14056_v22, %v5217_v6  ;;  %v5222_v47 = vadd.f32 %v11430_v60, %v4624_v24  ;;  %v14177_v37 = vsel %vm14141_vm15, 1.0, %v16280_v18  ;;  %16400 = vst [vmem:[#allocation20_spill] sm:$0xff] %v14195_v40 }
 0x27e   : > { %v5105_v31 = vpop.f32.mrf.mxu1  ;;  %16399 = vst [vmem:[#allocation23_spill] sm:$0xff] %v14177_v37  ;;  %v4619_v25 = vadd.f32 %v13953_v15, %v13937_v23  ;;  %v5389_v24 = vmul.f32 %v14180_v58, %v14180_v58  ;;  %v4632_v15 = vadd.f32 %v13965_v50, %v13943_v56  ;;  %v5391_v23 = vmul.f32 %v14190_v36, %v14190_v36  ;;  %v16405_v56 = vld [vmem:[#allocation40_spill] sm:$0xff] }
 0x27f   : > { %v5281_v34 = vadd.f32 %v5249_v53, %v14048_v19  ;;  %v5286_v39 = vadd.f32 %v5222_v47, %v13750_v7  ;;  %v5220_v41 = vadd.f32 %v5105_v31, %v4616_v2  ;;  %v14214_v9 = vadd.f32 %v14158_v10, %v5283_v5  ;;  %v16404_v2 = vld [vmem:[#allocation75_spill] sm:$0xff]  ;;  %v14235_v53 = vpop.f32.mrf.mxu0 }
 0x280   : > { %v11431_v13 = vpop.f32.mrf.mxu1  ;;  %v4643_v5 = vadd.f32 %v16404_v2, %v16403_v42  ;;  %v12093_v31 = vld [vmem:[%s16161_s7 + $0xf8] sm:$0xff]   ;;  %v14273_v42 = vsel %vm14201_vm3, 1.0, %v16280_v18  ;;  %v12094_v2 = vld [vmem:[%s16161_s7 + $0xf0] sm:$0xff]  }
 0x281   : > { %v14198_v19 = vadd.f32 %v14158_v10, %v5281_v34  ;;  %v5284_v7 = vadd.f32 %v5220_v41, %v13756_v49  ;;  %v5223_v55 = vadd.f32 %v11431_v13, %v4627_v51  ;;  %v4640_v49 = vadd.f32 %v13959_v45, %v13939_v62  ;;  %v12098_v34 = vld [vmem:[%s16161_s7 + $0x38] sm:$0xff]   ;;  %v16406_v13 = vld [vmem:[#allocation42_spill] sm:$0xff]  ;;  %11456 = vmatprep.subr.bf16.mxu0 %v12093_v31 }
 0x282   : > { %v5108_v26 = vpop.f32.mrf.mxu1  ;;  %v5392_v50 = vmul.f32 %v14214_v9, %v14214_v9  ;;  %11504 = vmatprep.subr.bf16.mxu1 %v12098_v34  ;;  %11457 = vmatpush3.bf16.msra.mxu0 %v12093_v31  ;;  %16410 = vst [vmem:[#allocation25_spill] sm:$0xff] %v14273_v42 }
 0x283   : > { %v5351_v38 = vadd.f32 %v14198_v19, %v14180_v58  ;;  %v5390_v33 = vmul.f32 %v14198_v19, %v14198_v19  ;;  %v5255_v6 = vmul.f32 %v14074_v16, %v5223_v55  ;;  %v5221_v32 = vadd.f32 %v5108_v26, %v4619_v25  ;;  %v16407_v55 = vld [vmem:[#allocation67_spill] sm:$0xff]  ;;  %v16408_v26 = vld [vmem:[#allocation78_spill] sm:$0xff]  ;;  %11505 = vmatpush3.bf16.msra.mxu1 %v12098_v34 }
 0x284   : > { %v11434_v14 = vpop.f32.mrf.mxu1  ;;  %v14230_v62 = vadd.f32 %v14158_v10, %v5284_v7  ;;  %11458 = vmatprep.subr.bf16.mxu0 %v12094_v2 }
 0x285   : > { %v5421_v45 = vadd.f32 %v5390_v33, %v5389_v24  ;;  %v5352_v60 = vadd.f32 %v5351_v38, %v14190_v36  ;;  %v5226_v21 = vadd.f32 %v11434_v14, %v4640_v49  ;;  %v5287_v47 = vadd.f32 %v5255_v6, %v16405_v56 }
 0x286   : > { %v5253_v57 = vmul.f32 %v14083_v8, %v5221_v32  ;;  %v5121_v3 = vpop.f32.mrf.mxu1  ;;  %v4635_v49 = vadd.f32 %v16408_v26, %v16407_v55  ;;  %v14254_v24 = vadd.f32 %v14158_v10, %v5286_v39  ;;  %v638_v6 = vand.u32 15, %v14206_v1  ;;  %v14265_v39 = vpop.f32.mrf.mxu0  ;;  %11459 = vmatpush3.bf16.msra.mxu0 %v12094_v2  ;;  %v12101_v2 = vld [vmem:[%s16161_s7 + $0x28] sm:$0xff]  }
 0x287   : > { %v5353_v41 = vadd.f32 %v5352_v60, %v14214_v9  ;;  %v5422_v51 = vadd.f32 %v5421_v45, %v5391_v23  ;;  %v14249_v7 = vadd.f32 %v5226_v21, %v16406_v13  ;;  %v5224_v25 = vadd.f32 %v5121_v3, %v4632_v15  ;;  %v16409_v15 = vld [vmem:[#allocation43_spill] sm:$0xff]  ;;  %v16413_v13 = vld [vmem:[#allocation69_spill] sm:$0xff] }
 0x288   : > { %v5285_v38 = vadd.f32 %v5253_v57, %v14078_v61  ;;  %v11435_v33 = vpop.f32.mrf.mxu1  ;;  %v5393_v23 = vmul.f32 %v14230_v62, %v14230_v62  ;;  %v14263_v60 = vadd.f32 %v3944_v20, %v14041_v35  ;;  %v12099_v35 = vld [vmem:[%s16161_s7 + $0x30] sm:$0xff]   ;;  %v16411_v20 = vld [vmem:[#allocation68_spill] sm:$0xff]  ;;  %vm14315_vm4 = vcmp.le.s32.totalorder %v638_v6, 14 }
 0x289   : > { %v5354_v32 = vadd.f32 %v5353_v41, %v14230_v62  ;;  %v5423_v14 = vadd.f32 %v5422_v51, %v5392_v50  ;;  %v5288_v45 = vadd.f32 %v5224_v25, %v16409_v15  ;;  %v5227_v1 = vadd.f32 %v11435_v33, %v4643_v5  ;;  %v16412_v50 = vld [vmem:[#allocation81_spill] sm:$0xff]  ;;  %11506 = vmatprep.subr.bf16.mxu1 %v12099_v35  ;;  %v16414_v25 = vld [vmem:[#allocation84_spill] sm:$0xff] }
 0x28a   : > { %v14268_v61 = vadd.f32 %v14158_v10, %v5285_v38  ;;  %v5124_v21 = vpop.f32.mrf.mxu1  ;;  %v4656_v56 = vadd.f32 %v16412_v50, %v16411_v20  ;;  %v14284_v5 = vadd.f32 %v14158_v10, %v5287_v47  ;;  %v14291_v51 = vadd.s32 248, %v16269_v48  ;;  %v14298_v38 = vpop.f32.mrf.mxu0  ;;  %11507 = vmatpush3.bf16.msra.mxu1 %v12099_v35  ;;  %v16416_v20 = vld [vmem:[#allocation70_spill] sm:$0xff]  ;;  %v16423_v6 = vld [vmem:[#allocation48_spill] sm:$0xff] }
 0x28b   : > { %v5424_v57 = vadd.f32 %v5423_v14, %v5393_v23  ;;  %v5225_v3 = vadd.f32 %v5124_v21, %v4635_v49  ;;  %v5259_v41 = vmul.f32 %v14092_v27, %v5227_v1  ;;  %v4648_v55 = vadd.f32 %v16414_v25, %v16413_v13  ;;  %v16415_v14 = vld [vmem:[#allocation45_spill] sm:$0xff]  ;;  %11508 = vmatprep.subr.bf16.mxu1 %v12101_v2 }
 0x28c   : > { %v5355_v44 = vadd.f32 %v5354_v32, %v14268_v61  ;;  %v5394_v31 = vmul.f32 %v14268_v61, %v14268_v61  ;;  %v11438_v34 = vpop.f32.mrf.mxu1  ;;  %v5395_v47 = vmul.f32 %v14254_v24, %v14254_v24  ;;  %v14301_v32 = vadd.f32 %v14158_v10, %v5288_v45  ;;  %v12095_v21 = vld [vmem:[%s16161_s7 + $0xe8] sm:$0xff]  }
 0x28d   : > { %v5257_v26 = vmul.f32 %v14097_v63, %v5225_v3  ;;  %v5230_v49 = vadd.f32 %v11438_v34, %v4656_v56  ;;  %v5291_v15 = vadd.f32 %v5259_v41, %v16415_v14  ;;  %v4659_v50 = vadd.f32 %v14005_v12, %v16416_v20  ;;  %v16417_v56 = vld [vmem:[#allocation24_spill] sm:$0xff]  ;;  %11460 = vmatprep.subr.bf16.mxu0 %v12095_v21  ;;  %v16421_v12 = vld [vmem:[#allocation71_spill] sm:$0xff]  ;;  %v14329_v20 = vpop.f32.mrf.mxu0  ;;  %v16426_v25 = vld [vmem:[#allocation73_spill] sm:$0xff] }
 0x28e   : > { %v5425_v33 = vadd.f32 %v5424_v57, %v5394_v31  ;;  %v5356_v23 = vadd.f32 %v5355_v44, %v14254_v24  ;;  %v5137_v1 = vpop.f32.mrf.mxu1  ;;  %v16418_v57 = vld [vmem:[#allocation47_spill] sm:$0xff]  ;;  %v5396_v41 = vmul.f32 %v14284_v5, %v14284_v5  ;;  %11461 = vmatpush3.bf16.msra.mxu0 %v12095_v21  ;;  %11509 = vmatpush3.bf16.msra.mxu1 %v12101_v2  ;;  %v12102_v21 = vld [vmem:[%s16161_s7 + $0x20] sm:$0xff]  }
 0x28f   : > { %v5289_v45 = vadd.f32 %v5257_v26, %v16417_v56  ;;  %v5294_v3 = vadd.f32 %v5230_v49, %v16418_v57  ;;  %v5228_v44 = vadd.f32 %v5137_v1, %v4648_v55  ;;  %v16422_v26 = vld [vmem:[#allocation7_spill] sm:$0xff]  ;;  %11510 = vmatprep.subr.bf16.mxu1 %v12102_v21 }
 0x290   : > { %v5357_v35 = vadd.f32 %v5356_v23, %v14284_v5  ;;  %v5426_v34 = vadd.f32 %v5425_v33, %v5395_v47  ;;  %v11439_v13 = vpop.f32.mrf.mxu1  ;;  %v4651_v14 = vadd.f32 %v16422_v26, %v16421_v12  ;;  %v14333_v47 = vadd.f32 %v14158_v10, %v14249_v7 }
 0x291   : > { %v14326_v55 = vadd.f32 %v14158_v10, %v5289_v45  ;;  %v5292_v49 = vadd.f32 %v5228_v44, %v16423_v6  ;;  %v5231_v1 = vadd.f32 %v11439_v13, %v4659_v50  ;;  %v5397_v23 = vmul.f32 %v14301_v32, %v14301_v32  ;;  %v12096_v45 = vld [vmem:[%s16161_s7 + $0xe0] sm:$0xff]   ;;  %v16425_v44 = vld [vmem:[#allocation17_spill] sm:$0xff] }
 0x292   : > { %v5358_v33 = vadd.f32 %v5357_v35, %v14301_v32  ;;  %v5427_v56 = vadd.f32 %v5426_v34, %v5396_v41  ;;  %v5140_v57 = vpop.f32.mrf.mxu1  ;;  %v16424_v50 = vld [vmem:[#allocation72_spill] sm:$0xff]  ;;  %v14347_v13 = vadd.f32 %v14158_v10, %v5291_v15  ;;  %v14354_v6 = vadd.s32 232, %v16269_v48  ;;  %11462 = vmatprep.subr.bf16.mxu0 %v12096_v45  ;;  %11511 = vmatpush3.bf16.msra.mxu1 %v12102_v21 }
 0x293   : > { %v4672_v7 = vadd.f32 %v16425_v44, %v16424_v50  ;;  %v5398_v35 = vmul.f32 %v14326_v55, %v14326_v55  ;;  %v5263_v41 = vmul.f32 %v14117_v59, %v5231_v1  ;;  %v5229_v26 = vadd.f32 %v5140_v57, %v4651_v14  ;;  %v16427_v44 = vld [vmem:[#allocation50_spill] sm:$0xff]  ;;  %11463 = vmatpush3.bf16.msra.mxu0 %v12096_v45  ;;  %v14362_v1 = vpop.f32.mrf.mxu0  ;;  %v16429_v45 = vld [vmem:[#allocation76_spill] sm:$0xff] }
 0x294   : > { %v5428_v34 = vadd.f32 %v5427_v56, %v5397_v23  ;;  %v5359_v12 = vadd.f32 %v5358_v33, %v14326_v55  ;;  %v11442_v2 = vpop.f32.mrf.mxu1  ;;  %v4664_v50 = vadd.f32 %v14105_v54, %v16426_v25  ;;  %v14359_v15 = vadd.f32 %v14158_v10, %v5292_v49  ;;  %v12097_v54 = vld [vmem:[%s16161_s7 + $0xd8] sm:$0xff]   ;;  %v12100_v25 = vld [vmem:[%s16161_s7 + $0xd0] sm:$0xff]  }
 0x295   : > { %v5295_v63 = vadd.f32 %v5263_v41, %v16427_v44  ;;  %v5234_v27 = vadd.f32 %v11442_v2, %v4672_v7  ;;  %v5399_v14 = vmul.f32 %v14333_v47, %v14333_v47  ;;  %v5261_v23 = vmul.f32 %v14132_v52, %v5229_v26  ;;  %v16428_v49 = vld [vmem:[#allocation74_spill] sm:$0xff]  ;;  %11464 = vmatprep.subr.bf16.mxu0 %v12097_v54 }
 0x296   : > { %v5429_v33 = vadd.f32 %v5428_v34, %v5398_v35  ;;  %v5360_v48 = vadd.f32 %v5359_v12, %v14333_v47  ;;  %v5153_v56 = vpop.f32.mrf.mxu1  ;;  %v4675_v57 = vadd.f32 %v14127_v29, %v16428_v49  ;;  %v4667_v7 = vadd.f32 %v14167_v28, %v16429_v45  ;;  %v16430_v35 = vld [vmem:[#allocation52_spill] sm:$0xff]  ;;  %v12104_v12 = vld [vmem:[%s16161_s7 + $0x18] sm:$0xff]  }
 0x297   : > { %v14379_v41 = vadd.f32 %v5234_v27, %v16430_v35  ;;  %v5232_v34 = vadd.f32 %v5153_v56, %v4664_v50  ;;  %v5400_v26 = vmul.f32 %v14347_v13, %v14347_v13  ;;  %v5293_v44 = vadd.f32 %v5261_v23, %v14124_v0  ;;  %v12105_v27 = vld [vmem:[%s16161_s7 + $0x10] sm:$0xff]   ;;  %v16431_v56 = vld [vmem:[#allocation53_spill] sm:$0xff]  ;;  %11465 = vmatpush3.bf16.msra.mxu0 %v12097_v54 }
 0x298   : > { %v5361_v2 = vadd.f32 %v5360_v48, %v14347_v13  ;;  %v5430_v21 = vadd.f32 %v5429_v33, %v5399_v14  ;;  %v11443_v29 = vpop.f32.mrf.mxu1  ;;  %v14392_v28 = vadd.f32 %v14158_v10, %v5294_v3  ;;  %v5401_v50 = vmul.f32 %v14359_v15, %v14359_v15  ;;  %v14397_v48 = vpop.f32.mrf.mxu0  ;;  %11466 = vmatprep.subr.bf16.mxu0 %v12100_v25  ;;  %v16433_v54 = vld [vmem:[#allocation77_spill] sm:$0xff] }
 0x299   : > { %v5296_v49 = vadd.f32 %v5232_v34, %v16431_v56  ;;  %v5235_v45 = vadd.f32 %v11443_v29, %v4675_v57  ;;  %v14401_v33 = vadd.f32 %v14158_v10, %v5293_v44  ;;  %v14406_v3 = vsel %vm14315_vm4, 1.0, %v16280_v18  ;;  %v12103_v57 = vld [vmem:[%s16161_s7 + $0xc8] sm:$0xff]   ;;  %11512 = vmatprep.subr.bf16.mxu1 %v12104_v12 }
 0x29a   : > { %v5362_v0 = vadd.f32 %v5361_v2, %v14359_v15  ;;  %v5431_v14 = vadd.f32 %v5430_v21, %v5400_v26  ;;  %v5156_v23 = vpop.f32.mrf.mxu1  ;;  %16432 = vst [vmem:[#allocation32_spill] sm:$0xff] %v14406_v3  ;;  %v4688_v35 = vadd.f32 %v14211_v17, %v16433_v54  ;;  %11513 = vmatpush3.bf16.msra.mxu1 %v12104_v12  ;;  %v16434_v52 = vand.u32 15, %v14291_v51  ;;  %v16437_v12 = vld [vmem:[#allocation79_spill] sm:$0xff] }
 0x29b   : > { %v5267_v34 = vmul.f32 %v14147_v43, %v5235_v45  ;;  %v5233_v26 = vadd.f32 %v5156_v23, %v4667_v7  ;;  %v14416_v31 = vadd.f32 %v14158_v10, %v5295_v63  ;;  %v5402_v29 = vmul.f32 %v14401_v33, %v14401_v33  ;;  %11514 = vmatprep.subr.bf16.mxu1 %v12105_v27  ;;  %v12107_v7 = vld [vmem:[%s16161_s7 + $0x8] sm:$0xff]   ;;  %v14434_v23 = vpop.f32.mrf.mxu0 }
 0x29c   : > { %v5432_v21 = vadd.f32 %v5431_v14, %v5401_v50  ;;  %v5363_v44 = vadd.f32 %v5362_v0, %v14401_v33  ;;  %v11446_v56 = vpop.f32.mrf.mxu1  ;;  %vm14423_vm5 = vcmp.le.s32.totalorder %v16434_v52, 14  ;;  %v4680_v63 = vadd.f32 %v14235_v53, %v16437_v12  ;;  %v16438_v50 = vld [vmem:[#allocation55_spill] sm:$0xff]  ;;  %11467 = vmatpush3.bf16.msra.mxu0 %v12100_v25  ;;  %v12106_v53 = vld [vmem:[%s16161_s7 + $0xc0] sm:$0xff]  }
 0x29d   : > { %v5299_v45 = vadd.f32 %v5267_v34, %v16438_v50  ;;  %v5265_v0 = vmul.f32 %v14172_v11, %v5233_v26  ;;  %v5238_v14 = vadd.f32 %v11446_v56, %v4688_v35  ;;  %v5403_v52 = vmul.f32 %v14392_v28, %v14392_v28  ;;  %11468 = vmatprep.subr.bf16.mxu0 %v12103_v57  ;;  %v16439_v34 = vld [vmem:[#allocation29_spill] sm:$0xff]  ;;  %v16440_v35 = vld [vmem:[#allocation27_spill] sm:$0xff] }
 0x29e   : > { %v5433_v51 = vadd.f32 %v5432_v21, %v5402_v29  ;;  %v14439_v54 = vadd.f32 %v14158_v10, %v5296_v49  ;;  %v5364_v2 = vadd.f32 %v5363_v44, %v14392_v28  ;;  %v5169_v43 = vpop.f32.mrf.mxu1  ;;  %v14447_v25 = vadd.f32 %v16440_v35, %v16439_v34  ;;  %v16441_v56 = vld [vmem:[#allocation57_spill] sm:$0xff]  ;;  %11515 = vmatpush3.bf16.msra.mxu1 %v12105_v27  ;;  %v16442_v49 = vld [vmem:[#allocation80_spill] sm:$0xff]  ;;  %v16444_v27 = vld [vmem:[#allocation58_spill] sm:$0xff] }
 0x29f   : > { %v5297_v26 = vadd.f32 %v5265_v0, %v14163_v46  ;;  %v5302_v12 = vadd.f32 %v5238_v14, %v16441_v56  ;;  %v5236_v21 = vadd.f32 %v5169_v43, %v4680_v63  ;;  %v4691_v29 = vadd.f32 %v14265_v39, %v16442_v49  ;;  %11516 = vmatprep.subr.bf16.mxu1 %v12107_v7  ;;  %v12108_v34 = vld [vmem:[%s16161_s7] sm:$0xff]   ;;  %v16443_v46 = vld [vmem:[#allocation82_spill] sm:$0xff]  ;;  %v16446_v49 = vld [vmem:[#allocation85_spill] sm:$0xff] }
 0x2a0   : > { %v5404_v44 = vmul.f32 %v14416_v31, %v14416_v31  ;;  %v5365_v50 = vadd.f32 %v5364_v2, %v14416_v31  ;;  %v5434_v11 = vadd.f32 %v5433_v51, %v5403_v52  ;;  %v11447_v59 = vpop.f32.mrf.mxu1  ;;  %v4683_v0 = vadd.f32 %v14298_v38, %v16443_v46  ;;  %11469 = vmatpush3.bf16.msra.mxu0 %v12103_v57  ;;  %v11406_v2 = vpop.f32.mrf.mxu0  ;;  %v16445_v38 = vld [vmem:[#allocation83_spill] sm:$0xff] }
 0x2a1   : > { %v14463_v43 = vadd.f32 %v14158_v10, %v14379_v41  ;;  %v14466_v39 = vadd.f32 %v14158_v10, %v5297_v26  ;;  %v5300_v63 = vadd.f32 %v5236_v21, %v16444_v27  ;;  %v5405_v52 = vmul.f32 %v14439_v54, %v14439_v54  ;;  %11470 = vmatprep.subr.bf16.mxu0 %v12106_v53 }
 0x2a2   : > { %v5366_v14 = vadd.f32 %v5365_v50, %v14439_v54  ;;  %v5435_v51 = vadd.f32 %v5434_v11, %v5404_v44  ;;  %v5239_v35 = vadd.f32 %v11447_v59, %v4691_v29  ;;  %v5172_v56 = vpop.f32.mrf.mxu1  ;;  %v4704_v41 = vadd.f32 %v14329_v20, %v16445_v38  ;;  %11517 = vmatpush3.bf16.msra.mxu1 %v12107_v7  ;;  %v16447_v44 = vld [vmem:[#allocation12_spill] sm:$0xff]  ;;  %v14491_v7 = vld [vmem:[%s16161_s7 + $0x1b8] sm:$0xff]  }
 0x2a3   : > { %v4696_v26 = vadd.f32 %v14362_v1, %v16446_v49  ;;  %v5406_v21 = vmul.f32 %v14466_v39, %v14466_v39  ;;  %v5237_v57 = vadd.f32 %v5172_v56, %v4683_v0  ;;  %v14479_v50 = vadd.f32 %v14158_v10, %v5299_v45  ;;  %11518 = vmatprep.subr.bf16.mxu1 %v12108_v34  ;;  %v4711_v45 = vpop.f32.mrf.mxu0  ;;  %v16449_v49 = vld [vmem:[#allocation62_spill] sm:$0xff] }
 0x2a4   : > { %v5436_v46 = vadd.f32 %v5435_v51, %v5405_v52  ;;  %v5367_v11 = vadd.f32 %v5366_v14, %v14466_v39  ;;  %v5271_v59 = vmul.f32 %v14177_v37, %v5239_v35  ;;  %v11450_v29 = vpop.f32.mrf.mxu1  ;;  %v4707_v20 = vadd.f32 %v14397_v48, %v16447_v44  ;;  %11471 = vmatpush3.bf16.msra.mxu0 %v12106_v53  ;;  %v16448_v48 = vld [vmem:[#allocation60_spill] sm:$0xff] }
 0x2a5   : > { %v5407_v1 = vmul.f32 %v14463_v43, %v14463_v43  ;;  %v5269_v27 = vmul.f32 %v14195_v40, %v5237_v57  ;;  %v5242_v0 = vadd.f32 %v11450_v29, %v4704_v41  ;;  %v14494_v52 = vadd.f32 %v14158_v10, %v5300_v63  ;;  %11552 = vmatprep.subr.bf16.mxu0 %v14491_v7 }
 0x2a6   : > { %v5437_v14 = vadd.f32 %v5436_v46, %v5406_v21  ;;  %v5368_v51 = vadd.f32 %v5367_v11, %v14463_v43  ;;  %v5303_v35 = vadd.f32 %v5271_v59, %v16448_v48  ;;  %v5185_v56 = vpop.f32.mrf.mxu1  ;;  %v14503_v57 = vsel %vm14423_vm5, 1.0, %v16280_v18  ;;  %11519 = vmatpush3.bf16.msra.mxu1 %v12108_v34 }
 0x2a7   : > { %v5301_v38 = vadd.f32 %v5269_v27, %v14185_v4  ;;  %v5306_v41 = vadd.f32 %v5242_v0, %v16449_v49  ;;  %v5240_v53 = vadd.f32 %v5185_v56, %v4696_v26  ;;  %16450 = vst [vmem:[#allocation75_spill] sm:$0xff] %v14503_v57  ;;  %v5408_v63 = vmul.f32 %v14479_v50, %v14479_v50  ;;  %v16454_v26 = vld [vmem:[#allocation63_spill] sm:$0xff]  ;;  %v16455_v27 = vld [vmem:[#allocation6_spill] sm:$0xff]  ;;  %v16457_v49 = vld [vmem:[#allocation5_spill] sm:$0xff] }
 0x2a8   : > { %v5369_v21 = vadd.f32 %v5368_v51, %v14479_v50  ;;  %v5438_v46 = vadd.f32 %v5437_v14, %v5407_v1  ;;  %v11451_v11 = vpop.f32.mrf.mxu1  ;;  %v16451_v4 = vand.u32 15, %v14354_v6  ;;  %v14516_v17 = vadd.f32 %v14158_v10, %v5302_v12  ;;  %v11407_v1 = vpop.f32.mrf.mxu0  ;;  %v16456_v12 = vld [vmem:[#allocation66_spill] sm:$0xff] }
 0x2a9   : > { %v14519_v34 = vadd.f32 %v14158_v10, %v5301_v38  ;;  %v5304_v29 = vadd.f32 %v5240_v53, %v16454_v26  ;;  %v5243_v44 = vadd.f32 %v11451_v11, %v4707_v20  ;;  %v4699_v0 = vadd.f32 %v14434_v23, %v16455_v27  ;;  %v16459_v27 = vld [vmem:[#allocation65_spill] sm:$0xff] }
 0x2aa   : > { %vm14511_vm6 = vcmp.le.s32.totalorder %v16451_v4, 14  ;;  %v5370_v14 = vadd.f32 %v5369_v21, %v14494_v52  ;;  %v5409_v6 = vmul.f32 %v14494_v52, %v14494_v52  ;;  %v5439_v51 = vadd.f32 %v5438_v46, %v5408_v63  ;;  %v5188_v48 = vpop.f32.mrf.mxu1  ;;  %v16458_v63 = vld [vmem:[#allocation8_spill] sm:$0xff] }
 0x2ab   : > { %v3948_v56 = vadd.f32 %v16456_v12, %v14447_v25  ;;  %v4720_v38 = vadd.f32 %v11406_v2, %v16457_v49  ;;  %v5410_v53 = vmul.f32 %v14519_v34, %v14519_v34  ;;  %v5275_v20 = vmul.f32 %v14273_v42, %v5243_v44  ;;  %v4714_v49 = vpop.f32.mrf.mxu0 }
 0x2ac   : > { %v5440_v11 = vadd.f32 %v5439_v51, %v5409_v6  ;;  %v14534_v23 = vadd.f32 %v14158_v10, %v5303_v35  ;;  %v5371_v21 = vadd.f32 %v5370_v14, %v14519_v34  ;;  %v5241_v4 = vadd.f32 %v5188_v48, %v4699_v0  ;;  %v11454_v26 = vpop.f32.mrf.mxu1  ;;  %v16460_v0 = vld [vmem:[#allocation15_spill] sm:$0xff]  ;;  %v16461_v48 = vld [vmem:[#allocation30_spill] sm:$0xff] }
 0x2ad   : > { %v4712_v46 = vadd.f32 %v4711_v45, %v16458_v63  ;;  %v5411_v25 = vmul.f32 %v14516_v17, %v14516_v17  ;;  %v5307_v2 = vadd.f32 %v5275_v20, %v16459_v27  ;;  %v5246_v12 = vadd.f32 %v11454_v26, %v4720_v38 }
 0x2ae   : > { %v5441_v40 = vadd.f32 %v5440_v11, %v5410_v53  ;;  %v14542_v44 = vadd.f32 %v14158_v10, %v5304_v29  ;;  %v5372_v35 = vadd.f32 %v5371_v21, %v14516_v17  ;;  %v5273_v6 = vmul.f32 %v14406_v3, %v5241_v4  ;;  %v5201_v14 = vpop.f32.mrf.mxu1  ;;  %v16463_v4 = vld [vmem:[#allocation13_spill] sm:$0xff] }
 0x2af   : > { %v4723_v51 = vadd.f32 %v11407_v1, %v16460_v0  ;;  %v5310_v45 = vadd.f32 %v5246_v12, %v16461_v48  ;;  %v5244_v63 = vadd.f32 %v5201_v14, %v4712_v46  ;;  %v14551_v20 = vsel %vm14511_vm6, 1.0, %v16280_v18  ;;  %v16464_v46 = vld [vmem:[#allocation31_spill] sm:$0xff] }
 0x2b0   : > { %16462 = vst [vmem:[#allocation40_spill] sm:$0xff] %v14551_v20  ;;  %v5412_v38 = vmul.f32 %v14534_v23, %v14534_v23  ;;  %v5373_v29 = vadd.f32 %v5372_v35, %v14534_v23  ;;  %v5442_v53 = vadd.f32 %v5441_v40, %v5411_v25  ;;  %v5305_v11 = vadd.f32 %v5273_v6, %v14263_v60  ;;  %v11455_v21 = vpop.f32.mrf.mxu1  ;;  %v16465_v60 = vld [vmem:[#allocation10_spill] sm:$0xff]  ;;  %v16466_v25 = vld [vmem:[#allocation33_spill] sm:$0xff] }
 0x2b1   : > { %v4715_v26 = vadd.f32 %v4714_v49, %v16463_v4  ;;  %v14559_v1 = vadd.f32 %v14158_v10, %v5306_v41  ;;  %v5308_v27 = vadd.f32 %v5244_v63, %v16464_v46  ;;  %v5247_v12 = vadd.f32 %v11455_v21, %v4723_v51 }
 0x2b2   : > { %v5374_v18 = vadd.f32 %v5373_v29, %v14542_v44  ;;  %v5413_v59 = vmul.f32 %v14542_v44, %v14542_v44  ;;  %v5443_v14 = vadd.f32 %v5442_v53, %v5412_v38  ;;  %v14566_v35 = vadd.f32 %v14158_v10, %v5305_v11  ;;  %v5204_v40 = vpop.f32.mrf.mxu1  ;;  %v16467_v29 = vld [vmem:[#allocation28_spill] sm:$0xff] }
 0x2b3   : > { %v3140_v6 = vadd.f32 %v16466_v25, %v16465_v60  ;;  %v5279_v49 = vmul.f32 %v14503_v57, %v5247_v12  ;;  %v5245_v41 = vadd.f32 %v5204_v40, %v4715_v26  ;;  %v14572_v48 = vadd.f32 %v14158_v10, %v5307_v2 }
 0x2b4   : > { %v5444_v0 = vadd.f32 %v5443_v14, %v5413_v59  ;;  %v5375_v51 = vadd.f32 %v5374_v18, %v14566_v35  ;;  %v5414_v63 = vmul.f32 %v14566_v35, %v14566_v35  ;;  %v5415_v21 = vmul.f32 %v14559_v1, %v14559_v1 }
 0x2b5   : > { %v3980_v38 = vadd.f32 %v3948_v56, %v3140_v6  ;;  %v5311_v53 = vadd.f32 %v5279_v49, %v16467_v29  ;;  %v5277_v11 = vmul.f32 %v14551_v20, %v5245_v41  ;;  %v14582_v26 = vadd.f32 %v14158_v10, %v5308_v27 }
 0x2b6   : > { %v5445_v4 = vadd.f32 %v5444_v0, %v5414_v63  ;;  %v5376_v2 = vadd.f32 %v5375_v51, %v14559_v1  ;;  %v5416_v12 = vmul.f32 %v14572_v48, %v14572_v48  ;;  %v5349_v14 = vadd.f32 %v14158_v10, %v5310_v45 }
 0x2b7   : > { %v5309_v46 = vadd.f32 %v5277_v11, %v3980_v38  ;;  %v5417_v60 = vmul.f32 %v14582_v26, %v14582_v26  ;;  %v14594_v49 = vadd.f32 %v14158_v10, %v5311_v53 }
 0x2b8   : > { %v5377_v18 = vadd.f32 %v5376_v2, %v14572_v48  ;;  %v5446_v56 = vadd.f32 %v5445_v4, %v5415_v21  ;;  %v5419_v0 = vmul.f32 %v5349_v14, %v5349_v14 }
 0x2b9   : > { %v5348_v59 = vadd.f32 %v14158_v10, %v5309_v46  ;;  %v5420_v38 = vmul.f32 %v14594_v49, %v14594_v49  ;;  %v14602_v10 = vld [vmem:[%s16161_s7 + $0x138] sm:$0xff]  }
 0x2ba   : > { %v5378_v40 = vadd.f32 %v5377_v18, %v14582_v26  ;;  %v5447_v27 = vadd.f32 %v5446_v56, %v5416_v12  ;;  %11600 = vmatprep.subr.bf16.mxu1 %v14602_v10 }
 0x2bb   : > { %v5418_v25 = vmul.f32 %v5348_v59, %v5348_v59 }
 0x2bc   : > { %v5448_v6 = vadd.f32 %v5447_v27, %v5417_v60  ;;  %v5379_v41 = vadd.f32 %v5378_v40, %v5348_v59 }
 0x2be   : > { %v5380_v51 = vadd.f32 %v5379_v41, %v5349_v14  ;;  %v5449_v63 = vadd.f32 %v5448_v6, %v5418_v25 }
 0x2c0   : > { %v5381_v45 = vadd.f32 %v5380_v51, %v14594_v49  ;;  %v5450_v29 = vadd.f32 %v5449_v63, %v5419_v0 }
 0x2c2   : > { %v5382_v11 = vrot.slane %v5381_v45, 4  ;;  %v5451_v21 = vadd.f32 %v5450_v29, %v5420_v38  ;;  %v5461_v38 = vld [vmem:[%s409_s16] sm:$0x1] }
 0x2c4   : > { %v5383_v4 = vadd.f32 %v5382_v11, %v5381_v45  ;;  %v5452_v2 = vrot.slane %v5451_v21, 4  ;;  %v5462_v45 = vadd.f32 1.0, %v5461_v38 }
 0x2c6   : > { %v5384_v46 = vrot.slane %v5383_v4, 2  ;;  %v5453_v12 = vadd.f32 %v5452_v2, %v5451_v21  ;;  %v5466_v21 = vld [vmem:[%s412_s21] sm:$0x1] }
 0x2c7   : > { %v16468_v2 = vld [vmem:[#allocation4_spill] sm:$0xff] }
 0x2c8   : > { %v5385_v53 = vadd.f32 %v5384_v46, %v5383_v4  ;;  %v5454_v18 = vrot.slane %v5453_v12, 2 }
 0x2ca   : > { %v5386_v56 = vrot.slane %v5385_v53, 1  ;;  %v5455_v40 = vadd.f32 %v5454_v18, %v5453_v12 }
 0x2cc   : > { %v5387_v60 = vadd.f32 %v5386_v56, %v5385_v53  ;;  %v5456_v27 = vrot.slane %v5455_v40, 1 }
 0x2ce   : > { %v5388_v25 = vmul.f32 0.00390625, %v5387_v60  ;;  %v5457_v6 = vadd.f32 %v5456_v27, %v5455_v40 }
 0x2d0   : > { %v5458_v41 = vmul.f32 0.00390625, %v5457_v6  ;;  %v5459_v0 = vmul.f32 %v5388_v25, %v5388_v25 }
 0x2d2   : > { %v5460_v51 = vsub.f32 %v5458_v41, %v5459_v0 }
 0x2d4   : > { %v5463_v63 = vadd.f32 1e-05, %v5460_v51 }
 0x2d6   : > { %12273 = vrsqrt.f32 %v5463_v63 }
 0x2e3   : > { %v12274_v29 = vpop.eup %12273 }
 0x2e4   : > { %v5465_v11 = vmul.f32 %v12274_v29, %v5462_v45 }
 0x2e6   : > { %v5467_v4 = vmul.f32 %v5465_v11, %v5388_v25  ;;  %v5473_v46 = vrot.slane %v5465_v11, %v16468_v2 }
 0x2e8   : > { %v5468_v12 = vsub.f32 %v5466_v21, %v5467_v4  ;;  %v5504_v53 = vmul.f32 %v5473_v46, %v5348_v59  ;;  %v5505_v18 = vmul.f32 %v5473_v46, %v5349_v14  ;;  %v5475_v56 = vmul.f32 %v5473_v46, %v14180_v58 }
 0x2e9   : > { %v5476_v40 = vmul.f32 %v5473_v46, %v14198_v19  ;;  %v5477_v60 = vmul.f32 %v5473_v46, %v14190_v36  ;;  %v5478_v27 = vmul.f32 %v5473_v46, %v14214_v9  ;;  %v5479_v6 = vmul.f32 %v5473_v46, %v14230_v62 }
 0x2ea   : > { %v14620_v41 = vrot.slane %v5468_v12, %v16468_v2  ;;  %v5480_v25 = vmul.f32 %v5473_v46, %v14268_v61  ;;  %v5481_v0 = vmul.f32 %v5473_v46, %v14254_v24  ;;  %v5482_v59 = vmul.f32 %v5473_v46, %v14284_v5 }
 0x2eb   : > { %v5483_v14 = vmul.f32 %v5473_v46, %v14301_v32  ;;  %v5484_v58 = vmul.f32 %v5473_v46, %v14326_v55  ;;  %v5485_v19 = vmul.f32 %v5473_v46, %v14333_v47  ;;  %v5486_v36 = vmul.f32 %v5473_v46, %v14347_v13 }
 0x2ec   : > { %v5542_v9 = vadd.f32 %v14620_v41, %v5504_v53  ;;  %v5543_v62 = vadd.f32 %v14620_v41, %v5505_v18  ;;  %v5487_v51 = vmul.f32 %v5473_v46, %v14359_v15  ;;  %v5488_v61 = vmul.f32 %v5473_v46, %v14401_v33 }
 0x2ed   : > { %v5489_v24 = vmul.f32 %v5473_v46, %v14392_v28  ;;  %v5490_v5 = vmul.f32 %v5473_v46, %v14416_v31  ;;  %v5491_v32 = vmul.f32 %v5473_v46, %v14439_v54  ;;  %v5492_v55 = vmul.f32 %v5473_v46, %v14466_v39 }
 0x2ee   : > { %vm5574_vm7 = vcmp.ge.f32.partialorder %v5542_v9, 0.0  ;;  %vm5575_vm8 = vcmp.ge.f32.partialorder %v5543_v62, 0.0  ;;  %v5606_v47 = vmul.f32 0.2, %v5542_v9  ;;  %v5607_v13 = vmul.f32 0.2, %v5543_v62 }
 0x2ef   : > { %v5493_v63 = vmul.f32 %v5473_v46, %v14463_v43  ;;  %v5494_v38 = vmul.f32 %v5473_v46, %v14479_v50  ;;  %v5495_v15 = vmul.f32 %v5473_v46, %v14494_v52  ;;  %v5496_v33 = vmul.f32 %v5473_v46, %v14519_v34 }
 0x2f0   : > { %v5638_v45 = vsel %vm5574_vm7, %v5542_v9, %v5606_v47  ;;  %v5639_v28 = vsel %vm5575_vm8, %v5543_v62, %v5607_v13  ;;  %v5497_v31 = vmul.f32 %v5473_v46, %v14516_v17  ;;  %v5498_v54 = vmul.f32 %v5473_v46, %v14534_v23 }
 0x2f1   : > { %v10488_v29 = vpack.c.bf16 %v5639_v28, %v5638_v45  ;;  %v5499_v39 = vmul.f32 %v5473_v46, %v14542_v44  ;;  %v5500_v11 = vmul.f32 %v5473_v46, %v14566_v35  ;;  %v5501_v21 = vmul.f32 %v5473_v46, %v14559_v1 }
 0x2f2   : > { %v5502_v43 = vmul.f32 %v5473_v46, %v14572_v48  ;;  %v5503_v50 = vmul.f32 %v5473_v46, %v14582_v26  ;;  %v5506_v52 = vmul.f32 %v5473_v46, %v14594_v49  ;;  %v14650_v34 = vadd.f32 %v14620_v41, %v5475_v56 }
 0x2f3   : > { %10519 = vst [vmem:[#allocation2 + $0x80] sm:$0xff] %v10488_v29   ;;  %v14653_v17 = vadd.f32 %v14620_v41, %v5476_v40  ;;  %v14656_v23 = vadd.f32 %v14620_v41, %v5477_v60  ;;  %v14659_v44 = vadd.f32 %v14620_v41, %v5478_v27  ;;  %v14662_v1 = vadd.f32 %v14620_v41, %v5479_v6 }
 0x2f4   : > { %v14665_v35 = vadd.f32 %v14620_v41, %v5480_v25  ;;  %v14668_v48 = vadd.f32 %v14620_v41, %v5481_v0  ;;  %v14671_v26 = vadd.f32 %v14620_v41, %v5482_v59  ;;  %v14674_v49 = vadd.f32 %v14620_v41, %v5483_v14  ;;  %v5801_v0 = vld [vmem:[#allocation2] sm:$0x8]  ;;  %v5802_v59 = vld [vmem:[#allocation2 + $0x4] sm:$0xf] }
 0x2f5   : > { %v14677_v4 = vadd.f32 %v14620_v41, %v5484_v58  ;;  %v14680_v2 = vadd.f32 %v14620_v41, %v5485_v19  ;;  %v14683_v46 = vadd.f32 %v14620_v41, %v5486_v36  ;;  %v14686_v12 = vadd.f32 %v14620_v41, %v5487_v51 }
 0x2f6   : > { %v14689_v53 = vadd.f32 %v14620_v41, %v5488_v61  ;;  %v14692_v18 = vadd.f32 %v14620_v41, %v5489_v24  ;;  %v14695_v56 = vadd.f32 %v14620_v41, %v5490_v5  ;;  %v14698_v40 = vadd.f32 %v14620_v41, %v5491_v32 }
 0x2f7   : > { %v14701_v60 = vadd.f32 %v14620_v41, %v5492_v55  ;;  %v14704_v27 = vadd.f32 %v14620_v41, %v5493_v63  ;;  %v14707_v6 = vadd.f32 %v14620_v41, %v5494_v38  ;;  %v14710_v25 = vadd.f32 %v14620_v41, %v5495_v15 }
 0x2f8   : > { %v14713_v14 = vadd.f32 %v14620_v41, %v5496_v33  ;;  %v14716_v58 = vadd.f32 %v14620_v41, %v5497_v31  ;;  %v14719_v19 = vadd.f32 %v14620_v41, %v5498_v54  ;;  %v14722_v36 = vadd.f32 %v14620_v41, %v5499_v39 }
 0x2f9   : > { %v14725_v9 = vadd.f32 %v14620_v41, %v5500_v11  ;;  %v14728_v62 = vadd.f32 %v14620_v41, %v5501_v21  ;;  %v14731_v51 = vadd.f32 %v14620_v41, %v5502_v43  ;;  %v14734_v61 = vadd.f32 %v14620_v41, %v5503_v50 }
 0x2fa   : > { %v14737_v24 = vadd.f32 %v14620_v41, %v5506_v52  ;;  %v14739_v5 = vcombine.low %v5801_v0, %v5802_v59  ;;  %vm5545_vm9 = vcmp.ge.f32.partialorder %v14650_v34, 0.0  ;;  %vm5546_vm10 = vcmp.ge.f32.partialorder %v14653_v17, 0.0 }
 0x2fb   : > { %vm5547_vm11 = vcmp.ge.f32.partialorder %v14656_v23, 0.0  ;;  %vm5548_vm12 = vcmp.ge.f32.partialorder %v14659_v44, 0.0  ;;  %vm5549_vm13 = vcmp.ge.f32.partialorder %v14662_v1, 0.0  ;;  %vm5550_vm14 = vcmp.ge.f32.partialorder %v14665_v35, 0.0 }
 0x2fc   : > { %vm5551_vm15 = vcmp.ge.f32.partialorder %v14668_v48, 0.0  ;;  %vm5554_vm4 = vcmp.ge.f32.partialorder %v14677_v4, 0.0  ;;  %vm5555_vm5 = vcmp.ge.f32.partialorder %v14680_v2, 0.0  ;;  %v5577_v41 = vmul.f32 0.2, %v14650_v34 }
 0x2fd   : > { %vm5560_vm0 = vcmp.ge.f32.partialorder %v14695_v56, 0.0  ;;  %vm5561_vm1 = vcmp.ge.f32.partialorder %v14698_v40, 0.0  ;;  %v5578_v47 = vmul.f32 0.2, %v14653_v17  ;;  %v5579_v13 = vmul.f32 0.2, %v14656_v23 }
 0x2fe   : > { %v5580_v63 = vmul.f32 0.2, %v14659_v44  ;;  %vm5566_vm2 = vcmp.ge.f32.partialorder %v14713_v14, 0.0  ;;  %v5581_v38 = vmul.f32 0.2, %v14662_v1  ;;  %v14775_v45 = vsel %vm5545_vm9, %v14650_v34, %v5577_v41 }
 0x2ff   : > { %v5582_v15 = vmul.f32 0.2, %v14665_v35  ;;  %v5583_v33 = vmul.f32 0.2, %v14668_v48  ;;  %vm5570_vm6 = vcmp.ge.f32.partialorder %v14725_v9, 0.0  ;;  %v14787_v29 = vsel %vm5546_vm10, %v14653_v17, %v5578_v47 }
 0x300   : > { %v5584_v28 = vmul.f32 0.2, %v14671_v26  ;;  %v5585_v31 = vmul.f32 0.2, %v14674_v49  ;;  %v5586_v54 = vmul.f32 0.2, %v14677_v4  ;;  %v5611_v43 = vsel %vm5547_vm11, %v14656_v23, %v5579_v13 }
 0x301   : > { %vm5571_vm9 = vcmp.ge.f32.partialorder %v14728_v62, 0.0  ;;  %vm5572_vm3 = vcmp.ge.f32.partialorder %v14731_v51, 0.0  ;;  %vm5573_vm7 = vcmp.ge.f32.partialorder %v14734_v61, 0.0  ;;  %vm5576_vm8 = vcmp.ge.f32.partialorder %v14737_v24, 0.0 }
 0x302   : > { %v5587_v39 = vmul.f32 0.2, %v14680_v2  ;;  %v5588_v11 = vmul.f32 0.2, %v14683_v46  ;;  %v5589_v21 = vmul.f32 0.2, %v14686_v12  ;;  %v5612_v17 = vsel %vm5548_vm12, %v14659_v44, %v5580_v63 }
 0x303   : > { %v5590_v50 = vmul.f32 0.2, %v14689_v53  ;;  %v5591_v52 = vmul.f32 0.2, %v14692_v18  ;;  %v5592_v34 = vmul.f32 0.2, %v14695_v56  ;;  %v5613_v23 = vsel %vm5549_vm13, %v14662_v1, %v5581_v38 }
 0x304   : > { %v5593_v0 = vmul.f32 0.2, %v14698_v40  ;;  %v5594_v59 = vmul.f32 0.2, %v14701_v60  ;;  %v5595_v41 = vmul.f32 0.2, %v14704_v27  ;;  %v5614_v44 = vsel %vm5550_vm14, %v14665_v35, %v5582_v15 }
 0x305   : > { %v5596_v47 = vmul.f32 0.2, %v14707_v6  ;;  %v5597_v13 = vmul.f32 0.2, %v14710_v25  ;;  %v5598_v55 = vmul.f32 0.2, %v14713_v14  ;;  %v5615_v1 = vsel %vm5551_vm15, %v14668_v48, %v5583_v33 }
 0x306   : > { %v5599_v63 = vmul.f32 0.2, %v14716_v58  ;;  %v5600_v32 = vmul.f32 0.2, %v14719_v19  ;;  %v5601_v20 = vmul.f32 0.2, %v14722_v36  ;;  %v5618_v48 = vsel %vm5554_vm4, %v14677_v4, %v5586_v54 }
 0x307   : > { %v5602_v38 = vmul.f32 0.2, %v14725_v9  ;;  %v5603_v57 = vmul.f32 0.2, %v14728_v62  ;;  %v5604_v3 = vmul.f32 0.2, %v14731_v51  ;;  %v5619_v33 = vsel %vm5555_vm5, %v14680_v2, %v5587_v39 }
 0x308   : > { %vm16469_vm10 = vcmp.ge.f32.partialorder %v14671_v26, 0.0  ;;  %v5605_v15 = vmul.f32 0.2, %v14734_v61  ;;  %v5608_v42 = vmul.f32 0.2, %v14737_v24  ;;  %vm16470_vm11 = vcmp.ge.f32.partialorder %v14674_v49, 0.0 }
 0x309   : > { %v5616_v35 = vsel %vm16469_vm10, %v14671_v26, %v5584_v28  ;;  %v5617_v37 = vsel %vm16470_vm11, %v14674_v49, %v5585_v31  ;;  %vm16471_vm12 = vcmp.ge.f32.partialorder %v14683_v46, 0.0  ;;  %vm16472_vm13 = vcmp.ge.f32.partialorder %v14686_v12, 0.0 }
 0x30a   : > { %v5620_v26 = vsel %vm16471_vm12, %v14683_v46, %v5588_v11  ;;  %v5621_v28 = vsel %vm16472_vm13, %v14686_v12, %v5589_v21  ;;  %vm16473_vm14 = vcmp.ge.f32.partialorder %v14689_v53, 0.0  ;;  %vm16474_vm15 = vcmp.ge.f32.partialorder %v14692_v18, 0.0 }
 0x30b   : > { %v5622_v49 = vsel %vm16473_vm14, %v14689_v53, %v5590_v50  ;;  %v5623_v4 = vsel %vm16474_vm15, %v14692_v18, %v5591_v52  ;;  %v5624_v2 = vsel %vm5560_vm0, %v14695_v56, %v5592_v34  ;;  %v5625_v46 = vsel %vm5561_vm1, %v14698_v40, %v5593_v0  ;;  %v5850_v50 = vld [vmem:[#allocation2 + $0x8] sm:$0x8] }
 0x30c   : > { %vm16475_vm4 = vcmp.ge.f32.partialorder %v14701_v60, 0.0  ;;  %vm16476_vm5 = vcmp.ge.f32.partialorder %v14704_v27, 0.0  ;;  %vm16477_vm10 = vcmp.ge.f32.partialorder %v14707_v6, 0.0  ;;  %vm16478_vm11 = vcmp.ge.f32.partialorder %v14710_v25, 0.0  ;;  %v5803_v52 = vld [vmem:[#allocation2 + $0x8] sm:$0xf] }
 0x30d   : > { %v5626_v12 = vsel %vm16475_vm4, %v14701_v60, %v5594_v59  ;;  %v5627_v53 = vsel %vm16476_vm5, %v14704_v27, %v5595_v41  ;;  %v5628_v18 = vsel %vm16477_vm10, %v14707_v6, %v5596_v47  ;;  %v5629_v56 = vsel %vm16478_vm11, %v14710_v25, %v5597_v13 }
 0x30e   : > { %v5630_v40 = vsel %vm5566_vm2, %v14713_v14, %v5598_v55  ;;  %vm16479_vm0 = vcmp.ge.f32.partialorder %v14716_v58, 0.0  ;;  %vm16480_vm1 = vcmp.ge.f32.partialorder %v14719_v19, 0.0  ;;  %vm16481_vm12 = vcmp.ge.f32.partialorder %v14722_v36, 0.0 }
 0x30f   : > { %v5631_v60 = vsel %vm16479_vm0, %v14716_v58, %v5599_v63  ;;  %v5632_v27 = vsel %vm16480_vm1, %v14719_v19, %v5600_v32  ;;  %v5633_v6 = vsel %vm16481_vm12, %v14722_v36, %v5601_v20  ;;  %v5634_v25 = vsel %vm5570_vm6, %v14725_v9, %v5602_v38 }
 0x310   : > { %v5635_v14 = vsel %vm5571_vm9, %v14728_v62, %v5603_v57  ;;  %v5636_v58 = vsel %vm5572_vm3, %v14731_v51, %v5604_v3  ;;  %v5637_v19 = vsel %vm5573_vm7, %v14734_v61, %v5605_v15  ;;  %v5640_v20 = vsel %vm5576_vm8, %v14737_v24, %v5608_v42 }
 0x311   : > { %v10308_v36 = vpack.c.bf16 %v14775_v45, %v14775_v45  ;;  %v10339_v9 = vpack.c.bf16 %v5640_v20, %v5640_v20  ;;  %v10418_v32 = vpack.c.bf16 %v5611_v43, %v14787_v29  ;;  %v10423_v55 = vpack.c.bf16 %v5613_v23, %v5612_v17 }
 0x312   : > { %v10428_v57 = vpack.c.bf16 %v5615_v1, %v5614_v44  ;;  %v10433_v62 = vpack.c.bf16 %v5617_v37, %v5616_v35  ;;  %v10438_v31 = vpack.c.bf16 %v5619_v33, %v5618_v48  ;;  %v10443_v54 = vpack.c.bf16 %v5621_v28, %v5620_v26 }
 0x313   : > { %5769 = vst [vmem:[#allocation2 + $0xc] sm:$0xf] %v10308_v36  ;;  %v10448_v3 = vpack.c.bf16 %v5623_v4, %v5622_v49  ;;  %v10453_v51 = vpack.c.bf16 %v5625_v46, %v5624_v2  ;;  %v10458_v39 = vpack.c.bf16 %v5627_v53, %v5626_v12  ;;  %v10463_v61 = vpack.c.bf16 %v5629_v56, %v5628_v18 }
 0x314   : > { %5800 = vst [vmem:[#allocation2 + $0x88] sm:$0xf] %v10339_v9  ;;  %10505 = vst [vmem:[#allocation2 + $0x10] sm:$0xff] %v10418_v32   ;;  %v10468_v42 = vpack.c.bf16 %v5631_v60, %v5630_v40  ;;  %v10473_v24 = vpack.c.bf16 %v5633_v6, %v5632_v27  ;;  %v10478_v11 = vpack.c.bf16 %v5635_v14, %v5634_v25  ;;  %v16482_v37 = vshrl.u32 %v14739_v5, 16 }
 0x315   : > { %10506 = vst [vmem:[#allocation2 + $0x18] sm:$0xff] %v10423_v55   ;;  %v10483_v45 = vpack.c.bf16 %v5637_v19, %v5636_v58  ;;  %10507 = vst [vmem:[#allocation2 + $0x20] sm:$0xff] %v10428_v57   ;;  %v16483_v21 = vshll.u32 %v14739_v5, 16  ;;  %vm16484_vm2 = vsmask.f32 4352 }
 0x316   : > { %10508 = vst [vmem:[#allocation2 + $0x28] sm:$0xff] %v10433_v62   ;;  %10509 = vst [vmem:[#allocation2 + $0x30] sm:$0xff] %v10438_v31   ;;  %v6342_v29 = vrot.slane %v16482_v37, 3 }
 0x317   : > { %10510 = vst [vmem:[#allocation2 + $0x38] sm:$0xff] %v10443_v54   ;;  %10511 = vst [vmem:[#allocation2 + $0x40] sm:$0xff] %v10448_v3   ;;  %v6345_v43 = vrot.slane %v16483_v21, 4 }
 0x318   : > { %10512 = vst [vmem:[#allocation2 + $0x48] sm:$0xff] %v10453_v51   ;;  %10513 = vst [vmem:[#allocation2 + $0x50] sm:$0xff] %v10458_v39  }
 0x319   : > { %10514 = vst [vmem:[#allocation2 + $0x58] sm:$0xff] %v10463_v61   ;;  %10515 = vst [vmem:[#allocation2 + $0x60] sm:$0xff] %v10468_v42   ;;  %v6346_v44 = vor.u32 %v6345_v43, %v6342_v29  ;;  %v12117_v42 = vld [vmem:[%s16161_s7 + $0x1b0] sm:$0xff]  }
 0x31a   : > { %10516 = vst [vmem:[#allocation2 + $0x68] sm:$0xff] %v10473_v24   ;;  %10517 = vst [vmem:[#allocation2 + $0x70] sm:$0xff] %v10478_v11   ;;  %v5804_v34 = vld [vmem:[#allocation2 + $0xc] sm:$0xf] }
 0x31b   : > { %10518 = vst [vmem:[#allocation2 + $0x78] sm:$0xff] %v10483_v45   ;;  %v5805_v17 = vld [vmem:[#allocation2 + $0x10] sm:$0xf]  ;;  %v5806_v0 = vld [vmem:[#allocation2 + $0x14] sm:$0xf]  ;;  %v9983_v23 = vcombine.low %v5850_v50, %v5804_v34  ;;  %v10009_v13 = vcombine.low %v5803_v52, %v5804_v34  ;;  %vm16485_vm3 = vmmov %vm16484_vm2 }
 0x31c   : > { %v5807_v59 = vld [vmem:[#allocation2 + $0x18] sm:$0xf]  ;;  %v5808_v41 = vld [vmem:[#allocation2 + $0x1c] sm:$0xf]  ;;  %v9984_v47 = vcombine.low %v5805_v17, %v5806_v0  ;;  %v5809_v63 = vld [vmem:[#allocation2 + $0x20] sm:$0xf]  ;;  %v14912_v48 = vcombine.low %v5804_v34, %v5805_v17 }
 0x31d   : > { %v9985_v1 = vcombine.low %v5807_v59, %v5808_v41  ;;  %v14904_v38 = vcombine.low %v5806_v0, %v5807_v59  ;;  %v14906_v35 = vld [vmem:[#allocation2 + $0x24] sm:$0xf]  ;;  %v14908_v15 = vld [vmem:[#allocation2 + $0x28] sm:$0xf]  ;;  %v14910_v5 = vld [vmem:[#allocation2 + $0x2c] sm:$0xf]  ;;  %v14914_v33 = vcombine.low %v5808_v41, %v5809_v63 }
 0x31e   : > { %v5954_v26 = vshrl.u32 %v9983_v23, 16  ;;  %v5957_v28 = vshll.u32 %v9983_v23, 16  ;;  %v5962_v49 = vshrl.u32 %v9984_v47, 16  ;;  %v5965_v4 = vshll.u32 %v9984_v47, 16  ;;  %v14916_v2 = vld [vmem:[#allocation2 + $0x30] sm:$0xf]  ;;  %vm16486_vm6 = vmmov %vm16484_vm2 }
 0x31f   : > { %v6348_v46 = vshrl.u32 %v10009_v13, 16  ;;  %v6351_v12 = vshll.u32 %v10009_v13, 16  ;;  %v5971_v53 = vshrl.u32 %v9985_v1, 16  ;;  %v5974_v18 = vshll.u32 %v9985_v1, 16  ;;  %v14918_v56 = vld [vmem:[#allocation2 + $0x34] sm:$0xf]  ;;  %vm16487_vm7 = vmmov %vm16484_vm2 }
 0x320   : > { %v5956_v40 = vrot.slane %v5954_v26, 3  ;;  %v5959_v60 = vrot.slane %v5957_v28, 4  ;;  %v5964_v27 = vrot.slane %v5962_v49, 3  ;;  %v5967_v6 = vrot.slane %v5965_v4, 4  ;;  %v14920_v25 = vld [vmem:[#allocation2 + $0x38] sm:$0xf]  ;;  %vm16488_vm8 = vmmov %vm16484_vm2 }
 0x321   : > { %v6350_v14 = vrot.slane %v6348_v46, 3  ;;  %v6353_v58 = vrot.slane %v6351_v12, 4  ;;  %v5973_v19 = vrot.slane %v5971_v53, 3  ;;  %v5976_v20 = vrot.slane %v5974_v18, 4  ;;  %v14922_v36 = vld [vmem:[#allocation2 + $0x3c] sm:$0xf]  ;;  %vm16489_vm9 = vmmov %vm16484_vm2 }
 0x322   : > { %v5960_v9 = vor.u32 %v5959_v60, %v5956_v40  ;;  %v5968_v32 = vor.u32 %v5967_v6, %v5964_v27  ;;  %v9986_v55 = vcombine.low %v5809_v63, %v14906_v35  ;;  %v9987_v57 = vcombine.low %v14908_v15, %v14910_v5  ;;  %v14938_v21 = vld [vmem:[#allocation2 + $0x40] sm:$0xf]  ;;  %v14940_v43 = vld [vmem:[#allocation2 + $0x44] sm:$0xf]  ;;  %v12130_v0 = vld [vmem:[%s16161_s7 + $0x130] sm:$0xff]  }
 0x323   : > { %v6354_v62 = vor.u32 %v6353_v58, %v6350_v14  ;;  %v5977_v31 = vor.u32 %v5976_v20, %v5973_v19  ;;  %v9988_v54 = vcombine.low %v14916_v2, %v14918_v56  ;;  %v9989_v3 = vcombine.low %v14920_v25, %v14922_v36  ;;  %v12120_v13 = vld [vmem:[%s16161_s7 + $0x1a8] sm:$0xff]   ;;  %v14960_v40 = vld [vmem:[#allocation2 + $0x50] sm:$0xf]  ;;  %v14962_v60 = vld [vmem:[#allocation2 + $0x54] sm:$0xf] }
 0x324   : > { %v5969_v51 = vsel %vm16484_vm2, %v5960_v9, %v5968_v32  ;;  %v5980_v39 = vshrl.u32 %v9986_v55, 16  ;;  %v5983_v61 = vshll.u32 %v9986_v55, 16  ;;  %v5989_v24 = vshrl.u32 %v9987_v57, 16  ;;  %v14956_v12 = vld [vmem:[#allocation2 + $0x48] sm:$0xf]  ;;  %v12123_v14 = vld [vmem:[%s16161_s7 + $0x1a0] sm:$0xff]   ;;  %vm16490_vm13 = vmmov %vm16484_vm2 }
 0x325   : > { %11472 = vmatprep.mubr.bf16.mxu0 %v5969_v51  ;;  %v6355_v11 = vsel %vm16485_vm3, %v6346_v44, %v6354_v62  ;;  %v5978_v45 = vsel %vm16486_vm6, %v5968_v32, %v5977_v31  ;;  %v6356_v37 = vsel %vm16487_vm7, %v6354_v62, %v5968_v32  ;;  %v5992_v29 = vshll.u32 %v9987_v57, 16  ;;  %v14958_v53 = vld [vmem:[#allocation2 + $0x4c] sm:$0xf]  ;;  %v12135_v55 = vld [vmem:[%s16161_s7 + $0x120] sm:$0xff]   ;;  %vm16491_vm14 = vmmov %vm16484_vm2 }
 0x326   : > { %11520 = vmatprep.mubr.bf16.mxu1 %v6355_v11  ;;  %11473 = vmatmul.mubr.bf16.vlgmr.msra.gmra.mxu0 %v5978_v45  ;;  %v5982_v50 = vrot.slane %v5980_v39, 3  ;;  %v5985_v52 = vrot.slane %v5983_v61, 4  ;;  %v5991_v34 = vrot.slane %v5989_v24, 3  ;;  %v5998_v17 = vshrl.u32 %v9988_v54, 16  ;;  %v14984_v24 = vld [vmem:[#allocation2 + $0x5c] sm:$0xf]  ;;  %vm16492_vm15 = vmmov %vm16484_vm2 }
 0x327   : > { %11521 = vmatmul.mubr.bf16.vlgmr.msra.gmra.mxu1 %v6356_v37  ;;  %11553 = vmatpush3.bf16.msra.mxu0 %v14491_v7  ;;  %v5994_v59 = vrot.slane %v5992_v29, 4  ;;  %v6001_v41 = vshll.u32 %v9988_v54, 16  ;;  %v9990_v44 = vcombine.low %v14938_v21, %v14940_v43  ;;  %v6007_v26 = vshrl.u32 %v9989_v3, 16  ;;  %v12133_v7 = vld [vmem:[%s16161_s7 + $0x128] sm:$0xff]   ;;  %v12126_v54 = vld [vmem:[%s16161_s7 + $0x198] sm:$0xff]   ;;  %vm16495_vm4 = vmmov %vm16484_vm2 }
 0x328   : > { %v5986_v23 = vor.u32 %v5985_v52, %v5982_v50  ;;  %11524 = vmatprep.mubr.bf16.mxu1 %v5978_v45  ;;  %11554 = vmatprep.subr.bf16.mxu0 %v12117_v42  ;;  %v6000_v47 = vrot.slane %v5998_v17, 3  ;;  %v6010_v28 = vshll.u32 %v9989_v3, 16  ;;  %v9991_v58 = vcombine.low %v14956_v12, %v14958_v53  ;;  %v12138_v3 = vld [vmem:[%s16161_s7 + $0x118] sm:$0xff]   ;;  %v14986_v11 = vld [vmem:[#allocation2 + $0x60] sm:$0xf]  ;;  %vm16496_vm5 = vmmov %vm16484_vm2 }
 0x329   : > { %v5995_v63 = vor.u32 %v5994_v59, %v5991_v34  ;;  %v6003_v1 = vrot.slane %v6001_v41, 4  ;;  %11601 = vmatpush3.bf16.msra.mxu1 %v14602_v10  ;;  %v6016_v4 = vshrl.u32 %v9990_v44, 16  ;;  %v6019_v46 = vshll.u32 %v9990_v44, 16  ;;  %v14988_v45 = vld [vmem:[#allocation2 + $0x64] sm:$0xf]  ;;  %v12131_v34 = vld [vmem:[%s16161_s7 + $0x190] sm:$0xff]   ;;  %vm16498_vm10 = vmmov %vm16484_vm2 }
 0x32a   : > { %v5987_v49 = vsel %vm16488_vm8, %v5977_v31, %v5986_v23  ;;  %11602 = vmatprep.subr.bf16.mxu1 %v12130_v0  ;;  %v6009_v27 = vrot.slane %v6007_v26, 3  ;;  %v6012_v6 = vrot.slane %v6010_v28, 4  ;;  %v9992_v32 = vcombine.low %v14960_v40, %v14962_v60  ;;  %v12136_v44 = vld [vmem:[%s16161_s7 + $0x188] sm:$0xff]   ;;  %vm16499_vm11 = vmmov %vm16484_vm2  ;;  %v15169_v8 = vld [vmem:[#allocation2 + $0x74] sm:$0xf] }
 0x32b   : > { %11476 = vmatprep.mubr.bf16.mxu0 %v5987_v49  ;;  %11555 = vmatpush3.bf16.msra.mxu0 %v12117_v42  ;;  %v6004_v18 = vor.u32 %v6003_v1, %v6000_v47  ;;  %v5996_v10 = vsel %vm16489_vm9, %v5986_v23, %v5995_v63  ;;  %v6018_v20 = vrot.slane %v6016_v4, 3  ;;  %v6021_v9 = vrot.slane %v6019_v46, 4  ;;  %v14982_v42 = vld [vmem:[#allocation2 + $0x58] sm:$0xf]  ;;  %v12140_v23 = vld [vmem:[%s16161_s7 + $0x110] sm:$0xff]   ;;  %vm16500_vm0 = vmmov %vm16484_vm2 }
 0x32c   : > { %11556 = vmatprep.subr.bf16.mxu0 %v12120_v13  ;;  %v6013_v57 = vor.u32 %v6012_v6, %v6009_v27  ;;  %v6025_v62 = vshrl.u32 %v9991_v58, 16  ;;  %v6028_v31 = vshll.u32 %v9991_v58, 16  ;;  %v6034_v39 = vshrl.u32 %v9992_v32, 16  ;;  %v15002_v47 = vld [vmem:[#allocation2 + $0x1c] sm:$0xf]  ;;  %vm16501_vm1 = vmmov %vm16500_vm0 }
 0x32d   : > { %11603 = vmatpush3.bf16.msra.mxu1 %v12130_v0  ;;  %v6005_v19 = vsel %vm16490_vm13, %v5995_v63, %v6004_v18  ;;  %v6022_v51 = vor.u32 %v6021_v9, %v6018_v20  ;;  %v6037_v61 = vshll.u32 %v9992_v32, 16  ;;  %v9993_v52 = vcombine.low %v14982_v42, %v14984_v24  ;;  %16493 = vst [vmem:[#allocation42_spill] sm:$0xff] %v15002_v47  ;;  %v12144_v63 = vld [vmem:[%s16161_s7 + $0x108] sm:$0xff]   ;;  %v15018_v27 = vld [vmem:[#allocation2 + $0x74] sm:$0xf]  ;;  %vm16502_vm12 = vmmov %vm16500_vm0 }
 0x32e   : > { %11477 = vmatmul.mubr.bf16.gmra.mxu0 %v5996_v10  ;;  %11604 = vmatprep.subr.bf16.mxu1 %v12133_v7  ;;  %v6014_v37 = vsel %vm16491_vm14, %v6004_v18, %v6013_v57  ;;  %v6027_v29 = vrot.slane %v6025_v62, 3  ;;  %v6030_v50 = vrot.slane %v6028_v31, 4  ;;  %v6036_v0 = vrot.slane %v6034_v39, 3  ;;  %v15027_v32 = vld [vmem:[#allocation2 + $0x80] sm:$0xf]  ;;  %vm16503_vm2 = vmmov %vm16500_vm0 }
 0x32f   : > { %11525 = vmatmul.mubr.bf16.gmra.mxu1 %v5987_v49  ;;  %11480 = vmatprep.mubr.bf16.mxu0 %v6005_v19  ;;  %v6023_v17 = vsel %vm16492_vm15, %v6013_v57, %v6022_v51  ;;  %v6039_v59 = vrot.slane %v6037_v61, 4  ;;  %v9994_v41 = vcombine.low %v14986_v11, %v14988_v45  ;;  %v6043_v26 = vshrl.u32 %v9993_v52, 16  ;;  %v15014_v49 = vld [vmem:[#allocation2 + $0x6c] sm:$0xf]  ;;  %v12150_v57 = vld [vmem:[%s16161_s7 + $0x100] sm:$0xff]   ;;  %vm16504_vm3 = vmmov %vm16500_vm0 }
 0x330   : > { %11528 = vmatprep.mubr.bf16.mxu1 %v5996_v10  ;;  %11557 = vmatpush3.bf16.msra.mxu0 %v12120_v13  ;;  %v15004_v13 = vld [vmem:[#allocation2 + $0x20] sm:$0xf]  ;;  %v6031_v1 = vor.u32 %v6030_v50, %v6027_v29  ;;  %v6046_v28 = vshll.u32 %v9993_v52, 16  ;;  %v15016_v10 = vld [vmem:[#allocation2 + $0x70] sm:$0xf]  ;;  %v15047_v29 = vcombine.low %v14906_v35, %v14908_v15  ;;  %v15052_v50 = vld [vmem:[%s16161_s7 + $0x1f8] sm:$0xff]   ;;  %v15060_v35 = vcombine.low %v14910_v5, %v14916_v2 }
 0x331   : > { %11558 = vmatprep.subr.bf16.mxu0 %v12123_v14  ;;  %11605 = vmatpush3.bf16.msra.mxu1 %v12133_v7  ;;  %16494 = vst [vmem:[#allocation67_spill] sm:$0xff] %v15004_v13  ;;  %v15012_v7 = vld [vmem:[#allocation2 + $0x68] sm:$0xf]  ;;  %v6040_v4 = vor.u32 %v6039_v59, %v6036_v0  ;;  %v6052_v46 = vshrl.u32 %v9994_v41, 16  ;;  %v6055_v18 = vshll.u32 %v9994_v41, 16  ;;  %v9996_v9 = vcombine.low %v15016_v10, %v15018_v27  ;;  %vm16505_vm6 = vmmov %vm16500_vm0 }
 0x332   : > { %11606 = vmatprep.subr.bf16.mxu1 %v12135_v55  ;;  %v6032_v58 = vsel %vm16495_vm4, %v6022_v51, %v6031_v1  ;;  %v6048_v20 = vrot.slane %v6046_v28, 4  ;;  %v15041_v51 = vld [vmem:[%s16161_s7 + $0x78] sm:$0xff]   ;;  %v15163_v6 = vld [vmem:[#allocation2 + $0x68] sm:$0xf]  ;;  %vm16506_vm7 = vmmov %vm16500_vm0 }
 0x333   : > { %v6041_v62 = vsel %vm16496_vm5, %v6031_v1, %v6040_v4  ;;  %v6054_v31 = vrot.slane %v6052_v46, 3  ;;  %v15054_v0 = vld [vmem:[#allocation2 + $0x7c] sm:$0xf]  ;;  %v15171_v30 = vld [vmem:[#allocation2 + $0x78] sm:$0xf]  ;;  %vm16507_vm8 = vmmov %vm16500_vm0 }
 0x334   : > { %11559 = vmatpush3.bf16.msra.mxu0 %v12123_v14  ;;  %v9995_v14 = vcombine.low %v15012_v7, %v15014_v49  ;;  %vm16508_vm9 = vmmov %vm16500_vm0 }
 0x335   : > { %11560 = vmatprep.subr.bf16.mxu0 %v12126_v54  ;;  %11607 = vmatpush3.bf16.msra.mxu1 %v12135_v55  ;;  %v12141_v55 = vld [vmem:[%s16161_s7 + $0x180] sm:$0xff]   ;;  %vm16509_vm13 = vmmov %vm16500_vm0 }
 0x336   : > { %11481 = vmatmul.mubr.bf16.gmra.mxu0 %v6014_v37  ;;  %11608 = vmatprep.subr.bf16.mxu1 %v12138_v3  ;;  %v6061_v39 = vshrl.u32 %v9995_v14, 16  ;;  %v6064_v61 = vshll.u32 %v9995_v14, 16  ;;  %vm16510_vm14 = vmmov %vm16500_vm0 }
 0x337   : > { %11529 = vmatmul.mubr.bf16.gmra.mxu1 %v6005_v19  ;;  %11484 = vmatprep.mubr.bf16.mxu0 %v6023_v17  ;;  %v6045_v19 = vrot.slane %v6043_v26, 3  ;;  %vm16511_vm15 = vmmov %vm16500_vm0 }
 0x338   : > { %11532 = vmatprep.mubr.bf16.mxu1 %v6014_v37  ;;  %11561 = vmatpush3.bf16.msra.mxu0 %v12126_v54  ;;  %v6057_v54 = vrot.slane %v6055_v18, 4  ;;  %v15043_v37 = vld [vmem:[#allocation2 + $0x78] sm:$0xf]  ;;  %v6063_v15 = vrot.slane %v6061_v39, 3  ;;  %v15076_v18 = vcombine.low %v14922_v36, %v14938_v21  ;;  %v15090_v36 = vcombine.low %v14958_v53, %v14960_v40  ;;  %vm16512_vm4 = vmmov %vm16500_vm0 }
 0x339   : > { %11562 = vmatprep.subr.bf16.mxu0 %v12131_v34  ;;  %11609 = vmatpush3.bf16.msra.mxu1 %v12138_v3  ;;  %v15036_v3 = vld [vmem:[#allocation2 + $0x84] sm:$0xf]  ;;  %v6049_v52 = vor.u32 %v6048_v20, %v6045_v19  ;;  %v9997_v1 = vcombine.low %v15043_v37, %v15054_v0  ;;  %v15104_v53 = vcombine.low %v14984_v24, %v14986_v11  ;;  %vm16514_vm5 = vmmov %vm16500_vm0 }
 0x33a   : > { %11610 = vmatprep.subr.bf16.mxu1 %v12140_v23  ;;  %16497 = vst [vmem:[#allocation78_spill] sm:$0xff] %v15036_v3  ;;  %v9998_v59 = vcombine.low %v15027_v32, %v15036_v3  ;;  %v6058_v41 = vor.u32 %v6057_v54, %v6054_v31  ;;  %v15113_v24 = vcombine.low %v14988_v45, %v15012_v7 }
 0x33b   : > { %v6079_v19 = vshrl.u32 %v9997_v1, 16  ;;  %v6082_v20 = vshll.u32 %v9997_v1, 16 }
 0x33c   : > { %11563 = vmatpush3.bf16.msra.mxu0 %v12131_v34  ;;  %v6070_v34 = vshrl.u32 %v9996_v9, 16  ;;  %v6088_v26 = vshrl.u32 %v9998_v59, 16  ;;  %v6059_v5 = vsel %vm16499_vm11, %v6049_v52, %v6058_v41  ;;  %v6091_v46 = vshll.u32 %v9998_v59, 16  ;;  %vm16520_vm11 = vmmov %vm16500_vm0 }
 0x33d   : > { %11564 = vmatprep.subr.bf16.mxu0 %v12136_v44  ;;  %11611 = vmatpush3.bf16.msra.mxu1 %v12140_v23  ;;  %v6066_v23 = vrot.slane %v6064_v61, 4  ;;  %v6081_v31 = vrot.slane %v6079_v19, 3  ;;  %v6084_v54 = vrot.slane %v6082_v20, 4  ;;  %v15125_v20 = vld [vmem:[#allocation2 + $0x30] sm:$0xf] }
 0x33e   : > { %11485 = vmatmul.mubr.bf16.gmra.mxu0 %v6032_v58  ;;  %11612 = vmatprep.subr.bf16.mxu1 %v12144_v63  ;;  %v6072_v2 = vrot.slane %v6070_v34, 3  ;;  %v6090_v61 = vrot.slane %v6088_v26, 3  ;;  %v15117_v26 = vld [vmem:[#allocation2 + $0x2c] sm:$0xf] }
 0x33f   : > { %11533 = vmatmul.mubr.bf16.gmra.mxu1 %v6023_v17  ;;  %11488 = vmatprep.mubr.bf16.mxu0 %v6041_v62  ;;  %v6073_v17 = vshll.u32 %v9996_v9, 16  ;;  %v6067_v14 = vor.u32 %v6066_v23, %v6063_v15  ;;  %v15109_v23 = vld [vmem:[#allocation2 + $0x28] sm:$0xf]  ;;  %v15115_v11 = vor.u32 %v6084_v54, %v6081_v31  ;;  %v15139_v31 = vld [vmem:[#allocation2 + $0x44] sm:$0xf] }
 0x340   : > { %11536 = vmatprep.mubr.bf16.mxu1 %v6032_v58  ;;  %11565 = vmatpush3.bf16.msra.mxu0 %v12136_v44  ;;  %v6050_v44 = vsel %vm16498_vm10, %v6040_v4, %v6049_v52  ;;  %v15072_v4 = vld [vmem:[#allocation2 + $0x88] sm:$0xf]  ;;  %v15082_v58 = vcombine.low %v14940_v43, %v14956_v12  ;;  %v15098_v12 = vcombine.low %v14962_v60, %v14982_v42  ;;  %v6093_v52 = vrot.slane %v6091_v46, 4  ;;  %v15107_v42 = vld [vmem:[#allocation2 + $0x24] sm:$0xf]  ;;  %vm16515_vm10 = vmmov %vm16500_vm0 }
 0x341   : > { %11566 = vmatprep.subr.bf16.mxu0 %v12141_v55  ;;  %11613 = vmatpush3.bf16.msra.mxu1 %v12144_v63  ;;  %v15068_v63 = vcombine.low %v14918_v56, %v14920_v25  ;;  %v6075_v28 = vrot.slane %v6073_v17, 4  ;;  %v6578_v56 = vld [vmem:[#allocation2 + $0x10] sm:$0x8]  ;;  %v15078_v25 = vld [vmem:[#allocation2 + $0x14] sm:$0xf]  ;;  %v9999_v21 = vcombine.low %v15072_v4, %v15072_v4  ;;  %v10037_v19 = vcombine.low %v15004_v13, %v15107_v42 }
 0x342   : > { %11614 = vmatprep.subr.bf16.mxu1 %v12150_v57  ;;  %v10035_v43 = vcombine.low %v6578_v56, %v15078_v25  ;;  %v15141_v54 = vld [vmem:[#allocation2 + $0x48] sm:$0xf] }
 0x343   : > { %v6076_v9 = vor.u32 %v6075_v28, %v6072_v2  ;;  %v6097_v17 = vshrl.u32 %v9999_v21, 16  ;;  %v6100_v59 = vshll.u32 %v9999_v21, 16  ;;  %v15121_v2 = vcombine.low %v15014_v49, %v15016_v10  ;;  %v15129_v21 = vld [vmem:[#allocation2 + $0x38] sm:$0xf]  ;;  %v15135_v10 = vld [vmem:[#allocation2 + $0x3c] sm:$0xf] }
 0x344   : > { %11567 = vmatpush3.bf16.msra.mxu0 %v12141_v55  ;;  %v10010_v55 = vcombine.low %v15027_v32, %v15027_v32  ;;  %v6715_v15 = vshll.u32 %v10035_v43, 16  ;;  %v10038_v49 = vcombine.low %v15109_v23, %v15117_v26  ;;  %v6729_v22 = vshrl.u32 %v10037_v19, 16 }
 0x345   : > { %11615 = vmatpush3.bf16.msra.mxu1 %v12150_v57  ;;  %11648 = vmatprep.subr.bf16.mxu0 %v15041_v51  ;;  %v15086_v57 = vld [vmem:[#allocation2 + $0x18] sm:$0xf]  ;;  %v6077_v40 = vsel %vm16501_vm1, %v6067_v14, %v6076_v9  ;;  %v6099_v28 = vrot.slane %v6097_v17, 3  ;;  %v6102_v56 = vrot.slane %v6100_v59, 4  ;;  %v15151_v17 = vld [vmem:[#allocation2 + $0x50] sm:$0xf]  ;;  %vm16521_vm1 = vmmov %vm16500_vm0 }
 0x346   : > { %11489 = vmatmul.mubr.bf16.gmra.mxu0 %v6050_v44  ;;  %11696 = vmatprep.subr.bf16.mxu1 %v15052_v50  ;;  %v10036_v39 = vcombine.low %v15086_v57, %v15002_v47  ;;  %v6358_v34 = vshrl.u32 %v10010_v55, 16  ;;  %v6361_v60 = vshll.u32 %v10010_v55, 16  ;;  %v6717_v7 = vrot.slane %v6715_v15, 4  ;;  %v15127_v55 = vld [vmem:[#allocation2 + $0x34] sm:$0xf] }
 0x347   : > { %11537 = vmatmul.mubr.bf16.gmra.mxu1 %v6041_v62  ;;  %11492 = vmatprep.mubr.bf16.mxu0 %v6059_v5  ;;  %v6068_v62 = vsel %vm16500_vm0, %v6058_v41, %v6067_v14  ;;  %v6712_v41 = vshrl.u32 %v10035_v43, 16  ;;  %v15137_v43 = vld [vmem:[#allocation2 + $0x40] sm:$0xf]  ;;  %v15155_v59 = vld [vmem:[#allocation2 + $0x58] sm:$0xf]  ;;  %v6103_v16 = vor.u32 %v6102_v56, %v6099_v28 }
 0x348   : > { %11540 = vmatprep.mubr.bf16.mxu1 %v6050_v44  ;;  %v6720_v44 = vshrl.u32 %v10036_v39, 16  ;;  %v6723_v1 = vshll.u32 %v10036_v39, 16  ;;  %v6360_v46 = vrot.slane %v6358_v34, 3  ;;  %v6363_v14 = vrot.slane %v6361_v60, 4  ;;  %v15149_v34 = vld [vmem:[#allocation2 + $0x4c] sm:$0xf] }
 0x349   : > { %v6714_v45 = vrot.slane %v6712_v41, 3  ;;  %v15145_v39 = vcombine.low %v15018_v27, %v15043_v37  ;;  %v15153_v60 = vld [vmem:[#allocation2 + $0x54] sm:$0xf]  ;;  %v15157_v41 = vld [vmem:[#allocation2 + $0x5c] sm:$0xf] }
 0x34a   : > { %v15159_v15 = vld [vmem:[#allocation2 + $0x60] sm:$0xf]  ;;  %v6364_v27 = vor.u32 %v6363_v14, %v6360_v46  ;;  %v15161_v37 = vld [vmem:[#allocation2 + $0x64] sm:$0xf]  ;;  %v6732_v14 = vshll.u32 %v10037_v19, 16  ;;  %v10039_v46 = vcombine.low %v15125_v20, %v15127_v55 }
 0x34b   : > { %v6718_v3 = vor.u32 %v6717_v7, %v6714_v45  ;;  %v10040_v45 = vcombine.low %v15129_v21, %v15135_v10 }
 0x34c   : > { %v6734_v56 = vrot.slane %v6732_v14, 4  ;;  %v6365_v13 = vsel %vm16505_vm6, %v15115_v11, %v6364_v27  ;;  %vm16525_vm6 = vmmov %vm16500_vm0 }
 0x34d   : > { %v6756_v14 = vshrl.u32 %v10040_v45, 16  ;;  %v6759_v28 = vshll.u32 %v10040_v45, 16 }
 0x34e   : > { %11493 = vmatmul.mubr.bf16.gmra.mxu0 %v6068_v62 }
 0x34f   : > { %11541 = vmatmul.mubr.bf16.gmra.mxu1 %v6059_v5  ;;  %11496 = vmatprep.mubr.bf16.mxu0 %v6077_v40  ;;  %v6094_v5 = vor.u32 %v6093_v52, %v6090_v61  ;;  %v6725_v52 = vrot.slane %v6723_v1, 4  ;;  %v15167_v1 = vld [vmem:[#allocation2 + $0x70] sm:$0xf] }
 0x350   : > { %11544 = vmatprep.mubr.bf16.mxu1 %v6068_v62  ;;  %v6086_v62 = vsel %vm16502_vm12, %v6076_v9, %v15115_v11  ;;  %v6722_v9 = vrot.slane %v6720_v44, 3  ;;  %v15165_v44 = vld [vmem:[#allocation2 + $0x6c] sm:$0xf]  ;;  %vm16522_vm12 = vmmov %vm16500_vm0 }
 0x351   : > { %v6095_v61 = vsel %vm16503_vm2, %v15115_v11, %v6094_v5  ;;  %vm16523_vm2 = vmmov %vm16500_vm0 }
 0x356   : > { %11497 = vmatmul.mubr.bf16.gmra.mxu0 %v6086_v62 }
 0x357   : > { %11545 = vmatmul.mubr.bf16.gmra.mxu1 %v6077_v40  ;;  %11500 = vmatprep.mubr.bf16.mxu0 %v6095_v61  ;;  %v6738_v61 = vshrl.u32 %v10038_v49, 16  ;;  %v6741_v40 = vshll.u32 %v10038_v49, 16  ;;  %v6104_v49 = vsel %vm16504_vm3, %v6094_v5, %v6103_v16  ;;  %v6747_v16 = vshrl.u32 %v10039_v46, 16  ;;  %vm16524_vm3 = vmmov %vm16500_vm0 }
 0x358   : > { %11548 = vmatprep.mubr.bf16.mxu1 %v6086_v62  ;;  %v6726_v62 = vor.u32 %v6725_v52, %v6722_v9  ;;  %v6731_v52 = vrot.slane %v6729_v22, 3  ;;  %v6750_v5 = vshll.u32 %v10039_v46, 16  ;;  %v10042_v46 = vcombine.low %v15141_v54, %v15149_v34 }
 0x359   : > { %v6740_v7 = vrot.slane %v6738_v61, 3  ;;  %v6743_v9 = vrot.slane %v6741_v40, 4  ;;  %v6749_v11 = vrot.slane %v6747_v16, 3  ;;  %v6758_v40 = vrot.slane %v6756_v14, 3  ;;  %v12164_v14 = vld [vmem:[%s16161_s7 + $0x60] sm:$0xff]  }
 0x35a   : > { %v6727_v19 = vsel %vm16506_vm7, %v6718_v3, %v6726_v62  ;;  %v6735_v22 = vor.u32 %v6734_v56, %v6731_v52  ;;  %v12154_v3 = vld [vmem:[%s16161_s7 + $0x70] sm:$0xff]   ;;  %v6752_v27 = vrot.slane %v6750_v5, 4  ;;  %v6761_v61 = vrot.slane %v6759_v28, 4 }
 0x35b   : > { %v12175_v56 = vld [vmem:[%s16161_s7 + $0x1f0] sm:$0xff]   ;;  %v6777_v52 = vshll.u32 %v10042_v46, 16  ;;  %vm16547_vm7 = vsmask.f32 7424 }
 0x35c   : > { %v6736_v47 = vsel %vm16507_vm8, %v6726_v62, %v6735_v22  ;;  %v6753_v28 = vor.u32 %v6752_v27, %v6749_v11  ;;  %vm16548_vm8 = vmmov %vm16547_vm7 }
 0x35e   : > { %11501 = vmatmul.mubr.bf16.gmra.mxu0 %v6104_v49  ;;  %v6744_v49 = vor.u32 %v6743_v9, %v6740_v7  ;;  %v6762_v7 = vor.u32 %v6761_v61, %v6758_v40  ;;  %v6774_v9 = vshrl.u32 %v10042_v46, 16 }
 0x35f   : > { %11549 = vmatmul.mubr.bf16.gmra.mxu1 %v6365_v13  ;;  %11568 = vmatprep.mubr.bf16.mxu0 %v6727_v19  ;;  %v10041_v13 = vcombine.low %v15137_v43, %v15139_v31 }
 0x360   : > { %11616 = vmatprep.mubr.bf16.mxu1 %v14912_v48  ;;  %v6745_v62 = vsel %vm16508_vm9, %v6735_v22, %v6744_v49  ;;  %v6754_v22 = vsel %vm16509_vm13, %v6744_v49, %v6753_v28  ;;  %v6763_v11 = vsel %vm16510_vm14, %v6753_v28, %v6762_v7  ;;  %v6776_v27 = vrot.slane %v6774_v9, 3  ;;  %v12182_v49 = vld [vmem:[%s16161_s7 + $0x1e0] sm:$0xff]   ;;  %vm16549_vm9 = vmmov %vm16547_vm7 }
 0x361   : > { %v6765_v19 = vshrl.u32 %v10041_v13, 16  ;;  %v6768_v45 = vshll.u32 %v10041_v13, 16  ;;  %v6779_v13 = vrot.slane %v6777_v52, 4  ;;  %vm16550_vm13 = vmmov %vm16547_vm7 }
 0x362   : > { %vm16551_vm14 = vmmov %vm16547_vm7 }
 0x363   : > { %v6767_v16 = vrot.slane %v6765_v19, 3  ;;  %v6770_v5 = vrot.slane %v6768_v45, 4  ;;  %v12186_v45 = vld [vmem:[%s16161_s7 + $0x1d8] sm:$0xff]  }
 0x365   : > { %v6771_v40 = vor.u32 %v6770_v5, %v6767_v16 }
 0x366   : > { %11569 = vmatmul.mubr.bf16.vlgmr.msra.gmra.mxu0 %v6736_v47  ;;  %v12159_v47 = vld [vmem:[%s16161_s7 + $0x68] sm:$0xff]  }
 0x367   : > { %11617 = vmatmul.mubr.bf16.vlgmr.msra.gmra.mxu1 %v14904_v38  ;;  %11649 = vmatpush3.bf16.msra.mxu0 %v15041_v51  ;;  %v12179_v51 = vld [vmem:[%s16161_s7 + $0x1e8] sm:$0xff]  }
 0x368   : > { %11572 = vmatprep.mubr.bf16.mxu0 %v6745_v62  ;;  %11620 = vmatprep.mubr.bf16.mxu1 %v14914_v33  ;;  %v6780_v62 = vor.u32 %v6779_v13, %v6776_v27 }
 0x369   : > { %11650 = vmatprep.subr.bf16.mxu0 %v12154_v3  ;;  %11697 = vmatpush3.bf16.msra.mxu1 %v15052_v50  ;;  %v10043_v50 = vcombine.low %v15151_v17, %v15153_v60 }
 0x36a   : > { %11698 = vmatprep.subr.bf16.mxu1 %v12175_v56  ;;  %v6781_v16 = vsel %vm16512_vm4, %v6771_v40, %v6780_v62  ;;  %vm16553_vm4 = vmmov %vm16547_vm7 }
 0x36b   : > { %11651 = vmatpush3.bf16.msra.mxu0 %v12154_v3  ;;  %v10044_v3 = vcombine.low %v15155_v59, %v15157_v41  ;;  %v6783_v61 = vshrl.u32 %v10043_v50, 16  ;;  %v6786_v46 = vshll.u32 %v10043_v50, 16 }
 0x36c   : > { %11652 = vmatprep.subr.bf16.mxu0 %v12159_v47 }
 0x36d   : > { %11699 = vmatpush3.bf16.msra.mxu1 %v12175_v56  ;;  %v12169_v56 = vld [vmem:[%s16161_s7 + $0x58] sm:$0xff]   ;;  %v6792_v28 = vshrl.u32 %v10044_v3, 16  ;;  %v6795_v19 = vshll.u32 %v10044_v3, 16  ;;  %v6785_v9 = vrot.slane %v6783_v61, 3  ;;  %v6788_v52 = vrot.slane %v6786_v46, 4  ;;  %v12183_v3 = vld [vmem:[%s16161_s7 + $0x48] sm:$0xff]  }
 0x36e   : > { %11573 = vmatmul.mubr.bf16.gmra.mxu0 %v6754_v22  ;;  %11700 = vmatprep.subr.bf16.mxu1 %v12179_v51  ;;  %v10045_v22 = vcombine.low %v15159_v15, %v15161_v37  ;;  %v12193_v46 = vld [vmem:[%s16161_s7 + $0x1c8] sm:$0xff]  }
 0x36f   : > { %11621 = vmatmul.mubr.bf16.gmra.mxu1 %v15047_v29  ;;  %11576 = vmatprep.mubr.bf16.mxu0 %v6763_v11  ;;  %v6794_v5 = vrot.slane %v6792_v28, 3  ;;  %v6797_v50 = vrot.slane %v6795_v19, 4  ;;  %v6789_v11 = vor.u32 %v6788_v52, %v6785_v9  ;;  %v15268_v28 = vld [vmem:[#allocation2 + $0x7c] sm:$0xf]  ;;  %v10047_v9 = vcombine.low %v15167_v1, %v15169_v8 }
 0x370   : > { %11624 = vmatprep.mubr.bf16.mxu1 %v15060_v35  ;;  %11653 = vmatpush3.bf16.msra.mxu0 %v12159_v47  ;;  %v6772_v47 = vsel %vm16511_vm15, %v6762_v7, %v6771_v40  ;;  %v12189_v7 = vld [vmem:[%s16161_s7 + $0x1d0] sm:$0xff]   ;;  %v6801_v27 = vshrl.u32 %v10045_v22, 16  ;;  %v6804_v13 = vshll.u32 %v10045_v22, 16  ;;  %16513 = vst [vmem:[#allocation43_spill] sm:$0xff] %v15268_v28  ;;  %vm16552_vm15 = vmmov %vm16547_vm7 }
 0x371   : > { %11654 = vmatprep.subr.bf16.mxu0 %v12164_v14  ;;  %11701 = vmatpush3.bf16.msra.mxu1 %v12179_v51  ;;  %v12176_v51 = vld [vmem:[%s16161_s7 + $0x50] sm:$0xff]  }
 0x372   : > { %11702 = vmatprep.subr.bf16.mxu1 %v12182_v49  ;;  %v6803_v19 = vrot.slane %v6801_v27, 3 }
 0x374   : > { %11655 = vmatpush3.bf16.msra.mxu0 %v12164_v14  ;;  %v10046_v14 = vcombine.low %v15163_v6, %v15165_v44 }
 0x375   : > { %11656 = vmatprep.subr.bf16.mxu0 %v12169_v56  ;;  %11703 = vmatpush3.bf16.msra.mxu1 %v12182_v49  ;;  %v6798_v49 = vor.u32 %v6797_v50, %v6794_v5  ;;  %v6819_v50 = vshrl.u32 %v10047_v9, 16 }
 0x376   : > { %11577 = vmatmul.mubr.bf16.gmra.mxu0 %v6772_v47  ;;  %11704 = vmatprep.subr.bf16.mxu1 %v12186_v45  ;;  %v6810_v40 = vshrl.u32 %v10046_v14, 16  ;;  %v6813_v61 = vshll.u32 %v10046_v14, 16  ;;  %v6806_v47 = vrot.slane %v6804_v13, 4  ;;  %v6822_v14 = vshll.u32 %v10047_v9, 16 }
 0x377   : > { %11625 = vmatmul.mubr.bf16.gmra.mxu1 %v15068_v63  ;;  %11580 = vmatprep.mubr.bf16.mxu0 %v6781_v16  ;;  %v6799_v52 = vsel %vm16515_vm10, %v6789_v11, %v6798_v49  ;;  %vm16555_vm10 = vmmov %vm16553_vm4 }
 0x378   : > { %11628 = vmatprep.mubr.bf16.mxu1 %v15076_v18  ;;  %11657 = vmatpush3.bf16.msra.mxu0 %v12169_v56  ;;  %v6790_v56 = vsel %vm16514_vm5, %v6780_v62, %v6789_v11  ;;  %v6812_v22 = vrot.slane %v6810_v40, 3  ;;  %v6815_v16 = vrot.slane %v6813_v61, 4  ;;  %v12195_v62 = vld [vmem:[%s16161_s7 + $0x1c0] sm:$0xff]   ;;  %v6807_v5 = vor.u32 %v6806_v47, %v6803_v19  ;;  %v15289_v11 = vld [vmem:[%s16161_s7 + $0x178] sm:$0xff]   ;;  %v15300_v19 = vld [vmem:[#allocation2 + $0x8c] sm:$0xf] }
 0x379   : > { %11658 = vmatprep.subr.bf16.mxu0 %v12176_v51  ;;  %11705 = vmatpush3.bf16.msra.mxu1 %v12186_v45  ;;  %v12190_v45 = vld [vmem:[%s16161_s7 + $0x40] sm:$0xff]   ;;  %16519 = vst [vmem:[#allocation84_spill] sm:$0xff] %v15300_v19  ;;  %v6821_v47 = vrot.slane %v6819_v50, 3  ;;  %v6824_v9 = vrot.slane %v6822_v14, 4  ;;  %vm16554_vm5 = vmmov %vm16553_vm4 }
 0x37a   : > { %11706 = vmatprep.subr.bf16.mxu1 %v12189_v7  ;;  %v6816_v27 = vor.u32 %v6815_v16, %v6812_v22  ;;  %v15291_v61 = vld [vmem:[#allocation2 + $0x84] sm:$0xf] }
 0x37b   : > { %16517 = vst [vmem:[#allocation81_spill] sm:$0xff] %v15291_v61 }
 0x37c   : > { %11659 = vmatpush3.bf16.msra.mxu0 %v12176_v51  ;;  %v10048_v51 = vcombine.low %v15171_v30, %v15268_v28  ;;  %v6817_v22 = vsel %vm16500_vm0, %v6807_v5, %v6816_v27  ;;  %vm16557_vm0 = vmmov %vm16553_vm4 }
 0x37d   : > { %11660 = vmatprep.subr.bf16.mxu0 %v12183_v3  ;;  %11707 = vmatpush3.bf16.msra.mxu1 %v12189_v7  ;;  %v15284_v7 = vld [vmem:[#allocation2 + $0x80] sm:$0xf] }
 0x37e   : > { %11581 = vmatmul.mubr.bf16.gmra.mxu0 %v6790_v56  ;;  %11708 = vmatprep.subr.bf16.mxu1 %v12193_v46  ;;  %16516 = vst [vmem:[#allocation68_spill] sm:$0xff] %v15284_v7  ;;  %v6828_v13 = vshrl.u32 %v10048_v51, 16  ;;  %v6831_v40 = vshll.u32 %v10048_v51, 16  ;;  %v15298_v56 = vld [vmem:[#allocation2 + $0x88] sm:$0xf] }
 0x37f   : > { %11629 = vmatmul.mubr.bf16.gmra.mxu1 %v15082_v58  ;;  %11584 = vmatprep.mubr.bf16.mxu0 %v6799_v52  ;;  %16518 = vst [vmem:[#allocation69_spill] sm:$0xff] %v15298_v56  ;;  %v10049_v52 = vcombine.low %v15284_v7, %v15291_v61  ;;  %v10050_v28 = vcombine.low %v15298_v56, %v15300_v19  ;;  %v15312_v61 = vld [vmem:[#allocation2 + $0x90] sm:$0xf] }
 0x380   : > { %11632 = vmatprep.mubr.bf16.mxu1 %v15090_v36  ;;  %11661 = vmatpush3.bf16.msra.mxu0 %v12183_v3  ;;  %v15296_v3 = vld [vmem:[%s16161_s7 + $0xb8] sm:$0xff]   ;;  %v6830_v16 = vrot.slane %v6828_v13, 3  ;;  %v6833_v51 = vrot.slane %v6831_v40, 4  ;;  %v10051_v19 = vcombine.low %v15312_v61, %v15312_v61 }
 0x381   : > { %11662 = vmatprep.subr.bf16.mxu0 %v12190_v45  ;;  %11709 = vmatpush3.bf16.msra.mxu1 %v12193_v46  ;;  %v6808_v46 = vsel %vm16520_vm11, %v6798_v49, %v6807_v5  ;;  %v6825_v49 = vor.u32 %v6824_v9, %v6821_v47  ;;  %v6846_v14 = vshrl.u32 %v10050_v28, 16  ;;  %vm16556_vm11 = vmmov %vm16553_vm4 }
 0x382   : > { %11710 = vmatprep.subr.bf16.mxu1 %v12195_v62  ;;  %v6834_v50 = vor.u32 %v6833_v51, %v6830_v16  ;;  %v6855_v47 = vshrl.u32 %v10051_v19, 16  ;;  %v6858_v9 = vshll.u32 %v10051_v19, 16  ;;  %v12294_v19 = vld [vmem:[#allocation2 + $0x8] sm:$0xf] }
 0x383   : > { %v6826_v5 = vsel %vm16521_vm1, %v6816_v27, %v6825_v49  ;;  %v6848_v56 = vrot.slane %v6846_v14, 3  ;;  %v12293_v14 = vld [vmem:[#allocation2 + $0x4] sm:$0xf]  ;;  %vm16558_vm1 = vmmov %vm16557_vm0 }
 0x384   : > { %11663 = vmatpush3.bf16.msra.mxu0 %v12190_v45  ;;  %v6837_v45 = vshrl.u32 %v10049_v52, 16  ;;  %v6857_v16 = vrot.slane %v6855_v47, 3  ;;  %v6860_v51 = vrot.slane %v6858_v9, 4  ;;  %v12231_v47 = vld [vmem:[#allocation2 + $0x1c] sm:$0xff]  }
 0x385   : > { %11711 = vmatpush3.bf16.msra.mxu1 %v12195_v62  ;;  %11744 = vmatprep.subr.bf16.mxu0 %v15289_v11  ;;  %v6840_v62 = vshll.u32 %v10049_v52, 16 }
 0x386   : > { %11585 = vmatmul.mubr.bf16.gmra.mxu0 %v6808_v46  ;;  %11792 = vmatprep.subr.bf16.mxu1 %v15296_v3  ;;  %v6849_v46 = vshll.u32 %v10050_v28, 16  ;;  %v6839_v13 = vrot.slane %v6837_v45, 3 }
 0x387   : > { %11633 = vmatmul.mubr.bf16.gmra.mxu1 %v15098_v12  ;;  %11588 = vmatprep.mubr.bf16.mxu0 %v6817_v22  ;;  %v6842_v40 = vrot.slane %v6840_v62, 4  ;;  %v6835_v22 = vsel %vm16522_vm12, %v6825_v49, %v6834_v50  ;;  %v15324_v49 = vcombine.low %v15054_v0, %v15027_v32  ;;  %v6861_v62 = vor.u32 %v6860_v51, %v6857_v16  ;;  %v12199_v0 = vld [vmem:[%s16161_s7 + $0x170] sm:$0xff]   ;;  %vm16559_vm12 = vmmov %vm16557_vm0 }
 0x388   : > { %11636 = vmatprep.mubr.bf16.mxu1 %v15104_v53  ;;  %v6851_v7 = vrot.slane %v6849_v46, 4  ;;  %v16527_v32 = vcombine.low %v15078_v25, %v15086_v57  ;;  %v16531_v25 = vcombine.low %v15107_v42, %v15109_v23  ;;  %v12215_v57 = vld [vmem:[%s16161_s7 + $0xa8] sm:$0xff]   ;;  %v12217_v42 = vld [vmem:[%s16161_s7 + $0xa0] sm:$0xff]   ;;  %v16532_v23 = vcombine.low %v15117_v26, %v15125_v20  ;;  %v12222_v26 = vld [vmem:[%s16161_s7 + $0x90] sm:$0xff]  }
 0x389   : > { %v6843_v28 = vor.u32 %v6842_v40, %v6839_v13  ;;  %v16528_v13 = vld [vmem:[#allocation42_spill] sm:$0xff]  ;;  %v16529_v40 = vld [vmem:[#allocation67_spill] sm:$0xff]  ;;  %v16534_v20 = vcombine.low %v15135_v10, %v15137_v43  ;;  %v12229_v10 = vld [vmem:[%s16161_s7 + $0x80] sm:$0xff]   ;;  %v16536_v43 = vcombine.low %v15149_v34, %v15151_v17  ;;  %v16540_v17 = vcombine.low %v15165_v44, %v15167_v1 }
 0x38a   : > { %v6852_v52 = vor.u32 %v6851_v7, %v6848_v56  ;;  %v10116_v7 = vcombine.low %v12293_v14, %v12294_v19  ;;  %v12226_v34 = vld [vmem:[#allocation2 + $0xc] sm:$0xff]   ;;  %v8129_v51 = vshll.u32 %v12231_v47, 16 }
 0x38b   : > { %v6844_v27 = vsel %vm16523_vm2, %v6834_v50, %v6843_v28  ;;  %v16526_v50 = vld [vmem:[#allocation78_spill] sm:$0xff]  ;;  %vm16560_vm2 = vmmov %vm16557_vm0 }
 0x38c   : > { %v6853_v45 = vsel %vm16524_vm3, %v6843_v28, %v6852_v52  ;;  %v6862_v56 = vsel %vm16525_vm6, %v6852_v52, %v6861_v62  ;;  %v10107_v46 = vcombine.low %v16526_v50, %v15072_v4  ;;  %v16530_v4 = vcombine.low %v16528_v13, %v16529_v40  ;;  %v16546_v52 = vld [vmem:[#allocation84_spill] sm:$0xff]  ;;  %v12234_v14 = vld [vmem:[#allocation2 + $0x2c] sm:$0xff]   ;;  %vm16561_vm3 = vmmov %vm16557_vm0 }
 0x38d   : > { %v8133_v50 = vshrl.u32 %v12231_v47, 16  ;;  %vm16562_vm6 = vmmov %vm16557_vm0 }
 0x38e   : > { %11589 = vmatmul.mubr.bf16.gmra.mxu0 %v6826_v5  ;;  %v12212_v5 = vld [vmem:[%s16161_s7 + $0xb0] sm:$0xff]  }
 0x38f   : > { %11637 = vmatmul.mubr.bf16.gmra.mxu1 %v15113_v24  ;;  %11592 = vmatprep.mubr.bf16.mxu0 %v6835_v22  ;;  %v16545_v22 = vld [vmem:[#allocation81_spill] sm:$0xff] }
 0x390   : > { %11640 = vmatprep.mubr.bf16.mxu1 %v15121_v2 }
 0x396   : > { %11593 = vmatmul.mubr.bf16.gmra.mxu0 %v6844_v27  ;;  %v10156_v27 = vcombine.low %v16546_v52, %v15312_v61  ;;  %v8145_v61 = vshll.u32 %v12234_v14, 16 }
 0x397   : > { %11641 = vmatmul.mubr.bf16.gmra.mxu1 %v15145_v39  ;;  %11596 = vmatprep.mubr.bf16.mxu0 %v6853_v45  ;;  %v12232_v45 = vld [vmem:[#allocation2 + $0x24] sm:$0xff]  }
 0x398   : > { %11644 = vmatprep.mubr.bf16.mxu1 %v15324_v49 }
 0x39e   : > { %11597 = vmatmul.mubr.bf16.gmra.mxu0 %v6862_v56 }
 0x39f   : > { %11645 = vmatmul.mubr.bf16.gmra.mxu1 %v10107_v46  ;;  %11664 = vmatprep.mubr.bf16.mxu0 %v10116_v7  ;;  %v8131_v7 = vrot.slane %v8129_v51, 1  ;;  %v8137_v46 = vshll.u32 %v12232_v45, 16  ;;  %v12241_v51 = vld [vmem:[#allocation2 + $0x54] sm:$0xff]  }
 0x3a0   : > { %11712 = vmatprep.mubr.bf16.mxu1 %v16527_v32 }
 0x3a1   : > { %v8135_v32 = vor.u32 %v8133_v50, %v8131_v7  ;;  %v8139_v13 = vrot.slane %v8137_v46, 1 }
 0x3a6   : > { %11665 = vmatmul.mubr.bf16.vlgmr.msra.gmra.mxu0 %v14912_v48  ;;  %v12202_v48 = vld [vmem:[%s16161_s7 + $0x168] sm:$0xff]  }
 0x3a7   : > { %11713 = vmatmul.mubr.bf16.vlgmr.msra.gmra.mxu1 %v16530_v4  ;;  %11745 = vmatpush3.bf16.msra.mxu0 %v15289_v11  ;;  %v16533_v11 = vcombine.low %v15127_v55, %v15129_v21  ;;  %v16535_v55 = vcombine.low %v15139_v31, %v15141_v54  ;;  %v12225_v21 = vld [vmem:[%s16161_s7 + $0x88] sm:$0xff]   ;;  %v16537_v31 = vcombine.low %v15153_v60, %v15155_v59  ;;  %v8116_v59 = vshll.u32 %v12226_v34, 16 }
 0x3a8   : > { %11668 = vmatprep.mubr.bf16.mxu0 %v14904_v38  ;;  %11716 = vmatprep.mubr.bf16.mxu1 %v16531_v25  ;;  %v12205_v38 = vld [vmem:[%s16161_s7 + $0x160] sm:$0xff]   ;;  %v16539_v54 = vcombine.low %v15161_v37, %v15163_v6  ;;  %v16541_v60 = vcombine.low %v15169_v8, %v15171_v30  ;;  %v16543_v6 = vld [vmem:[#allocation43_spill] sm:$0xff]  ;;  %v8114_v8 = vshrl.u32 %v12226_v34, 16  ;;  %v8147_v4 = vrot.slane %v8145_v61, 1 }
 0x3a9   : > { %11746 = vmatprep.subr.bf16.mxu0 %v12199_v0  ;;  %11793 = vmatpush3.bf16.msra.mxu1 %v15296_v3  ;;  %v12220_v3 = vld [vmem:[%s16161_s7 + $0x98] sm:$0xff]   ;;  %v8118_v44 = vrot.slane %v8116_v59, 1  ;;  %v12239_v34 = vld [vmem:[%s16161_s7 + $0x220] sm:$0xff]  }
 0x3aa   : > { %11794 = vmatprep.subr.bf16.mxu1 %v12212_v5  ;;  %v12237_v25 = vld [vmem:[#allocation2 + $0x3c] sm:$0xff]  }
 0x3ab   : > { %11747 = vmatpush3.bf16.msra.mxu0 %v12199_v0  ;;  %v8119_v9 = vor.u32 %v8118_v44, %v8114_v8  ;;  %v12235_v0 = vld [vmem:[#allocation2 + $0x34] sm:$0xff]  }
 0x3ac   : > { %11748 = vmatprep.subr.bf16.mxu0 %v12202_v48 }
 0x3ad   : > { %11795 = vmatpush3.bf16.msra.mxu1 %v12212_v5 }
 0x3ae   : > { %11669 = vmatmul.mubr.bf16.gmra.mxu0 %v14914_v33  ;;  %11796 = vmatprep.subr.bf16.mxu1 %v12215_v57  ;;  %v12208_v33 = vld [vmem:[%s16161_s7 + $0x158] sm:$0xff]  }
 0x3af   : > { %11717 = vmatmul.mubr.bf16.gmra.mxu1 %v16532_v23  ;;  %11672 = vmatprep.mubr.bf16.mxu0 %v15047_v29  ;;  %v12213_v29 = vld [vmem:[%s16161_s7 + $0x150] sm:$0xff]  }
 0x3b0   : > { %11720 = vmatprep.mubr.bf16.mxu1 %v16533_v11  ;;  %11749 = vmatpush3.bf16.msra.mxu0 %v12202_v48  ;;  %v8149_v11 = vshrl.u32 %v12234_v14, 16 }
 0x3b1   : > { %11750 = vmatprep.subr.bf16.mxu0 %v12205_v38  ;;  %11797 = vmatpush3.bf16.msra.mxu1 %v12215_v57  ;;  %v8140_v57 = vsel %vm16550_vm13, %v8135_v32, %v8139_v13  ;;  %vm16566_vm13 = vmmov %vm16557_vm0 }
 0x3b2   : > { %11798 = vmatprep.subr.bf16.mxu1 %v12217_v42 }
 0x3b4   : > { %11751 = vmatpush3.bf16.msra.mxu0 %v12205_v38  ;;  %v8141_v38 = vshrl.u32 %v12232_v45, 16 }
 0x3b5   : > { %11752 = vmatprep.subr.bf16.mxu0 %v12208_v33  ;;  %11799 = vmatpush3.bf16.msra.mxu1 %v12217_v42 }
 0x3b6   : > { %11673 = vmatmul.mubr.bf16.gmra.mxu0 %v15060_v35  ;;  %11800 = vmatprep.subr.bf16.mxu1 %v12220_v3  ;;  %v12218_v35 = vld [vmem:[%s16161_s7 + $0x148] sm:$0xff]  }
 0x3b7   : > { %11721 = vmatmul.mubr.bf16.gmra.mxu1 %v16534_v20  ;;  %11676 = vmatprep.mubr.bf16.mxu0 %v15068_v63  ;;  %v12223_v63 = vld [vmem:[%s16161_s7 + $0x140] sm:$0xff]  }
 0x3b8   : > { %11724 = vmatprep.mubr.bf16.mxu1 %v16535_v55  ;;  %11753 = vmatpush3.bf16.msra.mxu0 %v12208_v33  ;;  %v8153_v33 = vshll.u32 %v12235_v0, 16 }
 0x3b9   : > { %11754 = vmatprep.subr.bf16.mxu0 %v12213_v29  ;;  %11801 = vmatpush3.bf16.msra.mxu1 %v12220_v3  ;;  %v12236_v3 = vld [vmem:[%s16161_s7 + $0x228] sm:$0xff]  }
 0x3ba   : > { %11802 = vmatprep.subr.bf16.mxu1 %v12222_v26 }
 0x3bc   : > { %11755 = vmatpush3.bf16.msra.mxu0 %v12213_v29 }
 0x3bd   : > { %11756 = vmatprep.subr.bf16.mxu0 %v12218_v35  ;;  %11803 = vmatpush3.bf16.msra.mxu1 %v12222_v26  ;;  %v8143_v26 = vor.u32 %v8141_v38, %v8139_v13 }
 0x3be   : > { %11677 = vmatmul.mubr.bf16.gmra.mxu0 %v15076_v18  ;;  %11804 = vmatprep.subr.bf16.mxu1 %v12225_v21  ;;  %v12230_v18 = vld [vmem:[%s16161_s7 + $0x238] sm:$0xff]  }
 0x3bf   : > { %11725 = vmatmul.mubr.bf16.gmra.mxu1 %v16536_v43  ;;  %11680 = vmatprep.mubr.bf16.mxu0 %v15082_v58  ;;  %v16538_v58 = vcombine.low %v15157_v41, %v15159_v15  ;;  %v12227_v41 = vld [vmem:[#allocation2 + $0x14] sm:$0xff]   ;;  %v16542_v15 = vld [vmem:[#allocation68_spill] sm:$0xff] }
 0x3c0   : > { %11728 = vmatprep.mubr.bf16.mxu1 %v16537_v31  ;;  %11757 = vmatpush3.bf16.msra.mxu0 %v12218_v35  ;;  %v10154_v37 = vcombine.low %v16543_v6, %v16542_v15  ;;  %v8121_v30 = vshll.u32 %v12227_v41, 16  ;;  %v8151_v35 = vor.u32 %v8149_v11, %v8147_v4  ;;  %v8155_v31 = vrot.slane %v8153_v33, 1 }
 0x3c1   : > { %11758 = vmatprep.subr.bf16.mxu0 %v12223_v63  ;;  %11805 = vmatpush3.bf16.msra.mxu1 %v12225_v21  ;;  %v8161_v21 = vshll.u32 %v12237_v25, 16  ;;  %v8157_v15 = vshrl.u32 %v12235_v0, 16 }
 0x3c2   : > { %11806 = vmatprep.subr.bf16.mxu1 %v12229_v10 }
 0x3c3   : > { %v8163_v59 = vrot.slane %v8161_v21, 1 }
 0x3c4   : > { %11759 = vmatpush3.bf16.msra.mxu0 %v12223_v63 }
 0x3c5   : > { %11807 = vmatpush3.bf16.msra.mxu1 %v12229_v10  ;;  %11840 = vmatprep.subr.bf16.mxu0 %v12230_v18 }
 0x3c6   : > { %11681 = vmatmul.mubr.bf16.gmra.mxu0 %v15090_v36  ;;  %v12228_v36 = vld [vmem:[#allocation2 + $0x4] sm:$0xff]  }
 0x3c7   : > { %11729 = vmatmul.mubr.bf16.gmra.mxu1 %v16538_v58  ;;  %11684 = vmatprep.mubr.bf16.mxu0 %v15098_v12  ;;  %v8481_v12 = vshll.u32 %v12228_v36, 16 }
 0x3c8   : > { %11732 = vmatprep.mubr.bf16.mxu1 %v16539_v54  ;;  %v8148_v54 = vsel %vm16551_vm14, %v8143_v26, %v8147_v4  ;;  %vm16567_vm14 = vmmov %vm16557_vm0 }
 0x3c9   : > { %v8483_v1 = vrot.slane %v8481_v12, 1  ;;  %v12240_v12 = vld [vmem:[#allocation2 + $0x4c] sm:$0xff]  }
 0x3ca   : > { %v8181_v0 = vshrl.u32 %v12240_v12, 16 }
 0x3ce   : > { %11685 = vmatmul.mubr.bf16.gmra.mxu0 %v15104_v53  ;;  %v16544_v53 = vld [vmem:[#allocation69_spill] sm:$0xff] }
 0x3cf   : > { %11733 = vmatmul.mubr.bf16.gmra.mxu1 %v16540_v17  ;;  %11688 = vmatprep.mubr.bf16.mxu0 %v15113_v24  ;;  %v10155_v28 = vcombine.low %v16545_v22, %v16544_v53  ;;  %v8479_v24 = vshrl.u32 %v12228_v36, 16  ;;  %v8165_v53 = vshrl.u32 %v12237_v25, 16 }
 0x3d0   : > { %11736 = vmatprep.mubr.bf16.mxu1 %v16541_v60  ;;  %v8156_v60 = vsel %vm16552_vm15, %v8151_v35, %v8155_v31  ;;  %vm16568_vm15 = vmmov %vm16557_vm0 }
 0x3d1   : > { %v8484_v16 = vor.u32 %v8483_v1, %v8479_v24  ;;  %v12242_v24 = vld [vmem:[%s16161_s7 + $0x218] sm:$0xff]   ;;  %v8167_v8 = vor.u32 %v8165_v53, %v8163_v59 }
 0x3d3   : > { %v8485_v19 = vsel %vm16548_vm8, %v8484_v16, %v8118_v44  ;;  %v8159_v44 = vor.u32 %v8157_v15, %v8155_v31  ;;  %v12246_v31 = vld [vmem:[#allocation2 + $0x6c] sm:$0xff]   ;;  %vm16564_vm8 = vmmov %vm16557_vm0 }
 0x3d4   : > { %v8209_v53 = vshll.u32 %v12246_v31, 16 }
 0x3d5   : > { %v8164_v45 = vsel %vm16553_vm4, %v8159_v44, %v8163_v59  ;;  %vm16569_vm4 = vmmov %vm16557_vm0 }
 0x3d6   : > { %11689 = vmatmul.mubr.bf16.gmra.mxu0 %v15121_v2  ;;  %v8123_v2 = vrot.slane %v8121_v30, 1  ;;  %v8177_v30 = vshll.u32 %v12240_v12, 16 }
 0x3d7   : > { %11737 = vmatmul.mubr.bf16.gmra.mxu1 %v10154_v37  ;;  %11692 = vmatprep.mubr.bf16.mxu0 %v15145_v39  ;;  %v8125_v39 = vshrl.u32 %v12227_v41, 16 }
 0x3d8   : > { %11740 = vmatprep.mubr.bf16.mxu1 %v10155_v28  ;;  %v8124_v62 = vsel %vm16547_vm7, %v8119_v9, %v8123_v2  ;;  %vm16563_vm7 = vmmov %vm16557_vm0 }
 0x3d9   : > { %v8127_v56 = vor.u32 %v8125_v39, %v8123_v2 }
 0x3db   : > { %v8132_v5 = vsel %vm16549_vm9, %v8127_v56, %v8131_v7  ;;  %v8179_v7 = vrot.slane %v8177_v30, 1  ;;  %v12243_v56 = vld [vmem:[#allocation2 + $0x5c] sm:$0xff]   ;;  %vm16565_vm9 = vmmov %vm16557_vm0 }
 0x3de   : > { %11693 = vmatmul.mubr.bf16.gmra.mxu0 %v15324_v49  ;;  %v12233_v49 = vld [vmem:[%s16161_s7 + $0x230] sm:$0xff]  }
 0x3df   : > { %11741 = vmatmul.mubr.bf16.gmra.mxu1 %v10156_v27  ;;  %11760 = vmatprep.mubr.bf16.mxu0 %v8124_v62 }
 0x3e0   : > { %11808 = vmatprep.mubr.bf16.mxu1 %v8485_v19 }
 0x3e6   : > { %v11474_v40 = vpop.f32.mrf.mxu0  ;;  %11761 = vmatmul.mubr.bf16.vlgmr.msra.gmra.mxu0 %v8132_v5 }
 0x3e7   : > { %v11522_v48 = vpop.f32.mrf.mxu1  ;;  %11809 = vmatmul.mubr.bf16.vlgmr.msra.gmra.mxu1 %v8124_v62  ;;  %11841 = vmatpush3.bf16.msra.mxu0 %v12230_v18  ;;  %v12238_v18 = vld [vmem:[#allocation2 + $0x44] sm:$0xff]   ;;  %v12245_v62 = vld [vmem:[%s16161_s7 + $0x210] sm:$0xff]  }
 0x3e8   : > { %v15445_v42 = vadd.f32 %v11522_v48, %v11474_v40  ;;  %11764 = vmatprep.mubr.bf16.mxu0 %v8140_v57  ;;  %11812 = vmatprep.mubr.bf16.mxu1 %v8132_v5  ;;  %v6203_v23 = vpop.f32.mrf.mxu0  ;;  %v8169_v22 = vshll.u32 %v12238_v18, 16  ;;  %v8173_v46 = vshrl.u32 %v12238_v18, 16  ;;  %v8185_v5 = vshll.u32 %v12241_v51, 16  ;;  %v12248_v40 = vld [vmem:[%s16161_s7 + $0x208] sm:$0xff]  }
 0x3e9   : > { %v6451_v29 = vpop.f32.mrf.mxu1  ;;  %11842 = vmatprep.subr.bf16.mxu0 %v12233_v49  ;;  %v8183_v48 = vor.u32 %v8181_v0, %v8179_v7 }
 0x3ea   : > { %v15450_v20 = vadd.f32 %v6451_v29, %v6203_v23  ;;  %v11475_v55 = vpop.f32.mrf.mxu0  ;;  %v8171_v16 = vrot.slane %v8169_v22, 1  ;;  %v8187_v33 = vrot.slane %v8185_v5, 1 }
 0x3eb   : > { %v11523_v63 = vpop.f32.mrf.mxu1  ;;  %11843 = vmatpush3.bf16.msra.mxu0 %v12233_v49 }
 0x3ec   : > { %v15452_v10 = vadd.f32 %v11523_v63, %v11475_v55  ;;  %v6206_v43 = vpop.f32.mrf.mxu0  ;;  %11844 = vmatprep.subr.bf16.mxu0 %v12236_v3  ;;  %v8172_v19 = vsel %vm16554_vm5, %v8167_v8, %v8171_v16  ;;  %v8175_v49 = vor.u32 %v8173_v46, %v8171_v16  ;;  %v12251_v55 = vld [vmem:[%s16161_s7 + $0x200] sm:$0xff]   ;;  %v8188_v63 = vsel %vm16556_vm11, %v8183_v48, %v8187_v33  ;;  %vm16570_vm5 = vmmov %vm16557_vm0 }
 0x3ed   : > { %v6454_v58 = vpop.f32.mrf.mxu1  ;;  %vm16573_vm11 = vmmov %vm16557_vm0 }
 0x3ee   : > { %v15458_v17 = vadd.f32 %v6454_v58, %v6206_v43  ;;  %v11478_v36 = vpop.f32.mrf.mxu0  ;;  %11765 = vmatmul.mubr.bf16.gmra.mxu0 %v8148_v54  ;;  %v8180_v26 = vsel %vm16555_vm10, %v8175_v49, %v8179_v7  ;;  %v8189_v58 = vshrl.u32 %v12241_v51, 16  ;;  %v8211_v51 = vrot.slane %v8209_v53, 1  ;;  %vm16571_vm10 = vmmov %vm16557_vm0 }
 0x3ef   : > { %v11526_v41 = vpop.f32.mrf.mxu1  ;;  %11813 = vmatmul.mubr.bf16.gmra.mxu1 %v8140_v57  ;;  %11768 = vmatprep.mubr.bf16.mxu0 %v8156_v60  ;;  %v8193_v57 = vshll.u32 %v12243_v56, 16  ;;  %v8213_v7 = vshrl.u32 %v12246_v31, 16 }
 0x3f0   : > { %v15461_v6 = vadd.f32 %v11526_v41, %v11478_v36  ;;  %11816 = vmatprep.mubr.bf16.mxu1 %v8148_v54  ;;  %v6219_v37 = vpop.f32.mrf.mxu0  ;;  %11845 = vmatpush3.bf16.msra.mxu0 %v12236_v3  ;;  %v12244_v3 = vld [vmem:[#allocation2 + $0x64] sm:$0xff]   ;;  %v8197_v36 = vshrl.u32 %v12243_v56, 16  ;;  %v8191_v12 = vor.u32 %v8189_v58, %v8187_v33 }
 0x3f1   : > { %v6467_v28 = vpop.f32.mrf.mxu1  ;;  %11846 = vmatprep.subr.bf16.mxu0 %v12239_v34  ;;  %v8195_v43 = vrot.slane %v8193_v57, 1  ;;  %v8215_v5 = vor.u32 %v8213_v7, %v8211_v51  ;;  %v12250_v57 = vld [vmem:[#allocation2 + $0x84] sm:$0xff]  }
 0x3f2   : > { %v15466_v1 = vadd.f32 %v6467_v28, %v6219_v37  ;;  %v11479_v47 = vpop.f32.mrf.mxu0  ;;  %v8233_v58 = vshll.u32 %v12250_v57, 16 }
 0x3f3   : > { %v11527_v9 = vpop.f32.mrf.mxu1  ;;  %v8199_v37 = vor.u32 %v8197_v36, %v8195_v43  ;;  %v8196_v30 = vsel %vm16557_vm0, %v8191_v12, %v8195_v43 }
 0x3f4   : > { %v15468_v52 = vadd.f32 %v11527_v9, %v11479_v47  ;;  %v6222_v27 = vpop.f32.mrf.mxu0  ;;  %11847 = vmatpush3.bf16.msra.mxu0 %v12239_v34  ;;  %v12247_v47 = vld [vmem:[#allocation2 + $0x74] sm:$0xff]  }
 0x3f5   : > { %v6470_v2 = vpop.f32.mrf.mxu1  ;;  %11848 = vmatprep.subr.bf16.mxu0 %v12242_v24  ;;  %v8217_v56 = vshll.u32 %v12247_v47, 16 }
 0x3f6   : > { %v15474_v14 = vadd.f32 %v6470_v2, %v6222_v27  ;;  %v11482_v39 = vpop.f32.mrf.mxu0  ;;  %11769 = vmatmul.mubr.bf16.gmra.mxu0 %v8164_v45  ;;  %v12249_v2 = vld [vmem:[#allocation2 + $0x7c] sm:$0xff]  }
 0x3f7   : > { %v11530_v50 = vpop.f32.mrf.mxu1  ;;  %11817 = vmatmul.mubr.bf16.gmra.mxu1 %v8156_v60  ;;  %11772 = vmatprep.mubr.bf16.mxu0 %v8172_v19  ;;  %v8201_v60 = vshll.u32 %v12244_v3, 16  ;;  %v8219_v48 = vrot.slane %v8217_v56, 1  ;;  %v8237_v56 = vshrl.u32 %v12250_v57, 16 }
 0x3f8   : > { %v15477_v61 = vadd.f32 %v11530_v50, %v11482_v39  ;;  %11820 = vmatprep.mubr.bf16.mxu1 %v8164_v45  ;;  %v6235_v32 = vpop.f32.mrf.mxu0  ;;  %11849 = vmatpush3.bf16.msra.mxu0 %v12242_v24 }
 0x3f9   : > { %v6483_v13 = vpop.f32.mrf.mxu1  ;;  %11850 = vmatprep.subr.bf16.mxu0 %v12245_v62  ;;  %v8203_v24 = vrot.slane %v8201_v60, 1  ;;  %v12252_v60 = vld [vmem:[#allocation2 + $0x8c] ss:$0 sps:$4 sm:$0x11]  }
 0x3fa   : > { %v15482_v4 = vadd.f32 %v6483_v13, %v6235_v32  ;;  %v11483_v25 = vpop.f32.mrf.mxu0  ;;  %v8225_v13 = vshll.u32 %v12249_v2, 16 }
 0x3fb   : > { %v11531_v38 = vpop.f32.mrf.mxu1  ;;  %v8204_v16 = vsel %vm16558_vm1, %v8199_v37, %v8203_v24  ;;  %vm16578_vm1 = vmmov %vm16557_vm0 }
 0x3fc   : > { %v15484_v23 = vadd.f32 %v11531_v38, %v11483_v25  ;;  %v6238_v11 = vpop.f32.mrf.mxu0  ;;  %11851 = vmatpush3.bf16.msra.mxu0 %v12245_v62  ;;  %v8205_v62 = vshrl.u32 %v12244_v3, 16 }
 0x3fd   : > { %v6486_v29 = vpop.f32.mrf.mxu1  ;;  %11852 = vmatprep.subr.bf16.mxu0 %v12248_v40 }
 0x3fe   : > { %v15490_v35 = vadd.f32 %v6486_v29, %v6238_v11  ;;  %v11486_v21 = vpop.f32.mrf.mxu0  ;;  %11773 = vmatmul.mubr.bf16.gmra.mxu0 %v8180_v26  ;;  %v8207_v46 = vor.u32 %v8205_v62, %v8203_v24  ;;  %v8220_v29 = vsel %vm16560_vm2, %v8215_v5, %v8219_v48  ;;  %v8235_v24 = vrot.slane %v8233_v58, 1  ;;  %vm16584_vm2 = vmmov %vm16557_vm0 }
 0x3ff   : > { %v11534_v18 = vpop.f32.mrf.mxu1  ;;  %11821 = vmatmul.mubr.bf16.gmra.mxu1 %v8172_v19  ;;  %11776 = vmatprep.mubr.bf16.mxu0 %v8188_v63 }
 0x400   : > { %v15493_v54 = vadd.f32 %v11534_v18, %v11486_v21  ;;  %11824 = vmatprep.mubr.bf16.mxu1 %v8180_v26  ;;  %v6251_v34 = vpop.f32.mrf.mxu0  ;;  %11853 = vmatpush3.bf16.msra.mxu0 %v12248_v40  ;;  %v8212_v11 = vsel %vm16559_vm12, %v8207_v46, %v8211_v51  ;;  %v8227_v26 = vrot.slane %v8225_v13, 1  ;;  %v8229_v18 = vshrl.u32 %v12249_v2, 16  ;;  %vm16579_vm12 = vmmov %vm16557_vm0 }
 0x401   : > { %v6499_v59 = vpop.f32.mrf.mxu1  ;;  %11854 = vmatprep.subr.bf16.mxu0 %v12251_v55 }
 0x402   : > { %v15495_v41 = vadd.f32 %v6499_v59, %v6251_v34  ;;  %v11487_v15 = vpop.f32.mrf.mxu0 }
 0x403   : > { %v11535_v22 = vpop.f32.mrf.mxu1 }
 0x404   : > { %v15497_v28 = vadd.f32 %v11535_v22, %v11487_v15  ;;  %v6254_v44 = vpop.f32.mrf.mxu0  ;;  %11855 = vmatpush3.bf16.msra.mxu0 %v12251_v55  ;;  %v12254_v55 = vld [vmem:[#allocation2 + $0x14] sm:$0xff]   ;;  %v8231_v15 = vor.u32 %v8229_v18, %v8227_v26  ;;  %v12257_v18 = vld [vmem:[#allocation2 + $0x2c] sm:$0xff]  }
 0x405   : > { %v6502_v8 = vpop.f32.mrf.mxu1  ;;  %v8838_v37 = vshll.u32 %v12254_v55, 16  ;;  %v8836_v5 = vshrl.u32 %v12254_v55, 16 }
 0x406   : > { %v15500_v9 = vadd.f32 %v6502_v8, %v6254_v44  ;;  %v11490_v27 = vpop.f32.mrf.mxu0  ;;  %11777 = vmatmul.mubr.bf16.gmra.mxu0 %v8196_v30  ;;  %v12255_v8 = vld [vmem:[#allocation2 + $0x1c] sm:$0xff]  }
 0x407   : > { %v11538_v45 = vpop.f32.mrf.mxu1  ;;  %11825 = vmatmul.mubr.bf16.gmra.mxu1 %v8188_v63  ;;  %11780 = vmatprep.mubr.bf16.mxu0 %v8204_v16  ;;  %v8221_v63 = vshrl.u32 %v12247_v47, 16  ;;  %v12253_v47 = vld [vmem:[#allocation2 + $0x84] ss:$0 sps:$4 sm:$0x11]   ;;  %v8840_v62 = vrot.slane %v8838_v37, 1  ;;  %v8843_v13 = vshll.u32 %v12255_v8, 16 }
 0x408   : > { %v15503_v39 = vadd.f32 %v11538_v45, %v11490_v27  ;;  %11828 = vmatprep.mubr.bf16.mxu1 %v8196_v30  ;;  %v6267_v19 = vpop.f32.mrf.mxu0  ;;  %v8236_v45 = vsel %vm16562_vm6, %v8231_v15, %v8235_v24  ;;  %vm16587_vm6 = vmmov %vm16557_vm0 }
 0x409   : > { %v6515_v50 = vpop.f32.mrf.mxu1  ;;  %v8223_v36 = vor.u32 %v8221_v63, %v8219_v48 }
 0x40a   : > { %v15505_v32 = vadd.f32 %v6515_v50, %v6267_v19  ;;  %v11491_v0 = vpop.f32.mrf.mxu0  ;;  %v12256_v19 = vld [vmem:[#allocation2 + $0x24] sm:$0xff]  }
 0x40b   : > { %v11539_v49 = vpop.f32.mrf.mxu1  ;;  %v8228_v27 = vsel %vm16561_vm3, %v8223_v36, %v8227_v26  ;;  %v8851_v26 = vshll.u32 %v12256_v19, 16  ;;  %vm16585_vm3 = vmmov %vm16557_vm0 }
 0x40c   : > { %v15507_v40 = vadd.f32 %v11539_v49, %v11491_v0  ;;  %v6270_v25 = vpop.f32.mrf.mxu0  ;;  %v8487_v0 = vshll.u32 %v12253_v47, 16 }
 0x40d   : > { %v6518_v38 = vpop.f32.mrf.mxu1  ;;  %v8853_v37 = vrot.slane %v8851_v26, 1  ;;  %v12260_v26 = vld [vmem:[#allocation2 + $0x44] sm:$0xff]  }
 0x40e   : > { %v15510_v33 = vadd.f32 %v6518_v38, %v6270_v25  ;;  %v11494_v3 = vpop.f32.mrf.mxu0  ;;  %11781 = vmatmul.mubr.bf16.gmra.mxu0 %v8212_v11  ;;  %v8239_v25 = vor.u32 %v8237_v56, %v8235_v24  ;;  %v8489_v57 = vrot.slane %v8487_v0, 1  ;;  %v8847_v24 = vshrl.u32 %v12255_v8, 16 }
 0x40f   : > { %v11542_v21 = vpop.f32.mrf.mxu1  ;;  %11829 = vmatmul.mubr.bf16.gmra.mxu1 %v8204_v16  ;;  %11784 = vmatprep.mubr.bf16.mxu0 %v8220_v29  ;;  %v8241_v16 = vshll.u32 %v12252_v60, 16 }
 0x410   : > { %v15513_v43 = vadd.f32 %v11542_v21, %v11494_v3  ;;  %11832 = vmatprep.mubr.bf16.mxu1 %v8212_v11  ;;  %v6283_v31 = vpop.f32.mrf.mxu0  ;;  %v8841_v3 = vor.u32 %v8840_v62, %v8836_v5  ;;  %v8490_v60 = vsel %vm16564_vm8, %v8231_v15, %v8489_v57  ;;  %v8863_v57 = vshrl.u32 %v12257_v18, 16  ;;  %vm16589_vm8 = vmmov %vm16557_vm0 }
 0x411   : > { %v6531_v34 = vpop.f32.mrf.mxu1  ;;  %v8243_v48 = vrot.slane %v8241_v16, 1  ;;  %v8859_v16 = vshll.u32 %v12257_v18, 16  ;;  %v12261_v18 = vld [vmem:[#allocation2 + $0x4c] sm:$0xff]  }
 0x412   : > { %v15515_v59 = vadd.f32 %v6531_v34, %v6283_v31  ;;  %v11495_v12 = vpop.f32.mrf.mxu0  ;;  %v8845_v31 = vrot.slane %v8843_v13, 1 }
 0x413   : > { %v11543_v53 = vpop.f32.mrf.mxu1  ;;  %v8244_v34 = vsel %vm16563_vm7, %v8239_v25, %v8243_v48  ;;  %v8861_v13 = vrot.slane %v8859_v16, 1  ;;  %vm16588_vm7 = vmmov %vm16557_vm0 }
 0x414   : > { %v15517_v22 = vadd.f32 %v11543_v53, %v11495_v12  ;;  %v6286_v44 = vpop.f32.mrf.mxu0  ;;  %v8846_v12 = vsel %vm16565_vm9, %v8841_v3, %v8845_v31  ;;  %v12258_v53 = vld [vmem:[#allocation2 + $0x34] sm:$0xff]  }
 0x415   : > { %v6534_v30 = vpop.f32.mrf.mxu1  ;;  %v8867_v15 = vshll.u32 %v12258_v53, 16 }
 0x416   : > { %v15520_v51 = vadd.f32 %v6534_v30, %v6286_v44  ;;  %v11498_v2 = vpop.f32.mrf.mxu0  ;;  %11785 = vmatmul.mubr.bf16.gmra.mxu0 %v8228_v27 }
 0x417   : > { %v11546_v7 = vpop.f32.mrf.mxu1  ;;  %11833 = vmatmul.mubr.bf16.gmra.mxu1 %v8220_v29  ;;  %11788 = vmatprep.mubr.bf16.mxu0 %v8236_v45  ;;  %v8869_v3 = vrot.slane %v8867_v15, 1  ;;  %v12262_v15 = vld [vmem:[#allocation2 + $0x54] sm:$0xff]  }
 0x418   : > { %v15523_v50 = vadd.f32 %v11546_v7, %v11498_v2  ;;  %11836 = vmatprep.mubr.bf16.mxu1 %v8228_v27  ;;  %v6299_v46 = vpop.f32.mrf.mxu0  ;;  %v8855_v27 = vshrl.u32 %v12256_v19, 16  ;;  %v8849_v2 = vor.u32 %v8847_v24, %v8845_v31  ;;  %v8883_v24 = vshll.u32 %v12260_v26, 16 }
 0x419   : > { %v6547_v49 = vpop.f32.mrf.mxu1 }
 0x41a   : > { %v15525_v38 = vadd.f32 %v6547_v49, %v6299_v46  ;;  %v11499_v11 = vpop.f32.mrf.mxu0  ;;  %v8857_v56 = vor.u32 %v8855_v27, %v8853_v37  ;;  %v12259_v49 = vld [vmem:[#allocation2 + $0x3c] sm:$0xff]   ;;  %v8854_v25 = vsel %vm16566_vm13, %v8849_v2, %v8853_v37 }
 0x41b   : > { %v11547_v21 = vpop.f32.mrf.mxu1 }
 0x41c   : > { %v15527_v63 = vadd.f32 %v11547_v21, %v11499_v11  ;;  %v6302_v29 = vpop.f32.mrf.mxu0  ;;  %v8862_v11 = vsel %vm16567_vm14, %v8857_v56, %v8861_v13  ;;  %v8885_v56 = vrot.slane %v8883_v24, 1 }
 0x41d   : > { %v6550_v58 = vpop.f32.mrf.mxu1 }
 0x41e   : > { %v15530_v55 = vadd.f32 %v6550_v58, %v6302_v29  ;;  %v11502_v36 = vpop.f32.mrf.mxu0  ;;  %11789 = vmatmul.mubr.bf16.gmra.mxu0 %v8244_v34  ;;  %v8871_v58 = vshrl.u32 %v12258_v53, 16  ;;  %v8875_v34 = vshll.u32 %v12259_v49, 16 }
 0x41f   : > { %v11550_v44 = vpop.f32.mrf.mxu1  ;;  %11837 = vmatmul.mubr.bf16.gmra.mxu1 %v8490_v60  ;;  %11856 = vmatprep.mubr.bf16.mxu0 %v8846_v12  ;;  %v8865_v12 = vor.u32 %v8863_v57, %v8861_v13 }
 0x420   : > { %v15534_v47 = vadd.f32 %v11550_v44, %v11502_v36  ;;  %v6315_v30 = vpop.f32.mrf.mxu0  ;;  %v8873_v44 = vor.u32 %v8871_v58, %v8869_v3  ;;  %v8877_v16 = vrot.slane %v8875_v34, 1 }
 0x421   : > { %v6563_v45 = vpop.f32.mrf.mxu1 }
 0x422   : > { %v15536_v62 = vadd.f32 %v6563_v45, %v6315_v30  ;;  %v11503_v7 = vpop.f32.mrf.mxu0 }
 0x423   : > { %v11551_v46 = vpop.f32.mrf.mxu1 }
 0x424   : > { %v15538_v0 = vadd.f32 %v11551_v46, %v11503_v7  ;;  %v6318_v5 = vpop.f32.mrf.mxu0  ;;  %v8878_v7 = vsel %vm16569_vm4, %v8873_v44, %v8877_v16 }
 0x425   : > { %v6566_v8 = vpop.f32.mrf.mxu1 }
 0x426   : > { %v15541_v48 = vadd.f32 %v6566_v8, %v6318_v5  ;;  %v11570_v19 = vpop.f32.mrf.mxu0  ;;  %11857 = vmatmul.mubr.bf16.vlgmr.msra.gmra.mxu0 %v8854_v25  ;;  %v8879_v5 = vshrl.u32 %v12259_v49, 16  ;;  %v8891_v8 = vshll.u32 %v12261_v18, 16  ;;  %v12263_v49 = vld [vmem:[#allocation2 + $0x5c] sm:$0xff]  }
 0x427   : > { %v15545_v21 = vadd.f32 %v11570_v19, %v15445_v42  ;;  %v15547_v29 = vpop.f32.mrf.mxu1  ;;  %11860 = vmatprep.mubr.bf16.mxu0 %v8862_v11 }
 0x428   : > { %v6961_v31 = vpop.f32.mrf.mxu0  ;;  %v8881_v11 = vor.u32 %v8879_v5, %v8877_v16  ;;  %v12264_v16 = vld [vmem:[#allocation2 + $0x64] sm:$0xff]   ;;  %v8907_v5 = vshll.u32 %v12263_v49, 16 }
 0x429   : > { %v15550_v36 = vadd.f32 %v6961_v31, %v15450_v20  ;;  %v15552_v60 = vpop.f32.mrf.mxu1  ;;  %v8870_v20 = vsel %vm16568_vm15, %v8865_v12, %v8869_v3  ;;  %v8899_v31 = vshll.u32 %v12262_v15, 16  ;;  %v8893_v12 = vrot.slane %v8891_v8, 1 }
 0x42a   : > { %v11571_v37 = vpop.f32.mrf.mxu0 }
 0x42b   : > { %v15555_v30 = vadd.f32 %v11571_v37, %v15452_v10  ;;  %v15557_v42 = vpop.f32.mrf.mxu1 }
 0x42c   : > { %v6964_v27 = vpop.f32.mrf.mxu0 }
 0x42d   : > { %v15560_v53 = vadd.f32 %v6964_v27, %v15458_v17  ;;  %v15562_v2 = vpop.f32.mrf.mxu1  ;;  %v8887_v17 = vshrl.u32 %v12260_v26, 16  ;;  %v8901_v27 = vrot.slane %v8899_v31, 1 }
 0x42e   : > { %v11574_v45 = vpop.f32.mrf.mxu0  ;;  %11861 = vmatmul.mubr.bf16.gmra.mxu0 %v8870_v20 }
 0x42f   : > { %v15567_v10 = vadd.f32 %v11574_v45, %v15461_v6  ;;  %v15569_v46 = vpop.f32.mrf.mxu1  ;;  %11864 = vmatprep.mubr.bf16.mxu0 %v8878_v7  ;;  %v8889_v57 = vor.u32 %v8887_v17, %v8885_v56  ;;  %v8895_v45 = vshrl.u32 %v12261_v18, 16  ;;  %v12265_v18 = vld [vmem:[#allocation2 + $0x6c] sm:$0xff]  }
 0x430   : > { %v6977_v13 = vpop.f32.mrf.mxu0 }
 0x431   : > { %v15572_v25 = vadd.f32 %v6977_v13, %v15466_v1  ;;  %v15574_v19 = vpop.f32.mrf.mxu1  ;;  %v8886_v1 = vsel %vm16570_vm5, %v8881_v11, %v8885_v56  ;;  %v8894_v24 = vsel %vm16571_vm10, %v8889_v57, %v8893_v12  ;;  %v8897_v17 = vor.u32 %v8895_v45, %v8893_v12  ;;  %v12266_v45 = vld [vmem:[#allocation2 + $0x74] sm:$0xff]  }
 0x432   : > { %v11575_v3 = vpop.f32.mrf.mxu0 }
 0x433   : > { %v15577_v58 = vadd.f32 %v11575_v3, %v15468_v52  ;;  %v15579_v6 = vpop.f32.mrf.mxu1  ;;  %v8915_v3 = vshll.u32 %v12264_v16, 16 }
 0x434   : > { %v6980_v34 = vpop.f32.mrf.mxu0 }
 0x435   : > { %v15582_v26 = vadd.f32 %v6980_v34, %v15474_v14  ;;  %v15584_v37 = vpop.f32.mrf.mxu1  ;;  %v8903_v14 = vshrl.u32 %v12262_v15, 16  ;;  %v8909_v34 = vrot.slane %v8907_v5, 1 }
 0x436   : > { %v11578_v44 = vpop.f32.mrf.mxu0  ;;  %11865 = vmatmul.mubr.bf16.gmra.mxu0 %v8886_v1 }
 0x437   : > { %v15589_v52 = vadd.f32 %v11578_v44, %v15477_v61  ;;  %v15591_v20 = vpop.f32.mrf.mxu1  ;;  %11868 = vmatprep.mubr.bf16.mxu0 %v8894_v24  ;;  %v8905_v11 = vor.u32 %v8903_v14, %v8901_v27  ;;  %v8917_v24 = vrot.slane %v8915_v3, 1  ;;  %v8911_v14 = vshrl.u32 %v12263_v49, 16  ;;  %v12267_v49 = vld [vmem:[#allocation2 + $0x7c] sm:$0xff]  }
 0x438   : > { %v6993_v7 = vpop.f32.mrf.mxu0  ;;  %v8931_v3 = vshll.u32 %v12266_v45, 16 }
 0x439   : > { %v15594_v13 = vadd.f32 %v6993_v7, %v15482_v4  ;;  %v15596_v56 = vpop.f32.mrf.mxu1  ;;  %v8902_v4 = vsel %vm16573_vm11, %v8897_v17, %v8901_v27  ;;  %v8910_v12 = vsel %vm16557_vm0, %v8905_v11, %v8909_v34  ;;  %v8913_v17 = vor.u32 %v8911_v14, %v8909_v34 }
 0x43a   : > { %v11579_v8 = vpop.f32.mrf.mxu0  ;;  %v8933_v14 = vrot.slane %v8931_v3, 1 }
 0x43b   : > { %v15599_v57 = vadd.f32 %v11579_v8, %v15484_v23  ;;  %v15601_v61 = vpop.f32.mrf.mxu1  ;;  %v8923_v8 = vshll.u32 %v12265_v18, 16 }
 0x43c   : > { %v6996_v31 = vpop.f32.mrf.mxu0 }
 0x43d   : > { %v15604_v15 = vadd.f32 %v6996_v31, %v15490_v35  ;;  %v15606_v1 = vpop.f32.mrf.mxu1  ;;  %v8919_v35 = vshrl.u32 %v12264_v16, 16 }
 0x43e   : > { %v11582_v44 = vpop.f32.mrf.mxu0  ;;  %11869 = vmatmul.mubr.bf16.gmra.mxu0 %v8902_v4 }
 0x43f   : > { %16572 = vst [vmem:[#allocation45_spill] sm:$0xff] %v15604_v15  ;;  %v15611_v23 = vadd.f32 %v11582_v44, %v15493_v54  ;;  %v15613_v7 = vpop.f32.mrf.mxu1  ;;  %11872 = vmatprep.mubr.bf16.mxu0 %v8910_v12  ;;  %v8921_v11 = vor.u32 %v8919_v35, %v8917_v24  ;;  %v8925_v12 = vrot.slane %v8923_v8, 1  ;;  %v12268_v35 = vld [vmem:[#allocation2 + $0x84] sm:$0xff]   ;;  %v8927_v8 = vshrl.u32 %v12265_v18, 16 }
 0x440   : > { %v7009_v5 = vpop.f32.mrf.mxu0  ;;  %v8947_v3 = vshll.u32 %v12268_v35, 16 }
 0x441   : > { %16574 = vst [vmem:[#allocation70_spill] sm:$0xff] %v15611_v23  ;;  %v15616_v31 = vadd.f32 %v7009_v5, %v15495_v41  ;;  %v15618_v27 = vpop.f32.mrf.mxu1  ;;  %v8918_v41 = vsel %vm16578_vm1, %v8913_v17, %v8917_v24  ;;  %v8926_v34 = vsel %vm16579_vm12, %v8921_v11, %v8925_v12  ;;  %v8929_v17 = vor.u32 %v8927_v8, %v8925_v12 }
 0x442   : > { %v11583_v4 = vpop.f32.mrf.mxu0  ;;  %v8949_v8 = vrot.slane %v8947_v3, 1 }
 0x443   : > { %v15621_v15 = vadd.f32 %v11583_v4, %v15497_v28  ;;  %v15623_v54 = vpop.f32.mrf.mxu1 }
 0x444   : > { %v7012_v44 = vpop.f32.mrf.mxu0 }
 0x445   : > { %16575 = vst [vmem:[#allocation24_spill] sm:$0xff] %v15621_v15  ;;  %v15626_v16 = vadd.f32 %v7012_v44, %v15500_v9  ;;  %v15628_v23 = vpop.f32.mrf.mxu1  ;;  %v8935_v9 = vshrl.u32 %v12266_v45, 16  ;;  %v8939_v44 = vshll.u32 %v12267_v49, 16 }
 0x446   : > { %16577 = vst [vmem:[#allocation71_spill] sm:$0xff] %v15628_v23  ;;  %v11586_v5 = vpop.f32.mrf.mxu0  ;;  %11873 = vmatmul.mubr.bf16.gmra.mxu0 %v8918_v41  ;;  %v12269_v23 = vld [vmem:[#allocation2 + $0x8c] sm:$0xff]  }
 0x447   : > { %16576 = vst [vmem:[#allocation47_spill] sm:$0xff] %v15626_v16  ;;  %v15633_v28 = vadd.f32 %v11586_v5, %v15503_v39  ;;  %v15635_v4 = vpop.f32.mrf.mxu1  ;;  %11876 = vmatprep.mubr.bf16.mxu0 %v8926_v34  ;;  %v8937_v11 = vor.u32 %v8935_v9, %v8933_v14  ;;  %v8941_v18 = vrot.slane %v8939_v44, 1  ;;  %v8955_v9 = vshll.u32 %v12269_v23, 16 }
 0x448   : > { %v7025_v15 = vpop.f32.mrf.mxu0  ;;  %v8943_v44 = vshrl.u32 %v12267_v49, 16 }
 0x449   : > { %16580 = vst [vmem:[#allocation7_spill] sm:$0xff] %v15633_v28  ;;  %v15638_v16 = vadd.f32 %v7025_v15, %v15505_v32  ;;  %v15640_v24 = vpop.f32.mrf.mxu1  ;;  %v8934_v32 = vsel %vm16584_vm2, %v8929_v17, %v8933_v14  ;;  %v8942_v12 = vsel %vm16585_vm3, %v8937_v11, %v8941_v18  ;;  %v8957_v3 = vrot.slane %v8955_v9, 1 }
 0x44a   : > { %v11587_v41 = vpop.f32.mrf.mxu0  ;;  %v8945_v17 = vor.u32 %v8943_v44, %v8941_v18 }
 0x44b   : > { %v15643_v39 = vadd.f32 %v11587_v41, %v15507_v40  ;;  %v15645_v5 = vpop.f32.mrf.mxu1 }
 0x44c   : > { %v7028_v34 = vpop.f32.mrf.mxu0 }
 0x44d   : > { %16581 = vst [vmem:[#allocation48_spill] sm:$0xff] %v15643_v39  ;;  %v15648_v45 = vadd.f32 %v7028_v34, %v15510_v33  ;;  %v15650_v28 = vpop.f32.mrf.mxu1  ;;  %v12270_v39 = vld [vmem:[#allocation2 + $0x94] ss:$0 sps:$4 sm:$0x11]   ;;  %v8951_v34 = vshrl.u32 %v12268_v35, 16 }
 0x44e   : > { %16583 = vst [vmem:[#allocation17_spill] sm:$0xff] %v15650_v28  ;;  %v11590_v15 = vpop.f32.mrf.mxu0  ;;  %11877 = vmatmul.mubr.bf16.gmra.mxu0 %v8934_v32 }
 0x44f   : > { %16582 = vst [vmem:[#allocation72_spill] sm:$0xff] %v15648_v45  ;;  %v15655_v40 = vadd.f32 %v11590_v15, %v15513_v43  ;;  %v15657_v41 = vpop.f32.mrf.mxu1  ;;  %11880 = vmatprep.mubr.bf16.mxu0 %v8942_v12  ;;  %v8953_v11 = vor.u32 %v8951_v34, %v8949_v8  ;;  %v8959_v15 = vshrl.u32 %v12269_v23, 16  ;;  %v8963_v12 = vshll.u32 %v12270_v39, 16 }
 0x450   : > { %v7041_v33 = vpop.f32.mrf.mxu0 }
 0x451   : > { %16586 = vst [vmem:[#allocation73_spill] sm:$0xff] %v15655_v40  ;;  %v15660_v45 = vadd.f32 %v7041_v33, %v15515_v59  ;;  %v15662_v14 = vpop.f32.mrf.mxu1  ;;  %v8950_v59 = vsel %vm16587_vm6, %v8945_v17, %v8949_v8  ;;  %v8958_v18 = vsel %vm16588_vm7, %v8953_v11, %v8957_v3  ;;  %v8961_v23 = vor.u32 %v8959_v15, %v8957_v3 }
 0x452   : > { %v11591_v32 = vpop.f32.mrf.mxu0  ;;  %v8965_v39 = vrot.slane %v8963_v12, 1 }
 0x453   : > { %v15665_v28 = vadd.f32 %v11591_v32, %v15517_v22  ;;  %v15667_v43 = vpop.f32.mrf.mxu1 }
 0x454   : > { %v7044_v49 = vpop.f32.mrf.mxu0 }
 0x455   : > { %v15670_v40 = vadd.f32 %v7044_v49, %v15520_v51  ;;  %v15672_v35 = vpop.f32.mrf.mxu1 }
 0x456   : > { %v11594_v33 = vpop.f32.mrf.mxu0  ;;  %11881 = vmatmul.mubr.bf16.gmra.mxu0 %v8950_v59 }
 0x457   : > { %v15677_v9 = vadd.f32 %v11594_v33, %v15523_v50  ;;  %v15679_v22 = vpop.f32.mrf.mxu1  ;;  %11884 = vmatprep.mubr.bf16.mxu0 %v8958_v18  ;;  %v8966_v50 = vsel %vm16589_vm8, %v8961_v23, %v8965_v39 }
 0x458   : > { %v7057_v44 = vpop.f32.mrf.mxu0 }
 0x459   : > { %v15682_v51 = vadd.f32 %v7057_v44, %v15525_v38  ;;  %v15684_v34 = vpop.f32.mrf.mxu1 }
 0x45a   : > { %v11595_v32 = vpop.f32.mrf.mxu0 }
 0x45b   : > { %v15687_v8 = vadd.f32 %v11595_v32, %v15527_v63  ;;  %v15689_v17 = vpop.f32.mrf.mxu1 }
 0x45c   : > { %v7060_v11 = vpop.f32.mrf.mxu0 }
 0x45d   : > { %v15693_v49 = vadd.f32 %v7060_v11, %v15530_v55  ;;  %v15695_v3 = vpop.f32.mrf.mxu1 }
 0x45e   : > { %v11598_v15 = vpop.f32.mrf.mxu0  ;;  %11885 = vmatmul.mubr.bf16.gmra.mxu0 %v8966_v50 }
 0x45f   : > { %16590 = vst [vmem:[#allocation50_spill] sm:$0xff] %v15693_v49  ;;  %v15698_v38 = vadd.f32 %v11598_v15, %v15534_v47  ;;  %v15700_v12 = vpop.f32.mrf.mxu1  ;;  %v16597_v15 = vld [vmem:[#allocation34_spill] sm:$0xff] }
 0x460   : > { %v7073_v59 = vpop.f32.mrf.mxu0 }
 0x461   : > { %v15703_v63 = vadd.f32 %v7073_v59, %v15536_v62  ;;  %v15705_v33 = vpop.f32.mrf.mxu1  ;;  %v7122_v59 = vmul.f32 %v16597_v15, %v15545_v21  ;;  %v16599_v15 = vld [vmem:[#allocation37_spill] sm:$0xff] }
 0x462   : > { %16592 = vst [vmem:[#allocation76_spill] sm:$0xff] %v15705_v33  ;;  %v11599_v18 = vpop.f32.mrf.mxu0 }
 0x463   : > { %16591 = vst [vmem:[#allocation74_spill] sm:$0xff] %v15703_v63  ;;  %v15708_v23 = vadd.f32 %v11599_v18, %v15538_v0  ;;  %v15710_v55 = vpop.f32.mrf.mxu1 }
 0x464   : > { %16594 = vst [vmem:[#allocation53_spill] sm:$0xff] %v15710_v55  ;;  %v7076_v39 = vpop.f32.mrf.mxu0  ;;  %v16598_v55 = vld [vmem:[#allocation36_spill] sm:$0xff] }
 0x465   : > { %16593 = vst [vmem:[#allocation52_spill] sm:$0xff] %v15708_v23  ;;  %v15713_v44 = vadd.f32 %v7076_v39, %v15541_v48  ;;  %v15715_v47 = vpop.f32.mrf.mxu1  ;;  %v7120_v33 = vmul.f32 %v16598_v55, %v15550_v36 }
 0x466   : > { %16596 = vst [vmem:[#allocation79_spill] sm:$0xff] %v15715_v47  ;;  %v11666_v32 = vpop.f32.mrf.mxu0 }
 0x467   : > { %16595 = vst [vmem:[#allocation77_spill] sm:$0xff] %v15713_v44  ;;  %v7520_v50 = vadd.f32 %v11666_v32, %v15547_v29  ;;  %v11714_v11 = vpop.f32.mrf.mxu1 }
 0x468   : > { %v7511_v62 = vpop.f32.mrf.mxu0 }
 0x469   : > { %v7898_v63 = vadd.f32 %v11714_v11, %v7520_v50  ;;  %v7512_v0 = vadd.f32 %v7511_v62, %v15552_v60  ;;  %v7769_v18 = vpop.f32.mrf.mxu1 }
 0x46a   : > { %v11667_v23 = vpop.f32.mrf.mxu0 }
 0x46b   : > { %v15723_v48 = vadd.f32 %v7898_v63, %v7122_v59  ;;  %v7896_v39 = vadd.f32 %v7769_v18, %v7512_v0  ;;  %v7523_v44 = vadd.f32 %v11667_v23, %v15557_v42  ;;  %v11715_v47 = vpop.f32.mrf.mxu1  ;;  %v7126_v42 = vmul.f32 %v16599_v15, %v15567_v10  ;;  %v16600_v59 = vld [vmem:[#allocation38_spill] sm:$0xff] }
 0x46c   : > { %v7514_v29 = vpop.f32.mrf.mxu0 }
 0x46d   : > { %v15726_v32 = vadd.f32 %v7896_v39, %v7120_v33  ;;  %v7899_v49 = vadd.f32 %v11715_v47, %v7523_v44  ;;  %v7515_v21 = vadd.f32 %v7514_v29, %v15562_v2  ;;  %v7772_v50 = vpop.f32.mrf.mxu1 }
 0x46e   : > { %v11670_v11 = vpop.f32.mrf.mxu0 }
 0x46f   : > { %v15730_v60 = vadd.f32 %v7899_v49, %v15555_v30  ;;  %v7897_v62 = vadd.f32 %v7772_v50, %v7515_v21  ;;  %v7536_v36 = vadd.f32 %v11670_v11, %v15569_v46  ;;  %v11718_v63 = vpop.f32.mrf.mxu1  ;;  %v7124_v30 = vmul.f32 %v16600_v59, %v15572_v25 }
 0x470   : > { %v7527_v55 = vpop.f32.mrf.mxu0 }
 0x471   : > { %v15736_v23 = vadd.f32 %v7897_v62, %v15560_v53  ;;  %v7902_v33 = vadd.f32 %v11718_v63, %v7536_v36  ;;  %v7528_v44 = vadd.f32 %v7527_v55, %v15574_v19  ;;  %v7785_v2 = vpop.f32.mrf.mxu1  ;;  %v16601_v63 = vld [vmem:[#allocation39_spill] sm:$0xff] }
 0x472   : > { %v11671_v47 = vpop.f32.mrf.mxu0 }
 0x473   : > { %v15741_v49 = vadd.f32 %v7902_v33, %v7126_v42  ;;  %v7900_v0 = vadd.f32 %v7785_v2, %v7528_v44  ;;  %v7539_v46 = vadd.f32 %v11671_v47, %v15579_v6  ;;  %v11719_v18 = vpop.f32.mrf.mxu1  ;;  %v7130_v6 = vmul.f32 %v16601_v63, %v15589_v52  ;;  %v16602_v44 = vld [vmem:[#allocation41_spill] sm:$0xff] }
 0x474   : > { %v7530_v39 = vpop.f32.mrf.mxu0 }
 0x475   : > { %v15744_v29 = vadd.f32 %v7900_v0, %v7124_v30  ;;  %v7903_v10 = vadd.f32 %v11719_v18, %v7539_v46  ;;  %v7531_v53 = vadd.f32 %v7530_v39, %v15584_v37  ;;  %v7788_v21 = vpop.f32.mrf.mxu1 }
 0x476   : > { %v11674_v50 = vpop.f32.mrf.mxu0 }
 0x477   : > { %v15748_v19 = vadd.f32 %v7903_v10, %v15577_v58  ;;  %v7901_v11 = vadd.f32 %v7788_v21, %v7531_v53  ;;  %v7552_v25 = vadd.f32 %v11674_v50, %v15591_v20  ;;  %v11722_v62 = vpop.f32.mrf.mxu1  ;;  %v7128_v58 = vmul.f32 %v16602_v44, %v15594_v13  ;;  %v16603_v21 = vld [vmem:[#allocation70_spill] sm:$0xff]  ;;  %v16604_v50 = vld [vmem:[#allocation44_spill] sm:$0xff] }
 0x478   : > { %v7543_v36 = vpop.f32.mrf.mxu0 }
 0x479   : > { %v15754_v55 = vadd.f32 %v7901_v11, %v15582_v26  ;;  %v7906_v15 = vadd.f32 %v11722_v62, %v7552_v25  ;;  %v7544_v42 = vadd.f32 %v7543_v36, %v15596_v56  ;;  %v7801_v37 = vpop.f32.mrf.mxu1  ;;  %v16605_v11 = vld [vmem:[#allocation45_spill] sm:$0xff] }
 0x47a   : > { %v11675_v33 = vpop.f32.mrf.mxu0 }
 0x47b   : > { %v15759_v2 = vadd.f32 %v7906_v15, %v7130_v6  ;;  %v7904_v47 = vadd.f32 %v7801_v37, %v7544_v42  ;;  %v7555_v20 = vadd.f32 %v11675_v33, %v15601_v61  ;;  %v11723_v59 = vpop.f32.mrf.mxu1  ;;  %v7134_v61 = vmul.f32 %v16604_v50, %v16603_v21  ;;  %v16606_v6 = vld [vmem:[#allocation46_spill] sm:$0xff] }
 0x47c   : > { %v7546_v30 = vpop.f32.mrf.mxu0 }
 0x47d   : > { %v15762_v0 = vadd.f32 %v7904_v47, %v7128_v58  ;;  %v7907_v52 = vadd.f32 %v11723_v59, %v7555_v20  ;;  %v7547_v26 = vadd.f32 %v7546_v30, %v15606_v1  ;;  %v7804_v46 = vpop.f32.mrf.mxu1  ;;  %v16607_v47 = vld [vmem:[#allocation71_spill] sm:$0xff] }
 0x47e   : > { %v11678_v18 = vpop.f32.mrf.mxu0 }
 0x47f   : > { %v15766_v56 = vadd.f32 %v7907_v52, %v15599_v57  ;;  %v7905_v39 = vadd.f32 %v7804_v46, %v7547_v26  ;;  %v7568_v13 = vadd.f32 %v11678_v18, %v15613_v7  ;;  %v11726_v10 = vpop.f32.mrf.mxu1  ;;  %v7132_v57 = vmul.f32 %v16606_v6, %v15616_v31 }
 0x480   : > { %v7559_v53 = vpop.f32.mrf.mxu0 }
 0x481   : > { %v15772_v25 = vadd.f32 %v7905_v39, %v16605_v11  ;;  %v7910_v62 = vadd.f32 %v11726_v10, %v7568_v13  ;;  %v7560_v36 = vadd.f32 %v7559_v53, %v15618_v27  ;;  %v7817_v1 = vpop.f32.mrf.mxu1  ;;  %v16608_v27 = vld [vmem:[#allocation24_spill] sm:$0xff]  ;;  %v16609_v39 = vld [vmem:[#allocation7_spill] sm:$0xff]  ;;  %v16610_v13 = vld [vmem:[#allocation49_spill] sm:$0xff] }
 0x482   : > { %v11679_v63 = vpop.f32.mrf.mxu0  ;;  %v16611_v10 = vld [vmem:[#allocation47_spill] sm:$0xff] }
 0x483   : > { %v15777_v15 = vadd.f32 %v7910_v62, %v7134_v61  ;;  %v7908_v42 = vadd.f32 %v7817_v1, %v7560_v36  ;;  %v7571_v7 = vadd.f32 %v11679_v63, %v15623_v54  ;;  %v11727_v37 = vpop.f32.mrf.mxu1  ;;  %v7138_v54 = vmul.f32 %v16610_v13, %v16609_v39  ;;  %v16613_v62 = vld [vmem:[#allocation51_spill] sm:$0xff] }
 0x484   : > { %v7562_v33 = vpop.f32.mrf.mxu0  ;;  %v7136_v36 = vmul.f32 %v16613_v62, %v15638_v16 }
 0x485   : > { %v15780_v44 = vadd.f32 %v7908_v42, %v7132_v57  ;;  %v7911_v58 = vadd.f32 %v11727_v37, %v7571_v7  ;;  %v7563_v20 = vadd.f32 %v7562_v33, %v16607_v47  ;;  %v7820_v59 = vpop.f32.mrf.mxu1  ;;  %v16616_v37 = vld [vmem:[#allocation17_spill] sm:$0xff] }
 0x486   : > { %v11682_v30 = vpop.f32.mrf.mxu0 }
 0x487   : > { %v15784_v52 = vadd.f32 %v7911_v58, %v16608_v27  ;;  %v7909_v26 = vadd.f32 %v7820_v59, %v7563_v20  ;;  %v7584_v31 = vadd.f32 %v11682_v30, %v15635_v4  ;;  %v11730_v46 = vpop.f32.mrf.mxu1 }
 0x488   : > { %v7575_v18 = vpop.f32.mrf.mxu0 }
 0x489   : > { %v15790_v53 = vadd.f32 %v7909_v26, %v16611_v10  ;;  %v7914_v21 = vadd.f32 %v11730_v46, %v7584_v31  ;;  %v7576_v50 = vadd.f32 %v7575_v18, %v15640_v24  ;;  %v7833_v61 = vpop.f32.mrf.mxu1  ;;  %v16617_v24 = vld [vmem:[#allocation48_spill] sm:$0xff]  ;;  %v16619_v26 = vld [vmem:[#allocation73_spill] sm:$0xff]  ;;  %v16620_v31 = vld [vmem:[#allocation54_spill] sm:$0xff] }
 0x48a   : > { %v11683_v11 = vpop.f32.mrf.mxu0  ;;  %v16621_v46 = vld [vmem:[#allocation72_spill] sm:$0xff] }
 0x48b   : > { %16612 = vst [vmem:[#allocation55_spill] sm:$0xff] %v15790_v53  ;;  %v15795_v1 = vadd.f32 %v7914_v21, %v7138_v54  ;;  %v7912_v63 = vadd.f32 %v7833_v61, %v7576_v50  ;;  %v7587_v4 = vadd.f32 %v11683_v11, %v15645_v5  ;;  %v11731_v6 = vpop.f32.mrf.mxu1  ;;  %v7142_v5 = vmul.f32 %v16620_v31, %v16619_v26  ;;  %v16623_v21 = vld [vmem:[#allocation56_spill] sm:$0xff] }
 0x48c   : > { %v7578_v57 = vpop.f32.mrf.mxu0  ;;  %v7140_v50 = vmul.f32 %v16623_v21, %v15660_v45 }
 0x48d   : > { %16614 = vst [vmem:[#allocation29_spill] sm:$0xff] %v15795_v1  ;;  %v15798_v42 = vadd.f32 %v7912_v63, %v7136_v36  ;;  %v7915_v7 = vadd.f32 %v11731_v6, %v7587_v4  ;;  %v7579_v33 = vadd.f32 %v7578_v57, %v16616_v37  ;;  %v7836_v58 = vpop.f32.mrf.mxu1 }
 0x48e   : > { %v11686_v47 = vpop.f32.mrf.mxu0 }
 0x48f   : > { %16615 = vst [vmem:[#allocation27_spill] sm:$0xff] %v15798_v42  ;;  %v15802_v20 = vadd.f32 %v7915_v7, %v16617_v24  ;;  %v7913_v59 = vadd.f32 %v7836_v58, %v7579_v33  ;;  %v7600_v16 = vadd.f32 %v11686_v47, %v15657_v41  ;;  %v11734_v30 = vpop.f32.mrf.mxu1  ;;  %v16627_v47 = vld [vmem:[#allocation59_spill] sm:$0xff] }
 0x490   : > { %v7591_v27 = vpop.f32.mrf.mxu0 }
 0x491   : > { %16618 = vst [vmem:[#allocation57_spill] sm:$0xff] %v15802_v20  ;;  %v15808_v18 = vadd.f32 %v7913_v59, %v16621_v46  ;;  %v7918_v39 = vadd.f32 %v11734_v30, %v7600_v16  ;;  %v7592_v13 = vadd.f32 %v7591_v27, %v15662_v14  ;;  %v7849_v54 = vpop.f32.mrf.mxu1  ;;  %v16629_v27 = vld [vmem:[#allocation61_spill] sm:$0xff] }
 0x492   : > { %v11687_v10 = vpop.f32.mrf.mxu0 }
 0x493   : > { %16622 = vst [vmem:[#allocation80_spill] sm:$0xff] %v15808_v18  ;;  %v15813_v61 = vadd.f32 %v7918_v39, %v7142_v5  ;;  %v7916_v11 = vadd.f32 %v7849_v54, %v7592_v13  ;;  %v7603_v41 = vadd.f32 %v11687_v10, %v15667_v43  ;;  %v11735_v62 = vpop.f32.mrf.mxu1  ;;  %v7146_v43 = vmul.f32 %v16627_v47, %v15677_v9 }
 0x494   : > { %v7594_v36 = vpop.f32.mrf.mxu0 }
 0x495   : > { %16624 = vst [vmem:[#allocation82_spill] sm:$0xff] %v15813_v61  ;;  %v15816_v63 = vadd.f32 %v7916_v11, %v7140_v50  ;;  %v7919_v4 = vadd.f32 %v11735_v62, %v7603_v41  ;;  %v7595_v6 = vadd.f32 %v7594_v36, %v15672_v35  ;;  %v7852_v57 = vpop.f32.mrf.mxu1  ;;  %v16633_v11 = vld [vmem:[#allocation64_spill] sm:$0xff]  ;;  %v16634_v41 = vld [vmem:[#allocation50_spill] sm:$0xff] }
 0x496   : > { %v11690_v7 = vpop.f32.mrf.mxu0 }
 0x497   : > { %16625 = vst [vmem:[#allocation58_spill] sm:$0xff] %v15816_v63  ;;  %v15820_v14 = vadd.f32 %v7919_v4, %v15665_v28  ;;  %v7917_v37 = vadd.f32 %v7852_v57, %v7595_v6  ;;  %v7616_v45 = vadd.f32 %v11690_v7, %v15679_v22  ;;  %v11738_v33 = vpop.f32.mrf.mxu1  ;;  %v7144_v28 = vmul.f32 %v16629_v27, %v15682_v51  ;;  %v16636_v4 = vld [vmem:[#allocation76_spill] sm:$0xff]  ;;  %v16637_v7 = vld [vmem:[#allocation74_spill] sm:$0xff] }
 0x498   : > { %v7607_v58 = vpop.f32.mrf.mxu0 }
 0x499   : > { %16626 = vst [vmem:[#allocation83_spill] sm:$0xff] %v15820_v14  ;;  %v15826_v24 = vadd.f32 %v7917_v37, %v15670_v40  ;;  %v7922_v59 = vadd.f32 %v11738_v33, %v7616_v45  ;;  %v7608_v16 = vadd.f32 %v7607_v58, %v15684_v34  ;;  %v7865_v35 = vpop.f32.mrf.mxu1  ;;  %v16638_v37 = vld [vmem:[#allocation26_spill] sm:$0xff] }
 0x49a   : > { %v11691_v30 = vpop.f32.mrf.mxu0 }
 0x49b   : > { %16628 = vst [vmem:[#allocation85_spill] sm:$0xff] %v15826_v24  ;;  %v15831_v26 = vadd.f32 %v7922_v59, %v7146_v43  ;;  %v7920_v31 = vadd.f32 %v7865_v35, %v7608_v16  ;;  %v7619_v22 = vadd.f32 %v11691_v30, %v15689_v17  ;;  %v11739_v5 = vpop.f32.mrf.mxu1  ;;  %v7150_v17 = vmul.f32 %v16633_v11, %v15698_v38  ;;  %v16642_v16 = vld [vmem:[#allocation79_spill] sm:$0xff] }
 0x49c   : > { %v7610_v46 = vpop.f32.mrf.mxu0 }
 0x49d   : > { %16630 = vst [vmem:[#allocation12_spill] sm:$0xff] %v15831_v26  ;;  %v15834_v39 = vadd.f32 %v7920_v31, %v7144_v28  ;;  %v7923_v9 = vadd.f32 %v11739_v5, %v7619_v22  ;;  %v7611_v40 = vadd.f32 %v7610_v46, %v15695_v3  ;;  %v7868_v13 = vpop.f32.mrf.mxu1  ;;  %v16643_v28 = vld [vmem:[#allocation52_spill] sm:$0xff] }
 0x49e   : > { %v11694_v54 = vpop.f32.mrf.mxu0 }
 0x49f   : > { %16631 = vst [vmem:[#allocation60_spill] sm:$0xff] %v15834_v39  ;;  %v15838_v34 = vadd.f32 %v7923_v9, %v15687_v8  ;;  %v7921_v10 = vadd.f32 %v7868_v13, %v7611_v40  ;;  %v7632_v51 = vadd.f32 %v11694_v54, %v15700_v12  ;;  %v11742_v21 = vpop.f32.mrf.mxu1  ;;  %v7148_v8 = vmul.f32 %v16638_v37, %v16637_v7  ;;  %v16640_v12 = vld [vmem:[#allocation53_spill] sm:$0xff] }
 0x4a0   : > { %v7623_v50 = vpop.f32.mrf.mxu0  ;;  %v16645_v9 = vld [vmem:[#allocation77_spill] sm:$0xff] }
 0x4a1   : > { %16632 = vst [vmem:[#allocation62_spill] sm:$0xff] %v15838_v34  ;;  %v15844_v62 = vadd.f32 %v7921_v10, %v16634_v41  ;;  %v7926_v36 = vadd.f32 %v11742_v21, %v7632_v51  ;;  %v7624_v6 = vadd.f32 %v7623_v50, %v16636_v4  ;;  %v7881_v3 = vpop.f32.mrf.mxu1 }
 0x4a2   : > { %v11695_v57 = vpop.f32.mrf.mxu0 }
 0x4a3   : > { %16635 = vst [vmem:[#allocation63_spill] sm:$0xff] %v15844_v62  ;;  %v15849_v45 = vadd.f32 %v7926_v36, %v7150_v17  ;;  %v7924_v33 = vadd.f32 %v7881_v3, %v7624_v6  ;;  %v7635_v58 = vadd.f32 %v11695_v57, %v16640_v12  ;;  %v11743_v47 = vpop.f32.mrf.mxu1 }
 0x4a4   : > { %v7626_v43 = vpop.f32.mrf.mxu0 }
 0x4a5   : > { %16639 = vst [vmem:[#allocation6_spill] sm:$0xff] %v15849_v45  ;;  %v15852_v59 = vadd.f32 %v7924_v33, %v7148_v8  ;;  %v7927_v38 = vadd.f32 %v11743_v47, %v7635_v58  ;;  %v7627_v35 = vadd.f32 %v7626_v43, %v16642_v16  ;;  %v7884_v30 = vpop.f32.mrf.mxu1 }
 0x4a6   : > { %v11762_v27 = vpop.f32.mrf.mxu0 }
 0x4a7   : > { %16641 = vst [vmem:[#allocation66_spill] sm:$0xff] %v15852_v59  ;;  %v15856_v31 = vadd.f32 %v7927_v38, %v16643_v28  ;;  %v7925_v22 = vadd.f32 %v7884_v30, %v7627_v35  ;;  %v11810_v5 = vpop.f32.mrf.mxu1 }
 0x4a8   : > { %v8343_v46 = vpop.f32.mrf.mxu0 }
 0x4a9   : > { %16644 = vst [vmem:[#allocation5_spill] sm:$0xff] %v15856_v31  ;;  %v15859_v40 = vadd.f32 %v7925_v22, %v16645_v9  ;;  %v8575_v13 = vpop.f32.mrf.mxu1 }
 0x4aa   : > { %v11763_v54 = vpop.f32.mrf.mxu0 }
 0x4ab   : > { %16646 = vst [vmem:[#allocation8_spill] sm:$0xff] %v15859_v40  ;;  %v11811_v51 = vpop.f32.mrf.mxu1 }
 0x4ac   : > { %v8346_v10 = vpop.f32.mrf.mxu0 }
 0x4ad   : > { %v8578_v11 = vpop.f32.mrf.mxu1 }
 0x4ae   : > { %v15861_v21 = vpop.f32.mrf.mxu0 }
 0x4af   : > { %v11814_v36 = vpop.f32.mrf.mxu1 }
 0x4b0   : > { %v15863_v50 = vpop.f32.mrf.mxu0 }
 0x4b1   : > { %v8591_v3 = vpop.f32.mrf.mxu1 }
 0x4b2   : > { %v15865_v17 = vpop.f32.mrf.mxu0 }
 0x4b3   : > { %v11815_v37 = vpop.f32.mrf.mxu1 }
 0x4b4   : > { %v15867_v41 = vpop.f32.mrf.mxu0 }
 0x4b5   : > { %v15881_v12 = vpop.f32.mrf.mxu1 }
 0x4b6   : > { %v15869_v4 = vpop.f32.mrf.mxu0 }
 0x4b7   : > { %v15887_v43 = vpop.f32.mrf.mxu1 }
 0x4b8   : > { %v15871_v6 = vpop.f32.mrf.mxu0 }
 0x4b9   : > { %v15893_v35 = vpop.f32.mrf.mxu1 }
 0x4ba   : > { %v15873_v57 = vpop.f32.mrf.mxu0 }
 0x4bb   : > { %v15899_v22 = vpop.f32.mrf.mxu1 }
 0x4bc   : > { %v15875_v7 = vpop.f32.mrf.mxu0 }
 0x4bd   : > { %v15905_v31 = vpop.f32.mrf.mxu1 }
 0x4be   : > { %v15877_v8 = vpop.f32.mrf.mxu0 }
 0x4bf   : > { %v15911_v45 = vpop.f32.mrf.mxu1 }
 0x4c0   : > { %v15879_v33 = vpop.f32.mrf.mxu0 }
 0x4c1   : > { %v15917_v24 = vpop.f32.mrf.mxu1 }
 0x4c2   : > { %v15883_v58 = vpop.f32.mrf.mxu0 }
 0x4c3   : > { %v15923_v63 = vpop.f32.mrf.mxu1 }
 0x4c4   : > { %v15885_v47 = vpop.f32.mrf.mxu0 }
 0x4c6   : > { %v15889_v38 = vpop.f32.mrf.mxu0 }
 0x4c8   : > { %v15891_v16 = vpop.f32.mrf.mxu0 }
 0x4ca   : > { %v15895_v30 = vpop.f32.mrf.mxu0 }
 0x4cb   : > { %16647 = vst [vmem:[#allocation65_spill] sm:$0xff] %v15895_v30 }
 0x4cc   : > { %v15897_v28 = vpop.f32.mrf.mxu0 }
 0x4cd   : > { %16648 = vst [vmem:[#allocation15_spill] sm:$0xff] %v15897_v28  ;;  %v8587_v28 = vadd.f32 %v11811_v51, %v11763_v54  ;;  %v16661_v51 = vld [vmem:[#allocation9_spill] sm:$0xff] }
 0x4ce   : > { %v15901_v9 = vpop.f32.mrf.mxu0 }
 0x4cf   : > { %16649 = vst [vmem:[#allocation30_spill] sm:$0xff] %v15901_v9  ;;  %v8576_v9 = vadd.f32 %v8575_v13, %v8343_v46 }
 0x4d0   : > { %v15903_v40 = vpop.f32.mrf.mxu0 }
 0x4d1   : > { %16650 = vst [vmem:[#allocation13_spill] sm:$0xff] %v15903_v40 }
 0x4d2   : > { %v15907_v59 = vpop.f32.mrf.mxu0 }
 0x4d3   : > { %16651 = vst [vmem:[#allocation31_spill] sm:$0xff] %v15907_v59  ;;  %v15929_v59 = vpop.f32.mrf.mxu1 }
 0x4d4   : > { %v15909_v62 = vpop.f32.mrf.mxu0 }
 0x4d5   : > { %16652 = vst [vmem:[#allocation10_spill] sm:$0xff] %v15909_v62 }
 0x4d6   : > { %v15913_v34 = vpop.f32.mrf.mxu0 }
 0x4d7   : > { %16653 = vst [vmem:[#allocation33_spill] sm:$0xff] %v15913_v34  ;;  %v8584_v34 = vadd.f32 %v11810_v5, %v11762_v27  ;;  %v8579_v27 = vadd.f32 %v8578_v11, %v8346_v10 }
 0x4d8   : > { %v15915_v39 = vpop.f32.mrf.mxu0 }
 0x4d9   : > { %16654 = vst [vmem:[#allocation28_spill] sm:$0xff] %v15915_v39  ;;  %v15935_v39 = vpop.f32.mrf.mxu1 }
 0x4da   : > { %v15919_v26 = vpop.f32.mrf.mxu0 }
 0x4db   : > { %16655 = vst [vmem:[#allocation4_spill] sm:$0xff] %v15919_v26 }
 0x4dc   : > { %v15921_v14 = vpop.f32.mrf.mxu0 }
 0x4dd   : > { %16656 = vst [vmem:[#allocation78_spill] sm:$0xff] %v15921_v14  ;;  %v15940_v14 = vld [vmem:[%s16162_s8] ss:$0 sm:$0xff] }
 0x4de   : > { %v15925_v18 = vpop.f32.mrf.mxu0 }
 0x4df   : > { %16657 = vst [vmem:[#allocation42_spill] sm:$0xff] %v15925_v18 }
 0x4e0   : > { %v15927_v61 = vpop.f32.mrf.mxu0 }
 0x4e1   : > { %16658 = vst [vmem:[#allocation67_spill] sm:$0xff] %v15927_v61  ;;  %v15942_v61 = vpop.f32.mrf.mxu1 }
 0x4e2   : > { %v15931_v62 = vpop.f32.mrf.mxu0 }
 0x4e3   : > { %16659 = vst [vmem:[#allocation68_spill] sm:$0xff] %v15931_v62  ;;  %v15947_v13 = vpop.f32.mrf.mxu1 }
 0x4e4   : > { %v15933_v20 = vpop.f32.mrf.mxu0 }
 0x4e5   : > { %16660 = vst [vmem:[#allocation43_spill] sm:$0xff] %v15933_v20 }
 0x4e6   : > { %v11858_v40 = vpop.f32.mrf.mxu0 }
 0x4e7   : > { %v9194_v26 = vadd.f32 %v11858_v40, %v8584_v34 }
 0x4e8   : > { %v9065_v18 = vpop.f32.mrf.mxu0 }
 0x4e9   : > { %v9258_v62 = vadd.f32 %v9194_v26, %v15723_v48  ;;  %v9192_v42 = vadd.f32 %v9065_v18, %v8576_v9  ;;  %v8600_v48 = vadd.f32 %v11814_v36, %v15861_v21  ;;  %v8592_v18 = vadd.f32 %v8591_v3, %v15863_v50  ;;  %v9329_v26 = vld [vmem:[%s13057_s20 + $0x10] sm:$0xff]  ;;  %v9327_v9 = vld [vmem:[%s13057_s20] sm:$0xff] }
 0x4ea   : > { %v11859_v20 = vpop.f32.mrf.mxu0 }
 0x4eb   : > { %v9297_v5 = vadd.f32 %v15940_v14, %v9258_v62  ;;  %v9256_v46 = vadd.f32 %v9192_v42, %v15726_v32  ;;  %v9195_v34 = vadd.f32 %v11859_v20, %v8587_v28  ;;  %v16662_v20 = vld [vmem:[#allocation35_spill] sm:$0xff]  ;;  %v8603_v28 = vadd.f32 %v11815_v37, %v15865_v17 }
 0x4ec   : > { %v9068_v40 = vpop.f32.mrf.mxu0 }
 0x4ed   : > { %v9361_v53 = vmul.f32 0.70710677, %v9297_v5  ;;  %v9295_v54 = vadd.f32 %v15940_v14, %v9256_v46  ;;  %v9227_v1 = vmul.f32 %v16661_v51, %v9195_v34  ;;  %v9193_v30 = vadd.f32 %v9068_v40, %v8579_v27  ;;  %v15958_v27 = vpop.f32.mrf.mxu1 }
 0x4ee   : > { %v11862_v62 = vpop.f32.mrf.mxu0  ;;  %v8595_v34 = vadd.f32 %v15881_v12, %v15867_v41  ;;  %v8616_v40 = vadd.f32 %v15887_v43, %v15869_v4  ;;  %v8608_v41 = vadd.f32 %v15893_v35, %v15871_v6  ;;  %v9328_v12 = vld [vmem:[%s13057_s20 + $0x8] sm:$0xff]  ;;  %v16664_v6 = vld [vmem:[#allocation22_spill] sm:$0xff] }
 0x4ef   : > { %v9393_v10 = vadd.f32 %v9361_v53, %v9329_v26  ;;  %v9359_v32 = vmul.f32 0.70710677, %v9295_v54  ;;  %v9259_v42 = vadd.f32 %v9227_v1, %v15730_v60  ;;  %v9225_v11 = vmul.f32 %v16662_v20, %v9193_v30  ;;  %v15973_v51 = vpop.f32.mrf.mxu1  ;;  %v16663_v26 = vld [vmem:[#allocation11_spill] sm:$0xff] }
 0x4f0   : > { %v9198_v5 = vadd.f32 %v11862_v62, %v8600_v48  ;;  %v9081_v46 = vpop.f32.mrf.mxu0 }
 0x4f1   : > { %9425 = vst [vmem:[%s13057_s20 + $0x10] sm:$0xff] %v9393_v10  ;;  %v9391_v21 = vadd.f32 %v9359_v32, %v9327_v9  ;;  %v9298_v50 = vadd.f32 %v15940_v14, %v9259_v42  ;;  %v9257_v53 = vadd.f32 %v9225_v11, %v15736_v23  ;;  %v9196_v36 = vadd.f32 %v9081_v46, %v8592_v18  ;;  %v9330_v23 = vld [vmem:[%s13057_s20 + $0x18] sm:$0xff]  ;;  %v9333_v42 = vld [vmem:[%s13057_s20 + $0x30] sm:$0xff]  ;;  %v9331_v46 = vld [vmem:[%s13057_s20 + $0x20] sm:$0xff] }
 0x4f2   : > { %v9262_v3 = vadd.f32 %v9198_v5, %v15741_v49  ;;  %v11863_v60 = vpop.f32.mrf.mxu0  ;;  %v8619_v9 = vadd.f32 %v15899_v22, %v15873_v57 }
 0x4f3   : > { %9423 = vst [vmem:[%s13057_s20] sm:$0xff] %v9391_v21  ;;  %v9362_v1 = vmul.f32 0.70710677, %v9298_v50  ;;  %v9296_v17 = vadd.f32 %v15940_v14, %v9257_v53  ;;  %v9260_v37 = vadd.f32 %v9196_v36, %v15744_v29  ;;  %v9199_v30 = vadd.f32 %v11863_v60, %v8603_v28  ;;  %v15987_v50 = vpop.f32.mrf.mxu1 }
 0x4f4   : > { %v9301_v49 = vadd.f32 %v15940_v14, %v9262_v3  ;;  %v9084_v54 = vpop.f32.mrf.mxu0 }
 0x4f5   : > { %v9394_v48 = vadd.f32 %v9362_v1, %v9330_v23  ;;  %v9360_v18 = vmul.f32 0.70710677, %v9296_v17  ;;  %v9299_v29 = vadd.f32 %v15940_v14, %v9260_v37  ;;  %v9231_v62 = vmul.f32 %v16663_v26, %v9199_v30  ;;  %v16003_v23 = vpop.f32.mrf.mxu1  ;;  %v9332_v26 = vld [vmem:[%s13057_s20 + $0x28] sm:$0xff] }
 0x4f6   : > { %v9365_v4 = vmul.f32 0.70710677, %v9301_v49  ;;  %v9197_v43 = vadd.f32 %v9084_v54, %v8595_v34  ;;  %v11866_v10 = vpop.f32.mrf.mxu0  ;;  %v8611_v30 = vadd.f32 %v15905_v31, %v15875_v7  ;;  %v9334_v34 = vld [vmem:[%s13057_s20 + $0x38] sm:$0xff]  ;;  %v8624_v31 = vadd.f32 %v15917_v24, %v15879_v33  ;;  %v16666_v24 = vld [vmem:[#allocation14_spill] sm:$0xff] }
 0x4f7   : > { %9426 = vst [vmem:[%s13057_s20 + $0x18] sm:$0xff] %v9394_v48  ;;  %v9392_v32 = vadd.f32 %v9360_v18, %v9328_v12  ;;  %v9363_v20 = vmul.f32 0.70710677, %v9299_v29  ;;  %v9263_v11 = vadd.f32 %v9231_v62, %v15748_v19  ;;  %v9202_v28 = vadd.f32 %v11866_v10, %v8616_v40  ;;  %v16665_v48 = vld [vmem:[#allocation3_spill] sm:$0xff]  ;;  %v9337_v29 = vld [vmem:[%s13057_s20 + $0x50] sm:$0xff] }
 0x4f8   : > { %v9397_v5 = vadd.f32 %v9365_v4, %v9333_v42  ;;  %v9229_v35 = vmul.f32 %v16664_v6, %v9197_v43  ;;  %v9097_v21 = vpop.f32.mrf.mxu0  ;;  %v8635_v43 = vadd.f32 %v15923_v63, %v15883_v58 }
 0x4f9   : > { %9424 = vst [vmem:[%s13057_s20 + $0x8] sm:$0xff] %v9392_v32  ;;  %v9395_v53 = vadd.f32 %v9363_v20, %v9331_v46  ;;  %v9302_v36 = vadd.f32 %v15940_v14, %v9263_v11  ;;  %v9266_v3 = vadd.f32 %v9202_v28, %v15759_v2  ;;  %v9200_v19 = vadd.f32 %v9097_v21, %v8608_v41  ;;  %v9335_v32 = vld [vmem:[%s13057_s20 + $0x40] sm:$0xff]  ;;  %v16017_v20 = vpop.f32.mrf.mxu1 }
 0x4fa   : > { %9429 = vst [vmem:[%s13057_s20 + $0x30] sm:$0xff] %v9397_v5  ;;  %v9261_v60 = vadd.f32 %v9229_v35, %v15754_v55  ;;  %v11867_v1 = vpop.f32.mrf.mxu0  ;;  %v8632_v2 = vadd.f32 %v15911_v45, %v15877_v8  ;;  %v8627_v21 = vadd.f32 %v15929_v59, %v15885_v47  ;;  %v8640_v59 = vadd.f32 %v15942_v61, %v15891_v16  ;;  %v16669_v61 = vld [vmem:[#allocation16_spill] sm:$0xff] }
 0x4fb   : > { %9427 = vst [vmem:[%s13057_s20 + $0x20] sm:$0xff] %v9395_v53  ;;  %v9366_v57 = vmul.f32 0.70710677, %v9302_v36  ;;  %v9305_v22 = vadd.f32 %v15940_v14, %v9266_v3  ;;  %v9264_v17 = vadd.f32 %v9200_v19, %v15762_v0  ;;  %v9203_v37 = vadd.f32 %v11867_v1, %v8619_v9  ;;  %v9338_v53 = vld [vmem:[%s13057_s20 + $0x58] sm:$0xff]  ;;  %v16033_v3 = vpop.f32.mrf.mxu1 }
 0x4fc   : > { %v9300_v55 = vadd.f32 %v15940_v14, %v9261_v60  ;;  %v9100_v40 = vpop.f32.mrf.mxu0  ;;  %v16667_v1 = vld [vmem:[#allocation19_spill] sm:$0xff] }
 0x4fd   : > { %v9398_v49 = vadd.f32 %v9366_v57, %v9334_v34  ;;  %v9369_v54 = vmul.f32 0.70710677, %v9305_v22  ;;  %v9303_v0 = vadd.f32 %v15940_v14, %v9264_v17  ;;  %v9235_v18 = vmul.f32 %v16665_v48, %v9203_v37  ;;  %v9341_v22 = vld [vmem:[%s13057_s20 + $0x70] sm:$0xff]  ;;  %v9336_v17 = vld [vmem:[%s13057_s20 + $0x48] sm:$0xff]  ;;  %v16047_v48 = vpop.f32.mrf.mxu1 }
 0x4fe   : > { %v9364_v7 = vmul.f32 0.70710677, %v9300_v55  ;;  %v9201_v45 = vadd.f32 %v9100_v40, %v8611_v30  ;;  %v11870_v8 = vpop.f32.mrf.mxu0  ;;  %v16668_v55 = vld [vmem:[#allocation65_spill] sm:$0xff] }
 0x4ff   : > { %9430 = vst [vmem:[%s13057_s20 + $0x38] sm:$0xff] %v9398_v49  ;;  %v9401_v62 = vadd.f32 %v9369_v54, %v9337_v29  ;;  %v9367_v41 = vmul.f32 0.70710677, %v9303_v0  ;;  %v9267_v12 = vadd.f32 %v9235_v18, %v15766_v56  ;;  %v9206_v4 = vadd.f32 %v11870_v8, %v8632_v2  ;;  %v9339_v54 = vld [vmem:[%s13057_s20 + $0x60] sm:$0xff] }
 0x500   : > { %v9396_v10 = vadd.f32 %v9364_v7, %v9332_v26  ;;  %v9233_v33 = vmul.f32 %v16666_v24, %v9201_v45  ;;  %v9113_v42 = vpop.f32.mrf.mxu0  ;;  %v8651_v40 = vadd.f32 %v15947_v13, %v16668_v55  ;;  %v16670_v7 = vld [vmem:[#allocation29_spill] sm:$0xff]  ;;  %v16671_v45 = vld [vmem:[#allocation55_spill] sm:$0xff] }
 0x501   : > { %9433 = vst [vmem:[%s13057_s20 + $0x50] sm:$0xff] %v9401_v62  ;;  %v9399_v11 = vadd.f32 %v9367_v41, %v9335_v32  ;;  %v9306_v28 = vadd.f32 %v15940_v14, %v9267_v12  ;;  %v9270_v9 = vadd.f32 %v9206_v4, %v15777_v15  ;;  %v9204_v56 = vadd.f32 %v9113_v42, %v8624_v31  ;;  %v16672_v41 = vld [vmem:[#allocation27_spill] sm:$0xff]  ;;  %v16674_v32 = vld [vmem:[#allocation30_spill] sm:$0xff] }
 0x502   : > { %9428 = vst [vmem:[%s13057_s20 + $0x28] sm:$0xff] %v9396_v10  ;;  %v9265_v5 = vadd.f32 %v9233_v33, %v15772_v25  ;;  %v11871_v46 = vpop.f32.mrf.mxu0  ;;  %v8648_v15 = vadd.f32 %v15935_v39, %v15889_v38  ;;  %v8664_v24 = vadd.f32 %v15973_v51, %v16674_v32  ;;  %v9342_v33 = vld [vmem:[%s13057_s20 + $0x78] sm:$0xff] }
 0x503   : > { %9431 = vst [vmem:[%s13057_s20 + $0x40] sm:$0xff] %v9399_v11  ;;  %v9370_v63 = vmul.f32 0.70710677, %v9306_v28  ;;  %v9309_v58 = vadd.f32 %v15940_v14, %v9270_v9  ;;  %v9268_v6 = vadd.f32 %v9204_v56, %v15780_v44  ;;  %v9207_v35 = vadd.f32 %v11871_v46, %v8635_v43  ;;  %v16673_v43 = vld [vmem:[#allocation15_spill] sm:$0xff]  ;;  %v11835_v28 = vpop.f32.mrf.mxu1  ;;  %v16675_v46 = vld [vmem:[#allocation18_spill] sm:$0xff] }
 0x504   : > { %v9304_v25 = vadd.f32 %v15940_v14, %v9265_v5  ;;  %v9116_v36 = vpop.f32.mrf.mxu0  ;;  %v8643_v10 = vadd.f32 %v15958_v27, %v16673_v43 }
 0x505   : > { %v9402_v19 = vadd.f32 %v9370_v63, %v9338_v53  ;;  %v9373_v60 = vmul.f32 0.70710677, %v9309_v58  ;;  %v9307_v44 = vadd.f32 %v15940_v14, %v9268_v6  ;;  %v9239_v57 = vmul.f32 %v16667_v1, %v9207_v35  ;;  %v16676_v58 = vld [vmem:[#allocation13_spill] sm:$0xff]  ;;  %v9345_v35 = vld [vmem:[%s13057_s20 + $0x90] sm:$0xff] }
 0x506   : > { %v9368_v47 = vmul.f32 0.70710677, %v9304_v25  ;;  %v9205_v39 = vadd.f32 %v9116_v36, %v8627_v21  ;;  %v11874_v38 = vpop.f32.mrf.mxu0  ;;  %v8656_v6 = vadd.f32 %v15987_v50, %v16676_v58  ;;  %v16677_v36 = vld [vmem:[#allocation57_spill] sm:$0xff]  ;;  %v9347_v58 = vld [vmem:[%s13057_s20 + $0xa0] sm:$0xff] }
 0x507   : > { %9434 = vst [vmem:[%s13057_s20 + $0x58] sm:$0xff] %v9402_v19  ;;  %v9405_v37 = vadd.f32 %v9373_v60, %v9341_v22  ;;  %v9371_v30 = vmul.f32 0.70710677, %v9307_v44  ;;  %v9271_v2 = vadd.f32 %v9239_v57, %v15784_v52  ;;  %v9210_v34 = vadd.f32 %v11874_v38, %v8648_v15  ;;  %v9340_v15 = vld [vmem:[%s13057_s20 + $0x68] sm:$0xff]  ;;  %v16678_v44 = vld [vmem:[#allocation31_spill] sm:$0xff] }
 0x508   : > { %v9400_v49 = vadd.f32 %v9368_v47, %v9336_v17  ;;  %v9237_v16 = vmul.f32 %v16669_v61, %v9205_v39  ;;  %v9129_v0 = vpop.f32.mrf.mxu0  ;;  %v8667_v1 = vadd.f32 %v16003_v23, %v16678_v44  ;;  %v16679_v50 = vld [vmem:[#allocation21_spill] sm:$0xff]  ;;  %v8674_v39 = vpop.f32.mrf.mxu1 }
 0x509   : > { %9437 = vst [vmem:[%s13057_s20 + $0x70] sm:$0xff] %v9405_v37  ;;  %v9403_v18 = vadd.f32 %v9371_v30, %v9339_v54  ;;  %v9310_v31 = vadd.f32 %v15940_v14, %v9271_v2  ;;  %v9274_v29 = vadd.f32 %v9210_v34, %v16670_v7  ;;  %v9208_v52 = vadd.f32 %v9129_v0, %v8640_v59  ;;  %v9343_v59 = vld [vmem:[%s13057_s20 + $0x80] sm:$0xff]  ;;  %v16680_v37 = vld [vmem:[#allocation82_spill] sm:$0xff] }
 0x50a   : > { %9432 = vst [vmem:[%s13057_s20 + $0x48] sm:$0xff] %v9400_v49  ;;  %v9269_v8 = vadd.f32 %v9237_v16, %v16671_v45  ;;  %v11875_v26 = vpop.f32.mrf.mxu0  ;;  %v16681_v34 = vld [vmem:[#allocation80_spill] sm:$0xff]  ;;  %v16682_v54 = vld [vmem:[#allocation58_spill] sm:$0xff] }
 0x50b   : > { %9435 = vst [vmem:[%s13057_s20 + $0x60] sm:$0xff] %v9403_v18  ;;  %v9374_v13 = vmul.f32 0.70710677, %v9310_v31  ;;  %v9313_v62 = vadd.f32 %v15940_v14, %v9274_v29  ;;  %v9272_v12 = vadd.f32 %v9208_v52, %v16672_v41  ;;  %v9211_v4 = vadd.f32 %v11875_v26, %v8651_v40  ;;  %v16683_v0 = vld [vmem:[#allocation10_spill] sm:$0xff]  ;;  %v16684_v31 = vld [vmem:[#allocation33_spill] sm:$0xff]  ;;  %v9346_v29 = vld [vmem:[%s13057_s20 + $0x98] sm:$0xff] }
 0x50c   : > { %v9308_v42 = vadd.f32 %v15940_v14, %v9269_v8  ;;  %v9132_v11 = vpop.f32.mrf.mxu0  ;;  %v8659_v18 = vadd.f32 %v16017_v20, %v16683_v0  ;;  %v8680_v7 = vadd.f32 %v16033_v3, %v16684_v31  ;;  %v11838_v8 = vpop.f32.mrf.mxu1  ;;  %v16685_v41 = vld [vmem:[#allocation23_spill] sm:$0xff]  ;;  %v9348_v31 = vld [vmem:[%s13057_s20 + $0xa8] sm:$0xff] }
 0x50d   : > { %v9406_v9 = vadd.f32 %v9374_v13, %v9342_v33  ;;  %v9377_v56 = vmul.f32 0.70710677, %v9313_v62  ;;  %v9311_v5 = vadd.f32 %v15940_v14, %v9272_v12  ;;  %v9243_v63 = vmul.f32 %v16675_v46, %v9211_v4  ;;  %v16686_v4 = vld [vmem:[#allocation28_spill] sm:$0xff] }
 0x50e   : > { %v9372_v27 = vmul.f32 0.70710677, %v9308_v42  ;;  %v9209_v21 = vadd.f32 %v9132_v11, %v8643_v10  ;;  %v11878_v51 = vpop.f32.mrf.mxu0  ;;  %v8672_v43 = vadd.f32 %v16047_v48, %v16686_v4  ;;  %v9349_v10 = vld [vmem:[%s13057_s20 + $0xb0] sm:$0xff]  ;;  %v16687_v11 = vld [vmem:[#allocation83_spill] sm:$0xff] }
 0x50f   : > { %9438 = vst [vmem:[%s13057_s20 + $0x78] sm:$0xff] %v9406_v9  ;;  %v9409_v53 = vadd.f32 %v9377_v56, %v9345_v35  ;;  %v9375_v25 = vmul.f32 0.70710677, %v9311_v5  ;;  %v9275_v19 = vadd.f32 %v9243_v63, %v16677_v36  ;;  %v9214_v60 = vadd.f32 %v11878_v51, %v8664_v24  ;;  %v9344_v24 = vld [vmem:[%s13057_s20 + $0x88] sm:$0xff]  ;;  %v16688_v5 = vld [vmem:[#allocation4_spill] sm:$0xff]  ;;  %v8687_v35 = vpop.f32.mrf.mxu1 }
 0x510   : > { %v9404_v57 = vadd.f32 %v9372_v27, %v9340_v15  ;;  %v9241_v47 = vmul.f32 %v16679_v50, %v9209_v21  ;;  %v9145_v22 = vpop.f32.mrf.mxu0  ;;  %v8683_v46 = vadd.f32 %v11835_v28, %v16688_v5  ;;  %v16690_v15 = vld [vmem:[#allocation12_spill] sm:$0xff]  ;;  %v16691_v36 = vld [vmem:[#allocation85_spill] sm:$0xff]  ;;  %v16693_v50 = vld [vmem:[#allocation78_spill] sm:$0xff] }
 0x511   : > { %9441 = vst [vmem:[%s13057_s20 + $0x90] sm:$0xff] %v9409_v53  ;;  %v9407_v38 = vadd.f32 %v9375_v25, %v9343_v59  ;;  %v9314_v17 = vadd.f32 %v15940_v14, %v9275_v19  ;;  %v9278_v30 = vadd.f32 %v9214_v60, %v16680_v37  ;;  %v9212_v2 = vadd.f32 %v9145_v22, %v8656_v6  ;;  %v16689_v6 = vld [vmem:[#allocation20_spill] sm:$0xff]  ;;  %v16694_v22 = vld [vmem:[#allocation42_spill] sm:$0xff] }
 0x512   : > { %9436 = vst [vmem:[%s13057_s20 + $0x68] sm:$0xff] %v9404_v57  ;;  %v9273_v55 = vadd.f32 %v9241_v47, %v16681_v34  ;;  %v11879_v40 = vpop.f32.mrf.mxu0  ;;  %v8675_v47 = vadd.f32 %v8674_v39, %v16693_v50  ;;  %v9353_v39 = vld [vmem:[%s13057_s20 + $0xd0] sm:$0xff] }
 0x513   : > { %9439 = vst [vmem:[%s13057_s20 + $0x80] sm:$0xff] %v9407_v38  ;;  %v9378_v23 = vmul.f32 0.70710677, %v9314_v17  ;;  %v9317_v49 = vadd.f32 %v15940_v14, %v9278_v30  ;;  %v9276_v61 = vadd.f32 %v9212_v2, %v16682_v54  ;;  %v9215_v16 = vadd.f32 %v11879_v40, %v8667_v1  ;;  %v16692_v1 = vld [vmem:[#allocation60_spill] sm:$0xff]  ;;  %v9350_v17 = vld [vmem:[%s13057_s20 + $0xb8] sm:$0xff]  ;;  %v11839_v2 = vpop.f32.mrf.mxu1 }
 0x514   : > { %v9312_v52 = vadd.f32 %v15940_v14, %v9273_v55  ;;  %v9148_v45 = vpop.f32.mrf.mxu0  ;;  %v8696_v38 = vadd.f32 %v11838_v8, %v16694_v22  ;;  %v16696_v54 = vld [vmem:[#allocation67_spill] sm:$0xff]  ;;  %v9355_v22 = vld [vmem:[%s13057_s20 + $0xe0] sm:$0xff] }
 0x515   : > { %v9410_v26 = vadd.f32 %v9378_v23, %v9346_v29  ;;  %v9381_v13 = vmul.f32 0.70710677, %v9317_v49  ;;  %v9315_v62 = vadd.f32 %v15940_v14, %v9276_v61  ;;  %v9247_v12 = vmul.f32 %v16685_v41, %v9215_v16  ;;  %v16695_v23 = vld [vmem:[#allocation25_spill] sm:$0xff]  ;;  %v9351_v41 = vld [vmem:[%s13057_s20 + $0xc0] sm:$0xff] }
 0x516   : > { %v9376_v20 = vmul.f32 0.70710677, %v9312_v52  ;;  %v9213_v32 = vadd.f32 %v9148_v45, %v8659_v18  ;;  %v11882_v3 = vpop.f32.mrf.mxu0  ;;  %v8688_v61 = vadd.f32 %v8687_v35, %v16696_v54  ;;  %v16697_v52 = vld [vmem:[#allocation62_spill] sm:$0xff] }
 0x517   : > { %9442 = vst [vmem:[%s13057_s20 + $0x98] sm:$0xff] %v9410_v26  ;;  %v9413_v33 = vadd.f32 %v9381_v13, %v9349_v10  ;;  %v9379_v42 = vmul.f32 0.70710677, %v9315_v62  ;;  %v9279_v9 = vadd.f32 %v9247_v12, %v16687_v11  ;;  %v9218_v56 = vadd.f32 %v11882_v3, %v8680_v7  ;;  %v16698_v26 = vld [vmem:[#allocation68_spill] sm:$0xff]  ;;  %v16700_v3 = vld [vmem:[#allocation6_spill] sm:$0xff] }
 0x518   : > { %v9408_v63 = vadd.f32 %v9376_v20, %v9344_v24  ;;  %v9245_v48 = vmul.f32 %v16689_v6, %v9213_v32  ;;  %v9161_v27 = vpop.f32.mrf.mxu0  ;;  %v8699_v13 = vadd.f32 %v11839_v2, %v16698_v26  ;;  %v16699_v12 = vld [vmem:[#allocation32_spill] sm:$0xff]  ;;  %v8690_v20 = vpop.f32.mrf.mxu1  ;;  %v16703_v6 = vld [vmem:[#allocation43_spill] sm:$0xff] }
 0x519   : > { %9445 = vst [vmem:[%s13057_s20 + $0xb0] sm:$0xff] %v9413_v33  ;;  %v9411_v21 = vadd.f32 %v9379_v42, %v9347_v58  ;;  %v9318_v51 = vadd.f32 %v15940_v14, %v9279_v9  ;;  %v9282_v53 = vadd.f32 %v9218_v56, %v16690_v15  ;;  %v9216_v25 = vadd.f32 %v9161_v27, %v8672_v43  ;;  %v16701_v42 = vld [vmem:[#allocation63_spill] sm:$0xff]  ;;  %v16707_v2 = vld [vmem:[#allocation8_spill] sm:$0xff] }
 0x51a   : > { %9440 = vst [vmem:[%s13057_s20 + $0x88] sm:$0xff] %v9408_v63  ;;  %v9277_v19 = vadd.f32 %v9245_v48, %v16691_v36  ;;  %v11883_v60 = vpop.f32.mrf.mxu0  ;;  %v8691_v48 = vadd.f32 %v8690_v20, %v16703_v6  ;;  %v9354_v27 = vld [vmem:[%s13057_s20 + $0xd8] sm:$0xff] }
 0x51b   : > { %9443 = vst [vmem:[%s13057_s20 + $0xa0] sm:$0xff] %v9411_v21  ;;  %v9382_v28 = vmul.f32 0.70710677, %v9318_v51  ;;  %v9321_v44 = vadd.f32 %v15940_v14, %v9282_v53  ;;  %v9280_v57 = vadd.f32 %v9216_v25, %v16692_v1  ;;  %v9219_v59 = vadd.f32 %v11883_v60, %v8683_v46  ;;  %v16702_v46 = vld [vmem:[#allocation66_spill] sm:$0xff]  ;;  %v16704_v25 = vld [vmem:[#allocation75_spill] sm:$0xff] }
 0x51c   : > { %v9316_v37 = vadd.f32 %v15940_v14, %v9277_v19  ;;  %v9164_v30 = vpop.f32.mrf.mxu0  ;;  %v9357_v60 = vld [vmem:[%s13057_s20 + $0xf0] sm:$0xff] }
 0x51d   : > { %v9414_v34 = vadd.f32 %v9382_v28, %v9350_v17  ;;  %v9385_v55 = vmul.f32 0.70710677, %v9321_v44  ;;  %v9319_v40 = vadd.f32 %v15940_v14, %v9280_v57  ;;  %v9251_v49 = vmul.f32 %v16695_v23, %v9219_v59  ;;  %v9352_v44 = vld [vmem:[%s13057_s20 + $0xc8] sm:$0xff] }
 0x51e   : > { %v9380_v16 = vmul.f32 0.70710677, %v9316_v37  ;;  %v9217_v0 = vadd.f32 %v9164_v30, %v8675_v47  ;;  %v11886_v18 = vpop.f32.mrf.mxu0  ;;  %v16705_v59 = vld [vmem:[#allocation5_spill] sm:$0xff] }
 0x51f   : > { %9446 = vst [vmem:[%s13057_s20 + $0xb8] sm:$0xff] %v9414_v34  ;;  %v9417_v7 = vadd.f32 %v9385_v55, %v9353_v39  ;;  %v9383_v29 = vmul.f32 0.70710677, %v9319_v40  ;;  %v9283_v45 = vadd.f32 %v9251_v49, %v16697_v52  ;;  %v9222_v8 = vadd.f32 %v11886_v18, %v8696_v38  ;;  %v16706_v38 = vld [vmem:[#allocation40_spill] sm:$0xff]  ;;  %v9358_v40 = vld [vmem:[%s13057_s20 + $0xf8] sm:$0xff] }
 0x520   : > { %v9412_v62 = vadd.f32 %v9380_v16, %v9348_v31  ;;  %v9249_v4 = vmul.f32 %v16699_v12, %v9217_v0  ;;  %v9177_v43 = vpop.f32.mrf.mxu0 }
 0x521   : > { %9449 = vst [vmem:[%s13057_s20 + $0xd0] sm:$0xff] %v9417_v7  ;;  %v9415_v10 = vadd.f32 %v9383_v29, %v9351_v41  ;;  %v9322_v32 = vadd.f32 %v15940_v14, %v9283_v45  ;;  %v9286_v24 = vadd.f32 %v9222_v8, %v16700_v3  ;;  %v9220_v33 = vadd.f32 %v9177_v43, %v8688_v61  ;;  %v9356_v61 = vld [vmem:[%s13057_s20 + $0xe8] sm:$0xff] }
 0x522   : > { %9444 = vst [vmem:[%s13057_s20 + $0xa8] sm:$0xff] %v9412_v62  ;;  %v9281_v11 = vadd.f32 %v9249_v4, %v16701_v42  ;;  %v11887_v9 = vpop.f32.mrf.mxu0 }
 0x523   : > { %9447 = vst [vmem:[%s13057_s20 + $0xc0] sm:$0xff] %v9415_v10  ;;  %v9386_v56 = vmul.f32 0.70710677, %v9322_v32  ;;  %v9325_v5 = vadd.f32 %v15940_v14, %v9286_v24  ;;  %v9284_v63 = vadd.f32 %v9220_v33, %v16702_v46  ;;  %v9223_v58 = vadd.f32 %v11887_v9, %v8699_v13 }
 0x524   : > { %v9320_v35 = vadd.f32 %v15940_v14, %v9281_v11  ;;  %v9180_v21 = vpop.f32.mrf.mxu0 }
 0x525   : > { %v9418_v51 = vadd.f32 %v9386_v56, %v9354_v27  ;;  %v9389_v15 = vmul.f32 0.70710677, %v9325_v5  ;;  %v9323_v53 = vadd.f32 %v15940_v14, %v9284_v63  ;;  %v9255_v36 = vmul.f32 %v16704_v25, %v9223_v58 }
 0x526   : > { %v9384_v19 = vmul.f32 0.70710677, %v9320_v35  ;;  %v9221_v28 = vadd.f32 %v9180_v21, %v8691_v48 }
 0x527   : > { %9450 = vst [vmem:[%s13057_s20 + $0xd8] sm:$0xff] %v9418_v51  ;;  %v9421_v1 = vadd.f32 %v9389_v15, %v9357_v60  ;;  %v9387_v57 = vmul.f32 0.70710677, %v9323_v53  ;;  %v9287_v50 = vadd.f32 %v9255_v36, %v16705_v59 }
 0x528   : > { %v9416_v47 = vadd.f32 %v9384_v19, %v9352_v44  ;;  %v9253_v17 = vmul.f32 %v16706_v38, %v9221_v28 }
 0x529   : > { %9453 = vst [vmem:[%s13057_s20 + $0xf0] sm:$0xff] %v9421_v1  ;;  %v9419_v37 = vadd.f32 %v9387_v57, %v9355_v22  ;;  %v9326_v30 = vadd.f32 %v15940_v14, %v9287_v50 }
 0x52a   : > { %9448 = vst [vmem:[%s13057_s20 + $0xc8] sm:$0xff] %v9416_v47  ;;  %v9285_v34 = vadd.f32 %v9253_v17, %v16707_v2 }
 0x52b   : > { %9451 = vst [vmem:[%s13057_s20 + $0xe0] sm:$0xff] %v9419_v37  ;;  %v9390_v55 = vmul.f32 0.70710677, %v9326_v30 }
 0x52c   : > { %v9324_v23 = vadd.f32 %v15940_v14, %v9285_v34 }
 0x52d   : > { %v9422_v49 = vadd.f32 %v9390_v55, %v9358_v40 }
 0x52e   : > { %v9388_v54 = vmul.f32 0.70710677, %v9324_v23 }
 0x52f   : > { %9454 = vst [vmem:[%s13057_s20 + $0xf8] sm:$0xff] %v9422_v49 }
 0x530   : > { %v9420_v16 = vadd.f32 %v9388_v54, %v9356_v61 }
 0x532   : > { %9452 = vst [vmem:[%s13057_s20 + $0xe8] sm:$0xff] %v9420_v16 }
 0x533 PF: > { %s20_s13 = sadd.s32 1, %s12301_s13  }
 0x534   : > { %p17_p5 = scmp.ge.s32.totalorder %s20_s13, 4  }
 0x536   :  { %19 = sbr.rel (!%p17_p5) target bundleno = 1 (0x1), region = 118 }

</bundles_post_ra>
